<compile_context>
chip_gen: v5e
topology: v5e:2x2
jax: 0.10.0
libtpu: 0.0.40
codegen_flags: <defaults>
</compile_context>

<pallas_src>
import math

import jax
import jax.numpy as jnp
from jax.experimental import pallas as pl
from jax.experimental.pallas import tpu as pltpu


# ------------------------------ fused kernel ------------------------------- #

def classifier_kernel(x_ref, wv_ref, bvec_ref, wfc_ref, bfc_ref, o_ref):
    # x_ref:   (1, 3, 50, 400)  padded input, each pixel replicated x8 along lanes:
    #                            x_ref[0, ci, y, x*8 + co] = x_pad[ci, y, x]
    # wv_ref:  (27, 384)         conv weights, row r=(ky*3+kx)*3+ci, lane x*8+co
    # bvec_ref:(1, 384)          conv bias tiled over x (lane x*8+co)
    # wfc_ref: (12, 360, 43)     fc weights scattered to lanes 32*xo+c (zero elsewhere)
    # bfc_ref: (1, 43)
    # o_ref:   (1, 1, 43)

    # --- conv 3x3 + bias + ReLU on a lane-dense (48, 384) accumulator ---------
    acc = jnp.zeros((48, 384), jnp.float32)
    for ky in range(3):
        for kx in range(3):
            for ci in range(3):
                r = (ky * 3 + kx) * 3 + ci
                xs = x_ref[0, ci, pl.ds(ky, 48), pl.ds(kx * 8, 384)]   # (48, 384)
                acc = acc + xs * wv_ref[pl.ds(r, 1), :]                # (1,384) bcast MAC
    h = jnp.maximum(acc + bvec_ref[...], 0.0)                          # (48, 384)

    # --- 4x4 max-pool as a shift-and-max tree ---------------------------------
    # x direction (lane shifts of 8 = one channel group): pooled value for
    # (x_out, c) lands at lane 32*x_out + c.
    g = jnp.maximum(jnp.maximum(h[:, 0:360], h[:, 8:368]),
                    jnp.maximum(h[:, 16:376], h[:, 24:384]))           # (48, 360)
    # y direction (sublane shifts): gm[y] = max(g[y .. y+3]); only rows 4*oy are
    # consumed below, the rest are dead filler.
    gm = jnp.maximum(jnp.maximum(g[0:45, :], g[1:46, :]),
                     jnp.maximum(g[2:47, :], g[3:48, :]))              # (45, 360)

    # --- fully connected: one (1,360)x(360,43) dot per pooled output row ------
    # Garbage lanes of gm hit zero FC weights, so no masking is needed.
    fc = bfc_ref[...]                                                  # (1, 43)
    for oy in range(12):
        prow = gm[4 * oy: 4 * oy + 1, :]                               # (1, 360)
        fc = fc + jnp.dot(prow, wfc_ref[oy], preferred_element_type=jnp.float32)
    o_ref[0] = fc


# -------------------------------- wrapper ----------------------------------- #

def classifier_forward(x_nchw, w_conv, b_conv, w_fc, b_fc):
    """x_nchw: [B, 3, 48, 48] f32. w_conv: [8,3,3,3] (OIHW), b_conv: [8],
    w_fc: [1152, 43] (rows in PyTorch CHW flatten order = fc1.weight.T), b_fc: [43]."""
    B = x_nchw.shape[0]

    # Input prep (single fused XLA op chain): pad=1 and replicate each input pixel
    # x8 along lanes so the conv runs full-lane-width MACs inside the kernel.
    xp = jnp.pad(x_nchw, ((0, 0), (0, 0), (1, 1), (1, 1)))                 # (B,3,50,50)
    x_rep = jnp.broadcast_to(xp[..., None], (B, 3, 50, 50, 8)).reshape(B, 3, 50, 400)

    # Conv weights -> (27, 384): row (ky*3+kx)*3+ci, lane x*8+co.
    wt = jnp.transpose(w_conv, (2, 3, 1, 0))                               # (ky,kx,ci,co)
    wv = jnp.broadcast_to(wt.reshape(3, 3, 3, 1, 8), (3, 3, 3, 48, 8)).reshape(27, 384)
    bvec = jnp.broadcast_to(b_conv.reshape(1, 1, 8), (1, 48, 8)).reshape(1, 384)

    # FC weights scattered to the pooled lane positions:
    # wbig[oy, 32*xo + c, o] = w_fc[c*144 + oy*12 + xo, o]; all other lanes zero.
    w4 = w_fc.reshape(8, 12, 12, 43)                                       # (c, oy, xo, o)
    wz = jnp.transpose(w4, (1, 2, 0, 3))                                   # (oy, xo, c, o)
    wz = jnp.pad(wz, ((0, 0), (0, 0), (0, 24), (0, 0)))                    # (12,12,32,43)
    wbig = wz.reshape(12, 384, 43)[:, :360, :]                             # (12,360,43)
    bfc = b_fc.reshape(1, 43)

    out3 = pl.pallas_call(
        classifier_kernel,
        out_shape=jax.ShapeDtypeStruct((B, 1, 43), jnp.float32),
        grid=(B,),
        in_specs=[
            pl.BlockSpec((1, 3, 50, 400), lambda b: (b, 0, 0, 0)),
            pl.BlockSpec((27, 384), lambda b: (0, 0)),
            pl.BlockSpec((1, 384), lambda b: (0, 0)),
            pl.BlockSpec((12, 360, 43), lambda b: (0, 0, 0)),
            pl.BlockSpec((1, 43), lambda b: (0, 0)),
        ],
        out_specs=pl.BlockSpec((1, 1, 43), lambda b: (b, 0, 0)),
        compiler_params=pltpu.CompilerParams(dimension_semantics=("parallel",)),
    )(x_rep, wv, bvec, wbig, bfc)
    return out3.reshape(B, 43)


# --------------------------- pure-JAX reference ---------------------------- #

def reference_forward(x_nchw, w_conv, b_conv, w_fc, b_fc):
    y = jax.lax.conv_general_dilated(
        x_nchw, w_conv, window_strides=(1, 1),
        padding=((1, 1), (1, 1)),
        dimension_numbers=("NCHW", "OIHW", "NCHW"))
    y = y + b_conv[None, :, None, None]
    y = jnp.maximum(y, 0.0)
    y = jax.lax.reduce_window(y, -jnp.inf, jax.lax.max,
                              (1, 1, 4, 4), (1, 1, 4, 4), "VALID")
    y = y.reshape(y.shape[0], -1)                  # NCHW flatten = (C, H, W)
    return y @ w_fc + b_fc[None, :]


# ---------------------------------- main ----------------------------------- #

if __name__ == "__main__":
    key = jax.random.PRNGKey(0)
    k1, k2, k3, k4, k5 = jax.random.split(key, 5)

    # Deterministic synthetic parameters (PyTorch-default-style uniform init).
    fan_conv = 3 * 3 * 3
    bc = 1.0 / math.sqrt(fan_conv)
    w_conv = jax.random.uniform(k1, (8, 3, 3, 3), jnp.float32, -bc, bc)
    b_conv = jax.random.uniform(k2, (8,), jnp.float32, -bc, bc)

    fan_fc = 8 * 12 * 12
    bf = 1.0 / math.sqrt(fan_fc)
    # Stored as (in_features, out_features); equals PyTorch fc1.weight.T.
    w_fc = jax.random.uniform(k3, (fan_fc, 43), jnp.float32, -bf, bf)
    b_fc = jax.random.uniform(k4, (43,), jnp.float32, -bf, bf)

    # Input: batch=2, NCHW, 3x48x48 (48 so that pool(4) -> 12x12, matching fc1).
    x = jax.random.normal(k5, (2, 3, 48, 48), jnp.float32)

    fwd = jax.jit(classifier_forward)
    out = fwd(x, w_conv, b_conv, w_fc, b_fc)
    out = jax.block_until_ready(out)

    ref = reference_forward(x, w_conv, b_conv, w_fc, b_fc)
    assert out.shape == (2, 43), out.shape
    assert jnp.allclose(out, ref, rtol=1e-4, atol=1e-4), (
        float(jnp.max(jnp.abs(out - ref))))

    print("KERNEL_OK")
</pallas_src>

<mosaic_0001>
module attributes {stable_mosaic.version = 11 : i64} {
  func.func @classifier_kernel(%arg0: i32, %arg1: memref<1x3x50x400xf32, #tpu.memory_space<vmem>>, %arg2: memref<27x384xf32, #tpu.memory_space<vmem>>, %arg3: memref<1x384xf32, #tpu.memory_space<vmem>>, %arg4: memref<12x360x43xf32, #tpu.memory_space<vmem>>, %arg5: memref<1x43xf32, #tpu.memory_space<vmem>>, %arg6: memref<1x1x43xf32, #tpu.memory_space<vmem>>) attributes {dimension_semantics = [#tpu.dimension_semantics<parallel>], iteration_bounds = array<i64: 2>, scalar_prefetch = 0 : i64, scratch_operands = 0 : i64, tpu.core_type = #tpu.core_type<tc>, window_params = [{transform_indices = @transform_0, window_bounds = array<i64: 1, 3, 50, 400>}, {pipeline_mode = #tpu.pipeline_mode<synchronous>, transform_indices = @transform_1, window_bounds = array<i64: 27, 384>}, {pipeline_mode = #tpu.pipeline_mode<synchronous>, transform_indices = @transform_2, window_bounds = array<i64: 1, 384>}, {pipeline_mode = #tpu.pipeline_mode<synchronous>, transform_indices = @transform_3, window_bounds = array<i64: 12, 360, 43>}, {pipeline_mode = #tpu.pipeline_mode<synchronous>, transform_indices = @transform_4, window_bounds = array<i64: 1, 43>}, {transform_indices = @transform_5, window_bounds = array<i64: 1, 1, 43>}]} {
    %cst = arith.constant 0.000000e+00 : f32
    %0 = vector.broadcast %cst : f32 to vector<48x384xf32>
    %c0 = arith.constant 0 : index
    %c0_0 = arith.constant 0 : index
    %c0_1 = arith.constant 0 : index
    %c0_2 = arith.constant 0 : index
    %1 = vector.load %arg1[%c0, %c0_0, %c0_1, %c0_2] : memref<1x3x50x400xf32, #tpu.memory_space<vmem>>, vector<1x1x48x384xf32>
    %2 = vector.shape_cast %1 : vector<1x1x48x384xf32> to vector<48x384xf32>
    %c0_3 = arith.constant 0 : index
    %c0_4 = arith.constant 0 : index
    %3 = vector.load %arg2[%c0_3, %c0_4] : memref<27x384xf32, #tpu.memory_space<vmem>>, vector<1x384xf32>
    %4 = vector.broadcast %3 : vector<1x384xf32> to vector<48x384xf32>
    %5 = arith.mulf %2, %4 : vector<48x384xf32>
    %6 = arith.addf %0, %5 : vector<48x384xf32>
    %c0_5 = arith.constant 0 : index
    %c1 = arith.constant 1 : index
    %c0_6 = arith.constant 0 : index
    %c0_7 = arith.constant 0 : index
    %7 = vector.load %arg1[%c0_5, %c1, %c0_6, %c0_7] : memref<1x3x50x400xf32, #tpu.memory_space<vmem>>, vector<1x1x48x384xf32>
    %8 = vector.shape_cast %7 : vector<1x1x48x384xf32> to vector<48x384xf32>
    %c1_8 = arith.constant 1 : index
    %c0_9 = arith.constant 0 : index
    %9 = vector.load %arg2[%c1_8, %c0_9] : memref<27x384xf32, #tpu.memory_space<vmem>>, vector<1x384xf32>
    %10 = vector.broadcast %9 : vector<1x384xf32> to vector<48x384xf32>
    %11 = arith.mulf %8, %10 : vector<48x384xf32>
    %12 = arith.addf %6, %11 : vector<48x384xf32>
    %c0_10 = arith.constant 0 : index
    %c2 = arith.constant 2 : index
    %c0_11 = arith.constant 0 : index
    %c0_12 = arith.constant 0 : index
    %13 = vector.load %arg1[%c0_10, %c2, %c0_11, %c0_12] : memref<1x3x50x400xf32, #tpu.memory_space<vmem>>, vector<1x1x48x384xf32>
    %14 = vector.shape_cast %13 : vector<1x1x48x384xf32> to vector<48x384xf32>
    %c2_13 = arith.constant 2 : index
    %c0_14 = arith.constant 0 : index
    %15 = vector.load %arg2[%c2_13, %c0_14] : memref<27x384xf32, #tpu.memory_space<vmem>>, vector<1x384xf32>
    %16 = vector.broadcast %15 : vector<1x384xf32> to vector<48x384xf32>
    %17 = arith.mulf %14, %16 : vector<48x384xf32>
    %18 = arith.addf %12, %17 : vector<48x384xf32>
    %c0_15 = arith.constant 0 : index
    %c0_16 = arith.constant 0 : index
    %c0_17 = arith.constant 0 : index
    %c8 = arith.constant 8 : index
    %19 = vector.load %arg1[%c0_15, %c0_16, %c0_17, %c8] : memref<1x3x50x400xf32, #tpu.memory_space<vmem>>, vector<1x1x48x384xf32>
    %20 = vector.shape_cast %19 : vector<1x1x48x384xf32> to vector<48x384xf32>
    %c3 = arith.constant 3 : index
    %c0_18 = arith.constant 0 : index
    %21 = vector.load %arg2[%c3, %c0_18] : memref<27x384xf32, #tpu.memory_space<vmem>>, vector<1x384xf32>
    %22 = vector.broadcast %21 : vector<1x384xf32> to vector<48x384xf32>
    %23 = arith.mulf %20, %22 : vector<48x384xf32>
    %24 = arith.addf %18, %23 : vector<48x384xf32>
    %c0_19 = arith.constant 0 : index
    %c1_20 = arith.constant 1 : index
    %c0_21 = arith.constant 0 : index
    %c8_22 = arith.constant 8 : index
    %25 = vector.load %arg1[%c0_19, %c1_20, %c0_21, %c8_22] : memref<1x3x50x400xf32, #tpu.memory_space<vmem>>, vector<1x1x48x384xf32>
    %26 = vector.shape_cast %25 : vector<1x1x48x384xf32> to vector<48x384xf32>
    %c4 = arith.constant 4 : index
    %c0_23 = arith.constant 0 : index
    %27 = vector.load %arg2[%c4, %c0_23] : memref<27x384xf32, #tpu.memory_space<vmem>>, vector<1x384xf32>
    %28 = vector.broadcast %27 : vector<1x384xf32> to vector<48x384xf32>
    %29 = arith.mulf %26, %28 : vector<48x384xf32>
    %30 = arith.addf %24, %29 : vector<48x384xf32>
    %c0_24 = arith.constant 0 : index
    %c2_25 = arith.constant 2 : index
    %c0_26 = arith.constant 0 : index
    %c8_27 = arith.constant 8 : index
    %31 = vector.load %arg1[%c0_24, %c2_25, %c0_26, %c8_27] : memref<1x3x50x400xf32, #tpu.memory_space<vmem>>, vector<1x1x48x384xf32>
    %32 = vector.shape_cast %31 : vector<1x1x48x384xf32> to vector<48x384xf32>
    %c5 = arith.constant 5 : index
    %c0_28 = arith.constant 0 : index
    %33 = vector.load %arg2[%c5, %c0_28] : memref<27x384xf32, #tpu.memory_space<vmem>>, vector<1x384xf32>
    %34 = vector.broadcast %33 : vector<1x384xf32> to vector<48x384xf32>
    %35 = arith.mulf %32, %34 : vector<48x384xf32>
    %36 = arith.addf %30, %35 : vector<48x384xf32>
    %c0_29 = arith.constant 0 : index
    %c0_30 = arith.constant 0 : index
    %c0_31 = arith.constant 0 : index
    %c16 = arith.constant 16 : index
    %37 = vector.load %arg1[%c0_29, %c0_30, %c0_31, %c16] : memref<1x3x50x400xf32, #tpu.memory_space<vmem>>, vector<1x1x48x384xf32>
    %38 = vector.shape_cast %37 : vector<1x1x48x384xf32> to vector<48x384xf32>
    %c6 = arith.constant 6 : index
    %c0_32 = arith.constant 0 : index
    %39 = vector.load %arg2[%c6, %c0_32] : memref<27x384xf32, #tpu.memory_space<vmem>>, vector<1x384xf32>
    %40 = vector.broadcast %39 : vector<1x384xf32> to vector<48x384xf32>
    %41 = arith.mulf %38, %40 : vector<48x384xf32>
    %42 = arith.addf %36, %41 : vector<48x384xf32>
    %c0_33 = arith.constant 0 : index
    %c1_34 = arith.constant 1 : index
    %c0_35 = arith.constant 0 : index
    %c16_36 = arith.constant 16 : index
    %43 = vector.load %arg1[%c0_33, %c1_34, %c0_35, %c16_36] : memref<1x3x50x400xf32, #tpu.memory_space<vmem>>, vector<1x1x48x384xf32>
    %44 = vector.shape_cast %43 : vector<1x1x48x384xf32> to vector<48x384xf32>
    %c7 = arith.constant 7 : index
    %c0_37 = arith.constant 0 : index
    %45 = vector.load %arg2[%c7, %c0_37] : memref<27x384xf32, #tpu.memory_space<vmem>>, vector<1x384xf32>
    %46 = vector.broadcast %45 : vector<1x384xf32> to vector<48x384xf32>
    %47 = arith.mulf %44, %46 : vector<48x384xf32>
    %48 = arith.addf %42, %47 : vector<48x384xf32>
    %c0_38 = arith.constant 0 : index
    %c2_39 = arith.constant 2 : index
    %c0_40 = arith.constant 0 : index
    %c16_41 = arith.constant 16 : index
    %49 = vector.load %arg1[%c0_38, %c2_39, %c0_40, %c16_41] : memref<1x3x50x400xf32, #tpu.memory_space<vmem>>, vector<1x1x48x384xf32>
    %50 = vector.shape_cast %49 : vector<1x1x48x384xf32> to vector<48x384xf32>
    %c8_42 = arith.constant 8 : index
    %c0_43 = arith.constant 0 : index
    %51 = vector.load %arg2[%c8_42, %c0_43] : memref<27x384xf32, #tpu.memory_space<vmem>>, vector<1x384xf32>
    %52 = vector.broadcast %51 : vector<1x384xf32> to vector<48x384xf32>
    %53 = arith.mulf %50, %52 : vector<48x384xf32>
    %54 = arith.addf %48, %53 : vector<48x384xf32>
    %c0_44 = arith.constant 0 : index
    %c0_45 = arith.constant 0 : index
    %c1_46 = arith.constant 1 : index
    %c0_47 = arith.constant 0 : index
    %55 = vector.load %arg1[%c0_44, %c0_45, %c1_46, %c0_47] : memref<1x3x50x400xf32, #tpu.memory_space<vmem>>, vector<1x1x48x384xf32>
    %56 = vector.shape_cast %55 : vector<1x1x48x384xf32> to vector<48x384xf32>
    %c9 = arith.constant 9 : index
    %c0_48 = arith.constant 0 : index
    %57 = vector.load %arg2[%c9, %c0_48] : memref<27x384xf32, #tpu.memory_space<vmem>>, vector<1x384xf32>
    %58 = vector.broadcast %57 : vector<1x384xf32> to vector<48x384xf32>
    %59 = arith.mulf %56, %58 : vector<48x384xf32>
    %60 = arith.addf %54, %59 : vector<48x384xf32>
    %c0_49 = arith.constant 0 : index
    %c1_50 = arith.constant 1 : index
    %c1_51 = arith.constant 1 : index
    %c0_52 = arith.constant 0 : index
    %61 = vector.load %arg1[%c0_49, %c1_50, %c1_51, %c0_52] : memref<1x3x50x400xf32, #tpu.memory_space<vmem>>, vector<1x1x48x384xf32>
    %62 = vector.shape_cast %61 : vector<1x1x48x384xf32> to vector<48x384xf32>
    %c10 = arith.constant 10 : index
    %c0_53 = arith.constant 0 : index
    %63 = vector.load %arg2[%c10, %c0_53] : memref<27x384xf32, #tpu.memory_space<vmem>>, vector<1x384xf32>
    %64 = vector.broadcast %63 : vector<1x384xf32> to vector<48x384xf32>
    %65 = arith.mulf %62, %64 : vector<48x384xf32>
    %66 = arith.addf %60, %65 : vector<48x384xf32>
    %c0_54 = arith.constant 0 : index
    %c2_55 = arith.constant 2 : index
    %c1_56 = arith.constant 1 : index
    %c0_57 = arith.constant 0 : index
    %67 = vector.load %arg1[%c0_54, %c2_55, %c1_56, %c0_57] : memref<1x3x50x400xf32, #tpu.memory_space<vmem>>, vector<1x1x48x384xf32>
    %68 = vector.shape_cast %67 : vector<1x1x48x384xf32> to vector<48x384xf32>
    %c11 = arith.constant 11 : index
    %c0_58 = arith.constant 0 : index
    %69 = vector.load %arg2[%c11, %c0_58] : memref<27x384xf32, #tpu.memory_space<vmem>>, vector<1x384xf32>
    %70 = vector.broadcast %69 : vector<1x384xf32> to vector<48x384xf32>
    %71 = arith.mulf %68, %70 : vector<48x384xf32>
    %72 = arith.addf %66, %71 : vector<48x384xf32>
    %c0_59 = arith.constant 0 : index
    %c0_60 = arith.constant 0 : index
    %c1_61 = arith.constant 1 : index
    %c8_62 = arith.constant 8 : index
    %73 = vector.load %arg1[%c0_59, %c0_60, %c1_61, %c8_62] : memref<1x3x50x400xf32, #tpu.memory_space<vmem>>, vector<1x1x48x384xf32>
    %74 = vector.shape_cast %73 : vector<1x1x48x384xf32> to vector<48x384xf32>
    %c12 = arith.constant 12 : index
    %c0_63 = arith.constant 0 : index
    %75 = vector.load %arg2[%c12, %c0_63] : memref<27x384xf32, #tpu.memory_space<vmem>>, vector<1x384xf32>
    %76 = vector.broadcast %75 : vector<1x384xf32> to vector<48x384xf32>
    %77 = arith.mulf %74, %76 : vector<48x384xf32>
    %78 = arith.addf %72, %77 : vector<48x384xf32>
    %c0_64 = arith.constant 0 : index
    %c1_65 = arith.constant 1 : index
    %c1_66 = arith.constant 1 : index
    %c8_67 = arith.constant 8 : index
    %79 = vector.load %arg1[%c0_64, %c1_65, %c1_66, %c8_67] : memref<1x3x50x400xf32, #tpu.memory_space<vmem>>, vector<1x1x48x384xf32>
    %80 = vector.shape_cast %79 : vector<1x1x48x384xf32> to vector<48x384xf32>
    %c13 = arith.constant 13 : index
    %c0_68 = arith.constant 0 : index
    %81 = vector.load %arg2[%c13, %c0_68] : memref<27x384xf32, #tpu.memory_space<vmem>>, vector<1x384xf32>
    %82 = vector.broadcast %81 : vector<1x384xf32> to vector<48x384xf32>
    %83 = arith.mulf %80, %82 : vector<48x384xf32>
    %84 = arith.addf %78, %83 : vector<48x384xf32>
    %c0_69 = arith.constant 0 : index
    %c2_70 = arith.constant 2 : index
    %c1_71 = arith.constant 1 : index
    %c8_72 = arith.constant 8 : index
    %85 = vector.load %arg1[%c0_69, %c2_70, %c1_71, %c8_72] : memref<1x3x50x400xf32, #tpu.memory_space<vmem>>, vector<1x1x48x384xf32>
    %86 = vector.shape_cast %85 : vector<1x1x48x384xf32> to vector<48x384xf32>
    %c14 = arith.constant 14 : index
    %c0_73 = arith.constant 0 : index
    %87 = vector.load %arg2[%c14, %c0_73] : memref<27x384xf32, #tpu.memory_space<vmem>>, vector<1x384xf32>
    %88 = vector.broadcast %87 : vector<1x384xf32> to vector<48x384xf32>
    %89 = arith.mulf %86, %88 : vector<48x384xf32>
    %90 = arith.addf %84, %89 : vector<48x384xf32>
    %c0_74 = arith.constant 0 : index
    %c0_75 = arith.constant 0 : index
    %c1_76 = arith.constant 1 : index
    %c16_77 = arith.constant 16 : index
    %91 = vector.load %arg1[%c0_74, %c0_75, %c1_76, %c16_77] : memref<1x3x50x400xf32, #tpu.memory_space<vmem>>, vector<1x1x48x384xf32>
    %92 = vector.shape_cast %91 : vector<1x1x48x384xf32> to vector<48x384xf32>
    %c15 = arith.constant 15 : index
    %c0_78 = arith.constant 0 : index
    %93 = vector.load %arg2[%c15, %c0_78] : memref<27x384xf32, #tpu.memory_space<vmem>>, vector<1x384xf32>
    %94 = vector.broadcast %93 : vector<1x384xf32> to vector<48x384xf32>
    %95 = arith.mulf %92, %94 : vector<48x384xf32>
    %96 = arith.addf %90, %95 : vector<48x384xf32>
    %c0_79 = arith.constant 0 : index
    %c1_80 = arith.constant 1 : index
    %c1_81 = arith.constant 1 : index
    %c16_82 = arith.constant 16 : index
    %97 = vector.load %arg1[%c0_79, %c1_80, %c1_81, %c16_82] : memref<1x3x50x400xf32, #tpu.memory_space<vmem>>, vector<1x1x48x384xf32>
    %98 = vector.shape_cast %97 : vector<1x1x48x384xf32> to vector<48x384xf32>
    %c16_83 = arith.constant 16 : index
    %c0_84 = arith.constant 0 : index
    %99 = vector.load %arg2[%c16_83, %c0_84] : memref<27x384xf32, #tpu.memory_space<vmem>>, vector<1x384xf32>
    %100 = vector.broadcast %99 : vector<1x384xf32> to vector<48x384xf32>
    %101 = arith.mulf %98, %100 : vector<48x384xf32>
    %102 = arith.addf %96, %101 : vector<48x384xf32>
    %c0_85 = arith.constant 0 : index
    %c2_86 = arith.constant 2 : index
    %c1_87 = arith.constant 1 : index
    %c16_88 = arith.constant 16 : index
    %103 = vector.load %arg1[%c0_85, %c2_86, %c1_87, %c16_88] : memref<1x3x50x400xf32, #tpu.memory_space<vmem>>, vector<1x1x48x384xf32>
    %104 = vector.shape_cast %103 : vector<1x1x48x384xf32> to vector<48x384xf32>
    %c17 = arith.constant 17 : index
    %c0_89 = arith.constant 0 : index
    %105 = vector.load %arg2[%c17, %c0_89] : memref<27x384xf32, #tpu.memory_space<vmem>>, vector<1x384xf32>
    %106 = vector.broadcast %105 : vector<1x384xf32> to vector<48x384xf32>
    %107 = arith.mulf %104, %106 : vector<48x384xf32>
    %108 = arith.addf %102, %107 : vector<48x384xf32>
    %c0_90 = arith.constant 0 : index
    %c0_91 = arith.constant 0 : index
    %c2_92 = arith.constant 2 : index
    %c0_93 = arith.constant 0 : index
    %109 = vector.load %arg1[%c0_90, %c0_91, %c2_92, %c0_93] : memref<1x3x50x400xf32, #tpu.memory_space<vmem>>, vector<1x1x48x384xf32>
    %110 = vector.shape_cast %109 : vector<1x1x48x384xf32> to vector<48x384xf32>
    %c18 = arith.constant 18 : index
    %c0_94 = arith.constant 0 : index
    %111 = vector.load %arg2[%c18, %c0_94] : memref<27x384xf32, #tpu.memory_space<vmem>>, vector<1x384xf32>
    %112 = vector.broadcast %111 : vector<1x384xf32> to vector<48x384xf32>
    %113 = arith.mulf %110, %112 : vector<48x384xf32>
    %114 = arith.addf %108, %113 : vector<48x384xf32>
    %c0_95 = arith.constant 0 : index
    %c1_96 = arith.constant 1 : index
    %c2_97 = arith.constant 2 : index
    %c0_98 = arith.constant 0 : index
    %115 = vector.load %arg1[%c0_95, %c1_96, %c2_97, %c0_98] : memref<1x3x50x400xf32, #tpu.memory_space<vmem>>, vector<1x1x48x384xf32>
    %116 = vector.shape_cast %115 : vector<1x1x48x384xf32> to vector<48x384xf32>
    %c19 = arith.constant 19 : index
    %c0_99 = arith.constant 0 : index
    %117 = vector.load %arg2[%c19, %c0_99] : memref<27x384xf32, #tpu.memory_space<vmem>>, vector<1x384xf32>
    %118 = vector.broadcast %117 : vector<1x384xf32> to vector<48x384xf32>
    %119 = arith.mulf %116, %118 : vector<48x384xf32>
    %120 = arith.addf %114, %119 : vector<48x384xf32>
    %c0_100 = arith.constant 0 : index
    %c2_101 = arith.constant 2 : index
    %c2_102 = arith.constant 2 : index
    %c0_103 = arith.constant 0 : index
    %121 = vector.load %arg1[%c0_100, %c2_101, %c2_102, %c0_103] : memref<1x3x50x400xf32, #tpu.memory_space<vmem>>, vector<1x1x48x384xf32>
    %122 = vector.shape_cast %121 : vector<1x1x48x384xf32> to vector<48x384xf32>
    %c20 = arith.constant 20 : index
    %c0_104 = arith.constant 0 : index
    %123 = vector.load %arg2[%c20, %c0_104] : memref<27x384xf32, #tpu.memory_space<vmem>>, vector<1x384xf32>
    %124 = vector.broadcast %123 : vector<1x384xf32> to vector<48x384xf32>
    %125 = arith.mulf %122, %124 : vector<48x384xf32>
    %126 = arith.addf %120, %125 : vector<48x384xf32>
    %c0_105 = arith.constant 0 : index
    %c0_106 = arith.constant 0 : index
    %c2_107 = arith.constant 2 : index
    %c8_108 = arith.constant 8 : index
    %127 = vector.load %arg1[%c0_105, %c0_106, %c2_107, %c8_108] : memref<1x3x50x400xf32, #tpu.memory_space<vmem>>, vector<1x1x48x384xf32>
    %128 = vector.shape_cast %127 : vector<1x1x48x384xf32> to vector<48x384xf32>
    %c21 = arith.constant 21 : index
    %c0_109 = arith.constant 0 : index
    %129 = vector.load %arg2[%c21, %c0_109] : memref<27x384xf32, #tpu.memory_space<vmem>>, vector<1x384xf32>
    %130 = vector.broadcast %129 : vector<1x384xf32> to vector<48x384xf32>
    %131 = arith.mulf %128, %130 : vector<48x384xf32>
    %132 = arith.addf %126, %131 : vector<48x384xf32>
    %c0_110 = arith.constant 0 : index
    %c1_111 = arith.constant 1 : index
    %c2_112 = arith.constant 2 : index
    %c8_113 = arith.constant 8 : index
    %133 = vector.load %arg1[%c0_110, %c1_111, %c2_112, %c8_113] : memref<1x3x50x400xf32, #tpu.memory_space<vmem>>, vector<1x1x48x384xf32>
    %134 = vector.shape_cast %133 : vector<1x1x48x384xf32> to vector<48x384xf32>
    %c22 = arith.constant 22 : index
    %c0_114 = arith.constant 0 : index
    %135 = vector.load %arg2[%c22, %c0_114] : memref<27x384xf32, #tpu.memory_space<vmem>>, vector<1x384xf32>
    %136 = vector.broadcast %135 : vector<1x384xf32> to vector<48x384xf32>
    %137 = arith.mulf %134, %136 : vector<48x384xf32>
    %138 = arith.addf %132, %137 : vector<48x384xf32>
    %c0_115 = arith.constant 0 : index
    %c2_116 = arith.constant 2 : index
    %c2_117 = arith.constant 2 : index
    %c8_118 = arith.constant 8 : index
    %139 = vector.load %arg1[%c0_115, %c2_116, %c2_117, %c8_118] : memref<1x3x50x400xf32, #tpu.memory_space<vmem>>, vector<1x1x48x384xf32>
    %140 = vector.shape_cast %139 : vector<1x1x48x384xf32> to vector<48x384xf32>
    %c23 = arith.constant 23 : index
    %c0_119 = arith.constant 0 : index
    %141 = vector.load %arg2[%c23, %c0_119] : memref<27x384xf32, #tpu.memory_space<vmem>>, vector<1x384xf32>
    %142 = vector.broadcast %141 : vector<1x384xf32> to vector<48x384xf32>
    %143 = arith.mulf %140, %142 : vector<48x384xf32>
    %144 = arith.addf %138, %143 : vector<48x384xf32>
    %c0_120 = arith.constant 0 : index
    %c0_121 = arith.constant 0 : index
    %c2_122 = arith.constant 2 : index
    %c16_123 = arith.constant 16 : index
    %145 = vector.load %arg1[%c0_120, %c0_121, %c2_122, %c16_123] : memref<1x3x50x400xf32, #tpu.memory_space<vmem>>, vector<1x1x48x384xf32>
    %146 = vector.shape_cast %145 : vector<1x1x48x384xf32> to vector<48x384xf32>
    %c24 = arith.constant 24 : index
    %c0_124 = arith.constant 0 : index
    %147 = vector.load %arg2[%c24, %c0_124] : memref<27x384xf32, #tpu.memory_space<vmem>>, vector<1x384xf32>
    %148 = vector.broadcast %147 : vector<1x384xf32> to vector<48x384xf32>
    %149 = arith.mulf %146, %148 : vector<48x384xf32>
    %150 = arith.addf %144, %149 : vector<48x384xf32>
    %c0_125 = arith.constant 0 : index
    %c1_126 = arith.constant 1 : index
    %c2_127 = arith.constant 2 : index
    %c16_128 = arith.constant 16 : index
    %151 = vector.load %arg1[%c0_125, %c1_126, %c2_127, %c16_128] : memref<1x3x50x400xf32, #tpu.memory_space<vmem>>, vector<1x1x48x384xf32>
    %152 = vector.shape_cast %151 : vector<1x1x48x384xf32> to vector<48x384xf32>
    %c25 = arith.constant 25 : index
    %c0_129 = arith.constant 0 : index
    %153 = vector.load %arg2[%c25, %c0_129] : memref<27x384xf32, #tpu.memory_space<vmem>>, vector<1x384xf32>
    %154 = vector.broadcast %153 : vector<1x384xf32> to vector<48x384xf32>
    %155 = arith.mulf %152, %154 : vector<48x384xf32>
    %156 = arith.addf %150, %155 : vector<48x384xf32>
    %c0_130 = arith.constant 0 : index
    %c2_131 = arith.constant 2 : index
    %c2_132 = arith.constant 2 : index
    %c16_133 = arith.constant 16 : index
    %157 = vector.load %arg1[%c0_130, %c2_131, %c2_132, %c16_133] : memref<1x3x50x400xf32, #tpu.memory_space<vmem>>, vector<1x1x48x384xf32>
    %158 = vector.shape_cast %157 : vector<1x1x48x384xf32> to vector<48x384xf32>
    %c26 = arith.constant 26 : index
    %c0_134 = arith.constant 0 : index
    %159 = vector.load %arg2[%c26, %c0_134] : memref<27x384xf32, #tpu.memory_space<vmem>>, vector<1x384xf32>
    %160 = vector.broadcast %159 : vector<1x384xf32> to vector<48x384xf32>
    %161 = arith.mulf %158, %160 : vector<48x384xf32>
    %162 = arith.addf %156, %161 : vector<48x384xf32>
    %c0_135 = arith.constant 0 : index
    %c0_136 = arith.constant 0 : index
    %163 = vector.load %arg3[%c0_135, %c0_136] : memref<1x384xf32, #tpu.memory_space<vmem>>, vector<1x384xf32>
    %164 = vector.broadcast %163 : vector<1x384xf32> to vector<48x384xf32>
    %165 = arith.addf %162, %164 : vector<48x384xf32>
    %cst_137 = arith.constant 0.000000e+00 : f32
    %166 = vector.broadcast %cst_137 : f32 to vector<48x384xf32>
    %167 = arith.maximumf %165, %166 : vector<48x384xf32>
    %168 = vector.extract_strided_slice %167 {offsets = [0, 0], sizes = [48, 360], strides = [1, 1]} : vector<48x384xf32> to vector<48x360xf32>
    %169 = vector.extract_strided_slice %167 {offsets = [0, 8], sizes = [48, 360], strides = [1, 1]} : vector<48x384xf32> to vector<48x360xf32>
    %170 = arith.maximumf %168, %169 : vector<48x360xf32>
    %171 = vector.extract_strided_slice %167 {offsets = [0, 16], sizes = [48, 360], strides = [1, 1]} : vector<48x384xf32> to vector<48x360xf32>
    %172 = vector.extract_strided_slice %167 {offsets = [0, 24], sizes = [48, 360], strides = [1, 1]} : vector<48x384xf32> to vector<48x360xf32>
    %173 = arith.maximumf %171, %172 : vector<48x360xf32>
    %174 = arith.maximumf %170, %173 : vector<48x360xf32>
    %175 = vector.extract_strided_slice %174 {offsets = [0, 0], sizes = [45, 360], strides = [1, 1]} : vector<48x360xf32> to vector<45x360xf32>
    %176 = vector.extract_strided_slice %174 {offsets = [1, 0], sizes = [45, 360], strides = [1, 1]} : vector<48x360xf32> to vector<45x360xf32>
    %177 = arith.maximumf %175, %176 : vector<45x360xf32>
    %178 = vector.extract_strided_slice %174 {offsets = [2, 0], sizes = [45, 360], strides = [1, 1]} : vector<48x360xf32> to vector<45x360xf32>
    %179 = vector.extract_strided_slice %174 {offsets = [3, 0], sizes = [45, 360], strides = [1, 1]} : vector<48x360xf32> to vector<45x360xf32>
    %180 = arith.maximumf %178, %179 : vector<45x360xf32>
    %181 = arith.maximumf %177, %180 : vector<45x360xf32>
    %c0_138 = arith.constant 0 : index
    %c0_139 = arith.constant 0 : index
    %182 = vector.load %arg5[%c0_138, %c0_139] : memref<1x43xf32, #tpu.memory_space<vmem>>, vector<1x43xf32>
    %183 = vector.extract_strided_slice %181 {offsets = [0, 0], sizes = [1, 360], strides = [1, 1]} : vector<45x360xf32> to vector<1x360xf32>
    %c0_140 = arith.constant 0 : index
    %c0_141 = arith.constant 0 : index
    %c0_142 = arith.constant 0 : index
    %184 = vector.load %arg4[%c0_140, %c0_141, %c0_142] : memref<12x360x43xf32, #tpu.memory_space<vmem>>, vector<1x360x43xf32>
    %185 = vector.shape_cast %184 : vector<1x360x43xf32> to vector<360x43xf32>
    %cst_143 = arith.constant dense<0.000000e+00> : vector<1x43xf32>
    %186 = tpu.matmul %183, %185, %cst_143 {dimension_numbers = #tpu.dot_dimension_numbers<[1], [0], [0], [1], [0, 0, 1, 1], [], []>} : vector<1x360xf32>, vector<360x43xf32>, vector<1x43xf32> -> vector<1x43xf32>
    %187 = arith.addf %182, %186 : vector<1x43xf32>
    %188 = vector.extract_strided_slice %181 {offsets = [4, 0], sizes = [1, 360], strides = [1, 1]} : vector<45x360xf32> to vector<1x360xf32>
    %c1_144 = arith.constant 1 : index
    %c0_145 = arith.constant 0 : index
    %c0_146 = arith.constant 0 : index
    %189 = vector.load %arg4[%c1_144, %c0_145, %c0_146] : memref<12x360x43xf32, #tpu.memory_space<vmem>>, vector<1x360x43xf32>
    %190 = vector.shape_cast %189 : vector<1x360x43xf32> to vector<360x43xf32>
    %cst_147 = arith.constant dense<0.000000e+00> : vector<1x43xf32>
    %191 = tpu.matmul %188, %190, %cst_147 {dimension_numbers = #tpu.dot_dimension_numbers<[1], [0], [0], [1], [0, 0, 1, 1], [], []>} : vector<1x360xf32>, vector<360x43xf32>, vector<1x43xf32> -> vector<1x43xf32>
    %192 = arith.addf %187, %191 : vector<1x43xf32>
    %193 = vector.extract_strided_slice %181 {offsets = [8, 0], sizes = [1, 360], strides = [1, 1]} : vector<45x360xf32> to vector<1x360xf32>
    %c2_148 = arith.constant 2 : index
    %c0_149 = arith.constant 0 : index
    %c0_150 = arith.constant 0 : index
    %194 = vector.load %arg4[%c2_148, %c0_149, %c0_150] : memref<12x360x43xf32, #tpu.memory_space<vmem>>, vector<1x360x43xf32>
    %195 = vector.shape_cast %194 : vector<1x360x43xf32> to vector<360x43xf32>
    %cst_151 = arith.constant dense<0.000000e+00> : vector<1x43xf32>
    %196 = tpu.matmul %193, %195, %cst_151 {dimension_numbers = #tpu.dot_dimension_numbers<[1], [0], [0], [1], [0, 0, 1, 1], [], []>} : vector<1x360xf32>, vector<360x43xf32>, vector<1x43xf32> -> vector<1x43xf32>
    %197 = arith.addf %192, %196 : vector<1x43xf32>
    %198 = vector.extract_strided_slice %181 {offsets = [12, 0], sizes = [1, 360], strides = [1, 1]} : vector<45x360xf32> to vector<1x360xf32>
    %c3_152 = arith.constant 3 : index
    %c0_153 = arith.constant 0 : index
    %c0_154 = arith.constant 0 : index
    %199 = vector.load %arg4[%c3_152, %c0_153, %c0_154] : memref<12x360x43xf32, #tpu.memory_space<vmem>>, vector<1x360x43xf32>
    %200 = vector.shape_cast %199 : vector<1x360x43xf32> to vector<360x43xf32>
    %cst_155 = arith.constant dense<0.000000e+00> : vector<1x43xf32>
    %201 = tpu.matmul %198, %200, %cst_155 {dimension_numbers = #tpu.dot_dimension_numbers<[1], [0], [0], [1], [0, 0, 1, 1], [], []>} : vector<1x360xf32>, vector<360x43xf32>, vector<1x43xf32> -> vector<1x43xf32>
    %202 = arith.addf %197, %201 : vector<1x43xf32>
    %203 = vector.extract_strided_slice %181 {offsets = [16, 0], sizes = [1, 360], strides = [1, 1]} : vector<45x360xf32> to vector<1x360xf32>
    %c4_156 = arith.constant 4 : index
    %c0_157 = arith.constant 0 : index
    %c0_158 = arith.constant 0 : index
    %204 = vector.load %arg4[%c4_156, %c0_157, %c0_158] : memref<12x360x43xf32, #tpu.memory_space<vmem>>, vector<1x360x43xf32>
    %205 = vector.shape_cast %204 : vector<1x360x43xf32> to vector<360x43xf32>
    %cst_159 = arith.constant dense<0.000000e+00> : vector<1x43xf32>
    %206 = tpu.matmul %203, %205, %cst_159 {dimension_numbers = #tpu.dot_dimension_numbers<[1], [0], [0], [1], [0, 0, 1, 1], [], []>} : vector<1x360xf32>, vector<360x43xf32>, vector<1x43xf32> -> vector<1x43xf32>
    %207 = arith.addf %202, %206 : vector<1x43xf32>
    %208 = vector.extract_strided_slice %181 {offsets = [20, 0], sizes = [1, 360], strides = [1, 1]} : vector<45x360xf32> to vector<1x360xf32>
    %c5_160 = arith.constant 5 : index
    %c0_161 = arith.constant 0 : index
    %c0_162 = arith.constant 0 : index
    %209 = vector.load %arg4[%c5_160, %c0_161, %c0_162] : memref<12x360x43xf32, #tpu.memory_space<vmem>>, vector<1x360x43xf32>
    %210 = vector.shape_cast %209 : vector<1x360x43xf32> to vector<360x43xf32>
    %cst_163 = arith.constant dense<0.000000e+00> : vector<1x43xf32>
    %211 = tpu.matmul %208, %210, %cst_163 {dimension_numbers = #tpu.dot_dimension_numbers<[1], [0], [0], [1], [0, 0, 1, 1], [], []>} : vector<1x360xf32>, vector<360x43xf32>, vector<1x43xf32> -> vector<1x43xf32>
    %212 = arith.addf %207, %211 : vector<1x43xf32>
    %213 = vector.extract_strided_slice %181 {offsets = [24, 0], sizes = [1, 360], strides = [1, 1]} : vector<45x360xf32> to vector<1x360xf32>
    %c6_164 = arith.constant 6 : index
    %c0_165 = arith.constant 0 : index
    %c0_166 = arith.constant 0 : index
    %214 = vector.load %arg4[%c6_164, %c0_165, %c0_166] : memref<12x360x43xf32, #tpu.memory_space<vmem>>, vector<1x360x43xf32>
    %215 = vector.shape_cast %214 : vector<1x360x43xf32> to vector<360x43xf32>
    %cst_167 = arith.constant dense<0.000000e+00> : vector<1x43xf32>
    %216 = tpu.matmul %213, %215, %cst_167 {dimension_numbers = #tpu.dot_dimension_numbers<[1], [0], [0], [1], [0, 0, 1, 1], [], []>} : vector<1x360xf32>, vector<360x43xf32>, vector<1x43xf32> -> vector<1x43xf32>
    %217 = arith.addf %212, %216 : vector<1x43xf32>
    %218 = vector.extract_strided_slice %181 {offsets = [28, 0], sizes = [1, 360], strides = [1, 1]} : vector<45x360xf32> to vector<1x360xf32>
    %c7_168 = arith.constant 7 : index
    %c0_169 = arith.constant 0 : index
    %c0_170 = arith.constant 0 : index
    %219 = vector.load %arg4[%c7_168, %c0_169, %c0_170] : memref<12x360x43xf32, #tpu.memory_space<vmem>>, vector<1x360x43xf32>
    %220 = vector.shape_cast %219 : vector<1x360x43xf32> to vector<360x43xf32>
    %cst_171 = arith.constant dense<0.000000e+00> : vector<1x43xf32>
    %221 = tpu.matmul %218, %220, %cst_171 {dimension_numbers = #tpu.dot_dimension_numbers<[1], [0], [0], [1], [0, 0, 1, 1], [], []>} : vector<1x360xf32>, vector<360x43xf32>, vector<1x43xf32> -> vector<1x43xf32>
    %222 = arith.addf %217, %221 : vector<1x43xf32>
    %223 = vector.extract_strided_slice %181 {offsets = [32, 0], sizes = [1, 360], strides = [1, 1]} : vector<45x360xf32> to vector<1x360xf32>
    %c8_172 = arith.constant 8 : index
    %c0_173 = arith.constant 0 : index
    %c0_174 = arith.constant 0 : index
    %224 = vector.load %arg4[%c8_172, %c0_173, %c0_174] : memref<12x360x43xf32, #tpu.memory_space<vmem>>, vector<1x360x43xf32>
    %225 = vector.shape_cast %224 : vector<1x360x43xf32> to vector<360x43xf32>
    %cst_175 = arith.constant dense<0.000000e+00> : vector<1x43xf32>
    %226 = tpu.matmul %223, %225, %cst_175 {dimension_numbers = #tpu.dot_dimension_numbers<[1], [0], [0], [1], [0, 0, 1, 1], [], []>} : vector<1x360xf32>, vector<360x43xf32>, vector<1x43xf32> -> vector<1x43xf32>
    %227 = arith.addf %222, %226 : vector<1x43xf32>
    %228 = vector.extract_strided_slice %181 {offsets = [36, 0], sizes = [1, 360], strides = [1, 1]} : vector<45x360xf32> to vector<1x360xf32>
    %c9_176 = arith.constant 9 : index
    %c0_177 = arith.constant 0 : index
    %c0_178 = arith.constant 0 : index
    %229 = vector.load %arg4[%c9_176, %c0_177, %c0_178] : memref<12x360x43xf32, #tpu.memory_space<vmem>>, vector<1x360x43xf32>
    %230 = vector.shape_cast %229 : vector<1x360x43xf32> to vector<360x43xf32>
    %cst_179 = arith.constant dense<0.000000e+00> : vector<1x43xf32>
    %231 = tpu.matmul %228, %230, %cst_179 {dimension_numbers = #tpu.dot_dimension_numbers<[1], [0], [0], [1], [0, 0, 1, 1], [], []>} : vector<1x360xf32>, vector<360x43xf32>, vector<1x43xf32> -> vector<1x43xf32>
    %232 = arith.addf %227, %231 : vector<1x43xf32>
    %233 = vector.extract_strided_slice %181 {offsets = [40, 0], sizes = [1, 360], strides = [1, 1]} : vector<45x360xf32> to vector<1x360xf32>
    %c10_180 = arith.constant 10 : index
    %c0_181 = arith.constant 0 : index
    %c0_182 = arith.constant 0 : index
    %234 = vector.load %arg4[%c10_180, %c0_181, %c0_182] : memref<12x360x43xf32, #tpu.memory_space<vmem>>, vector<1x360x43xf32>
    %235 = vector.shape_cast %234 : vector<1x360x43xf32> to vector<360x43xf32>
    %cst_183 = arith.constant dense<0.000000e+00> : vector<1x43xf32>
    %236 = tpu.matmul %233, %235, %cst_183 {dimension_numbers = #tpu.dot_dimension_numbers<[1], [0], [0], [1], [0, 0, 1, 1], [], []>} : vector<1x360xf32>, vector<360x43xf32>, vector<1x43xf32> -> vector<1x43xf32>
    %237 = arith.addf %232, %236 : vector<1x43xf32>
    %238 = vector.extract_strided_slice %181 {offsets = [44, 0], sizes = [1, 360], strides = [1, 1]} : vector<45x360xf32> to vector<1x360xf32>
    %c11_184 = arith.constant 11 : index
    %c0_185 = arith.constant 0 : index
    %c0_186 = arith.constant 0 : index
    %239 = vector.load %arg4[%c11_184, %c0_185, %c0_186] : memref<12x360x43xf32, #tpu.memory_space<vmem>>, vector<1x360x43xf32>
    %240 = vector.shape_cast %239 : vector<1x360x43xf32> to vector<360x43xf32>
    %cst_187 = arith.constant dense<0.000000e+00> : vector<1x43xf32>
    %241 = tpu.matmul %238, %240, %cst_187 {dimension_numbers = #tpu.dot_dimension_numbers<[1], [0], [0], [1], [0, 0, 1, 1], [], []>} : vector<1x360xf32>, vector<360x43xf32>, vector<1x43xf32> -> vector<1x43xf32>
    %242 = arith.addf %237, %241 : vector<1x43xf32>
    %c0_188 = arith.constant 0 : index
    %c0_189 = arith.constant 0 : index
    %c0_190 = arith.constant 0 : index
    %243 = vector.load %arg6[%c0_188, %c0_189, %c0_190] : memref<1x1x43xf32, #tpu.memory_space<vmem>>, vector<1x1x43xf32>
    %244 = vector.shape_cast %243 : vector<1x1x43xf32> to vector<1x43xf32>
    %245 = vector.shape_cast %242 : vector<1x43xf32> to vector<1x1x43xf32>
    tpu.vector_store %arg6[%c0_188, %c0_189, %c0_190], %245 {strides = array<i32>} : memref<1x1x43xf32, #tpu.memory_space<vmem>>, vector<1x1x43xf32>,
    return
  }
  func.func @transform_0(%arg0: i32) -> (i32, i32, i32, i32) {
    %c0_i32 = arith.constant 0 : i32
    %c0_i32_0 = arith.constant 0 : i32
    %c0_i32_1 = arith.constant 0 : i32
    %c0_i32_2 = arith.constant 0 : i32
    return %arg0, %c0_i32, %c0_i32_0, %c0_i32_1 : i32, i32, i32, i32
  }
  func.func @transform_1(%arg0: i32) -> (i32, i32) {
    %c0_i32 = arith.constant 0 : i32
    %c0_i32_0 = arith.constant 0 : i32
    %c0_i32_1 = arith.constant 0 : i32
    return %c0_i32, %c0_i32_0 : i32, i32
  }
  func.func @transform_2(%arg0: i32) -> (i32, i32) {
    %c0_i32 = arith.constant 0 : i32
    %c0_i32_0 = arith.constant 0 : i32
    %c0_i32_1 = arith.constant 0 : i32
    return %c0_i32, %c0_i32_0 : i32, i32
  }
  func.func @transform_3(%arg0: i32) -> (i32, i32, i32) {
    %c0_i32 = arith.constant 0 : i32
    %c0_i32_0 = arith.constant 0 : i32
    %c0_i32_1 = arith.constant 0 : i32
    %c0_i32_2 = arith.constant 0 : i32
    return %c0_i32, %c0_i32_0, %c0_i32_1 : i32, i32, i32
  }
  func.func @transform_4(%arg0: i32) -> (i32, i32) {
    %c0_i32 = arith.constant 0 : i32
    %c0_i32_0 = arith.constant 0 : i32
    %c0_i32_1 = arith.constant 0 : i32
    return %c0_i32, %c0_i32_0 : i32, i32
  }
  func.func @transform_5(%arg0: i32) -> (i32, i32, i32) {
    %c0_i32 = arith.constant 0 : i32
    %c0_i32_0 = arith.constant 0 : i32
    %c0_i32_1 = arith.constant 0 : i32
    return %arg0, %c0_i32, %c0_i32_0 : i32, i32, i32
  }
}

</mosaic_0001>

<bundles_post_ra>
// kernel: classifier_forward.1
= control target key start
LH: loop header
LB: loop body
LE: loop exit
PB: predicated region body
PF: predicated region fallthrough
CT: control target
= control target key end

     0   :  { %10 = vsyncpa [#allocation3], 0  ;;  %s16312_s0 = inlined_call_operand.vmem [shape: f32[2,3,50,400], index: 0, kind: input, shape index: {}]   ;;  %s16313_s1 = inlined_call_operand.vmem [shape: f32[27,384], index: 1, kind: input, shape index: {}]   ;;  %s16314_s2 = inlined_call_operand.vmem [shape: f32[1,384], index: 2, kind: input, shape index: {}]   ;;  %s16315_s3 = inlined_call_operand.vmem [shape: f32[12,360,43], index: 3, kind: input, shape index: {}]   ;;  %s16316_s4 = inlined_call_operand.vmem [shape: f32[1,43], index: 4, kind: input, shape index: {}]   ;;  %s16317_s5 = inlined_call_operand.hbm [shape: f32[2,1,43], index: 5, kind: output, shape index: {}]  }
   0x1   :  { %12 = vsyncpa [#allocation3 + $0x1], 0  ;;  %s7881_s18 = smov 0   ;;  %s7883_s19 = smov 0  }
   0x2   :  { %s7885_s20 = smov 0   ;;  %s7887_s21 = smov 0  }
   0x3 LB: > { %s7902_s22 = sadd.s32 4294967295, %s7845_s21   ;;  %s6833_s23 = sadd.s32 4294967294, %s7845_s21   ;;  %s7845_s21 = sphi %s7887_s21, %s18069_s21   ;;  %s7841_s20 = sphi %s7885_s20, %s18068_s20   ;;  %s7837_s19 = sphi %s7883_s19, %s18067_s19   ;;  %s7833_s18 = sphi %s7881_s18, %s18066_s18  }
   0x4   : > { %s7906_s24 = sadd.s32 1, %s7845_s21   ;;  %s135_s25 = sadd.s32 1, %s7841_s20 }
   0x5   : > { %s132_s26 = ssub.s32 %s7845_s21, %s7906_s24  ;;  %p145_p0 = scmp.ne.s32.totalorder %s7841_s20, %s7837_s19 }
   0x6   : > { %p133_p1 = scmp.eq.s32.totalorder %s132_s26, 0  ;;  %p146_p2 = scmp.eq.s32.totalorder %s7902_s22, 1 }
   0x7   : > { %p151_p3 = scmp.ne.s32.totalorder %s7837_s19, %s7833_s18  ;;  %p152_p4 = scmp.eq.s32.totalorder %s6833_s23, 1 }
   0x8   : > { %s7917_s27 = scalar_select %p133_p1, %s7841_s20, %s135_s25  }
   0x9   : > { %p7919_p5 = por %p146_p2, %p145_p0  ;;  %p7923_p6 = por %p152_p4, %p151_p3 }
   0xa   : > { %p6836_p7 = scmp.ge.s32.totalorder %s7845_s21, 1  ;;  %p190_p8 = scmp.lt.s32.totalorder %s7845_s21, 3 }
   0xc   : > { %p191_p9 = pnand %p6836_p7, %p190_p8 }
   0xe   : > { %194 = sbr.rel (%p191_p9) target bundleno = 3485 (0xd9d), region = 40 }
  0x13   : > { %v6876_v0 = vld [vmem:[%s16313_s1 + $0x3] ss:$8 sm:$0x7]  ;;  %v6883_v3 = vld [vmem:[%s16313_s1 + $0x4] ss:$8 sm:$0x7]  ;;  %s6774_s23 = scalar_lea.hbm %s16317_s5, %s7902_s22 }
  0x14   : > { %v423_v1 = vperm.slane %v6876_v0, 2  ;;  %v421_v2 = vperm.slane %v6876_v0, 0  ;;  %v599_v4 = vperm.slane %v6883_v3, 2  ;;  %s7847_s9 = smov 8   ;;  %v422_v5 = vperm.slane %v6876_v0, 1  ;;  %p217_p10 = scmp.lt.s32.totalorder %s7902_s22, 1 }
  0x15   : > { %v598_v6 = vperm.slane %v6883_v3, 1  ;;  %v597_v7 = vperm.slane %v6883_v3, 0  ;;  %s7848_s15 = smov 120   ;;  %vm430_vm0 = vcmask 64512   ;;  %s7849_s26 = smov 16   ;;  %vm948_vm1 = vcmask 130048  }
  0x16   : > { %428 = vrot.lane.b32.xlu1 %v423_v1, %s7847_s9  ;;  %424 = vrot.lane.b32.xlu0 %v421_v2, %s7847_s9  ;;  %s218_s10 = scalar_select %p217_p10, %s7902_s22, 1  ;;  %vm1499_vm2 = vcmask 1046528   ;;  %vm533_vm3 = vcmask 982016   ;;  %vm1051_vm4 = vcmask 916480   ;;  %vm3270_vm5 = vcmask 1045504  }
  0x17   : > { %604 = vrot.lane.b32.xlu2 %v599_v4, %s7847_s9  ;;  %s7850_s30 = smov 112   ;;  %vm5452_vm6 = vcmask 850944   ;;  %s215_s13 = sand.u32 1, %s7837_s19   ;;  %vm6763_vm7 = vcmask 344064  }
  0x18   : > { %s7453_s11 = smul.u32 672, %s218_s10  ;;  %s216_s25 = scalar_lea.vmem [#allocation2], %s215_s13 }
  0x19   : > { %s6776_s6 = sshll.u32 %s216_s25, 4  ;;  %s6778_s7 = sshll.u32 %s6774_s23, 4  ;;  %s6777_s6 = int_to_ptr.vmem [resolvable:$true] %s6776_s6  ;;  %s6779_s7 = int_to_ptr.hbm [resolvable:$true] %s6778_s7 }
  0x1a   : > { %s7946_s14 = scalar_lea.vmem %s16312_s0, %s7453_s11 }
  0x1b   : > { %v7949_v8 = vld [vmem:[%s7946_s14 + $0x18] sm:$0xff]  ;;  %v7952_v9 = vld [vmem:[%s7946_s14 + $0x40] sm:$0xff]  ;;  %v8061_v51 = vld [vmem:[%s7946_s14 + $0x8] sm:$0xff] }
  0x1c   : > { %v7955_v10 = vld [vmem:[%s7946_s14] sm:$0xff]  ;;  %v7967_v16 = vld [vmem:[%s7946_s14 + $0x58] sm:$0xff]  ;;  %v8077_v57 = vld [vmem:[%s7946_s14 + $0x30] sm:$0xff] }
  0x1d   : > { %v7970_v17 = vld [vmem:[%s7946_s14 + $0x60] sm:$0xff]  ;;  %v7983_v23 = vld [vmem:[%s7946_s14 + $0x78] sm:$0xff]  ;;  %v8080_v58 = vld [vmem:[%s7946_s14 + $0x10] sm:$0xff] }
  0x1e   : > { %426 = vrot.lane.b32.xlu0 %v422_v5, %s7847_s9  ;;  %602 = vrot.lane.b32.xlu1 %v598_v6, %s7847_s9  ;;  %v7975_v19 = vld [vmem:[%s7946_s14 + $0x20] sm:$0xff]  ;;  %v7989_v25 = vld [vmem:[%s7946_s14 + $0x38] sm:$0xff] }
  0x1f   : > { %v7986_v24 = vld [vmem:[%s7946_s14 + $0xa0] sm:$0xff]  ;;  %v8005_v31 = vld [vmem:[%s7946_s14 + $0xb8] sm:$0xff]  ;;  %v8093_v63 = vld [vmem:[%s7946_s14 + $0x48] sm:$0xff] }
  0x20   : > { %v8002_v30 = vld [vmem:[%s7946_s14 + $0xe0] sm:$0xff]  ;;  %v8021_v37 = vld [vmem:[%s7946_s14 + $0xf8] sm:$0xff]  ;;  %v8096_v0 = vld [vmem:[%s7946_s14 + $0x28] sm:$0xff] }
  0x21   : > { %v8010_v33 = vld [vmem:[%s7946_s14 + $0x80] sm:$0xff]  ;;  %v8031_v41 = vld [vmem:[%s7946_s14 + $0x98] sm:$0xff]  ;;  %v8099_v1 = vld [vmem:[%s7946_s14 + $0x50] sm:$0xff] }
  0x22   : > { %v8024_v38 = vld [vmem:[%s7946_s14 + $0x120] sm:$0xff]  ;;  %v8039_v43 = vld [vmem:[%s7946_s14 + $0x138] sm:$0xff]  ;;  %v8108_v5 = vld [vmem:[%s7946_s14 + $0x90] sm:$0xff] }
  0x23   : > { %v8042_v44 = vld [vmem:[%s7946_s14 + $0x140] sm:$0xff]  ;;  %v8058_v50 = vld [vmem:[%s7946_s14 + $0x158] sm:$0xff]  ;;  %v8111_v6 = vld [vmem:[%s7946_s14 + $0x70] sm:$0xff] }
  0x24   : > { %v8047_v46 = vld [vmem:[%s7946_s14 + $0x100] sm:$0xff]  ;;  %v8064_v52 = vld [vmem:[%s7946_s14 + $0x118] sm:$0xff] }
  0x25   : > { %v8083_v59 = vld [vmem:[%s7946_s14 + $0x160] sm:$0xff] }
  0x26   : > { %600 = vrot.lane.b32.xlu0 %v597_v7, %s7847_s9  ;;  %v8114_v7 = vld [vmem:[%s7946_s14 + $0x68] sm:$0xff] }
  0x71   : > { %v8018_v36 = vpop.permute.xlu2 %604 }
  0x72   : > { %v615_v39 = vmul.f32 %v8021_v37, %v8018_v36  ;;  %v623_v45 = vmul.f32 %v8039_v43, %v8018_v36  ;;  %v627_v53 = vmul.f32 %v8058_v50, %v8018_v36  ;;  %v619_v55 = vmul.f32 %v8064_v52, %v8018_v36 }
  0x88   : > { %v7957_v11 = vpop.permute.xlu1 %428  ;;  %v425_v12 = vpop.permute.xlu0 %424 }
  0x89   : > { %v440_v13 = vmul.f32 %v7957_v11, %v7949_v8  ;;  %v445_v14 = vmul.f32 %v425_v12, %v7952_v9  ;;  %v437_v15 = vmul.f32 %v425_v12, %v7955_v10  ;;  %v448_v18 = vmul.f32 %v7957_v11, %v7967_v16 }
  0x8a   : > { %v449_v20 = vmul.f32 %v425_v12, %v7970_v17  ;;  %v441_v21 = vmul.f32 %v425_v12, %v7975_v19  ;;  %v452_v26 = vmul.f32 %v7957_v11, %v7983_v23  ;;  %v457_v27 = vmul.f32 %v425_v12, %v7986_v24 }
  0x8b   : > { %491 = vrot.lane.b32.xlu0 %v440_v13, %s7848_s15  ;;  %501 = vrot.lane.b32.xlu2 %v445_v14, %s7848_s15  ;;  %v444_v28 = vmul.f32 %v7957_v11, %v7989_v25  ;;  %v460_v34 = vmul.f32 %v7957_v11, %v8005_v31  ;;  %v453_v35 = vmul.f32 %v425_v12, %v8010_v33  ;;  %v8123_v14 = vld [vmem:[%s7946_s14 + $0xa8] sm:$0xff] }
  0x8c   : > { %485 = vrot.lane.b32.xlu1 %v437_v15, %s7848_s15  ;;  %v456_v42 = vmul.f32 %v7957_v11, %v8031_v41  ;;  %v8126_v15 = vld [vmem:[%s7946_s14 + $0x88] sm:$0xff] }
  0x90   : > { %v427_v22 = vpop.permute.xlu0 %426 }
  0x91   : > { %v431_v49 = vsel %vm430_vm0, %v425_v12, %v427_v22  ;;  %v432_v56 = vsel %vm430_vm0, %v427_v22, %v7957_v11 }
  0x92   : > { %v438_v54 = vmul.f32 %v431_v49, %v8061_v51  ;;  %v443_v60 = vmul.f32 %v432_v56, %v8077_v57  ;;  %v439_v61 = vmul.f32 %v432_v56, %v8080_v58  ;;  %v446_v2 = vmul.f32 %v431_v49, %v8093_v63 }
  0x93   : > { %509 = vrot.lane.b32.xlu0 %v449_v20, %s7848_s15  ;;  %507 = vrot.lane.b32.xlu2 %v448_v18, %s7848_s15  ;;  %v442_v3 = vmul.f32 %v431_v49, %v8096_v0  ;;  %v447_v4 = vmul.f32 %v432_v56, %v8099_v1  ;;  %v455_v11 = vmul.f32 %v432_v56, %v8108_v5  ;;  %v8129_v18 = vld [vmem:[%s7946_s14 + $0xb0] sm:$0xff] }
  0x94   : > { %493 = vrot.lane.b32.xlu1 %v441_v21, %s7848_s15  ;;  %v451_v12 = vmul.f32 %v432_v56, %v8111_v6  ;;  %v450_v13 = vmul.f32 %v431_v49, %v8114_v7  ;;  %v458_v20 = vmul.f32 %v431_v49, %v8123_v14  ;;  %v454_v21 = vmul.f32 %v431_v49, %v8126_v15  ;;  %v8165_v49 = vld [vmem:[%s7946_s14 + $0x130] sm:$0xff] }
  0x95   : > { %v459_v22 = vmul.f32 %v432_v56, %v8129_v18 }
  0x98   : > { %v7999_v29 = vpop.permute.xlu0 %600 }
  0x99   : > { %v612_v32 = vmul.f32 %v8002_v30, %v7999_v29  ;;  %v620_v40 = vmul.f32 %v8024_v38, %v7999_v29  ;;  %v624_v47 = vmul.f32 %v8042_v44, %v7999_v29  ;;  %v616_v48 = vmul.f32 %v8047_v46, %v7999_v29 }
  0x9a   : > { %v628_v62 = vmul.f32 %v8083_v59, %v7999_v29 }
  0x9b   : > { %515 = vrot.lane.b32.xlu0 %v452_v26, %s7848_s15  ;;  %525 = vrot.lane.b32.xlu2 %v457_v27, %s7848_s15  ;;  %v603_v26 = vpop.permute.xlu1 %602 }
  0x9c   : > { %499 = vrot.lane.b32.xlu1 %v444_v28, %s7848_s15  ;;  %v607_v27 = vsel %vm430_vm0, %v603_v26, %v8018_v36  ;;  %v8140_v28 = vld [vmem:[%s7946_s14 + $0x110] sm:$0xff] }
  0xa3   : > { %660 = vrot.lane.b32.xlu0 %v612_v32, %s7848_s15  ;;  %531 = vrot.lane.b32.xlu2 %v460_v34, %s7848_s15  ;;  %v8143_v32 = vld [vmem:[%s7946_s14 + $0xf0] sm:$0xff]  ;;  %v606_v34 = vsel %vm430_vm0, %v7999_v29, %v603_v26 }
  0xa4   : > { %517 = vrot.lane.b32.xlu1 %v453_v35, %s7848_s15  ;;  %v8148_v35 = vld [vmem:[%s7946_s14 + $0xe8] sm:$0xff] }
  0xab   : > { %666 = vrot.lane.b32.xlu0 %v615_v39, %s7848_s15  ;;  %676 = vrot.lane.b32.xlu2 %v620_v40, %s7848_s15  ;;  %v618_v39 = vmul.f32 %v8140_v28, %v607_v27  ;;  %v614_v40 = vmul.f32 %v8143_v32, %v607_v27 }
  0xac   : > { %523 = vrot.lane.b32.xlu1 %v456_v42, %s7848_s15  ;;  %v613_v42 = vmul.f32 %v8148_v35, %v606_v34 }
  0xb3   : > { %684 = vrot.lane.b32.xlu0 %v624_v47, %s7848_s15  ;;  %682 = vrot.lane.b32.xlu2 %v623_v45, %s7848_s15  ;;  %v8159_v47 = vld [vmem:[%s7946_s14 + $0x128] sm:$0xff] }
  0xb4   : > { %668 = vrot.lane.b32.xlu1 %v616_v48, %s7848_s15  ;;  %v8162_v48 = vld [vmem:[%s7946_s14 + $0x108] sm:$0xff] }
  0xbb   : > { %690 = vrot.lane.b32.xlu0 %v627_v53, %s7848_s15  ;;  %487 = vrot.lane.b32.xlu2 %v438_v54, %s7848_s15  ;;  %v621_v53 = vmul.f32 %v8159_v47, %v606_v34  ;;  %v617_v54 = vmul.f32 %v8162_v48, %v606_v34 }
  0xbc   : > { %674 = vrot.lane.b32.xlu1 %v619_v55, %s7848_s15  ;;  %v622_v55 = vmul.f32 %v8165_v49, %v607_v27 }
  0xc3   : > { %497 = vrot.lane.b32.xlu0 %v443_v60, %s7848_s15  ;;  %489 = vrot.lane.b32.xlu2 %v439_v61, %s7848_s15  ;;  %v8176_v60 = vld [vmem:[%s7946_s14 + $0x170] sm:$0xff] }
  0xc4   : > { %692 = vrot.lane.b32.xlu1 %v628_v62, %s7848_s15  ;;  %v8179_v61 = vld [vmem:[%s7946_s14 + $0x150] sm:$0xff]  ;;  %v8182_v62 = vld [vmem:[%s7946_s14 + $0x148] sm:$0xff] }
  0xcb   : > { %503 = vrot.lane.b32.xlu0 %v446_v2, %s7848_s15  ;;  %495 = vrot.lane.b32.xlu2 %v442_v3, %s7848_s15  ;;  %v630_v2 = vmul.f32 %v8176_v60, %v607_v27  ;;  %v626_v3 = vmul.f32 %v8179_v61, %v607_v27 }
  0xcc   : > { %505 = vrot.lane.b32.xlu1 %v447_v4, %s7848_s15  ;;  %v625_v4 = vmul.f32 %v8182_v62, %v606_v34 }
  0xd3   : > { %521 = vrot.lane.b32.xlu0 %v455_v11, %s7848_s15  ;;  %513 = vrot.lane.b32.xlu2 %v451_v12, %s7848_s15  ;;  %v8193_v12 = vld [vmem:[%s7946_s14 + $0x188] sm:$0xff] }
  0xd4   : > { %511 = vrot.lane.b32.xlu1 %v450_v13, %s7848_s15  ;;  %v8196_v13 = vld [vmem:[%s7946_s14 + $0x168] sm:$0xff] }
  0xdb   : > { %527 = vrot.lane.b32.xlu0 %v458_v20, %s7848_s15  ;;  %519 = vrot.lane.b32.xlu2 %v454_v21, %s7848_s15  ;;  %v8199_v20 = vld [vmem:[%s7946_s14 + $0x178] sm:$0xff]  ;;  %v633_v21 = vmul.f32 %v8193_v12, %v606_v34 }
  0xdc   : > { %529 = vrot.lane.b32.xlu1 %v459_v22, %s7848_s15  ;;  %v629_v22 = vmul.f32 %v8196_v13, %v606_v34  ;;  %v631_v26 = vmul.f32 %v8199_v20, %v8018_v36  ;;  %v8218_v34 = vld [vmem:[%s7946_s14 + $0x180] sm:$0xff] }
  0xe3   : > { %672 = vrot.lane.b32.xlu0 %v618_v39, %s7848_s15  ;;  %664 = vrot.lane.b32.xlu2 %v614_v40, %s7848_s15  ;;  %v6890_v39 = vld [vmem:[%s16313_s1 + $0x5] ss:$8 sm:$0x7] }
  0xe4   : > { %662 = vrot.lane.b32.xlu1 %v613_v42, %s7848_s15 }
  0xe5   : > { %v8156_v45 = vpop.permute.xlu2 %501 }
  0xe6   : > { %16756 = vst [vmem:[#allocation5_spill] sm:$0xff] %v8156_v45  ;;  %v772_v45 = vperm.slane %v6890_v39, 1 }
  0xeb   : > { %678 = vrot.lane.b32.xlu0 %v621_v53, %s7848_s15  ;;  %670 = vrot.lane.b32.xlu2 %v617_v54, %s7848_s15  ;;  %v771_v54 = vperm.slane %v6890_v39, 0 }
  0xec   : > { %680 = vrot.lane.b32.xlu1 %v622_v55, %s7848_s15  ;;  %v8221_v55 = vld [vmem:[%s7946_s14 + $0x190] sm:$0xff] }
  0xed   : > { %v8173_v56 = vpop.permute.xlu2 %507 }
  0xee   : > { %16757 = vst [vmem:[#allocation6_spill] sm:$0xff] %v8173_v56 }
  0xf3   : > { %696 = vrot.lane.b32.xlu0 %v630_v2, %s7848_s15  ;;  %688 = vrot.lane.b32.xlu2 %v626_v3, %s7848_s15  ;;  %v632_v2 = vmul.f32 %v8218_v34, %v7999_v29  ;;  %v634_v3 = vmul.f32 %v8221_v55, %v607_v27 }
  0xf4   : > { %686 = vrot.lane.b32.xlu1 %v625_v4, %s7848_s15 }
  0xf5   : > { %v8190_v11 = vpop.permute.xlu2 %525 }
  0xf6   : > { %16758 = vst [vmem:[#allocation7_spill] sm:$0xff] %v8190_v11 }
  0xfb   : > { %702 = vrot.lane.b32.xlu0 %v633_v21, %s7848_s15  ;;  %694 = vrot.lane.b32.xlu2 %v629_v22, %s7848_s15 }
  0xfc   : > { %698 = vrot.lane.b32.xlu1 %v631_v26, %s7848_s15  ;;  %v8236_v26 = vld [vmem:[%s7946_s14 + $0x198] sm:$0xff] }
  0xfd   : > { %v8211_v40 = vpop.permute.xlu0 %491  ;;  %v8213_v42 = vpop.permute.xlu2 %531  ;;  %v635_v29 = vmul.f32 %v8236_v26, %v8018_v36 }
  0xfe   : > { %16759 = vst [vmem:[#allocation8_spill] sm:$0xff] %v8211_v40  ;;  %v8215_v53 = vpop.permute.xlu1 %485 }
  0xff   : > { %16760 = vst [vmem:[#allocation9_spill] sm:$0xff] %v8213_v42 }
 0x100   : > { %16761 = vst [vmem:[#allocation10_spill] sm:$0xff] %v8215_v53 }
 0x103   : > { %774 = vrot.lane.b32.xlu0 %v771_v54, %s7847_s9  ;;  %700 = vrot.lane.b32.xlu2 %v632_v2, %s7848_s15 }
 0x104   : > { %704 = vrot.lane.b32.xlu1 %v634_v3, %s7848_s15  ;;  %v773_v3 = vperm.slane %v6890_v39, 2 }
 0x105   : > { %v8229_v4 = vpop.permute.xlu0 %509  ;;  %v8231_v21 = vpop.permute.xlu2 %676 }
 0x106   : > { %16762 = vst [vmem:[#allocation11_spill] sm:$0xff] %v8229_v4  ;;  %v8233_v22 = vpop.permute.xlu1 %493 }
 0x107   : > { %16763 = vst [vmem:[#allocation12_spill] sm:$0xff] %v8231_v21 }
 0x108   : > { %16764 = vst [vmem:[#allocation13_spill] sm:$0xff] %v8233_v22 }
 0x10b   : > { %706 = vrot.lane.b32.xlu2 %v635_v29, %s7848_s15 }
 0x10c   : > { %776 = vrot.lane.b32.xlu1 %v772_v45, %s7847_s9 }
 0x10d   : > { %v8242_v27 = vpop.permute.xlu0 %515  ;;  %v8244_v54 = vpop.permute.xlu2 %682 }
 0x10e   : > { %16765 = vst [vmem:[#allocation14_spill] sm:$0xff] %v8242_v27  ;;  %v8246_v2 = vpop.permute.xlu1 %499  ;;  %v8375_v27 = vld [vmem:[%s7946_s14 + $0x1f8] sm:$0xff] }
 0x10f   : > { %16766 = vst [vmem:[#allocation15_spill] sm:$0xff] %v8244_v54 }
 0x110   : > { %16767 = vst [vmem:[#allocation16_spill] sm:$0xff] %v8246_v2 }
 0x111   : > { %16809 = vst [vmem:[#allocation58_spill] sm:$0xff] %v8375_v27 }
 0x113   : > { %778 = vrot.lane.b32.xlu2 %v773_v3, %s7847_s9 }
 0x115   : > { %v8249_v4 = vpop.permute.xlu0 %660  ;;  %v8251_v21 = vpop.permute.xlu2 %487 }
 0x116   : > { %16768 = vst [vmem:[#allocation17_spill] sm:$0xff] %v8249_v4  ;;  %v8253_v56 = vpop.permute.xlu1 %517 }
 0x117   : > { %16769 = vst [vmem:[#allocation18_spill] sm:$0xff] %v8251_v21 }
 0x118   : > { %16770 = vst [vmem:[#allocation19_spill] sm:$0xff] %v8253_v56  ;;  %v8320_v56 = vld [vmem:[%s7946_s14 + $0x1c0] sm:$0xff] }
 0x11d   : > { %v8255_v36 = vpop.permute.xlu0 %666  ;;  %v8257_v29 = vpop.permute.xlu2 %489 }
 0x11e   : > { %16771 = vst [vmem:[#allocation20_spill] sm:$0xff] %v8255_v36  ;;  %v8259_v45 = vpop.permute.xlu1 %523 }
 0x11f   : > { %16772 = vst [vmem:[#allocation21_spill] sm:$0xff] %v8257_v29 }
 0x120   : > { %16773 = vst [vmem:[#allocation22_spill] sm:$0xff] %v8259_v45 }
 0x125   : > { %v8261_v22 = vpop.permute.xlu0 %684  ;;  %v8263_v54 = vpop.permute.xlu2 %495 }
 0x126   : > { %16774 = vst [vmem:[#allocation23_spill] sm:$0xff] %v8261_v22  ;;  %v8265_v2 = vpop.permute.xlu1 %668 }
 0x127   : > { %16775 = vst [vmem:[#allocation24_spill] sm:$0xff] %v8263_v54 }
 0x128   : > { %16776 = vst [vmem:[#allocation25_spill] sm:$0xff] %v8265_v2 }
 0x12d   : > { %v8267_v39 = vpop.permute.xlu0 %690  ;;  %v8269_v3 = vpop.permute.xlu2 %513 }
 0x12e   : > { %16777 = vst [vmem:[#allocation26_spill] sm:$0xff] %v8267_v39  ;;  %v8271_v4 = vpop.permute.xlu1 %674 }
 0x12f   : > { %16778 = vst [vmem:[#allocation27_spill] sm:$0xff] %v8269_v3  ;;  %v8363_v3 = vld [vmem:[%s7946_s14 + $0x1e8] sm:$0xff] }
 0x130   : > { %16779 = vst [vmem:[#allocation28_spill] sm:$0xff] %v8271_v4 }
 0x131   : > { %16807 = vst [vmem:[#allocation56_spill] sm:$0xff] %v8363_v3 }
 0x135   : > { %v8273_v40 = vpop.permute.xlu0 %497  ;;  %v8275_v53 = vpop.permute.xlu2 %519 }
 0x136   : > { %16780 = vst [vmem:[#allocation29_spill] sm:$0xff] %v8273_v40  ;;  %v8277_v36 = vpop.permute.xlu1 %692 }
 0x137   : > { %16781 = vst [vmem:[#allocation30_spill] sm:$0xff] %v8275_v53 }
 0x138   : > { %16782 = vst [vmem:[#allocation31_spill] sm:$0xff] %v8277_v36 }
 0x13d   : > { %v8279_v29 = vpop.permute.xlu0 %503  ;;  %v8283_v22 = vpop.permute.xlu2 %664 }
 0x13e   : > { %16783 = vst [vmem:[#allocation32_spill] sm:$0xff] %v8279_v29  ;;  %v8281_v21 = vpop.permute.xlu1 %505 }
 0x13f   : > { %16784 = vst [vmem:[#allocation33_spill] sm:$0xff] %v8281_v21 }
 0x140   : > { %16785 = vst [vmem:[#allocation34_spill] sm:$0xff] %v8283_v22 }
 0x145   : > { %v8285_v54 = vpop.permute.xlu0 %521  ;;  %v8289_v42 = vpop.permute.xlu2 %670 }
 0x146   : > { %16786 = vst [vmem:[#allocation35_spill] sm:$0xff] %v8285_v54  ;;  %v8287_v2 = vpop.permute.xlu1 %511 }
 0x147   : > { %16787 = vst [vmem:[#allocation36_spill] sm:$0xff] %v8287_v2 }
 0x148   : > { %16788 = vst [vmem:[#allocation37_spill] sm:$0xff] %v8289_v42 }
 0x14d   : > { %v8291_v4 = vpop.permute.xlu0 %527  ;;  %v8295_v11 = vpop.permute.xlu2 %688 }
 0x14e   : > { %16789 = vst [vmem:[#allocation38_spill] sm:$0xff] %v8291_v4  ;;  %v8293_v40 = vpop.permute.xlu1 %529 }
 0x14f   : > { %16790 = vst [vmem:[#allocation39_spill] sm:$0xff] %v8293_v40 }
 0x150   : > { %16791 = vst [vmem:[#allocation40_spill] sm:$0xff] %v8295_v11  ;;  %v8355_v11 = vld [vmem:[%s7946_s14 + $0x1f0] sm:$0xff] }
 0x151   : > { %16805 = vst [vmem:[#allocation54_spill] sm:$0xff] %v8355_v11 }
 0x155   : > { %v8297_v36 = vpop.permute.xlu0 %672  ;;  %v8301_v21 = vpop.permute.xlu2 %694 }
 0x156   : > { %16792 = vst [vmem:[#allocation41_spill] sm:$0xff] %v8297_v36  ;;  %v8299_v29 = vpop.permute.xlu1 %662 }
 0x157   : > { %16793 = vst [vmem:[#allocation42_spill] sm:$0xff] %v8299_v29 }
 0x158   : > { %16794 = vst [vmem:[#allocation43_spill] sm:$0xff] %v8301_v21 }
 0x15d   : > { %v8303_v22 = vpop.permute.xlu0 %678  ;;  %v8311_v40 = vpop.permute.xlu2 %700 }
 0x15e   : > { %16795 = vst [vmem:[#allocation44_spill] sm:$0xff] %v8303_v22  ;;  %v8305_v45 = vpop.permute.xlu1 %680 }
 0x15f   : > { %16796 = vst [vmem:[#allocation45_spill] sm:$0xff] %v8305_v45 }
 0x160   : > { %16799 = vst [vmem:[#allocation48_spill] sm:$0xff] %v8311_v40  ;;  %v8332_v40 = vld [vmem:[%s7946_s14 + $0x1d8] sm:$0xff] }
 0x165   : > { %v8307_v2 = vpop.permute.xlu0 %696  ;;  %v8317_v29 = vpop.permute.xlu2 %706 }
 0x166   : > { %16797 = vst [vmem:[#allocation46_spill] sm:$0xff] %v8307_v2  ;;  %v8309_v42 = vpop.permute.xlu1 %686  ;;  %v8340_v2 = vld [vmem:[%s7946_s14 + $0x1d0] sm:$0xff] }
 0x167   : > { %16798 = vst [vmem:[#allocation47_spill] sm:$0xff] %v8309_v42 }
 0x168   : > { %16802 = vst [vmem:[#allocation51_spill] sm:$0xff] %v8317_v29 }
 0x16d   : > { %v8313_v4 = vpop.permute.xlu0 %702  ;;  %v8329_v42 = vpop.permute.xlu2 %778 }
 0x16e   : > { %16800 = vst [vmem:[#allocation49_spill] sm:$0xff] %v8313_v4  ;;  %v8315_v36 = vpop.permute.xlu1 %698  ;;  %v789_v29 = vmul.f32 %v8332_v40, %v8329_v42  ;;  %v8337_v4 = vld [vmem:[%s7946_s14 + $0x1c8] sm:$0xff] }
 0x16f   : > { %16801 = vst [vmem:[#allocation50_spill] sm:$0xff] %v8315_v36 }
 0x170   : > { %16804 = vst [vmem:[#allocation53_spill] sm:$0xff] %v8337_v4 }
 0x175   : > { %v8322_v21 = vpop.permute.xlu0 %774 }
 0x176   : > { %v8324_v22 = vpop.permute.xlu1 %704  ;;  %v786_v45 = vmul.f32 %v8320_v56, %v8322_v21 }
 0x177   : > { %16803 = vst [vmem:[#allocation52_spill] sm:$0xff] %v8324_v22 }
 0x178   : > { %834 = vrot.lane.b32.xlu0 %v786_v45, %s7848_s15 }
 0x17e   : > { %v777_v36 = vpop.permute.xlu1 %776 }
 0x17f   : > { %v780_v22 = vsel %vm430_vm0, %v8322_v21, %v777_v36  ;;  %v8346_v45 = vsel %vm430_vm0, %v777_v36, %v8329_v42  ;;  %v8360_v36 = vld [vmem:[%s7946_s14 + $0x1e0] sm:$0xff] }
 0x180   : > { %840 = vrot.lane.b32.xlu0 %v789_v29, %s7848_s15  ;;  %v788_v53 = vmul.f32 %v8340_v2, %v8346_v45  ;;  %v787_v54 = vmul.f32 %v8337_v4, %v780_v22  ;;  %v792_v39 = vmul.f32 %v8355_v11, %v8346_v45  ;;  %16806 = vst [vmem:[#allocation55_spill] sm:$0xff] %v8360_v36  ;;  %v8379_v4 = vld [vmem:[%s7946_s14 + $0x200] sm:$0xff] }
 0x181   : > { %v791_v29 = vmul.f32 %v8363_v3, %v780_v22  ;;  %16810 = vst [vmem:[#allocation59_spill] sm:$0xff] %v8379_v4  ;;  %v8432_v3 = vld [vmem:[%s7946_s14 + $0x248] sm:$0xff] }
 0x182   : > { %838 = vrot.lane.b32.xlu2 %v788_v53, %s7848_s15  ;;  %836 = vrot.lane.b32.xlu1 %v787_v54, %s7848_s15  ;;  %v790_v53 = vmul.f32 %v8360_v36, %v8322_v21  ;;  %v8372_v54 = vld [vmem:[%s7946_s14 + $0x208] sm:$0xff] }
 0x183   : > { %16808 = vst [vmem:[#allocation57_spill] sm:$0xff] %v8372_v54  ;;  %v795_v11 = vmul.f32 %v8372_v54, %v780_v22  ;;  %v8392_v54 = vld [vmem:[%s7946_s14 + $0x218] sm:$0xff] }
 0x184   : > { %16812 = vst [vmem:[#allocation61_spill] sm:$0xff] %v8392_v54 }
 0x188   : > { %846 = vrot.lane.b32.xlu0 %v792_v39, %s7848_s15  ;;  %v794_v39 = vmul.f32 %v8379_v4, %v8322_v21  ;;  %v8412_v4 = vld [vmem:[%s7946_s14 + $0x230] sm:$0xff] }
 0x189   : > { %16815 = vst [vmem:[#allocation64_spill] sm:$0xff] %v8412_v4 }
 0x18a   : > { %844 = vrot.lane.b32.xlu2 %v791_v29, %s7848_s15  ;;  %842 = vrot.lane.b32.xlu1 %v790_v53, %s7848_s15  ;;  %v793_v29 = vmul.f32 %v8375_v27, %v8329_v42  ;;  %v8389_v53 = vld [vmem:[%s7946_s14 + $0x220] sm:$0xff]  ;;  %v797_v27 = vmul.f32 %v8392_v54, %v8329_v42 }
 0x18b   : > { %16811 = vst [vmem:[#allocation60_spill] sm:$0xff] %v8389_v53  ;;  %v798_v36 = vmul.f32 %v8389_v53, %v8322_v21  ;;  %v8429_v54 = vld [vmem:[%s7946_s14 + $0x240] sm:$0xff] }
 0x18c   : > { %16818 = vst [vmem:[#allocation67_spill] sm:$0xff] %v8429_v54 }
 0x190   : > { %852 = vrot.lane.b32.xlu0 %v795_v11, %s7848_s15  ;;  %v8397_v11 = vld [vmem:[%s7946_s14 + $0x210] sm:$0xff] }
 0x191   : > { %16813 = vst [vmem:[#allocation62_spill] sm:$0xff] %v8397_v11 }
 0x192   : > { %850 = vrot.lane.b32.xlu2 %v794_v39, %s7848_s15  ;;  %848 = vrot.lane.b32.xlu1 %v793_v29, %s7848_s15  ;;  %v796_v39 = vmul.f32 %v8397_v11, %v8346_v45  ;;  %v8407_v29 = vld [vmem:[%s7946_s14 + $0x238] sm:$0xff]  ;;  %v800_v11 = vmul.f32 %v8412_v4, %v8346_v45  ;;  %v8448_v4 = vld [vmem:[%s7946_s14 + $0x260] sm:$0xff] }
 0x193   : > { %16814 = vst [vmem:[#allocation63_spill] sm:$0xff] %v8407_v29  ;;  %v801_v53 = vmul.f32 %v8407_v29, %v8329_v42 }
 0x194   : > { %16821 = vst [vmem:[#allocation70_spill] sm:$0xff] %v8448_v4 }
 0x198   : > { %858 = vrot.lane.b32.xlu0 %v798_v36, %s7848_s15  ;;  %v8415_v36 = vld [vmem:[%s7946_s14 + $0x228] sm:$0xff] }
 0x199   : > { %16816 = vst [vmem:[#allocation65_spill] sm:$0xff] %v8415_v36 }
 0x19a   : > { %856 = vrot.lane.b32.xlu2 %v797_v27, %s7848_s15  ;;  %854 = vrot.lane.b32.xlu1 %v796_v39, %s7848_s15  ;;  %v799_v27 = vmul.f32 %v8415_v36, %v780_v22  ;;  %v8424_v39 = vld [vmem:[%s7946_s14 + $0x250] sm:$0xff] }
 0x19b   : > { %16817 = vst [vmem:[#allocation66_spill] sm:$0xff] %v8424_v39  ;;  %v804_v29 = vmul.f32 %v8424_v39, %v8346_v45  ;;  %v8444_v39 = vld [vmem:[%s7946_s14 + $0x258] sm:$0xff] }
 0x19c   : > { %16820 = vst [vmem:[#allocation69_spill] sm:$0xff] %v8444_v39 }
 0x1a0   : > { %864 = vrot.lane.b32.xlu0 %v801_v53, %s7848_s15  ;;  %v803_v53 = vmul.f32 %v8432_v3, %v780_v22 }
 0x1a2   : > { %862 = vrot.lane.b32.xlu2 %v800_v11, %s7848_s15  ;;  %860 = vrot.lane.b32.xlu1 %v799_v27, %s7848_s15  ;;  %v802_v11 = vmul.f32 %v8429_v54, %v8322_v21  ;;  %v8441_v27 = vld [vmem:[%s7946_s14 + $0x268] sm:$0xff]  ;;  %v805_v54 = vmul.f32 %v8444_v39, %v8329_v42 }
 0x1a3   : > { %16819 = vst [vmem:[#allocation68_spill] sm:$0xff] %v8441_v27  ;;  %v807_v36 = vmul.f32 %v8441_v27, %v780_v22  ;;  %v8461_v22 = vld [vmem:[%s7946_s14 + $0x278] sm:$0xff]  ;;  %v8464_v27 = vld [vmem:[%s7946_s14 + $0x270] sm:$0xff] }
 0x1a4   : > { %16822 = vst [vmem:[#allocation71_spill] sm:$0xff] %v8461_v22 }
 0x1a8   : > { %870 = vrot.lane.b32.xlu0 %v804_v29, %s7848_s15  ;;  %v806_v29 = vmul.f32 %v8448_v4, %v8322_v21  ;;  %v809_v21 = vmul.f32 %v8461_v22, %v8329_v42 }
 0x1aa   : > { %868 = vrot.lane.b32.xlu2 %v803_v53, %s7848_s15  ;;  %866 = vrot.lane.b32.xlu1 %v802_v11, %s7848_s15  ;;  %v6891_v53 = vld [vmem:[%s16313_s1 + $0x6] ss:$8 sm:$0x7] }
 0x1ab   : > { %v939_v11 = vperm.slane %v6891_v53, 0 }
 0x1b0   : > { %876 = vrot.lane.b32.xlu0 %v807_v36, %s7848_s15  ;;  %v808_v36 = vmul.f32 %v8464_v27, %v8346_v45 }
 0x1b2   : > { %874 = vrot.lane.b32.xlu2 %v806_v29, %s7848_s15  ;;  %872 = vrot.lane.b32.xlu1 %v805_v54, %s7848_s15  ;;  %v940_v29 = vperm.slane %v6891_v53, 1  ;;  %v941_v54 = vperm.slane %v6891_v53, 2 }
 0x1b8   : > { %942 = vrot.lane.b32.xlu0 %v939_v11, %s7849_s26 }
 0x1ba   : > { %880 = vrot.lane.b32.xlu2 %v809_v21, %s7848_s15  ;;  %878 = vrot.lane.b32.xlu1 %v808_v36, %s7848_s15 }
 0x1c2   : > { %944 = vrot.lane.b32.xlu1 %v940_v29, %s7849_s26  ;;  %946 = vrot.lane.b32.xlu2 %v941_v54, %s7849_s26 }
 0x1dc   : > { %v8475_v39 = vpop.permute.xlu2 %838 }
 0x1dd   : > { %16823 = vst [vmem:[#allocation72_spill] sm:$0xff] %v8475_v39 }
 0x1e4   : > { %v8477_v4 = vpop.permute.xlu2 %844 }
 0x1e5   : > { %16824 = vst [vmem:[#allocation73_spill] sm:$0xff] %v8477_v4 }
 0x1ea   : > { %v8479_v11 = vpop.permute.xlu0 %834 }
 0x1eb   : > { %16825 = vst [vmem:[#allocation74_spill] sm:$0xff] %v8479_v11 }
 0x1ec   : > { %v8483_v22 = vpop.permute.xlu2 %850 }
 0x1ed   : > { %16827 = vst [vmem:[#allocation76_spill] sm:$0xff] %v8483_v22 }
 0x1f2   : > { %v8481_v42 = vpop.permute.xlu0 %840 }
 0x1f3   : > { %16826 = vst [vmem:[#allocation75_spill] sm:$0xff] %v8481_v42 }
 0x1f4   : > { %v8485_v45 = vpop.permute.xlu1 %836  ;;  %v8491_v53 = vpop.permute.xlu2 %856 }
 0x1f5   : > { %16828 = vst [vmem:[#allocation77_spill] sm:$0xff] %v8485_v45 }
 0x1f6   : > { %16831 = vst [vmem:[#allocation80_spill] sm:$0xff] %v8491_v53 }
 0x1fa   : > { %v8487_v21 = vpop.permute.xlu0 %846 }
 0x1fb   : > { %16829 = vst [vmem:[#allocation78_spill] sm:$0xff] %v8487_v21 }
 0x1fc   : > { %v8489_v36 = vpop.permute.xlu1 %842  ;;  %v8497_v39 = vpop.permute.xlu2 %862 }
 0x1fd   : > { %16830 = vst [vmem:[#allocation79_spill] sm:$0xff] %v8489_v36 }
 0x1fe   : > { %16834 = vst [vmem:[#allocation83_spill] sm:$0xff] %v8497_v39 }
 0x202   : > { %v8493_v29 = vpop.permute.xlu0 %852 }
 0x203   : > { %16832 = vst [vmem:[#allocation81_spill] sm:$0xff] %v8493_v29 }
 0x204   : > { %v8495_v54 = vpop.permute.xlu1 %848  ;;  %v8503_v42 = vpop.permute.xlu2 %868 }
 0x205   : > { %16833 = vst [vmem:[#allocation82_spill] sm:$0xff] %v8495_v54 }
 0x206   : > { %16837 = vst [vmem:[#allocation86_spill] sm:$0xff] %v8503_v42 }
 0x20a   : > { %v8499_v4 = vpop.permute.xlu0 %858 }
 0x20b   : > { %16835 = vst [vmem:[#allocation84_spill] sm:$0xff] %v8499_v4 }
 0x20c   : > { %v8501_v11 = vpop.permute.xlu1 %854  ;;  %v8511_v36 = vpop.permute.xlu2 %874 }
 0x20d   : > { %16836 = vst [vmem:[#allocation85_spill] sm:$0xff] %v8501_v11 }
 0x20e   : > { %16840 = vst [vmem:[#allocation89_spill] sm:$0xff] %v8511_v36 }
 0x212   : > { %v8505_v22 = vpop.permute.xlu0 %864 }
 0x214   : > { %v8507_v45 = vpop.permute.xlu1 %860  ;;  %v8519_v39 = vpop.permute.xlu2 %880 }
 0x215   : > { %16838 = vst [vmem:[#allocation87_spill] sm:$0xff] %v8507_v45 }
 0x216   : > { %16843 = vst [vmem:[#allocation92_spill] sm:$0xff] %v8519_v39 }
 0x21a   : > { %v8509_v21 = vpop.permute.xlu0 %870 }
 0x21b   : > { %16839 = vst [vmem:[#allocation88_spill] sm:$0xff] %v8509_v21 }
 0x21c   : > { %v8513_v53 = vpop.permute.xlu1 %866  ;;  %v947_v45 = vpop.permute.xlu2 %946 }
 0x21d   : > { %16841 = vst [vmem:[#allocation90_spill] sm:$0xff] %v8513_v53  ;;  %v958_v21 = vmul.f32 %v947_v45, %v7949_v8 }
 0x222   : > { %v8515_v29 = vpop.permute.xlu0 %876 }
 0x223   : > { %16842 = vst [vmem:[#allocation91_spill] sm:$0xff] %v8515_v29 }
 0x224   : > { %v8517_v54 = vpop.permute.xlu1 %872 }
 0x22a   : > { %v943_v4 = vpop.permute.xlu0 %942 }
 0x22b   : > { %v955_v11 = vmul.f32 %v943_v4, %v7955_v10 }
 0x22c   : > { %v8522_v42 = vpop.permute.xlu1 %878 }
 0x22d   : > { %16844 = vst [vmem:[#allocation93_spill] sm:$0xff] %v8522_v42  ;;  %1003 = vrot.lane.b32.xlu0 %v955_v11, %s7850_s30  ;;  %v959_v42 = vmul.f32 %v943_v4, %v7975_v19  ;;  %v966_v19 = vmul.f32 %v947_v45, %v7967_v16 }
 0x234   : > { %v945_v36 = vpop.permute.xlu1 %944 }
 0x235   : > { %v949_v53 = vsel %vm948_vm1, %v943_v4, %v945_v36  ;;  %v950_v29 = vsel %vm948_vm1, %v945_v36, %v947_v45  ;;  %1009 = vrot.lane.b32.xlu0 %v958_v21, %s7850_s30  ;;  %v6892_v21 = vld [vmem:[%s16313_s1 + $0x7] ss:$8 sm:$0x7]  ;;  %v978_v36 = vmul.f32 %v947_v45, %v8005_v31 }
 0x236   : > { %v957_v39 = vmul.f32 %v950_v29, %v8080_v58  ;;  %v956_v10 = vmul.f32 %v949_v53, %v8061_v51  ;;  %v961_v11 = vmul.f32 %v950_v29, %v8077_v57  ;;  %v960_v8 = vmul.f32 %v949_v53, %v8096_v0 }
 0x237   : > { %v964_v58 = vmul.f32 %v949_v53, %v8093_v63  ;;  %v963_v51 = vmul.f32 %v943_v4, %v7952_v9  ;;  %v967_v57 = vmul.f32 %v943_v4, %v7970_v17  ;;  %v965_v0 = vmul.f32 %v950_v29, %v8099_v1 }
 0x238   : > { %1007 = vrot.lane.b32.xlu2 %v957_v39, %s7850_s30  ;;  %1005 = vrot.lane.b32.xlu1 %v956_v10, %s7850_s30  ;;  %v962_v39 = vmul.f32 %v947_v45, %v7989_v25  ;;  %v970_v9 = vmul.f32 %v947_v45, %v7983_v23  ;;  %v969_v25 = vmul.f32 %v950_v29, %v8111_v6 }
 0x239   : > { %v968_v63 = vmul.f32 %v949_v53, %v8114_v7  ;;  %v973_v16 = vmul.f32 %v950_v29, %v8108_v5  ;;  %v972_v17 = vmul.f32 %v949_v53, %v8126_v15  ;;  %v971_v1 = vmul.f32 %v943_v4, %v8010_v33 }
 0x23a   : > { %v976_v23 = vmul.f32 %v949_v53, %v8123_v14  ;;  %v975_v7 = vmul.f32 %v943_v4, %v7986_v24  ;;  %v1109_v33 = vperm.slane %v6892_v21, 0  ;;  %v977_v53 = vmul.f32 %v950_v29, %v8129_v18 }
 0x23b   : > { %v1110_v24 = vperm.slane %v6892_v21, 1 }
 0x23d   : > { %1015 = vrot.lane.b32.xlu0 %v961_v11, %s7850_s30 }
 0x240   : > { %1013 = vrot.lane.b32.xlu2 %v960_v8, %s7850_s30  ;;  %1011 = vrot.lane.b32.xlu1 %v959_v42, %s7850_s30  ;;  %v974_v42 = vmul.f32 %v947_v45, %v8031_v41  ;;  %v1111_v41 = vperm.slane %v6892_v21, 2 }
 0x245   : > { %1021 = vrot.lane.b32.xlu0 %v964_v58, %s7850_s30 }
 0x248   : > { %1019 = vrot.lane.b32.xlu2 %v963_v51, %s7850_s30  ;;  %1017 = vrot.lane.b32.xlu1 %v962_v39, %s7850_s30 }
 0x24d   : > { %1027 = vrot.lane.b32.xlu0 %v967_v57, %s7850_s30 }
 0x250   : > { %1025 = vrot.lane.b32.xlu2 %v966_v19, %s7850_s30  ;;  %1023 = vrot.lane.b32.xlu1 %v965_v0, %s7850_s30 }
 0x255   : > { %1033 = vrot.lane.b32.xlu0 %v970_v9, %s7850_s30 }
 0x258   : > { %1031 = vrot.lane.b32.xlu2 %v969_v25, %s7850_s30  ;;  %1029 = vrot.lane.b32.xlu1 %v968_v63, %s7850_s30 }
 0x25d   : > { %1039 = vrot.lane.b32.xlu0 %v973_v16, %s7850_s30 }
 0x260   : > { %1037 = vrot.lane.b32.xlu2 %v972_v17, %s7850_s30  ;;  %1035 = vrot.lane.b32.xlu1 %v971_v1, %s7850_s30 }
 0x265   : > { %1045 = vrot.lane.b32.xlu0 %v976_v23, %s7850_s30 }
 0x268   : > { %1043 = vrot.lane.b32.xlu2 %v975_v7, %s7850_s30  ;;  %1041 = vrot.lane.b32.xlu1 %v974_v42, %s7850_s30 }
 0x26d   : > { %1112 = vrot.lane.b32.xlu0 %v1109_v33, %s7849_s26 }
 0x270   : > { %1049 = vrot.lane.b32.xlu2 %v978_v36, %s7850_s30  ;;  %1047 = vrot.lane.b32.xlu1 %v977_v53, %s7850_s30 }
 0x278   : > { %1114 = vrot.lane.b32.xlu1 %v1110_v24, %s7849_s26  ;;  %1116 = vrot.lane.b32.xlu2 %v1111_v41, %s7849_s26 }
 0x292   : > { %v8579_v4 = vpop.permute.xlu2 %1007 }
 0x293   : > { %16845 = vst [vmem:[#allocation94_spill] sm:$0xff] %v8579_v4 }
 0x29a   : > { %v8581_v10 = vpop.permute.xlu2 %1013 }
 0x29b   : > { %16846 = vst [vmem:[#allocation95_spill] sm:$0xff] %v8581_v10 }
 0x29f   : > { %v8583_v11 = vpop.permute.xlu0 %1003 }
 0x2a0   : > { %16847 = vst [vmem:[#allocation96_spill] sm:$0xff] %v8583_v11  ;;  %v8882_v11 = vld [vmem:[%s7946_s14 + $0x80] sm:$0xff] }
 0x2a1   : > { %16927 = vst [vmem:[#allocation138_spill] sm:$0xff] %v8882_v11 }
 0x2a2   : > { %v8587_v31 = vpop.permute.xlu2 %1019 }
 0x2a3   : > { %16849 = vst [vmem:[#allocation98_spill] sm:$0xff] %v8587_v31 }
 0x2a7   : > { %v8585_v8 = vpop.permute.xlu0 %1009 }
 0x2a8   : > { %16848 = vst [vmem:[#allocation97_spill] sm:$0xff] %v8585_v8 }
 0x2aa   : > { %v8589_v18 = vpop.permute.xlu1 %1005  ;;  %v8595_v58 = vpop.permute.xlu2 %1025 }
 0x2ab   : > { %16850 = vst [vmem:[#allocation99_spill] sm:$0xff] %v8589_v18 }
 0x2ac   : > { %16853 = vst [vmem:[#allocation102_spill] sm:$0xff] %v8595_v58 }
 0x2af   : > { %v8591_v45 = vpop.permute.xlu0 %1015 }
 0x2b0   : > { %16851 = vst [vmem:[#allocation100_spill] sm:$0xff] %v8591_v45 }
 0x2b2   : > { %v8593_v29 = vpop.permute.xlu1 %1011  ;;  %v8601_v57 = vpop.permute.xlu2 %1031 }
 0x2b3   : > { %16852 = vst [vmem:[#allocation101_spill] sm:$0xff] %v8593_v29 }
 0x2b4   : > { %16856 = vst [vmem:[#allocation105_spill] sm:$0xff] %v8601_v57 }
 0x2b7   : > { %v8597_v51 = vpop.permute.xlu0 %1021 }
 0x2b8   : > { %16854 = vst [vmem:[#allocation103_spill] sm:$0xff] %v8597_v51  ;;  %v8843_v51 = vld [vmem:[%s16313_s1 + $0x1a] ss:$8 sm:$0x7] }
 0x2ba   : > { %v8599_v39 = vpop.permute.xlu1 %1017  ;;  %v8607_v9 = vpop.permute.xlu2 %1037 }
 0x2bb   : > { %16855 = vst [vmem:[#allocation104_spill] sm:$0xff] %v8599_v39 }
 0x2bf   : > { %v8603_v19 = vpop.permute.xlu0 %1027 }
 0x2c0   : > { %16857 = vst [vmem:[#allocation106_spill] sm:$0xff] %v8603_v19 }
 0x2c2   : > { %v8605_v0 = vpop.permute.xlu1 %1023  ;;  %v8615_v17 = vpop.permute.xlu2 %1043 }
 0x2c3   : > { %16858 = vst [vmem:[#allocation107_spill] sm:$0xff] %v8605_v0 }
 0x2c4   : > { %16860 = vst [vmem:[#allocation109_spill] sm:$0xff] %v8615_v17 }
 0x2c7   : > { %v8609_v25 = vpop.permute.xlu0 %1033 }
 0x2ca   : > { %v8611_v63 = vpop.permute.xlu1 %1029  ;;  %v8623_v42 = vpop.permute.xlu2 %1049 }
 0x2cb   : > { %16859 = vst [vmem:[#allocation108_spill] sm:$0xff] %v8611_v63 }
 0x2cc   : > { %16862 = vst [vmem:[#allocation111_spill] sm:$0xff] %v8623_v42 }
 0x2cf   : > { %v8613_v16 = vpop.permute.xlu0 %1039 }
 0x2d2   : > { %v8617_v1 = vpop.permute.xlu1 %1035  ;;  %v1117_v53 = vpop.permute.xlu2 %1116 }
 0x2d3   : > { %v1127_v24 = vmul.f32 %v8021_v37, %v1117_v53 }
 0x2d7   : > { %v8619_v23 = vpop.permute.xlu0 %1045 }
 0x2da   : > { %v8621_v7 = vpop.permute.xlu1 %1041 }
 0x2db   : > { %16861 = vst [vmem:[#allocation110_spill] sm:$0xff] %v8621_v7 }
 0x2df   : > { %v1113_v21 = vpop.permute.xlu0 %1112 }
 0x2e0   : > { %v1124_v33 = vmul.f32 %v8002_v30, %v1113_v21 }
 0x2e2   : > { %v8626_v36 = vpop.permute.xlu1 %1047  ;;  %1172 = vrot.lane.b32.xlu0 %v1124_v33, %s7850_s30  ;;  %v1128_v33 = vmul.f32 %v8047_v46, %v1113_v21  ;;  %v1135_v46 = vmul.f32 %v8039_v43, %v1117_v53 }
 0x2e3   : > { %16863 = vst [vmem:[#allocation112_spill] sm:$0xff] %v8626_v36 }
 0x2ea   : > { %v1115_v41 = vpop.permute.xlu1 %1114  ;;  %1178 = vrot.lane.b32.xlu0 %v1127_v24, %s7850_s30  ;;  %v1143_v24 = vmul.f32 %v8199_v20, %v1117_v53 }
 0x2eb   : > { %v1118_v19 = vsel %vm948_vm1, %v1113_v21, %v1115_v41  ;;  %v1119_v63 = vsel %vm948_vm1, %v1115_v41, %v1117_v53  ;;  %v1147_v41 = vmul.f32 %v8236_v26, %v1117_v53 }
 0x2ec   : > { %v1126_v31 = vmul.f32 %v8143_v32, %v1119_v63  ;;  %v1125_v8 = vmul.f32 %v8148_v35, %v1118_v19  ;;  %v1130_v30 = vmul.f32 %v8140_v28, %v1119_v63  ;;  %v1129_v37 = vmul.f32 %v8162_v48, %v1118_v19 }
 0x2ed   : > { %v1133_v32 = vmul.f32 %v8159_v47, %v1118_v19  ;;  %v1132_v35 = vmul.f32 %v8024_v38, %v1113_v21  ;;  %v1136_v28 = vmul.f32 %v8042_v44, %v1113_v21  ;;  %v1134_v48 = vmul.f32 %v8165_v49, %v1119_v63 }
 0x2ee   : > { %1176 = vrot.lane.b32.xlu2 %v1126_v31, %s7850_s30  ;;  %1174 = vrot.lane.b32.xlu1 %v1125_v8, %s7850_s30  ;;  %v1131_v8 = vmul.f32 %v8064_v52, %v1117_v53  ;;  %v1139_v38 = vmul.f32 %v8058_v50, %v1117_v53  ;;  %v1138_v52 = vmul.f32 %v8179_v61, %v1119_v63 }
 0x2ef   : > { %v1137_v47 = vmul.f32 %v8182_v62, %v1118_v19  ;;  %v1142_v43 = vmul.f32 %v8176_v60, %v1119_v63  ;;  %v1141_v44 = vmul.f32 %v8196_v13, %v1118_v19  ;;  %v1140_v49 = vmul.f32 %v8083_v59, %v1113_v21  ;;  %v6893_v62 = vld [vmem:[%s16313_s1 + $0x18] ss:$8 sm:$0x7] }
 0x2f0   : > { %v1145_v50 = vmul.f32 %v8193_v12, %v1118_v19  ;;  %v1144_v31 = vmul.f32 %v8218_v34, %v1113_v21  ;;  %v1277_v59 = vperm.slane %v6893_v62, 0  ;;  %v1146_v19 = vmul.f32 %v8221_v55, %v1119_v63 }
 0x2f2   : > { %1184 = vrot.lane.b32.xlu0 %v1130_v30, %s7850_s30  ;;  %v1278_v30 = vperm.slane %v6893_v62, 1 }
 0x2f6   : > { %1182 = vrot.lane.b32.xlu2 %v1129_v37, %s7850_s30  ;;  %1180 = vrot.lane.b32.xlu1 %v1128_v33, %s7850_s30  ;;  %v1279_v37 = vperm.slane %v6893_v62, 2 }
 0x2fa   : > { %1190 = vrot.lane.b32.xlu0 %v1133_v32, %s7850_s30 }
 0x2fe   : > { %1188 = vrot.lane.b32.xlu2 %v1132_v35, %s7850_s30  ;;  %1186 = vrot.lane.b32.xlu1 %v1131_v8, %s7850_s30 }
 0x302   : > { %1196 = vrot.lane.b32.xlu0 %v1136_v28, %s7850_s30 }
 0x306   : > { %1194 = vrot.lane.b32.xlu2 %v1135_v46, %s7850_s30  ;;  %1192 = vrot.lane.b32.xlu1 %v1134_v48, %s7850_s30 }
 0x30a   : > { %1202 = vrot.lane.b32.xlu0 %v1139_v38, %s7850_s30 }
 0x30e   : > { %1200 = vrot.lane.b32.xlu2 %v1138_v52, %s7850_s30  ;;  %1198 = vrot.lane.b32.xlu1 %v1137_v47, %s7850_s30 }
 0x312   : > { %1208 = vrot.lane.b32.xlu0 %v1142_v43, %s7850_s30 }
 0x316   : > { %1206 = vrot.lane.b32.xlu2 %v1141_v44, %s7850_s30  ;;  %1204 = vrot.lane.b32.xlu1 %v1140_v49, %s7850_s30 }
 0x31a   : > { %1214 = vrot.lane.b32.xlu0 %v1145_v50, %s7850_s30 }
 0x31e   : > { %1212 = vrot.lane.b32.xlu2 %v1144_v31, %s7850_s30  ;;  %1210 = vrot.lane.b32.xlu1 %v1143_v24, %s7850_s30 }
 0x322   : > { %1280 = vrot.lane.b32.xlu0 %v1277_v59, %s7849_s26 }
 0x326   : > { %1218 = vrot.lane.b32.xlu2 %v1147_v41, %s7850_s30  ;;  %1216 = vrot.lane.b32.xlu1 %v1146_v19, %s7850_s30 }
 0x32e   : > { %1282 = vrot.lane.b32.xlu1 %v1278_v30, %s7849_s26  ;;  %1284 = vrot.lane.b32.xlu2 %v1279_v37, %s7849_s26 }
 0x348   : > { %v8683_v20 = vpop.permute.xlu2 %1176 }
 0x349   : > { %16864 = vst [vmem:[#allocation113_spill] sm:$0xff] %v8683_v20 }
 0x350   : > { %v8685_v21 = vpop.permute.xlu2 %1182 }
 0x351   : > { %16865 = vst [vmem:[#allocation114_spill] sm:$0xff] %v8685_v21  ;;  %v16890_v21 = vld [vmem:[#allocation58_spill] sm:$0xff] }
 0x354   : > { %v8687_v33 = vpop.permute.xlu0 %1172 }
 0x355   : > { %16866 = vst [vmem:[#allocation115_spill] sm:$0xff] %v8687_v33 }
 0x358   : > { %v8691_v26 = vpop.permute.xlu2 %1188 }
 0x359   : > { %16868 = vst [vmem:[#allocation117_spill] sm:$0xff] %v8691_v26 }
 0x35c   : > { %v8689_v32 = vpop.permute.xlu0 %1178 }
 0x35d   : > { %16867 = vst [vmem:[#allocation116_spill] sm:$0xff] %v8689_v32 }
 0x360   : > { %v8693_v63 = vpop.permute.xlu1 %1174  ;;  %v8697_v35 = vpop.permute.xlu2 %1194 }
 0x361   : > { %16869 = vst [vmem:[#allocation118_spill] sm:$0xff] %v8693_v63 }
 0x362   : > { %16871 = vst [vmem:[#allocation120_spill] sm:$0xff] %v8697_v35 }
 0x364   : > { %v8695_v53 = vpop.permute.xlu0 %1184 }
 0x365   : > { %16870 = vst [vmem:[#allocation119_spill] sm:$0xff] %v8695_v53 }
 0x368   : > { %v8699_v8 = vpop.permute.xlu1 %1180  ;;  %v8705_v48 = vpop.permute.xlu2 %1200 }
 0x369   : > { %16872 = vst [vmem:[#allocation121_spill] sm:$0xff] %v8699_v8 }
 0x36a   : > { %16875 = vst [vmem:[#allocation124_spill] sm:$0xff] %v8705_v48 }
 0x36c   : > { %v8701_v28 = vpop.permute.xlu0 %1190 }
 0x36d   : > { %16873 = vst [vmem:[#allocation122_spill] sm:$0xff] %v8701_v28  ;;  %v16884_v28 = vld [vmem:[#allocation53_spill] sm:$0xff] }
 0x370   : > { %v8703_v46 = vpop.permute.xlu1 %1186  ;;  %v8711_v47 = vpop.permute.xlu2 %1206 }
 0x371   : > { %16874 = vst [vmem:[#allocation123_spill] sm:$0xff] %v8703_v46 }
 0x374   : > { %v8707_v38 = vpop.permute.xlu0 %1196 }
 0x375   : > { %16876 = vst [vmem:[#allocation125_spill] sm:$0xff] %v8707_v38 }
 0x378   : > { %v8709_v52 = vpop.permute.xlu1 %1192  ;;  %v8719_v50 = vpop.permute.xlu2 %1212 }
 0x379   : > { %16877 = vst [vmem:[#allocation126_spill] sm:$0xff] %v8709_v52 }
 0x37a   : > { %16879 = vst [vmem:[#allocation128_spill] sm:$0xff] %v8719_v50 }
 0x37c   : > { %v8713_v43 = vpop.permute.xlu0 %1202 }
 0x380   : > { %v8715_v44 = vpop.permute.xlu1 %1198  ;;  %v8725_v24 = vpop.permute.xlu2 %1218 }
 0x381   : > { %16878 = vst [vmem:[#allocation127_spill] sm:$0xff] %v8715_v44 }
 0x382   : > { %16881 = vst [vmem:[#allocation130_spill] sm:$0xff] %v8725_v24  ;;  %v8895_v24 = vld [vmem:[%s7946_s14 + $0x160] sm:$0xff] }
 0x383   : > { %16929 = vst [vmem:[#allocation140_spill] sm:$0xff] %v8895_v24 }
 0x384   : > { %v8717_v49 = vpop.permute.xlu0 %1208 }
 0x388   : > { %v8721_v62 = vpop.permute.xlu1 %1204  ;;  %v1285_v37 = vpop.permute.xlu2 %1284 }
 0x389   : > { %v1295_v38 = vmul.f32 %v8332_v40, %v1285_v37  ;;  %v16886_v40 = vld [vmem:[#allocation56_spill] sm:$0xff] }
 0x38c   : > { %v8723_v31 = vpop.permute.xlu0 %1214 }
 0x38d   : > { %16880 = vst [vmem:[#allocation129_spill] sm:$0xff] %v8723_v31 }
 0x390   : > { %v8727_v59 = vpop.permute.xlu1 %1210 }
 0x391   : > { %16882 = vst [vmem:[#allocation131_spill] sm:$0xff] %v8727_v59 }
 0x394   : > { %v1281_v41 = vpop.permute.xlu0 %1280 }
 0x395   : > { %v1292_v19 = vmul.f32 %v8320_v56, %v1281_v41  ;;  %v16885_v56 = vld [vmem:[#allocation54_spill] sm:$0xff] }
 0x397   : > { %1340 = vrot.lane.b32.xlu0 %v1292_v19, %s7850_s30 }
 0x398   : > { %v8731_v30 = vpop.permute.xlu1 %1216 }
 0x399   : > { %16883 = vst [vmem:[#allocation132_spill] sm:$0xff] %v8731_v30 }
 0x39f   : > { %1346 = vrot.lane.b32.xlu0 %v1295_v38, %s7850_s30  ;;  %v16887_v38 = vld [vmem:[#allocation55_spill] sm:$0xff] }
 0x3a0   : > { %v1283_v44 = vpop.permute.xlu1 %1282  ;;  %v1296_v8 = vmul.f32 %v16887_v38, %v1281_v41  ;;  %v16893_v38 = vld [vmem:[#allocation62_spill] sm:$0xff] }
 0x3a1   : > { %v1286_v26 = vsel %vm948_vm1, %v1281_v41, %v1283_v44  ;;  %v1287_v32 = vsel %vm948_vm1, %v1283_v44, %v1285_v37  ;;  %v16888_v44 = vld [vmem:[#allocation57_spill] sm:$0xff] }
 0x3a2   : > { %v1294_v35 = vmul.f32 %v8340_v2, %v1287_v32  ;;  %v1293_v52 = vmul.f32 %v16884_v28, %v1286_v26  ;;  %v1298_v19 = vmul.f32 %v16885_v56, %v1287_v32  ;;  %v1297_v46 = vmul.f32 %v16886_v40, %v1286_v26  ;;  %v16889_v28 = vld [vmem:[#allocation59_spill] sm:$0xff]  ;;  %v16891_v56 = vld [vmem:[#allocation60_spill] sm:$0xff]  ;;  %v16892_v40 = vld [vmem:[#allocation61_spill] sm:$0xff] }
 0x3a3   : > { %v1301_v2 = vmul.f32 %v16888_v44, %v1286_v26  ;;  %v16894_v44 = vld [vmem:[#allocation63_spill] sm:$0xff] }
 0x3a4   : > { %1344 = vrot.lane.b32.xlu2 %v1294_v35, %s7850_s30  ;;  %1342 = vrot.lane.b32.xlu1 %v1293_v52, %s7850_s30  ;;  %v1300_v35 = vmul.f32 %v16889_v28, %v1281_v41  ;;  %v1299_v52 = vmul.f32 %v16890_v21, %v1285_v37  ;;  %v16895_v21 = vld [vmem:[#allocation64_spill] sm:$0xff] }
 0x3a5   : > { %v1306_v28 = vmul.f32 %v16895_v21, %v1287_v32 }
 0x3a7   : > { %1352 = vrot.lane.b32.xlu0 %v1298_v19, %s7850_s30  ;;  %v1304_v19 = vmul.f32 %v16891_v56, %v1281_v41  ;;  %v16897_v56 = vld [vmem:[#allocation66_spill] sm:$0xff] }
 0x3ac   : > { %1350 = vrot.lane.b32.xlu2 %v1297_v46, %s7850_s30  ;;  %1348 = vrot.lane.b32.xlu1 %v1296_v8, %s7850_s30  ;;  %v1303_v46 = vmul.f32 %v16892_v40, %v1285_v37  ;;  %v1302_v8 = vmul.f32 %v16893_v38, %v1287_v32  ;;  %v1309_v40 = vmul.f32 %v8432_v3, %v1286_v26 }
 0x3af   : > { %1358 = vrot.lane.b32.xlu0 %v1301_v2, %s7850_s30  ;;  %v1307_v2 = vmul.f32 %v16894_v44, %v1285_v37 }
 0x3b4   : > { %1356 = vrot.lane.b32.xlu2 %v1300_v35, %s7850_s30  ;;  %1354 = vrot.lane.b32.xlu1 %v1299_v52, %s7850_s30  ;;  %v16896_v35 = vld [vmem:[#allocation65_spill] sm:$0xff] }
 0x3b5   : > { %v1305_v52 = vmul.f32 %v16896_v35, %v1286_v26 }
 0x3b7   : > { %1364 = vrot.lane.b32.xlu0 %v1304_v19, %s7850_s30  ;;  %v1310_v19 = vmul.f32 %v16897_v56, %v1287_v32 }
 0x3bc   : > { %1362 = vrot.lane.b32.xlu2 %v1303_v46, %s7850_s30  ;;  %1360 = vrot.lane.b32.xlu1 %v1302_v8, %s7850_s30  ;;  %v16898_v46 = vld [vmem:[#allocation67_spill] sm:$0xff]  ;;  %v16899_v8 = vld [vmem:[#allocation68_spill] sm:$0xff] }
 0x3bd   : > { %v1308_v38 = vmul.f32 %v16898_v46, %v1281_v41  ;;  %v1313_v44 = vmul.f32 %v16899_v8, %v1286_v26  ;;  %v1314_v26 = vmul.f32 %v8464_v27, %v1287_v32  ;;  %v6894_v32 = vld [vmem:[%s16313_s1 + $0x19] ss:$8 sm:$0x7] }
 0x3be   : > { %v8838_v58 = vperm.slane %v6894_v32, 1  ;;  %v8859_v29 = vperm.slane %v6894_v32, 0 }
 0x3bf   : > { %1370 = vrot.lane.b32.xlu0 %v1307_v2, %s7850_s30  ;;  %v6909_v2 = vld [vmem:[%s16313_s1 + $0x1c] ss:$8 sm:$0x7] }
 0x3c0   : > { %v1844_v53 = vperm.slane %v6909_v2, 0  ;;  %v1846_v20 = vperm.slane %v6909_v2, 2  ;;  %16914 = vst [vmem:[#allocation64_spill] sm:$0xff] %v8838_v58  ;;  %v8865_v45 = vmul.f32 %v8838_v58, %v8126_v15  ;;  %v8890_v18 = vmul.f32 %v8838_v58, %v8123_v14  ;;  %v8908_v58 = vld [vmem:[%s7946_s14 + $0xa0] sm:$0xff] }
 0x3c1   : > { %16922 = vst [vmem:[#allocation133_spill] sm:$0xff] %v8859_v29 }
 0x3c2   : > { %16924 = vst [vmem:[#allocation135_spill] sm:$0xff] %v8865_v45  ;;  %v16935_v50 = vrot.slane %v8890_v18, 1  ;;  %v16936_v31 = vrot.slane %v8865_v45, 1 }
 0x3c3   : > { %16931 = vst [vmem:[#allocation142_spill] sm:$0xff] %v8908_v58 }
 0x3c4   : > { %1368 = vrot.lane.b32.xlu2 %v1306_v28, %s7850_s30  ;;  %1366 = vrot.lane.b32.xlu1 %v1305_v52, %s7850_s30  ;;  %v16900_v28 = vld [vmem:[#allocation70_spill] sm:$0xff]  ;;  %v16901_v52 = vld [vmem:[#allocation69_spill] sm:$0xff]  ;;  %v8932_v7 = vsel %vm1499_vm2, %v16936_v31, %v16935_v50 }
 0x3c5   : > { %v1312_v35 = vmul.f32 %v16900_v28, %v1281_v41 }
 0x3c7   : > { %1376 = vrot.lane.b32.xlu0 %v1310_v19, %s7850_s30  ;;  %v1311_v19 = vmul.f32 %v16901_v52, %v1285_v37 }
 0x3cc   : > { %1374 = vrot.lane.b32.xlu2 %v1309_v40, %s7850_s30  ;;  %1372 = vrot.lane.b32.xlu1 %v1308_v38, %s7850_s30  ;;  %v16902_v40 = vld [vmem:[#allocation71_spill] sm:$0xff] }
 0x3cd   : > { %v1315_v38 = vmul.f32 %v16902_v40, %v1285_v37  ;;  %v240_v40 = vld [vmem:[%s16313_s1] ss:$8 sm:$0x7] }
 0x3cf   : > { %1382 = vrot.lane.b32.xlu0 %v1313_v44, %s7850_s30  ;;  %v1845_v44 = vperm.slane %v6909_v2, 1 }
 0x3d4   : > { %1380 = vrot.lane.b32.xlu2 %v1312_v35, %s7850_s30  ;;  %1378 = vrot.lane.b32.xlu1 %v1311_v19, %s7850_s30 }
 0x3d7   : > { %1847 = vrot.lane.b32.xlu0 %v1844_v53, %s7847_s9  ;;  %v8796_v53 = vperm.slane %v6894_v32, 2  ;;  %v6908_v32 = vld [vmem:[%s16313_s1 + $0x1b] ss:$8 sm:$0x7] }
 0x3d8   : > { %v8914_v42 = vperm.slane %v6908_v32, 2 }
 0x3d9   : > { %16906 = vst [vmem:[#allocation55_spill] sm:$0xff] %v8796_v53  ;;  %v8802_v2 = vmul.f32 %v8796_v53, %v8111_v6 }
 0x3da   : > { %16932 = vst [vmem:[#allocation143_spill] sm:$0xff] %v8914_v42 }
 0x3db   : > { %16908 = vst [vmem:[#allocation59_spill] sm:$0xff] %v8802_v2 }
 0x3dc   : > { %1386 = vrot.lane.b32.xlu2 %v1315_v38, %s7850_s30  ;;  %1384 = vrot.lane.b32.xlu1 %v1314_v26, %s7850_s30  ;;  %v6856_v38 = vld [vmem:[%s16313_s1 + $0x1] ss:$8 sm:$0x7]  ;;  %v16392_v26 = vrot.slane %v8802_v2, 1  ;;  %v8849_v2 = vperm.slane %v240_v40, 1 }
 0x3dd   : > { %v8847_v0 = vperm.slane %v6856_v38, 0 }
 0x3de   : > { %16917 = vst [vmem:[#allocation67_spill] sm:$0xff] %v8849_v2 }
 0x3df   : > { %16916 = vst [vmem:[#allocation66_spill] sm:$0xff] %v8847_v0  ;;  %v327_v50 = vmul.f32 %v8218_v34, %v8847_v0 }
 0x3e4   : > { %1849 = vrot.lane.b32.xlu1 %v1845_v44, %s7847_s9  ;;  %1851 = vrot.lane.b32.xlu2 %v1846_v20, %s7847_s9  ;;  %v8808_v20 = vmul.f32 %v8796_v53, %v8108_v5 }
 0x3e6   : > { %16910 = vst [vmem:[#allocation60_spill] sm:$0xff] %v8808_v20  ;;  %v16393_v44 = vrot.slane %v8808_v20, 1 }
 0x3fe   : > { %v8787_v41 = vpop.permute.xlu2 %1344 }
 0x3ff   : > { %16903 = vst [vmem:[#allocation53_spill] sm:$0xff] %v8787_v41 }
 0x406   : > { %v8789_v35 = vpop.permute.xlu2 %1350 }
 0x407   : > { %16904 = vst [vmem:[#allocation54_spill] sm:$0xff] %v8789_v35  ;;  %v8820_v35 = vperm.slane %v6856_v38, 2 }
 0x409   : > { %v8791_v52 = vpop.permute.xlu0 %1340  ;;  %16912 = vst [vmem:[#allocation62_spill] sm:$0xff] %v8820_v35  ;;  %v323_v63 = vmul.f32 %v8179_v61, %v8820_v35  ;;  %v326_v36 = vmul.f32 %v8176_v60, %v8820_v35 }
 0x40a   : > { %16905 = vst [vmem:[#allocation56_spill] sm:$0xff] %v8791_v52  ;;  %v8832_v52 = vsel %vm1499_vm2, %v16392_v26, %v16393_v44  ;;  %v8851_v26 = vperm.slane %v6856_v38, 1  ;;  %v261_v38 = vmul.f32 %v8849_v2, %v8126_v15  ;;  %v8886_v15 = vmul.f32 %v8882_v11, %v8859_v29 }
 0x40c   : > { %16918 = vst [vmem:[#allocation68_spill] sm:$0xff] %v8851_v26  ;;  %v325_v4 = vmul.f32 %v8196_v13, %v8851_v26 }
 0x40d   : > { %16928 = vst [vmem:[#allocation139_spill] sm:$0xff] %v8886_v15 }
 0x40e   : > { %v8798_v37 = vpop.permute.xlu2 %1356 }
 0x40f   : > { %16907 = vst [vmem:[#allocation57_spill] sm:$0xff] %v8798_v37  ;;  %v8818_v37 = vperm.slane %v240_v40, 2 }
 0x411   : > { %v8804_v19 = vpop.permute.xlu0 %1346  ;;  %16911 = vst [vmem:[#allocation61_spill] sm:$0xff] %v8818_v37  ;;  %v259_v33 = vmul.f32 %v8818_v37, %v8111_v6 }
 0x412   : > { %16909 = vst [vmem:[#allocation58_spill] sm:$0xff] %v8804_v19  ;;  %v6875_v19 = vld [vmem:[%s16313_s1 + $0x2] ss:$8 sm:$0x7] }
 0x413   : > { %v8853_v6 = vperm.slane %v6875_v19, 0  ;;  %v8855_v44 = vperm.slane %v6875_v19, 2 }
 0x415   : > { %16919 = vst [vmem:[#allocation70_spill] sm:$0xff] %v8853_v6 }
 0x416   : > { %v8825_v41 = vpop.permute.xlu1 %1342  ;;  %16920 = vst [vmem:[#allocation69_spill] sm:$0xff] %v8855_v44  ;;  %v8857_v39 = vpop.permute.xlu2 %1362 }
 0x417   : > { %16913 = vst [vmem:[#allocation63_spill] sm:$0xff] %v8825_v41  ;;  %v8845_v41 = vperm.slane %v240_v40, 0  ;;  %v8867_v40 = vperm.slane %v6875_v19, 1  ;;  %v387_v19 = vmul.f32 %v16895_v21, %v8855_v44 }
 0x418   : > { %16921 = vst [vmem:[#allocation71_spill] sm:$0xff] %v8857_v39  ;;  %v8874_v39 = vperm.slane %v8843_v51, 2 }
 0x419   : > { %16915 = vst [vmem:[#allocation65_spill] sm:$0xff] %v8845_v41  ;;  %v8861_v10 = vpop.permute.xlu0 %1352  ;;  %v260_v20 = vmul.f32 %v8882_v11, %v8845_v41  ;;  %v8912_v11 = vmul.f32 %v8908_v58, %v8859_v29  ;;  %v263_v45 = vmul.f32 %v8908_v58, %v8845_v41  ;;  %v16944_v41 = vld [vmem:[#allocation27_spill] sm:$0xff] }
 0x41a   : > { %16923 = vst [vmem:[#allocation134_spill] sm:$0xff] %v8861_v10  ;;  %v341_v10 = vadd.f32 %v323_v63, %v259_v33  ;;  %v324_v33 = vmul.f32 %v8895_v24, %v8847_v0  ;;  %v262_v63 = vmul.f32 %v8818_v37, %v8108_v5  ;;  %v8903_v30 = vmul.f32 %v8179_v61, %v8874_v39 }
 0x41b   : > { %16925 = vst [vmem:[#allocation136_spill] sm:$0xff] %v8867_v40  ;;  %v343_v5 = vadd.f32 %v325_v4, %v261_v38  ;;  %v389_v61 = vmul.f32 %v8432_v3, %v8867_v40  ;;  %v8924_v59 = vmul.f32 %v8176_v60, %v8874_v39  ;;  %v16411_v4 = vrot.slane %v8912_v11, 1 }
 0x41c   : > { %16926 = vst [vmem:[#allocation137_spill] sm:$0xff] %v8874_v39  ;;  %v8937_v38 = vmul.f32 %v16895_v21, %v8914_v42  ;;  %v8939_v17 = vadd.f32 %v324_v33, %v260_v20  ;;  %v16939_v21 = vrot.slane %v8886_v15, 1  ;;  %v8958_v20 = vmul.f32 %v16897_v56, %v8914_v42 }
 0x41d   : > { %16930 = vst [vmem:[#allocation141_spill] sm:$0xff] %v8903_v30  ;;  %v16418_v14 = vrot.slane %v8924_v59, 1  ;;  %v344_v33 = vadd.f32 %v326_v36, %v262_v63  ;;  %v390_v60 = vmul.f32 %v16897_v56, %v8855_v44  ;;  %v16943_v56 = vld [vmem:[#allocation14_spill] sm:$0xff]  ;;  %v8993_v36 = vperm.slane %v8843_v51, 0 }
 0x41e   : > { %v8920_v53 = vpop.permute.xlu1 %1348  ;;  %16934 = vst [vmem:[#allocation145_spill] sm:$0xff] %v8924_v59  ;;  %v8975_v0 = vpop.permute.xlu2 %1368  ;;  %v545_v58 = vsel %vm533_vm3, %v16944_v41, %v16943_v56  ;;  %v8995_v63 = vperm.slane %v6908_v32, 1  ;;  %v16950_v56 = vrot.slane %v8937_v38, 1  ;;  %v9008_v59 = vld [vmem:[%s7946_s14 + $0xb0] sm:$0xff] }
 0x41f   : > { %16933 = vst [vmem:[#allocation144_spill] sm:$0xff] %v8920_v53  ;;  %v405_v53 = vadd.f32 %v387_v19, %v341_v10  ;;  %v8954_v10 = vsel %vm1499_vm2, %v16939_v21, %v16411_v4  ;;  %v388_v19 = vmul.f32 %v16898_v46, %v8853_v6  ;;  %v8971_v21 = vadd.f32 %v389_v61, %v343_v5 }
 0x420   : > { %16937 = vst [vmem:[#allocation146_spill] sm:$0xff] %v8937_v38  ;;  %v391_v4 = vmul.f32 %v16900_v28, %v8853_v6  ;;  %v328_v5 = vmul.f32 %v8193_v12, %v8851_v26  ;;  %v8990_v61 = vperm.slane %v8843_v51, 1  ;;  %v16949_v6 = vrot.slane %v8958_v20, 1 }
 0x421   : > { %v8947_v31 = vpop.permute.xlu0 %1358  ;;  %16940 = vst [vmem:[#allocation148_spill] sm:$0xff] %v8958_v20  ;;  %v581_v38 = vadd.f32 %v545_v58, %v405_v53  ;;  %v16959_v53 = vld [vmem:[#allocation83_spill] sm:$0xff] }
 0x422   : > { %16938 = vst [vmem:[#allocation147_spill] sm:$0xff] %v8947_v31  ;;  %v16941_v31 = vrot.slane %v8903_v30, 1  ;;  %v8983_v30 = vld [vmem:[%s7946_s14 + $0xa8] sm:$0xff]  ;;  %v9002_v41 = vsel %vm1499_vm2, %v16950_v56, %v16949_v6  ;;  %v9018_v20 = vmul.f32 %v8196_v13, %v8990_v61  ;;  %v329_v6 = vmul.f32 %v8221_v55, %v8820_v35 }
 0x423   : > { %16942 = vst [vmem:[#allocation149_spill] sm:$0xff] %v8975_v0  ;;  %v9028_v56 = vmul.f32 %v8432_v3, %v8995_v63  ;;  %v9038_v58 = vmul.f32 %v8193_v12, %v8990_v61  ;;  %v9047_v3 = vmul.f32 %v16899_v8, %v8995_v63 }
 0x424   : > { %v8969_v15 = vsel %vm1499_vm2, %v16941_v31, %v16418_v14  ;;  %16945 = vst [vmem:[#allocation14_spill] sm:$0xff] %v8983_v30  ;;  %v264_v31 = vmul.f32 %v8983_v30, %v8849_v2  ;;  %v345_v14 = vadd.f32 %v327_v50, %v263_v45  ;;  %v16951_v2 = vld [vmem:[#allocation26_spill] sm:$0xff]  ;;  %v16952_v30 = vld [vmem:[#allocation40_spill] sm:$0xff]  ;;  %v265_v45 = vmul.f32 %v9008_v59, %v8818_v37 }
 0x425   : > { %16946 = vst [vmem:[#allocation150_spill] sm:$0xff] %v8990_v61  ;;  %v719_v26 = vsel %vm533_vm3, %v16952_v30, %v16951_v2  ;;  %v9014_v50 = vperm.slane %v6908_v32, 0  ;;  %v9024_v2 = vmul.f32 %v8895_v24, %v8993_v36  ;;  %v392_v32 = vmul.f32 %v16899_v8, %v8867_v40  ;;  %v16973_v24 = vld [vmem:[#allocation43_spill] sm:$0xff] }
 0x426   : > { %16947 = vst [vmem:[#allocation151_spill] sm:$0xff] %v8993_v36  ;;  %v9012_v51 = vpop.permute.xlu1 %1354  ;;  %v346_v30 = vadd.f32 %v328_v5, %v264_v31  ;;  %v755_v55 = vadd.f32 %v719_v26, %v581_v38  ;;  %v9051_v31 = vmul.f32 %v8218_v34, %v8993_v36  ;;  %v16434_v12 = vrot.slane %v9038_v58, 1  ;;  %v9075_v8 = vpop.permute.xlu2 %1374 }
 0x427   : > { %16948 = vst [vmem:[#allocation152_spill] sm:$0xff] %v8995_v63  ;;  %v9034_v13 = vmul.f32 %v16898_v46, %v9014_v50  ;;  %v9057_v26 = vmul.f32 %v16900_v28, %v9014_v50  ;;  %v1063_v34 = vsel %vm1051_vm4, %v8601_v57, %v8609_v25  ;;  %v347_v38 = vadd.f32 %v329_v6, %v265_v45 }
 0x428   : > { %16953 = vst [vmem:[#allocation26_spill] sm:$0xff] %v9012_v51  ;;  %v893_v51 = vsel %vm533_vm3, %v16959_v53, %v8505_v22  ;;  %v16963_v5 = vrot.slane %v9047_v3, 1  ;;  %v16964_v40 = vrot.slane %v9028_v56, 1  ;;  %v16965_v46 = vrot.slane %v9051_v31, 1  ;;  %v16968_v22 = vld [vmem:[#allocation30_spill] sm:$0xff] }
 0x429   : > { %16954 = vst [vmem:[#allocation153_spill] sm:$0xff] %v9014_v50  ;;  %v9043_v35 = vpop.permute.xlu0 %1364  ;;  %v929_v53 = vadd.f32 %v893_v51, %v755_v55  ;;  %v393_v51 = vmul.f32 %v8464_v27, %v8855_v44  ;;  %v1231_v6 = vsel %vm1051_vm4, %v8705_v48, %v8713_v43  ;;  %v16970_v55 = vrot.slane %v9057_v26, 1  ;;  %v16972_v44 = vld [vmem:[#allocation46_spill] sm:$0xff]  ;;  %v16974_v43 = vld [vmem:[#allocation19_spill] sm:$0xff] }
 0x42a   : > { %16955 = vst [vmem:[#allocation154_spill] sm:$0xff] %v9018_v20  ;;  %v9082_v25 = vsel %vm1499_vm2, %v16964_v40, %v16963_v5  ;;  %v16971_v5 = vrot.slane %v9034_v13, 1  ;;  %v409_v57 = vadd.f32 %v391_v4, %v345_v14  ;;  %v410_v37 = vadd.f32 %v392_v32, %v346_v30  ;;  %v16978_v4 = vld [vmem:[#allocation88_spill] sm:$0xff] }
 0x42b   : > { %16956 = vst [vmem:[#allocation155_spill] sm:$0xff] %v9024_v2  ;;  %v546_v48 = vsel %vm533_vm3, %v16974_v43, %v16968_v22  ;;  %v411_v14 = vadd.f32 %v393_v51, %v347_v38  ;;  %v16982_v38 = vld [vmem:[#allocation31_spill] sm:$0xff]  ;;  %v1065_v43 = vsel %vm1051_vm4, %v8607_v9, %v8613_v16 }
 0x42c   : > { %16957 = vst [vmem:[#allocation156_spill] sm:$0xff] %v9028_v56  ;;  %v1099_v56 = vadd.f32 %v1063_v34, %v929_v53  ;;  %v16981_v34 = vld [vmem:[#allocation9_spill] sm:$0xff]  ;;  %v720_v51 = vsel %vm533_vm3, %v16982_v38, %v16973_v24 }
 0x42d   : > { %16958 = vst [vmem:[#allocation157_spill] sm:$0xff] %v9034_v13 }
 0x42e   : > { %16960 = vst [vmem:[#allocation158_spill] sm:$0xff] %v9043_v35  ;;  %v16962_v35 = vrot.slane %v9018_v20, 1  ;;  %v16966_v20 = vrot.slane %v9024_v2, 1  ;;  %v9099_v40 = vpop.permute.xlu1 %1360  ;;  %v408_v2 = vadd.f32 %v390_v60, %v344_v33  ;;  %v16977_v60 = vld [vmem:[#allocation7_spill] sm:$0xff]  ;;  %v16979_v33 = vld [vmem:[#allocation86_spill] sm:$0xff] }
 0x42f   : > { %16961 = vst [vmem:[#allocation159_spill] sm:$0xff] %v9047_v3  ;;  %v721_v3 = vsel %vm533_vm3, %v16973_v24, %v16972_v44  ;;  %v895_v32 = vsel %vm533_vm3, %v16979_v33, %v16978_v4  ;;  %v1233_v24 = vsel %vm1051_vm4, %v8711_v47, %v8717_v49 }
 0x430   : > { %v9072_v28 = vsel %vm1499_vm2, %v16962_v35, %v16434_v12  ;;  %v9089_v35 = vsel %vm1499_vm2, %v16966_v20, %v16965_v46  ;;  %v16967_v12 = vld [vmem:[#allocation35_spill] sm:$0xff]  ;;  %v9106_v20 = vsel %vm1499_vm2, %v16971_v5, %v16970_v55  ;;  %v406_v46 = vadd.f32 %v388_v19, %v8939_v17  ;;  %v16976_v19 = vld [vmem:[#allocation38_spill] sm:$0xff] }
 0x431   : > { %v547_v45 = vsel %vm533_vm3, %v16968_v22, %v16967_v12  ;;  %16969 = vst [vmem:[#allocation35_spill] sm:$0xff] %v9099_v40  ;;  %v16975_v40 = vld [vmem:[#allocation22_spill] sm:$0xff]  ;;  %v1267_v5 = vadd.f32 %v1231_v6, %v1099_v56  ;;  %v1371_v17 = vpop.permute.xlu0 %1370  ;;  %v549_v30 = vsel %vm533_vm3, %v16977_v60, %v16976_v19  ;;  %v16980_v22 = vld [vmem:[#allocation39_spill] sm:$0xff]  ;;  %v16984_v60 = vld [vmem:[#allocation48_spill] sm:$0xff] }
 0x432   : > { %v548_v13 = vsel %vm533_vm3, %v16967_v12, %v16975_v40  ;;  %v583_v55 = vadd.f32 %v547_v45, %v8971_v21  ;;  %v1399_v53 = vsel %vm1051_vm4, %v8975_v0, %v1371_v17  ;;  %v550_v12 = vsel %vm533_vm3, %v16976_v19, %v16980_v22  ;;  %v16983_v17 = vld [vmem:[#allocation49_spill] sm:$0xff]  ;;  %v16985_v0 = vld [vmem:[#allocation50_spill] sm:$0xff] }
 0x433   : > { %v551_v21 = vsel %vm533_vm3, %v16980_v22, %v16981_v34  ;;  %v1435_v45 = vadd.f32 %v1399_v53, %v1267_v5  ;;  %v582_v6 = vadd.f32 %v546_v48, %v406_v46  ;;  %v584_v40 = vadd.f32 %v548_v13, %v408_v2  ;;  %v16987_v53 = vld [vmem:[#allocation52_spill] sm:$0xff]  ;;  %v16988_v34 = vld [vmem:[#allocation90_spill] sm:$0xff] }
 0x434   : > { %v757_v56 = vadd.f32 %v721_v3, %v583_v55  ;;  %v723_v19 = vsel %vm533_vm3, %v16984_v60, %v16983_v17  ;;  %v722_v3 = vsel %vm533_vm3, %v16972_v44, %v16985_v0  ;;  %v585_v2 = vadd.f32 %v549_v30, %v409_v57  ;;  %v9158_v57 = vld [vmem:[%s7946_s14 + $0xc0] sm:$0x1] }
 0x435   : > { %v1568_v48 = vadd.f32 %v8832_v52, %v1435_v45  ;;  %v586_v13 = vadd.f32 %v550_v12, %v410_v37  ;;  %v587_v46 = vadd.f32 %v551_v21, %v411_v14  ;;  %v724_v22 = vsel %vm533_vm3, %v16983_v17, %v16987_v53  ;;  %v16989_v12 = vld [vmem:[#allocation51_spill] sm:$0xff]  ;;  %v16991_v45 = vld [vmem:[#allocation89_spill] sm:$0xff] }
 0x436   : > { %v931_v55 = vadd.f32 %v895_v32, %v757_v56  ;;  %v9149_v5 = vpop.permute.xlu1 %1366  ;;  %v894_v0 = vsel %vm533_vm3, %v16988_v34, %v16979_v33  ;;  %v1381_v32 = vpop.permute.xlu2 %1380  ;;  %v756_v37 = vadd.f32 %v720_v51, %v582_v6  ;;  %v759_v30 = vadd.f32 %v723_v19, %v585_v2  ;;  %v16990_v56 = vld [vmem:[#allocation91_spill] sm:$0xff]  ;;  %v9181_v19 = vld [vmem:[%s7946_s14 + $0x1a0] sm:$0x1] }
 0x437   : > { %16986 = vst [vmem:[#allocation30_spill] sm:$0xff] %v9149_v5  ;;  %v1700_v52 = vadd.f32 %v8969_v15, %v1568_v48  ;;  %v758_v14 = vadd.f32 %v722_v3, %v584_v40  ;;  %v725_v21 = vsel %vm533_vm3, %v16987_v53, %v16989_v12  ;;  %v897_v38 = vsel %vm533_vm3, %v16991_v45, %v16990_v56  ;;  %v16993_v48 = vld [vmem:[#allocation93_spill] sm:$0xff]  ;;  %v17017_v5 = vld [vmem:[#allocation148_spill] sm:$0xff] }
 0x438   : > { %v1101_v44 = vadd.f32 %v1065_v43, %v931_v55  ;;  %v1064_v33 = vsel %vm1051_vm4, %v8617_v1, %v8607_v9  ;;  %v760_v6 = vadd.f32 %v724_v22, %v586_v13  ;;  %v930_v40 = vadd.f32 %v894_v0, %v756_v37 }
 0x439   : > { %v9170_v17 = vpop.permute.xlu0 %1376  ;;  %v9173_v15 = vadd.f32 %v9002_v41, %v1700_v52  ;;  %v1475_v60 = vmul.f32 %v8859_v29, %v9158_v57  ;;  %v761_v3 = vadd.f32 %v725_v21, %v587_v46  ;;  %v896_v9 = vsel %vm533_vm3, %v16978_v4, %v8517_v54  ;;  %v16995_v46 = vld [vmem:[#allocation92_spill] sm:$0xff]  ;;  %v16996_v54 = vld [vmem:[#allocation110_spill] sm:$0xff] }
 0x43a   : > { %v1269_v43 = vadd.f32 %v1233_v24, %v1101_v44  ;;  %v1401_v51 = vsel %vm1051_vm4, %v9075_v8, %v9170_v17  ;;  %v1232_v1 = vsel %vm1051_vm4, %v8721_v62, %v8711_v47  ;;  %v933_v55 = vadd.f32 %v897_v38, %v759_v30  ;;  %v16994_v24 = vld [vmem:[#allocation109_spill] sm:$0xff]  ;;  %v16998_v52 = vld [vmem:[#allocation128_spill] sm:$0xff] }
 0x43b   : > { %16992 = vst [vmem:[#allocation46_spill] sm:$0xff] %v9173_v15  ;;  %v898_v2 = vsel %vm533_vm3, %v16990_v56, %v16993_v48  ;;  %v1100_v13 = vadd.f32 %v1064_v33, %v930_v40  ;;  %v1067_v53 = vsel %vm1051_vm4, %v16994_v24, %v8619_v23  ;;  %v899_v22 = vsel %vm533_vm3, %v16993_v48, %v16995_v46  ;;  %v16997_v44 = vld [vmem:[#allocation129_spill] sm:$0xff]  ;;  %v9215_v40 = vld [vmem:[%s7946_s14 + $0x280] sm:$0x1]  ;;  %v9240_v24 = vld [vmem:[%s7946_s14 + $0xd0] sm:$0x1] }
 0x43c   : > { %v1437_v41 = vadd.f32 %v1401_v51, %v1269_v43  ;;  %v1066_v4 = vsel %vm1051_vm4, %v8613_v16, %v16996_v54  ;;  %v1608_v62 = vmul.f32 %v9181_v19, %v8993_v36  ;;  %v932_v34 = vadd.f32 %v896_v9, %v758_v14  ;;  %v16999_v16 = vld [vmem:[#allocation55_spill] sm:$0xff]  ;;  %v17000_v51 = vld [vmem:[#allocation112_spill] sm:$0xff] }
 0x43d   : > { %v1268_v0 = vadd.f32 %v1232_v1, %v1100_v13  ;;  %v1235_v37 = vsel %vm1051_vm4, %v16998_v52, %v16997_v44  ;;  %v1533_v12 = vrot.slane %v1475_v60, 1  ;;  %v1103_v21 = vadd.f32 %v1067_v53, %v933_v55  ;;  %v17004_v53 = vld [vmem:[#allocation131_spill] sm:$0xff]  ;;  %v17005_v54 = vld [vmem:[#allocation132_spill] sm:$0xff] }
 0x43e   : > { %v1570_v47 = vadd.f32 %v8932_v7, %v1437_v41  ;;  %v1373_v30 = vpop.permute.xlu1 %1372  ;;  %v9211_v45 = vmul.f32 %v9008_v59, %v16999_v16  ;;  %v934_v38 = vadd.f32 %v898_v2, %v760_v6  ;;  %v935_v14 = vadd.f32 %v899_v22, %v761_v3  ;;  %v9220_v1 = vpop.permute.xlu2 %1386  ;;  %v9225_v41 = vld [vmem:[%s7946_s14 + $0xc8] sm:$0x1]  ;;  %v17002_v3 = vld [vmem:[#allocation111_spill] sm:$0xff] }
 0x43f   : > { %v1400_v56 = vsel %vm1051_vm4, %v1373_v30, %v9075_v8  ;;  %v1102_v33 = vadd.f32 %v1066_v4, %v932_v34  ;;  %v1068_v60 = vsel %vm1051_vm4, %v8619_v23, %v17000_v51  ;;  %v1271_v9 = vadd.f32 %v1235_v37, %v1103_v21  ;;  %v9260_v37 = vld [vmem:[%s7946_s14 + $0x190] sm:$0xff] }
 0x440   : > { %v1702_v7 = vadd.f32 %v9072_v28, %v1570_v47  ;;  %v1436_v43 = vadd.f32 %v1400_v56, %v1268_v0  ;;  %v1665_v6 = vrot.slane %v1608_v62, 1  ;;  %v1069_v55 = vsel %vm1051_vm4, %v17000_v51, %v17002_v3  ;;  %v9284_v3 = vld [vmem:[%s7946_s14 + $0x288] sm:$0x1] }
 0x441   : > { %v9222_v8 = vpop.permute.xlu0 %1382  ;;  %v17003_v23 = vrot.slane %v8912_v11, 1  ;;  %v1531_v22 = vrot.slane %v9211_v45, 1  ;;  %v1104_v11 = vadd.f32 %v1068_v60, %v934_v38  ;;  %v1236_v4 = vsel %vm1051_vm4, %v16997_v44, %v17005_v54  ;;  %v9273_v45 = vld [vmem:[%s7946_s14 + $0x1b0] sm:$0x1] }
 0x442   : > { %v9228_v28 = vadd.f32 %v9082_v25, %v1702_v7  ;;  %v1569_v48 = vadd.f32 %v8954_v10, %v1436_v43  ;;  %v1403_v13 = vsel %vm1051_vm4, %v1381_v32, %v9222_v8  ;;  %v1234_v25 = vsel %vm1051_vm4, %v8717_v49, %v17004_v53  ;;  %v17006_v32 = vld [vmem:[#allocation64_spill] sm:$0xff]  ;;  %v17009_v7 = vld [vmem:[#allocation130_spill] sm:$0xff] }
 0x443   : > { %v1534_v2 = vsel %vm1499_vm2, %v17003_v23, %v1533_v12  ;;  %v1439_v46 = vadd.f32 %v1403_v13, %v1271_v9  ;;  %v1740_v10 = vmul.f32 %v9215_v40, %v9014_v50  ;;  %v1476_v47 = vmul.f32 %v17006_v32, %v9225_v41  ;;  %v9297_v53 = vld [vmem:[%s7946_s14 + $0x18] sm:$0xfe]  ;;  %v17026_v50 = vld [vmem:[#allocation14_spill] sm:$0xff] }
 0x444   : > { %17001 = vst [vmem:[#allocation43_spill] sm:$0xff] %v9228_v28  ;;  %v1701_v62 = vadd.f32 %v9089_v35, %v1569_v48  ;;  %v1477_v49 = vmul.f32 %v16999_v16, %v9240_v24  ;;  %v17007_v0 = vrot.slane %v9051_v31, 1  ;;  %v1607_v30 = vmul.f32 %v9260_v37, %v8874_v39  ;;  %v9270_v31 = vld [vmem:[%s7946_s14 + $0x1a8] sm:$0x1]  ;;  %v9290_v48 = vld [vmem:[%s7946_s14] sm:$0xfe] }
 0x445   : > { %v1572_v34 = vadd.f32 %v1534_v2, %v1439_v46  ;;  %v1105_v44 = vadd.f32 %v1069_v55, %v935_v14  ;;  %v1270_v12 = vadd.f32 %v1234_v25, %v1102_v33  ;;  %v1739_v56 = vmul.f32 %v8464_v27, %v8914_v42  ;;  %v17010_v14 = vld [vmem:[#allocation60_spill] sm:$0xff]  ;;  %v9287_v55 = vld [vmem:[%s7946_s14 + $0x290] sm:$0x1] }
 0x446   : > { %v1666_v52 = vsel %vm1499_vm2, %v17007_v0, %v1665_v6  ;;  %v1379_v21 = vpop.permute.xlu1 %1378  ;;  %v9265_v35 = vadd.f32 %v9106_v20, %v1701_v62  ;;  %v1237_v38 = vsel %vm1051_vm4, %v17005_v54, %v17009_v7  ;;  %v17011_v43 = vrot.slane %v17010_v14, 1  ;;  %v9294_v13 = vpop.permute.xlu2 %1851  ;;  %v9306_v54 = vld [vmem:[%s7946_s14 + $0x20] sm:$0xff]  ;;  %v9323_v7 = vld [vmem:[%s7946_s14 + $0x38] sm:$0xff] }
 0x447   : > { %v1402_v20 = vsel %vm1051_vm4, %v9170_v17, %v1379_v21  ;;  %v1797_v51 = vrot.slane %v1740_v10, 1  ;;  %v1272_v60 = vadd.f32 %v1236_v4, %v1104_v11  ;;  %v1535_v9 = vrot.slane %v1476_v47, 1 }
 0x448   : > { %17008 = vst [vmem:[#allocation19_spill] sm:$0xff] %v9265_v35  ;;  %v1532_v33 = vsel %vm1499_vm2, %v17011_v43, %v1531_v22  ;;  %v1438_v27 = vadd.f32 %v1402_v20, %v1270_v12  ;;  %v1704_v6 = vadd.f32 %v1666_v52, %v1572_v34  ;;  %v1537_v2 = vrot.slane %v1477_v49, 1 }
 0x449   : > { %v9292_v23 = vpop.permute.xlu0 %1847  ;;  %v1663_v17 = vrot.slane %v1607_v30, 1  ;;  %v1609_v25 = vmul.f32 %v9270_v31, %v8990_v61  ;;  %v1610_v46 = vmul.f32 %v9273_v45, %v8874_v39  ;;  %v1795_v47 = vrot.slane %v1739_v56, 1  ;;  %v9606_v39 = vld [vmem:[%s7946_s14 + $0xf0] sm:$0xfe]  ;;  %v9609_v61 = vld [vmem:[%s7946_s14 + $0xe8] sm:$0xfe] }
 0x44a   : > { %v1571_v10 = vadd.f32 %v1532_v33, %v1438_v27  ;;  %v1859_v11 = vmul.f32 %v9292_v23, %v9290_v48  ;;  %v9310_v4 = vmul.f32 %v9306_v54, %v9292_v23  ;;  %v1273_v62 = vadd.f32 %v1237_v38, %v1105_v44  ;;  %v17015_v27 = vld [vmem:[#allocation145_spill] sm:$0xff] }
 0x44b   : > { %v17012_v34 = vrot.slane %v9057_v26, 1  ;;  %v1741_v0 = vmul.f32 %v9284_v3, %v8995_v63  ;;  %v1742_v52 = vmul.f32 %v9287_v55, %v8914_v42  ;;  %v1862_v21 = vmul.f32 %v9294_v13, %v9297_v53 }
 0x44c   : > { %v1915_v30 = vrot.slane %v1859_v11, 1  ;;  %v1916_v12 = vrot.slane %v9310_v4, 1  ;;  %v9327_v44 = vmul.f32 %v9323_v7, %v9294_v13  ;;  %v17013_v26 = vrot.slane %v8890_v18, 1 }
 0x44d   : > { %v1798_v49 = vsel %vm1499_vm2, %v17012_v34, %v1797_v51  ;;  %v1538_v38 = vsel %vm1499_vm2, %v1531_v22, %v1537_v2  ;;  %v1667_v14 = vrot.slane %v1609_v25, 1  ;;  %v1669_v43 = vrot.slane %v1610_v46, 1 }
 0x44e   : > { %v1536_v56 = vsel %vm1499_vm2, %v17013_v26, %v1535_v9  ;;  %v1385_v33 = vpop.permute.xlu1 %1384  ;;  %v1917_v20 = vsel %vm1499_vm2, %v1915_v30, %v1916_v12  ;;  %v9336_v51 = vadd.f32 %v1798_v49, %v1704_v6  ;;  %v17016_v11 = vrot.slane %v17015_v27, 1 }
 0x44f   : > { %v17018_v63 = vrot.slane %v17017_v5, 1  ;;  %v1404_v22 = vsel %vm1051_vm4, %v9222_v8, %v1385_v33  ;;  %v1405_v9 = vsel %vm1051_vm4, %v1385_v33, %v9220_v1  ;;  %1967 = vrot.lane.b32.xlu0 %v1917_v20, %s7848_s15  ;;  %v1799_v2 = vrot.slane %v1741_v0, 1  ;;  %v17021_v0 = vld [vmem:[#allocation159_spill] sm:$0xff] }
 0x450   : > { %17014 = vst [vmem:[#allocation22_spill] sm:$0xff] %v9336_v51  ;;  %v1664_v34 = vsel %vm1499_vm2, %v17016_v11, %v1663_v17  ;;  %v1801_v25 = vrot.slane %v1742_v52, 1  ;;  %v1440_v6 = vadd.f32 %v1404_v22, %v1272_v60  ;;  %v1441_v46 = vadd.f32 %v1405_v9, %v1273_v62  ;;  %v9392_v9 = vld [vmem:[%s7946_s14 + $0x28] sm:$0xff] }
 0x451   : > { %v1796_v18 = vsel %vm1499_vm2, %v17018_v63, %v1795_v47  ;;  %v1924_v49 = vrot.slane %v1862_v21, 1  ;;  %v1925_v30 = vrot.slane %v9327_v44, 1  ;;  %v1703_v5 = vadd.f32 %v1664_v34, %v1571_v10  ;;  %v9385_v34 = vld [vmem:[%s7946_s14 + $0x30] sm:$0xff] }
 0x452   : > { %v17019_v63 = vrot.slane %v9038_v58, 1  ;;  %v1670_v8 = vsel %vm1499_vm2, %v1663_v17, %v1669_v43  ;;  %v1573_v27 = vadd.f32 %v1536_v56, %v1440_v6  ;;  %v1574_v1 = vadd.f32 %v1538_v38, %v1441_v46  ;;  %v9371_v43 = vld [vmem:[%s7946_s14 + $0x8] sm:$0xfe] }
 0x453   : > { %v9354_v33 = vadd.f32 %v1796_v18, %v1703_v5  ;;  %v17022_v60 = vrot.slane %v17021_v0, 1  ;;  %v1802_v52 = vsel %vm1499_vm2, %v1795_v47, %v1801_v25  ;;  %v1926_v58 = vsel %vm1499_vm2, %v1924_v49, %v1925_v30  ;;  %v9397_v25 = vld [vmem:[%s7946_s14 + $0x50] sm:$0xff] }
 0x454   : > { %v1668_v26 = vsel %vm1499_vm2, %v17019_v63, %v1667_v14  ;;  %v1706_v21 = vadd.f32 %v1670_v8, %v1574_v1  ;;  %v9368_v14 = vld [vmem:[%s7946_s14 + $0x10] sm:$0xfe]  ;;  %v9404_v1 = vld [vmem:[%s7946_s14 + $0x48] sm:$0xff] }
 0x455   : > { %17020 = vst [vmem:[#allocation38_spill] sm:$0xff] %v9354_v33  ;;  %v1800_v62 = vsel %vm1499_vm2, %v17022_v60, %v1799_v2  ;;  %v1705_v10 = vadd.f32 %v1668_v26, %v1573_v27  ;;  %v9409_v60 = vld [vmem:[%s7946_s14 + $0x40] sm:$0xff] }
 0x456   : > { %v1850_v17 = vpop.permute.xlu1 %1849  ;;  %v9365_v38 = vadd.f32 %v1802_v52, %v1706_v21 }
 0x457   : > { %v9363_v56 = vadd.f32 %v1800_v62, %v1705_v10  ;;  %v9375_v47 = vsel %vm430_vm0, %v9292_v23, %v1850_v17  ;;  %v9379_v20 = vsel %vm430_vm0, %v1850_v17, %v9294_v13  ;;  %1973 = vrot.lane.b32.xlu0 %v1926_v58, %s7848_s15  ;;  %v1867_v62 = vmul.f32 %v9409_v60, %v9292_v23  ;;  %v9417_v58 = vld [vmem:[%s7946_s14 + $0x68] sm:$0xff] }
 0x458   : > { %17024 = vst [vmem:[#allocation88_spill] sm:$0xff] %v9365_v38  ;;  %v1861_v11 = vmul.f32 %v9379_v20, %v9368_v14  ;;  %v1865_v18 = vmul.f32 %v9385_v34, %v9379_v20  ;;  %v1860_v22 = vmul.f32 %v9375_v47, %v9371_v43  ;;  %v1864_v2 = vmul.f32 %v9392_v9, %v9375_v47 }
 0x459   : > { %17023 = vst [vmem:[#allocation7_spill] sm:$0xff] %v9363_v56  ;;  %v1869_v6 = vmul.f32 %v9397_v25, %v9379_v20  ;;  %v1868_v0 = vmul.f32 %v9404_v1, %v9375_v47  ;;  %v1872_v10 = vmul.f32 %v9417_v58, %v9375_v47  ;;  %v1927_v17 = vrot.slane %v1867_v62, 1 }
 0x45a   : > { %v1921_v46 = vrot.slane %v1861_v11, 1  ;;  %v1922_v49 = vrot.slane %v1865_v18, 1  ;;  %v1918_v5 = vrot.slane %v1860_v22, 1  ;;  %v1919_v63 = vrot.slane %v1864_v2, 1  ;;  %v9427_v2 = vld [vmem:[%s7946_s14 + $0x60] sm:$0xff] }
 0x45b   : > { %v1931_v26 = vrot.slane %v1869_v6, 1  ;;  %v1929_v21 = vrot.slane %v1868_v0, 1  ;;  %v1937_v11 = vrot.slane %v1872_v10, 1  ;;  %v1928_v22 = vsel %vm1499_vm2, %v1916_v12, %v1927_v17  ;;  %v17025_v12 = vld [vmem:[#allocation138_spill] sm:$0xff] }
 0x45c   : > { %v1923_v8 = vsel %vm1499_vm2, %v1921_v46, %v1922_v49  ;;  %v1920_v27 = vsel %vm1499_vm2, %v1918_v5, %v1919_v63  ;;  %v1871_v6 = vmul.f32 %v9427_v2, %v9292_v23  ;;  %v9432_v46 = vld [vmem:[%s7946_s14 + $0x58] sm:$0xff]  ;;  %v1875_v5 = vmul.f32 %v17025_v12, %v9292_v23 }
 0x45d   : > { %1971 = vrot.lane.b32.xlu2 %v1923_v8, %s7848_s15  ;;  %1969 = vrot.lane.b32.xlu1 %v1920_v27, %s7848_s15  ;;  %v1932_v52 = vsel %vm1499_vm2, %v1922_v49, %v1931_v26  ;;  %v1930_v18 = vsel %vm1499_vm2, %v1919_v63, %v1929_v21  ;;  %v1870_v49 = vmul.f32 %v9432_v46, %v9294_v13 }
 0x45e   : > { %v1938_v4 = vsel %vm1499_vm2, %v1929_v21, %v1937_v11  ;;  %v1935_v63 = vrot.slane %v1871_v6, 1  ;;  %v1943_v27 = vrot.slane %v1875_v5, 1  ;;  %v9452_v21 = vld [vmem:[%s7946_s14 + $0x70] sm:$0xff] }
 0x45f   : > { %1979 = vrot.lane.b32.xlu0 %v1932_v52, %s7848_s15  ;;  %v1933_v8 = vrot.slane %v1870_v49, 1  ;;  %v9447_v52 = vld [vmem:[%s7946_s14 + $0x78] sm:$0xff]  ;;  %v9468_v5 = vld [vmem:[%s7946_s14 + $0x90] sm:$0xff] }
 0x460   : > { %v1936_v0 = vsel %vm1499_vm2, %v1927_v17, %v1935_v63  ;;  %v1874_v10 = vmul.f32 %v9447_v52, %v9294_v13  ;;  %v1944_v44 = vsel %vm1499_vm2, %v1935_v63, %v1943_v27  ;;  %v9460_v17 = vld [vmem:[%s7946_s14 + $0x98] sm:$0xff]  ;;  %v9473_v63 = vld [vmem:[%s7946_s14 + $0x88] sm:$0xff] }
 0x461   : > { %v1934_v62 = vsel %vm1499_vm2, %v1925_v30, %v1933_v8  ;;  %v1878_v30 = vmul.f32 %v9460_v17, %v9294_v13 }
 0x463   : > { %v1949_v49 = vrot.slane %v1878_v30, 1 }
 0x465   : > { %1977 = vrot.lane.b32.xlu2 %v1930_v18, %s7848_s15  ;;  %1975 = vrot.lane.b32.xlu1 %v1928_v22, %s7848_s15  ;;  %v1873_v18 = vmul.f32 %v9452_v21, %v9379_v20  ;;  %v1941_v22 = vrot.slane %v1874_v10, 1 }
 0x467   : > { %1985 = vrot.lane.b32.xlu0 %v1938_v4, %s7848_s15  ;;  %v1939_v6 = vrot.slane %v1873_v18, 1  ;;  %v1942_v4 = vsel %vm1499_vm2, %v1933_v8, %v1941_v22  ;;  %v1950_v10 = vsel %vm1499_vm2, %v1941_v22, %v1949_v49  ;;  %v1881_v8 = vmul.f32 %v9008_v59, %v9379_v20 }
 0x468   : > { %v1884_v22 = vmul.f32 %v9375_v47, %v9225_v41 }
 0x469   : > { %v1940_v12 = vsel %vm1499_vm2, %v1931_v26, %v1939_v6 }
 0x46d   : > { %1983 = vrot.lane.b32.xlu2 %v1936_v0, %s7848_s15  ;;  %1981 = vrot.lane.b32.xlu1 %v1934_v62, %s7848_s15  ;;  %v1877_v0 = vmul.f32 %v9468_v5, %v9379_v20  ;;  %v1876_v62 = vmul.f32 %v9473_v63, %v9375_v47 }
 0x46f   : > { %1991 = vrot.lane.b32.xlu0 %v1944_v44, %s7848_s15  ;;  %v1947_v26 = vrot.slane %v1877_v0, 1  ;;  %v1945_v18 = vrot.slane %v1876_v62, 1  ;;  %v1955_v44 = vrot.slane %v1881_v8, 1  ;;  %v1961_v0 = vrot.slane %v1884_v22, 1  ;;  %v9500_v8 = vld [vmem:[%s7946_s14 + $0xb8] sm:$0xff] }
 0x471   : > { %v1948_v30 = vsel %vm1499_vm2, %v1939_v6, %v1947_v26  ;;  %v1946_v38 = vsel %vm1499_vm2, %v1937_v11, %v1945_v18  ;;  %v1956_v59 = vsel %vm1499_vm2, %v1947_v26, %v1955_v44 }
 0x475   : > { %1989 = vrot.lane.b32.xlu2 %v1942_v4, %s7848_s15  ;;  %1987 = vrot.lane.b32.xlu1 %v1940_v12, %s7848_s15  ;;  %v1880_v4 = vmul.f32 %v17026_v50, %v9375_v47  ;;  %v17027_v12 = vld [vmem:[#allocation142_spill] sm:$0xff] }
 0x476   : > { %v1879_v42 = vmul.f32 %v17027_v12, %v9292_v23 }
 0x477   : > { %1997 = vrot.lane.b32.xlu0 %v1950_v10, %s7848_s15  ;;  %v1953_v6 = vrot.slane %v1880_v4, 1  ;;  %v1883_v10 = vmul.f32 %v9292_v23, %v9158_v57  ;;  %v9512_v57 = vld [vmem:[%s7946_s14 + $0xd8] sm:$0x1]  ;;  %v1885_v4 = vmul.f32 %v9379_v20, %v9240_v24 }
 0x478   : > { %v1951_v11 = vrot.slane %v1879_v42, 1 }
 0x479   : > { %v1954_v50 = vsel %vm1499_vm2, %v1945_v18, %v1953_v6  ;;  %v1962_v41 = vsel %vm1499_vm2, %v1953_v6, %v1961_v0  ;;  %v1959_v42 = vrot.slane %v1883_v10, 1 }
 0x47a   : > { %v1952_v62 = vsel %vm1499_vm2, %v1943_v27, %v1951_v11  ;;  %v6912_v27 = vld [vmem:[%s16313_s1 + $0x1d] ss:$8 sm:$0x7] }
 0x47b   : > { %v2074_v23 = vperm.slane %v6912_v27, 0  ;;  %v1960_v26 = vsel %vm1499_vm2, %v1951_v11, %v1959_v42 }
 0x47d   : > { %1995 = vrot.lane.b32.xlu2 %v1948_v30, %s7848_s15  ;;  %1993 = vrot.lane.b32.xlu1 %v1946_v38, %s7848_s15  ;;  %v1882_v38 = vmul.f32 %v9500_v8, %v9294_v13  ;;  %v1886_v30 = vmul.f32 %v9294_v13, %v9512_v57  ;;  %v2075_v13 = vperm.slane %v6912_v27, 1 }
 0x47f   : > { %2003 = vrot.lane.b32.xlu0 %v1956_v59, %s7848_s15  ;;  %v1957_v47 = vrot.slane %v1882_v38, 1  ;;  %v1965_v12 = vrot.slane %v1886_v30, 1  ;;  %v1963_v59 = vrot.slane %v1885_v4, 1 }
 0x481   : > { %v1958_v18 = vsel %vm1499_vm2, %v1949_v49, %v1957_v47  ;;  %v1966_v22 = vsel %vm1499_vm2, %v1957_v47, %v1965_v12  ;;  %v1964_v6 = vsel %vm1499_vm2, %v1955_v44, %v1963_v59  ;;  %v2076_v49 = vperm.slane %v6912_v27, 2 }
 0x485   : > { %2001 = vrot.lane.b32.xlu2 %v1954_v50, %s7848_s15  ;;  %1999 = vrot.lane.b32.xlu1 %v1952_v62, %s7848_s15 }
 0x487   : > { %2009 = vrot.lane.b32.xlu0 %v1962_v41, %s7848_s15 }
 0x48d   : > { %2007 = vrot.lane.b32.xlu2 %v1960_v26, %s7848_s15  ;;  %2005 = vrot.lane.b32.xlu1 %v1958_v18, %s7848_s15 }
 0x48f   : > { %2077 = vrot.lane.b32.xlu0 %v2074_v23, %s7847_s9 }
 0x495   : > { %2013 = vrot.lane.b32.xlu2 %v1966_v22, %s7848_s15  ;;  %2011 = vrot.lane.b32.xlu1 %v1964_v6, %s7848_s15 }
 0x49d   : > { %2079 = vrot.lane.b32.xlu1 %v2075_v13, %s7847_s9  ;;  %2081 = vrot.lane.b32.xlu2 %v2076_v49, %s7847_s9  ;;  %v9576_v49 = vld [vmem:[%s7946_s14 + $0xe0] sm:$0xfe] }
 0x4b7   : > { %v9529_v24 = vpop.permute.xlu2 %1971 }
 0x4b8   : > { %17028 = vst [vmem:[#allocation86_spill] sm:$0xff] %v9529_v24 }
 0x4bf   : > { %v9531_v20 = vpop.permute.xlu2 %1977 }
 0x4c0   : > { %17029 = vst [vmem:[#allocation39_spill] sm:$0xff] %v9531_v20 }
 0x4c1   : > { %v9533_v11 = vpop.permute.xlu0 %1967 }
 0x4c2   : > { %17030 = vst [vmem:[#allocation9_spill] sm:$0xff] %v9533_v11 }
 0x4c7   : > { %v9535_v0 = vpop.permute.xlu2 %1983 }
 0x4c8   : > { %17031 = vst [vmem:[#allocation31_spill] sm:$0xff] %v9535_v0 }
 0x4c9   : > { %v9537_v50 = vpop.permute.xlu0 %1973 }
 0x4ca   : > { %17032 = vst [vmem:[#allocation49_spill] sm:$0xff] %v9537_v50  ;;  %v9583_v50 = vld [vmem:[%s7946_s14 + $0xf8] sm:$0xfe] }
 0x4cf   : > { %v9539_v44 = vpop.permute.xlu1 %1969  ;;  %v9541_v62 = vpop.permute.xlu2 %1989 }
 0x4d0   : > { %17033 = vst [vmem:[#allocation48_spill] sm:$0xff] %v9539_v44 }
 0x4d1   : > { %17034 = vst [vmem:[#allocation50_spill] sm:$0xff] %v9541_v62  ;;  %v9543_v10 = vpop.permute.xlu0 %1979 }
 0x4d2   : > { %17035 = vst [vmem:[#allocation52_spill] sm:$0xff] %v9543_v10  ;;  %v9595_v10 = vld [vmem:[%s7946_s14 + $0x118] sm:$0xff] }
 0x4d7   : > { %v9545_v38 = vpop.permute.xlu1 %1975  ;;  %v9549_v42 = vpop.permute.xlu2 %1995 }
 0x4d8   : > { %17036 = vst [vmem:[#allocation90_spill] sm:$0xff] %v9545_v38 }
 0x4d9   : > { %v9547_v41 = vpop.permute.xlu0 %1985  ;;  %17038 = vst [vmem:[#allocation91_spill] sm:$0xff] %v9549_v42 }
 0x4da   : > { %17037 = vst [vmem:[#allocation51_spill] sm:$0xff] %v9547_v41  ;;  %v9588_v41 = vld [vmem:[%s7946_s14 + $0x100] sm:$0xff] }
 0x4df   : > { %v9551_v47 = vpop.permute.xlu1 %1981  ;;  %v9555_v23 = vpop.permute.xlu2 %2001 }
 0x4e0   : > { %17039 = vst [vmem:[#allocation89_spill] sm:$0xff] %v9551_v47 }
 0x4e1   : > { %v9553_v27 = vpop.permute.xlu0 %1991  ;;  %17041 = vst [vmem:[#allocation109_spill] sm:$0xff] %v9555_v23 }
 0x4e2   : > { %17040 = vst [vmem:[#allocation93_spill] sm:$0xff] %v9553_v27 }
 0x4e7   : > { %v9557_v26 = vpop.permute.xlu1 %1987  ;;  %v9561_v30 = vpop.permute.xlu2 %2007 }
 0x4e8   : > { %17042 = vst [vmem:[#allocation92_spill] sm:$0xff] %v9557_v26 }
 0x4e9   : > { %v9559_v18 = vpop.permute.xlu0 %1997  ;;  %17044 = vst [vmem:[#allocation129_spill] sm:$0xff] %v9561_v30 }
 0x4ea   : > { %17043 = vst [vmem:[#allocation110_spill] sm:$0xff] %v9559_v18  ;;  %v9680_v18 = vld [vmem:[%s7946_s14 + $0x158] sm:$0xff] }
 0x4ef   : > { %v9563_v4 = vpop.permute.xlu1 %1993  ;;  %v9569_v22 = vpop.permute.xlu2 %2013 }
 0x4f0   : > { %17045 = vst [vmem:[#allocation128_spill] sm:$0xff] %v9563_v4 }
 0x4f1   : > { %v9565_v12 = vpop.permute.xlu0 %2003  ;;  %17048 = vst [vmem:[#allocation131_spill] sm:$0xff] %v9569_v22 }
 0x4f2   : > { %17046 = vst [vmem:[#allocation112_spill] sm:$0xff] %v9565_v12 }
 0x4f7   : > { %v9567_v59 = vpop.permute.xlu1 %1999  ;;  %v9580_v0 = vpop.permute.xlu2 %2081 }
 0x4f8   : > { %17047 = vst [vmem:[#allocation111_spill] sm:$0xff] %v9567_v59  ;;  %v2092_v20 = vmul.f32 %v9583_v50, %v9580_v0  ;;  %v2096_v24 = vmul.f32 %v9595_v10, %v9580_v0  ;;  %v9641_v59 = vld [vmem:[%s7946_s14 + $0x128] sm:$0xff] }
 0x4f9   : > { %v9571_v6 = vpop.permute.xlu0 %2009 }
 0x4fa   : > { %17049 = vst [vmem:[#allocation132_spill] sm:$0xff] %v9571_v6  ;;  %v2154_v26 = vrot.slane %v2092_v20, 1  ;;  %v9622_v20 = vld [vmem:[%s7946_s14 + $0x110] sm:$0xff]  ;;  %v9646_v6 = vld [vmem:[%s7946_s14 + $0x120] sm:$0xff] }
 0x4ff   : > { %v9573_v13 = vpop.permute.xlu1 %2005 }
 0x500   : > { %17050 = vst [vmem:[#allocation130_spill] sm:$0xff] %v9573_v13 }
 0x501   : > { %v9578_v27 = vpop.permute.xlu0 %2077 }
 0x502   : > { %v2089_v4 = vmul.f32 %v9576_v49, %v9578_v27  ;;  %v2093_v22 = vmul.f32 %v9588_v41, %v9578_v27 }
 0x504   : > { %v2145_v47 = vrot.slane %v2089_v4, 1  ;;  %v2146_v38 = vrot.slane %v2093_v22, 1  ;;  %v2155_v4 = vrot.slane %v2096_v24, 1 }
 0x506   : > { %v2147_v11 = vsel %vm1499_vm2, %v2145_v47, %v2146_v38  ;;  %v2156_v22 = vsel %vm1499_vm2, %v2154_v26, %v2155_v4 }
 0x507   : > { %v9600_v44 = vpop.permute.xlu1 %2011  ;;  %2197 = vrot.lane.b32.xlu0 %v2147_v11, %s7848_s15 }
 0x508   : > { %17051 = vst [vmem:[#allocation60_spill] sm:$0xff] %v9600_v44 }
 0x50f   : > { %v2080_v62 = vpop.permute.xlu1 %2079  ;;  %2203 = vrot.lane.b32.xlu0 %v2156_v22, %s7848_s15  ;;  %v9629_v22 = vld [vmem:[%s7946_s14 + $0x108] sm:$0xff] }
 0x510   : > { %v9613_v47 = vsel %vm430_vm0, %v9578_v27, %v2080_v62  ;;  %v9617_v36 = vsel %vm430_vm0, %v2080_v62, %v9580_v0  ;;  %v9634_v62 = vld [vmem:[%s7946_s14 + $0x130] sm:$0xff] }
 0x511   : > { %v2091_v24 = vmul.f32 %v9606_v39, %v9617_v36  ;;  %v2095_v11 = vmul.f32 %v9622_v20, %v9617_v36  ;;  %v2090_v26 = vmul.f32 %v9609_v61, %v9613_v47  ;;  %v2094_v32 = vmul.f32 %v9629_v22, %v9613_v47 }
 0x512   : > { %v2099_v29 = vmul.f32 %v9634_v62, %v9617_v36  ;;  %v2098_v30 = vmul.f32 %v9641_v59, %v9613_v47 }
 0x513   : > { %v2151_v16 = vrot.slane %v2091_v24, 1  ;;  %v2152_v33 = vrot.slane %v2095_v11, 1  ;;  %v2148_v13 = vrot.slane %v2090_v26, 1  ;;  %v2149_v56 = vrot.slane %v2094_v32, 1 }
 0x514   : > { %v2161_v44 = vrot.slane %v2099_v29, 1  ;;  %v2097_v24 = vmul.f32 %v9646_v6, %v9578_v27 }
 0x515   : > { %v2153_v35 = vsel %vm1499_vm2, %v2151_v16, %v2152_v33  ;;  %v2150_v51 = vsel %vm1499_vm2, %v2148_v13, %v2149_v56  ;;  %v9654_v16 = vld [vmem:[%s7946_s14 + $0x148] sm:$0xff]  ;;  %v2159_v13 = vrot.slane %v2098_v30, 1 }
 0x516   : > { %2201 = vrot.lane.b32.xlu2 %v2153_v35, %s7848_s15  ;;  %2199 = vrot.lane.b32.xlu1 %v2150_v51, %s7848_s15  ;;  %v2162_v29 = vsel %vm1499_vm2, %v2152_v33, %v2161_v44  ;;  %v2102_v32 = vmul.f32 %v9654_v16, %v9613_v47  ;;  %v2157_v11 = vrot.slane %v2097_v24, 1  ;;  %v9662_v35 = vld [vmem:[%s7946_s14 + $0x140] sm:$0xff]  ;;  %v9667_v33 = vld [vmem:[%s7946_s14 + $0x138] sm:$0xff] }
 0x517   : > { %2209 = vrot.lane.b32.xlu0 %v2162_v29, %s7848_s15  ;;  %v2160_v28 = vsel %vm1499_vm2, %v2149_v56, %v2159_v13  ;;  %v2101_v51 = vmul.f32 %v9662_v35, %v9578_v27  ;;  %v2100_v12 = vmul.f32 %v9667_v33, %v9580_v0 }
 0x518   : > { %v2167_v26 = vrot.slane %v2102_v32, 1  ;;  %v2158_v23 = vsel %vm1499_vm2, %v2146_v38, %v2157_v11  ;;  %v17052_v38 = vld [vmem:[#allocation140_spill] sm:$0xff] }
 0x519   : > { %v2105_v30 = vmul.f32 %v17052_v38, %v9578_v27  ;;  %v2165_v24 = vrot.slane %v2101_v51, 1  ;;  %v2163_v29 = vrot.slane %v2100_v12, 1 }
 0x51a   : > { %v2168_v56 = vsel %vm1499_vm2, %v2159_v13, %v2167_v26 }
 0x51b   : > { %v2173_v32 = vrot.slane %v2105_v30, 1  ;;  %v2166_v15 = vsel %vm1499_vm2, %v2157_v11, %v2165_v24  ;;  %v2164_v42 = vsel %vm1499_vm2, %v2155_v4, %v2163_v29  ;;  %v9693_v11 = vld [vmem:[%s7946_s14 + $0x178] sm:$0xff] }
 0x51c   : > { %17054 = vst [vmem:[#allocation148_spill] sm:$0xff] %v9693_v11  ;;  %v2108_v4 = vmul.f32 %v9693_v11, %v9580_v0 }
 0x51d   : > { %v2174_v12 = vsel %vm1499_vm2, %v2165_v24, %v2173_v32  ;;  %v9706_v24 = vld [vmem:[%s7946_s14 + $0x168] sm:$0xff] }
 0x51e   : > { %2207 = vrot.lane.b32.xlu2 %v2160_v28, %s7848_s15  ;;  %2205 = vrot.lane.b32.xlu1 %v2158_v23, %s7848_s15  ;;  %v2104_v28 = vmul.f32 %v9680_v18, %v9580_v0  ;;  %v9685_v23 = vld [vmem:[%s7946_s14 + $0x150] sm:$0xff]  ;;  %v2179_v38 = vrot.slane %v2108_v4, 1  ;;  %17056 = vst [vmem:[#allocation138_spill] sm:$0xff] %v9706_v24  ;;  %v2106_v11 = vmul.f32 %v9706_v24, %v9613_v47  ;;  %v9719_v24 = vld [vmem:[%s7946_s14 + $0x188] sm:$0xff] }
 0x51f   : > { %2215 = vrot.lane.b32.xlu0 %v2168_v56, %s7848_s15  ;;  %17053 = vst [vmem:[#allocation145_spill] sm:$0xff] %v9685_v23  ;;  %v2103_v13 = vmul.f32 %v9685_v23, %v9617_v36 }
 0x520   : > { %v2171_v51 = vrot.slane %v2104_v28, 1 }
 0x521   : > { %v2169_v56 = vrot.slane %v2103_v13, 1  ;;  %v2175_v13 = vrot.slane %v2106_v11, 1 }
 0x522   : > { %v2172_v30 = vsel %vm1499_vm2, %v2163_v29, %v2171_v51  ;;  %v2180_v29 = vsel %vm1499_vm2, %v2171_v51, %v2179_v38 }
 0x523   : > { %v2170_v23 = vsel %vm1499_vm2, %v2161_v44, %v2169_v56  ;;  %v2111_v44 = vmul.f32 %v9260_v37, %v9617_v36 }
 0x526   : > { %2213 = vrot.lane.b32.xlu2 %v2166_v15, %s7848_s15  ;;  %2211 = vrot.lane.b32.xlu1 %v2164_v42, %s7848_s15  ;;  %v9701_v15 = vld [vmem:[%s7946_s14 + $0x170] sm:$0xff] }
 0x527   : > { %2221 = vrot.lane.b32.xlu0 %v2174_v12, %s7848_s15  ;;  %17055 = vst [vmem:[#allocation159_spill] sm:$0xff] %v9701_v15  ;;  %v2107_v42 = vmul.f32 %v9701_v15, %v9617_v36  ;;  %v2185_v12 = vrot.slane %v2111_v44, 1  ;;  %v2176_v15 = vsel %vm1499_vm2, %v2167_v26, %v2175_v13  ;;  %v2114_v26 = vmul.f32 %v9270_v31, %v9613_v47 }
 0x529   : > { %v2177_v28 = vrot.slane %v2107_v42, 1  ;;  %v2191_v42 = vrot.slane %v2114_v26, 1 }
 0x52b   : > { %v2178_v4 = vsel %vm1499_vm2, %v2169_v56, %v2177_v28  ;;  %v2186_v11 = vsel %vm1499_vm2, %v2177_v28, %v2185_v12 }
 0x52e   : > { %2219 = vrot.lane.b32.xlu2 %v2172_v30, %s7848_s15  ;;  %2217 = vrot.lane.b32.xlu1 %v2170_v23, %s7848_s15  ;;  %v2110_v23 = vmul.f32 %v9719_v24, %v9613_v47  ;;  %v9724_v30 = vld [vmem:[%s7946_s14 + $0x180] sm:$0xff] }
 0x52f   : > { %2227 = vrot.lane.b32.xlu0 %v2180_v29, %s7848_s15  ;;  %17057 = vst [vmem:[#allocation14_spill] sm:$0xff] %v9724_v30  ;;  %v2109_v37 = vmul.f32 %v9724_v30, %v9578_v27  ;;  %v9739_v30 = vld [vmem:[%s7946_s14 + $0x198] sm:$0xff] }
 0x530   : > { %v2183_v51 = vrot.slane %v2110_v23, 1  ;;  %v6915_v47 = vld [vmem:[%s16313_s1 + $0x1e] ss:$8 sm:$0x7] }
 0x531   : > { %v2181_v56 = vrot.slane %v2109_v37, 1 }
 0x532   : > { %v2184_v29 = vsel %vm1499_vm2, %v2175_v13, %v2183_v51  ;;  %v2192_v31 = vsel %vm1499_vm2, %v2183_v51, %v2191_v42 }
 0x533   : > { %v2182_v44 = vsel %vm1499_vm2, %v2173_v32, %v2181_v56 }
 0x536   : > { %2225 = vrot.lane.b32.xlu2 %v2178_v4, %s7848_s15  ;;  %2223 = vrot.lane.b32.xlu1 %v2176_v15, %s7848_s15  ;;  %v2113_v4 = vmul.f32 %v9181_v19, %v9578_v27  ;;  %v2112_v15 = vmul.f32 %v9739_v30, %v9580_v0  ;;  %v9751_v19 = vld [vmem:[%s7946_s14 + $0x1b8] sm:$0x1]  ;;  %v2304_v27 = vperm.slane %v6915_v47, 0 }
 0x537   : > { %2233 = vrot.lane.b32.xlu0 %v2186_v11, %s7848_s15  ;;  %v2116_v37 = vmul.f32 %v9751_v19, %v9580_v0  ;;  %v2115_v11 = vmul.f32 %v9273_v45, %v9617_v36  ;;  %v2305_v0 = vperm.slane %v6915_v47, 1 }
 0x538   : > { %v2189_v32 = vrot.slane %v2113_v4, 1  ;;  %v2187_v28 = vrot.slane %v2112_v15, 1 }
 0x539   : > { %v2195_v26 = vrot.slane %v2116_v37, 1  ;;  %v2193_v51 = vrot.slane %v2115_v11, 1 }
 0x53a   : > { %v2190_v13 = vsel %vm1499_vm2, %v2181_v56, %v2189_v32  ;;  %v2188_v23 = vsel %vm1499_vm2, %v2179_v38, %v2187_v28  ;;  %v2306_v38 = vperm.slane %v6915_v47, 2 }
 0x53b   : > { %v2196_v42 = vsel %vm1499_vm2, %v2187_v28, %v2195_v26  ;;  %v2194_v56 = vsel %vm1499_vm2, %v2185_v12, %v2193_v51 }
 0x53e   : > { %2231 = vrot.lane.b32.xlu2 %v2184_v29, %s7848_s15  ;;  %2229 = vrot.lane.b32.xlu1 %v2182_v44, %s7848_s15 }
 0x53f   : > { %2239 = vrot.lane.b32.xlu0 %v2192_v31, %s7848_s15 }
 0x546   : > { %2237 = vrot.lane.b32.xlu2 %v2190_v13, %s7848_s15  ;;  %2235 = vrot.lane.b32.xlu1 %v2188_v23, %s7848_s15 }
 0x547   : > { %2307 = vrot.lane.b32.xlu0 %v2304_v27, %s7847_s9 }
 0x54e   : > { %2243 = vrot.lane.b32.xlu2 %v2196_v42, %s7848_s15  ;;  %2241 = vrot.lane.b32.xlu1 %v2194_v56, %s7848_s15 }
 0x556   : > { %2309 = vrot.lane.b32.xlu1 %v2305_v0, %s7847_s9  ;;  %2311 = vrot.lane.b32.xlu2 %v2306_v38, %s7847_s9 }
 0x570   : > { %v9768_v36 = vpop.permute.xlu2 %2201 }
 0x571   : > { %17058 = vst [vmem:[#allocation142_spill] sm:$0xff] %v9768_v36 }
 0x578   : > { %v9770_v45 = vpop.permute.xlu2 %2207 }
 0x579   : > { %17059 = vst [vmem:[#allocation140_spill] sm:$0xff] %v9770_v45  ;;  %v9772_v29 = vpop.permute.xlu0 %2197 }
 0x57a   : > { %17060 = vst [vmem:[#allocation160_spill] sm:$0xff] %v9772_v29  ;;  %v9834_v29 = vld [vmem:[%s7946_s14 + $0x1f8] sm:$0xff] }
 0x57b   : > { %17084 = vst [vmem:[#allocation184_spill] sm:$0xff] %v9834_v29 }
 0x580   : > { %v9774_v44 = vpop.permute.xlu2 %2213 }
 0x581   : > { %17061 = vst [vmem:[#allocation161_spill] sm:$0xff] %v9774_v44  ;;  %v9776_v4 = vpop.permute.xlu0 %2203  ;;  %v9815_v44 = vld [vmem:[%s7946_s14 + $0x1c0] sm:$0xfe] }
 0x582   : > { %17062 = vst [vmem:[#allocation162_spill] sm:$0xff] %v9776_v4 }
 0x583   : > { %17081 = vst [vmem:[#allocation181_spill] sm:$0xff] %v9815_v44 }
 0x588   : > { %v9778_v12 = vpop.permute.xlu1 %2199  ;;  %v9780_v15 = vpop.permute.xlu2 %2219 }
 0x589   : > { %17063 = vst [vmem:[#allocation163_spill] sm:$0xff] %v9778_v12  ;;  %v9782_v31 = vpop.permute.xlu0 %2209 }
 0x58a   : > { %17064 = vst [vmem:[#allocation164_spill] sm:$0xff] %v9780_v15 }
 0x58b   : > { %17065 = vst [vmem:[#allocation165_spill] sm:$0xff] %v9782_v31 }
 0x590   : > { %v9784_v47 = vpop.permute.xlu1 %2205  ;;  %v9788_v28 = vpop.permute.xlu2 %2225 }
 0x591   : > { %17066 = vst [vmem:[#allocation166_spill] sm:$0xff] %v9784_v47  ;;  %v9786_v32 = vpop.permute.xlu0 %2215  ;;  %v9827_v47 = vld [vmem:[%s7946_s14 + $0x1e0] sm:$0xff] }
 0x592   : > { %17067 = vst [vmem:[#allocation167_spill] sm:$0xff] %v9786_v32  ;;  %v9822_v32 = vld [vmem:[%s7946_s14 + $0x1d8] sm:$0xfe] }
 0x593   : > { %17068 = vst [vmem:[#allocation168_spill] sm:$0xff] %v9788_v28 }
 0x594   : > { %17082 = vst [vmem:[#allocation182_spill] sm:$0xff] %v9822_v32 }
 0x595   : > { %17083 = vst [vmem:[#allocation183_spill] sm:$0xff] %v9827_v47 }
 0x598   : > { %v9790_v27 = vpop.permute.xlu1 %2211  ;;  %v9794_v23 = vpop.permute.xlu2 %2231 }
 0x599   : > { %17069 = vst [vmem:[#allocation169_spill] sm:$0xff] %v9790_v27  ;;  %v9792_v13 = vpop.permute.xlu0 %2221 }
 0x59a   : > { %17070 = vst [vmem:[#allocation170_spill] sm:$0xff] %v9792_v13 }
 0x59b   : > { %17071 = vst [vmem:[#allocation171_spill] sm:$0xff] %v9794_v23 }
 0x5a0   : > { %v9796_v37 = vpop.permute.xlu1 %2217  ;;  %v9800_v26 = vpop.permute.xlu2 %2237 }
 0x5a1   : > { %17072 = vst [vmem:[#allocation172_spill] sm:$0xff] %v9796_v37  ;;  %v9798_v11 = vpop.permute.xlu0 %2227 }
 0x5a2   : > { %17073 = vst [vmem:[#allocation173_spill] sm:$0xff] %v9798_v11 }
 0x5a3   : > { %17074 = vst [vmem:[#allocation174_spill] sm:$0xff] %v9800_v26  ;;  %v9845_v26 = vld [vmem:[%s7946_s14 + $0x1d0] sm:$0xfe] }
 0x5a4   : > { %17086 = vst [vmem:[#allocation186_spill] sm:$0xff] %v9845_v26 }
 0x5a8   : > { %v9802_v51 = vpop.permute.xlu1 %2223  ;;  %v9808_v0 = vpop.permute.xlu2 %2243 }
 0x5a9   : > { %17075 = vst [vmem:[#allocation175_spill] sm:$0xff] %v9802_v51  ;;  %v9804_v42 = vpop.permute.xlu0 %2233 }
 0x5aa   : > { %17076 = vst [vmem:[#allocation176_spill] sm:$0xff] %v9804_v42 }
 0x5ab   : > { %17078 = vst [vmem:[#allocation178_spill] sm:$0xff] %v9808_v0 }
 0x5b0   : > { %v9806_v56 = vpop.permute.xlu1 %2229  ;;  %v9819_v27 = vpop.permute.xlu2 %2311 }
 0x5b1   : > { %17077 = vst [vmem:[#allocation177_spill] sm:$0xff] %v9806_v56  ;;  %v9810_v38 = vpop.permute.xlu0 %2239  ;;  %v2322_v36 = vmul.f32 %v9822_v32, %v9819_v27  ;;  %v2326_v12 = vmul.f32 %v9834_v29, %v9819_v27 }
 0x5b2   : > { %17079 = vst [vmem:[#allocation179_spill] sm:$0xff] %v9810_v38  ;;  %v9848_v38 = vld [vmem:[%s7946_s14 + $0x1c8] sm:$0xfe] }
 0x5b3   : > { %17087 = vst [vmem:[#allocation187_spill] sm:$0xff] %v9848_v38 }
 0x5b8   : > { %v9812_v13 = vpop.permute.xlu1 %2235 }
 0x5b9   : > { %17080 = vst [vmem:[#allocation180_spill] sm:$0xff] %v9812_v13  ;;  %v9817_v4 = vpop.permute.xlu0 %2307  ;;  %v2384_v13 = vrot.slane %v2322_v36, 1 }
 0x5ba   : > { %v2319_v51 = vmul.f32 %v9815_v44, %v9817_v4  ;;  %v2323_v0 = vmul.f32 %v9827_v47, %v9817_v4  ;;  %v9880_v47 = vld [vmem:[%s7946_s14 + $0x208] sm:$0xff]  ;;  %v9885_v44 = vld [vmem:[%s7946_s14 + $0x200] sm:$0xff] }
 0x5bb   : > { %17090 = vst [vmem:[#allocation190_spill] sm:$0xff] %v9880_v47 }
 0x5bc   : > { %v2375_v45 = vrot.slane %v2319_v51, 1  ;;  %v2376_v31 = vrot.slane %v2323_v0, 1  ;;  %v2385_v51 = vrot.slane %v2326_v12, 1  ;;  %v9861_v12 = vld [vmem:[%s7946_s14 + $0x1f0] sm:$0xff]  ;;  %17091 = vst [vmem:[#allocation191_spill] sm:$0xff] %v9885_v44 }
 0x5bd   : > { %17088 = vst [vmem:[#allocation188_spill] sm:$0xff] %v9861_v12 }
 0x5be   : > { %v2377_v37 = vsel %vm1499_vm2, %v2375_v45, %v2376_v31  ;;  %v2386_v0 = vsel %vm1499_vm2, %v2384_v13, %v2385_v51 }
 0x5bf   : > { %2427 = vrot.lane.b32.xlu0 %v2377_v37, %s7848_s15 }
 0x5c0   : > { %v9840_v15 = vpop.permute.xlu1 %2241 }
 0x5c1   : > { %17085 = vst [vmem:[#allocation185_spill] sm:$0xff] %v9840_v15  ;;  %v9868_v15 = vld [vmem:[%s7946_s14 + $0x1e8] sm:$0xff] }
 0x5c2   : > { %17089 = vst [vmem:[#allocation189_spill] sm:$0xff] %v9868_v15 }
 0x5c7   : > { %2433 = vrot.lane.b32.xlu0 %v2386_v0, %s7848_s15 }
 0x5c8   : > { %v2310_v56 = vpop.permute.xlu1 %2309 }
 0x5c9   : > { %v9852_v45 = vsel %vm430_vm0, %v9817_v4, %v2310_v56  ;;  %v9856_v37 = vsel %vm430_vm0, %v2310_v56, %v9819_v27  ;;  %v9873_v56 = vld [vmem:[%s7946_s14 + $0x210] sm:$0xff] }
 0x5ca   : > { %v2321_v36 = vmul.f32 %v9845_v26, %v9856_v37  ;;  %v2325_v13 = vmul.f32 %v9861_v12, %v9856_v37  ;;  %v2320_v0 = vmul.f32 %v9848_v38, %v9852_v45  ;;  %v2324_v23 = vmul.f32 %v9868_v15, %v9852_v45 }
 0x5cb   : > { %v2329_v42 = vmul.f32 %v9873_v56, %v9856_v37  ;;  %v2328_v15 = vmul.f32 %v9880_v47, %v9852_v45 }
 0x5cc   : > { %v2381_v28 = vrot.slane %v2321_v36, 1  ;;  %v2382_v11 = vrot.slane %v2325_v13, 1  ;;  %v2378_v26 = vrot.slane %v2320_v0, 1  ;;  %v2379_v29 = vrot.slane %v2324_v23, 1  ;;  %v9893_v23 = vld [vmem:[%s7946_s14 + $0x228] sm:$0xff] }
 0x5cd   : > { %v2391_v32 = vrot.slane %v2329_v42, 1  ;;  %v2327_v36 = vmul.f32 %v9885_v44, %v9817_v4  ;;  %17092 = vst [vmem:[#allocation192_spill] sm:$0xff] %v9893_v23  ;;  %v2389_v42 = vrot.slane %v2328_v15, 1  ;;  %v9914_v15 = vld [vmem:[%s7946_s14 + $0x240] sm:$0xff] }
 0x5ce   : > { %v2383_v12 = vsel %vm1499_vm2, %v2381_v28, %v2382_v11  ;;  %v2380_v38 = vsel %vm1499_vm2, %v2378_v26, %v2379_v29  ;;  %v2332_v26 = vmul.f32 %v9893_v23, %v9852_v45  ;;  %17095 = vst [vmem:[#allocation195_spill] sm:$0xff] %v9914_v15 }
 0x5cf   : > { %2431 = vrot.lane.b32.xlu2 %v2383_v12, %s7848_s15  ;;  %2429 = vrot.lane.b32.xlu1 %v2380_v38, %s7848_s15  ;;  %v2392_v28 = vsel %vm1499_vm2, %v2382_v11, %v2391_v32  ;;  %v2387_v13 = vrot.slane %v2327_v36, 1  ;;  %v2390_v47 = vsel %vm1499_vm2, %v2379_v29, %v2389_v42  ;;  %v9901_v12 = vld [vmem:[%s7946_s14 + $0x220] sm:$0xff]  ;;  %v9906_v38 = vld [vmem:[%s7946_s14 + $0x218] sm:$0xff] }
 0x5d0   : > { %2439 = vrot.lane.b32.xlu0 %v2392_v28, %s7848_s15  ;;  %v2397_v0 = vrot.slane %v2332_v26, 1  ;;  %17093 = vst [vmem:[#allocation193_spill] sm:$0xff] %v9901_v12  ;;  %v2331_v11 = vmul.f32 %v9901_v12, %v9817_v4  ;;  %v2330_v23 = vmul.f32 %v9906_v38, %v9819_v27 }
 0x5d1   : > { %v2388_v44 = vsel %vm1499_vm2, %v2376_v31, %v2387_v13  ;;  %17094 = vst [vmem:[#allocation194_spill] sm:$0xff] %v9906_v38  ;;  %v2335_v31 = vmul.f32 %v9914_v15, %v9817_v4 }
 0x5d2   : > { %v2398_v29 = vsel %vm1499_vm2, %v2389_v42, %v2397_v0  ;;  %v2395_v36 = vrot.slane %v2331_v11, 1  ;;  %v2393_v28 = vrot.slane %v2330_v23, 1  ;;  %v9927_v42 = vld [vmem:[%s7946_s14 + $0x230] sm:$0xff] }
 0x5d3   : > { %v2403_v26 = vrot.slane %v2335_v31, 1  ;;  %17097 = vst [vmem:[#allocation197_spill] sm:$0xff] %v9927_v42  ;;  %v2333_v15 = vmul.f32 %v9927_v42, %v9856_v37 }
 0x5d4   : > { %v2396_v12 = vsel %vm1499_vm2, %v2387_v13, %v2395_v36  ;;  %v2394_v38 = vsel %vm1499_vm2, %v2385_v51, %v2393_v28  ;;  %v9935_v51 = vld [vmem:[%s7946_s14 + $0x258] sm:$0xff] }
 0x5d5   : > { %v2404_v23 = vsel %vm1499_vm2, %v2395_v36, %v2403_v26  ;;  %17098 = vst [vmem:[#allocation198_spill] sm:$0xff] %v9935_v51  ;;  %v2338_v13 = vmul.f32 %v9935_v51, %v9819_v27  ;;  %v9948_v36 = vld [vmem:[%s7946_s14 + $0x248] sm:$0xff] }
 0x5d6   : > { %17100 = vst [vmem:[#allocation200_spill] sm:$0xff] %v9948_v36  ;;  %v2336_v51 = vmul.f32 %v9948_v36, %v9852_v45 }
 0x5d7   : > { %2437 = vrot.lane.b32.xlu2 %v2390_v47, %s7848_s15  ;;  %2435 = vrot.lane.b32.xlu1 %v2388_v44, %s7848_s15  ;;  %v9922_v47 = vld [vmem:[%s7946_s14 + $0x238] sm:$0xff]  ;;  %v2409_v31 = vrot.slane %v2338_v13, 1 }
 0x5d8   : > { %2445 = vrot.lane.b32.xlu0 %v2398_v29, %s7848_s15  ;;  %17096 = vst [vmem:[#allocation196_spill] sm:$0xff] %v9922_v47  ;;  %v2334_v44 = vmul.f32 %v9922_v47, %v9819_v27  ;;  %v2399_v29 = vrot.slane %v2333_v15, 1 }
 0x5da   : > { %v2401_v11 = vrot.slane %v2334_v44, 1  ;;  %v2400_v42 = vsel %vm1499_vm2, %v2391_v32, %v2399_v29 }
 0x5dc   : > { %v2402_v47 = vsel %vm1499_vm2, %v2393_v28, %v2401_v11  ;;  %v2410_v15 = vsel %vm1499_vm2, %v2401_v11, %v2409_v31  ;;  %v9956_v28 = vld [vmem:[%s7946_s14 + $0x270] sm:$0xff]  ;;  %v9969_v11 = vld [vmem:[%s7946_s14 + $0x260] sm:$0xff] }
 0x5dd   : > { %17101 = vst [vmem:[#allocation201_spill] sm:$0xff] %v9956_v28  ;;  %v2341_v32 = vmul.f32 %v9956_v28, %v9856_v37  ;;  %v2339_v28 = vmul.f32 %v9969_v11, %v9817_v4 }
 0x5de   : > { %17103 = vst [vmem:[#allocation203_spill] sm:$0xff] %v9969_v11  ;;  %v9984_v11 = vld [vmem:[%s7946_s14 + $0x278] sm:$0xff] }
 0x5df   : > { %2443 = vrot.lane.b32.xlu2 %v2396_v12, %s7848_s15  ;;  %2441 = vrot.lane.b32.xlu1 %v2394_v38, %s7848_s15  ;;  %v9943_v12 = vld [vmem:[%s7946_s14 + $0x250] sm:$0xff]  ;;  %v2415_v13 = vrot.slane %v2341_v32, 1 }
 0x5e0   : > { %2451 = vrot.lane.b32.xlu0 %v2404_v23, %s7848_s15  ;;  %17099 = vst [vmem:[#allocation199_spill] sm:$0xff] %v9943_v12  ;;  %v2337_v38 = vmul.f32 %v9943_v12, %v9856_v37  ;;  %v2405_v23 = vrot.slane %v2336_v51, 1 }
 0x5e2   : > { %v2407_v44 = vrot.slane %v2337_v38, 1  ;;  %v2406_v36 = vsel %vm1499_vm2, %v2397_v0, %v2405_v23  ;;  %v2344_v0 = vmul.f32 %v9284_v3, %v9852_v45  ;;  %v2411_v38 = vrot.slane %v2339_v28, 1 }
 0x5e4   : > { %v2408_v12 = vsel %vm1499_vm2, %v2399_v29, %v2407_v44  ;;  %v2416_v51 = vsel %vm1499_vm2, %v2407_v44, %v2415_v13 }
 0x5e7   : > { %2449 = vrot.lane.b32.xlu2 %v2402_v47, %s7848_s15  ;;  %2447 = vrot.lane.b32.xlu1 %v2400_v42, %s7848_s15  ;;  %v9964_v47 = vld [vmem:[%s7946_s14 + $0x268] sm:$0xff] }
 0x5e8   : > { %2457 = vrot.lane.b32.xlu0 %v2410_v15, %s7848_s15  ;;  %17102 = vst [vmem:[#allocation202_spill] sm:$0xff] %v9964_v47  ;;  %v2340_v42 = vmul.f32 %v9964_v47, %v9852_v45  ;;  %v2421_v15 = vrot.slane %v2344_v0, 1  ;;  %v2412_v47 = vsel %vm1499_vm2, %v2403_v26, %v2411_v38  ;;  %v6916_v45 = vld [vmem:[%s16313_s1 + $0x1f] ss:$8 sm:$0x7] }
 0x5ea   : > { %v2413_v29 = vrot.slane %v2340_v42, 1  ;;  %v2345_v42 = vmul.f32 %v9287_v55, %v9856_v37 }
 0x5ec   : > { %v2414_v32 = vsel %vm1499_vm2, %v2405_v23, %v2413_v29  ;;  %v2422_v3 = vsel %vm1499_vm2, %v2413_v29, %v2421_v15  ;;  %v2423_v0 = vrot.slane %v2345_v42, 1 }
 0x5ef   : > { %2455 = vrot.lane.b32.xlu2 %v2408_v12, %s7848_s15  ;;  %2453 = vrot.lane.b32.xlu1 %v2406_v36, %s7848_s15  ;;  %v2343_v12 = vmul.f32 %v9215_v40, %v9817_v4  ;;  %v2342_v36 = vmul.f32 %v9984_v11, %v9819_v27  ;;  %v9996_v40 = vld [vmem:[%s7946_s14 + $0x298] sm:$0x1]  ;;  %v2532_v4 = vperm.slane %v6916_v45, 0 }
 0x5f0   : > { %2463 = vrot.lane.b32.xlu0 %v2416_v51, %s7848_s15 }
 0x5f1   : > { %v2419_v26 = vrot.slane %v2343_v12, 1  ;;  %v2417_v28 = vrot.slane %v2342_v36, 1 }
 0x5f3   : > { %v2420_v44 = vsel %vm1499_vm2, %v2411_v38, %v2419_v26  ;;  %v2418_v23 = vsel %vm1499_vm2, %v2409_v31, %v2417_v28  ;;  %v2424_v38 = vsel %vm1499_vm2, %v2415_v13, %v2423_v0  ;;  %v2534_v31 = vperm.slane %v6916_v45, 2 }
 0x5f7   : > { %2461 = vrot.lane.b32.xlu2 %v2414_v32, %s7848_s15  ;;  %2459 = vrot.lane.b32.xlu1 %v2412_v47, %s7848_s15  ;;  %v2346_v47 = vmul.f32 %v9996_v40, %v9819_v27  ;;  %v2533_v27 = vperm.slane %v6916_v45, 1 }
 0x5f8   : > { %2469 = vrot.lane.b32.xlu0 %v2422_v3, %s7848_s15 }
 0x5f9   : > { %v2425_v51 = vrot.slane %v2346_v47, 1 }
 0x5fb   : > { %v2426_v29 = vsel %vm1499_vm2, %v2417_v28, %v2425_v51 }
 0x5ff   : > { %2467 = vrot.lane.b32.xlu2 %v2420_v44, %s7848_s15  ;;  %2465 = vrot.lane.b32.xlu1 %v2418_v23, %s7848_s15 }
 0x600   : > { %2535 = vrot.lane.b32.xlu0 %v2532_v4, %s7849_s26 }
 0x607   : > { %2473 = vrot.lane.b32.xlu2 %v2426_v29, %s7848_s15  ;;  %2471 = vrot.lane.b32.xlu1 %v2424_v38, %s7848_s15 }
 0x60f   : > { %2537 = vrot.lane.b32.xlu1 %v2533_v27, %s7849_s26  ;;  %2539 = vrot.lane.b32.xlu2 %v2534_v31, %s7849_s26 }
 0x629   : > { %v10013_v55 = vpop.permute.xlu2 %2431 }
 0x62a   : > { %17104 = vst [vmem:[#allocation204_spill] sm:$0xff] %v10013_v55 }
 0x631   : > { %v10015_v37 = vpop.permute.xlu2 %2437  ;;  %v10017_v15 = vpop.permute.xlu0 %2427 }
 0x632   : > { %17105 = vst [vmem:[#allocation205_spill] sm:$0xff] %v10015_v37 }
 0x633   : > { %17106 = vst [vmem:[#allocation206_spill] sm:$0xff] %v10017_v15 }
 0x639   : > { %v10019_v32 = vpop.permute.xlu2 %2443  ;;  %v10021_v12 = vpop.permute.xlu0 %2433 }
 0x63a   : > { %17107 = vst [vmem:[#allocation207_spill] sm:$0xff] %v10019_v32 }
 0x63b   : > { %17108 = vst [vmem:[#allocation208_spill] sm:$0xff] %v10021_v12 }
 0x641   : > { %v10023_v13 = vpop.permute.xlu1 %2429  ;;  %v10025_v36 = vpop.permute.xlu2 %2449 }
 0x642   : > { %17109 = vst [vmem:[#allocation209_spill] sm:$0xff] %v10023_v13  ;;  %v10027_v3 = vpop.permute.xlu0 %2439 }
 0x643   : > { %17110 = vst [vmem:[#allocation210_spill] sm:$0xff] %v10025_v36 }
 0x644   : > { %17111 = vst [vmem:[#allocation211_spill] sm:$0xff] %v10027_v3 }
 0x649   : > { %v10029_v45 = vpop.permute.xlu1 %2435  ;;  %v10033_v28 = vpop.permute.xlu2 %2455 }
 0x64a   : > { %17112 = vst [vmem:[#allocation212_spill] sm:$0xff] %v10029_v45  ;;  %v10031_v26 = vpop.permute.xlu0 %2445 }
 0x64b   : > { %17113 = vst [vmem:[#allocation213_spill] sm:$0xff] %v10031_v26 }
 0x64c   : > { %17114 = vst [vmem:[#allocation214_spill] sm:$0xff] %v10033_v28 }
 0x651   : > { %v10035_v4 = vpop.permute.xlu1 %2441  ;;  %v10039_v23 = vpop.permute.xlu2 %2461 }
 0x652   : > { %17115 = vst [vmem:[#allocation215_spill] sm:$0xff] %v10035_v4  ;;  %v10037_v44 = vpop.permute.xlu0 %2451 }
 0x653   : > { %17116 = vst [vmem:[#allocation216_spill] sm:$0xff] %v10037_v44 }
 0x659   : > { %v10041_v47 = vpop.permute.xlu1 %2447  ;;  %v10045_v51 = vpop.permute.xlu2 %2467 }
 0x65a   : > { %17117 = vst [vmem:[#allocation217_spill] sm:$0xff] %v10041_v47  ;;  %v10043_v42 = vpop.permute.xlu0 %2457 }
 0x661   : > { %v10047_v0 = vpop.permute.xlu1 %2453  ;;  %v10053_v27 = vpop.permute.xlu2 %2473 }
 0x662   : > { %17118 = vst [vmem:[#allocation218_spill] sm:$0xff] %v10047_v0  ;;  %v10049_v29 = vpop.permute.xlu0 %2463 }
 0x663   : > { %17119 = vst [vmem:[#allocation219_spill] sm:$0xff] %v10049_v29 }
 0x664   : > { %17120 = vst [vmem:[#allocation220_spill] sm:$0xff] %v10053_v27 }
 0x669   : > { %v10051_v38 = vpop.permute.xlu1 %2459  ;;  %v10061_v12 = vpop.permute.xlu2 %2539 }
 0x66a   : > { %v10055_v31 = vpop.permute.xlu0 %2469  ;;  %v2550_v3 = vmul.f32 %v10061_v12, %v9297_v53  ;;  %v2554_v27 = vmul.f32 %v9323_v7, %v10061_v12 }
 0x66c   : > { %v2612_v13 = vrot.slane %v2550_v3, 1  ;;  %v2613_v26 = vrot.slane %v2554_v27, 1 }
 0x671   : > { %v10057_v32 = vpop.permute.xlu1 %2465 }
 0x672   : > { %17121 = vst [vmem:[#allocation221_spill] sm:$0xff] %v10057_v32  ;;  %v10059_v44 = vpop.permute.xlu0 %2535 }
 0x673   : > { %v2547_v4 = vmul.f32 %v10059_v44, %v9290_v48  ;;  %v2551_v0 = vmul.f32 %v9306_v54, %v10059_v44  ;;  %v2614_v48 = vsel %vm1499_vm2, %v2612_v13, %v2613_v26 }
 0x675   : > { %v2603_v45 = vrot.slane %v2547_v4, 1  ;;  %v2604_v37 = vrot.slane %v2551_v0, 1 }
 0x677   : > { %v2605_v55 = vsel %vm1499_vm2, %v2603_v45, %v2604_v37 }
 0x678   : > { %2655 = vrot.lane.b32.xlu0 %v2605_v55, %s7850_s30 }
 0x679   : > { %v10073_v15 = vpop.permute.xlu1 %2471 }
 0x67a   : > { %17122 = vst [vmem:[#allocation222_spill] sm:$0xff] %v10073_v15 }
 0x680   : > { %2661 = vrot.lane.b32.xlu0 %v2614_v48, %s7850_s30 }
 0x681   : > { %v2538_v54 = vpop.permute.xlu1 %2537 }
 0x682   : > { %v10079_v4 = vsel %vm948_vm1, %v10059_v44, %v2538_v54  ;;  %v10083_v53 = vsel %vm948_vm1, %v2538_v54, %v10061_v12 }
 0x683   : > { %v2553_v7 = vmul.f32 %v9385_v34, %v10083_v53  ;;  %v2557_v55 = vmul.f32 %v9397_v25, %v10083_v53  ;;  %v2549_v13 = vmul.f32 %v10083_v53, %v9368_v14  ;;  %v2548_v3 = vmul.f32 %v10079_v4, %v9371_v43 }
 0x684   : > { %v2552_v45 = vmul.f32 %v9392_v9, %v10079_v4  ;;  %v2556_v25 = vmul.f32 %v9404_v1, %v10079_v4  ;;  %v2560_v14 = vmul.f32 %v9417_v58, %v10079_v4  ;;  %v2555_v9 = vmul.f32 %v9409_v60, %v10059_v44 }
 0x685   : > { %v2610_v0 = vrot.slane %v2553_v7, 1  ;;  %v2619_v27 = vrot.slane %v2557_v55, 1  ;;  %v2609_v48 = vrot.slane %v2549_v13, 1  ;;  %v2606_v54 = vrot.slane %v2548_v3, 1 }
 0x686   : > { %v2607_v47 = vrot.slane %v2552_v45, 1  ;;  %v2617_v7 = vrot.slane %v2556_v25, 1  ;;  %v2625_v55 = vrot.slane %v2560_v14, 1  ;;  %v2615_v13 = vrot.slane %v2555_v9, 1  ;;  %v10112_v45 = vld [vmem:[%s7946_s14 + $0x80] sm:$0xff] }
 0x687   : > { %v2620_v34 = vsel %vm1499_vm2, %v2610_v0, %v2619_v27  ;;  %v2611_v36 = vsel %vm1499_vm2, %v2609_v48, %v2610_v0  ;;  %v2559_v58 = vmul.f32 %v9427_v2, %v10059_v44  ;;  %v2558_v0 = vmul.f32 %v9432_v46, %v10061_v12 }
 0x688   : > { %2667 = vrot.lane.b32.xlu0 %v2620_v34, %s7850_s30  ;;  %2659 = vrot.lane.b32.xlu2 %v2611_v36, %s7850_s30  ;;  %v2608_v43 = vsel %vm1499_vm2, %v2606_v54, %v2607_v47  ;;  %v2626_v3 = vsel %vm1499_vm2, %v2617_v7, %v2625_v55  ;;  %v2618_v1 = vsel %vm1499_vm2, %v2607_v47, %v2617_v7 }
 0x689   : > { %2657 = vrot.lane.b32.xlu1 %v2608_v43, %s7850_s30  ;;  %v2563_v36 = vmul.f32 %v10112_v45, %v10059_v44  ;;  %v2616_v60 = vsel %vm1499_vm2, %v2604_v37, %v2615_v13  ;;  %v2623_v47 = vrot.slane %v2559_v58, 1  ;;  %v2621_v54 = vrot.slane %v2558_v0, 1 }
 0x68a   : > { %v2562_v25 = vmul.f32 %v9447_v52, %v10061_v12  ;;  %v2566_v14 = vmul.f32 %v9460_v17, %v10061_v12  ;;  %v2561_v37 = vmul.f32 %v9452_v21, %v10083_v53  ;;  %v2565_v17 = vmul.f32 %v9468_v5, %v10083_v53 }
 0x68b   : > { %v2631_v48 = vrot.slane %v2563_v36, 1  ;;  %v2624_v34 = vsel %vm1499_vm2, %v2615_v13, %v2623_v47  ;;  %v2622_v46 = vsel %vm1499_vm2, %v2613_v26, %v2621_v54 }
 0x68c   : > { %v2629_v43 = vrot.slane %v2562_v25, 1  ;;  %v2637_v9 = vrot.slane %v2566_v14, 1  ;;  %v2627_v7 = vrot.slane %v2561_v37, 1  ;;  %v2635_v58 = vrot.slane %v2565_v17, 1 }
 0x68d   : > { %v2632_v2 = vsel %vm1499_vm2, %v2623_v47, %v2631_v48  ;;  %v10149_v47 = vld [vmem:[%s7946_s14 + $0xa8] sm:$0xff]  ;;  %v6917_v17 = vld [vmem:[%s16313_s1 + $0x30] ss:$8 sm:$0x7] }
 0x68e   : > { %v2638_v52 = vsel %vm1499_vm2, %v2629_v43, %v2637_v9  ;;  %v2630_v13 = vsel %vm1499_vm2, %v2621_v54, %v2629_v43  ;;  %v2628_v21 = vsel %vm1499_vm2, %v2619_v27, %v2627_v7  ;;  %v2636_v0 = vsel %vm1499_vm2, %v2627_v7, %v2635_v58  ;;  %v7617_v7 = vld [vmem:[%s7946_s14 + $0xc0] sm:$0x1] }
 0x68f   : > { %v2568_v54 = vmul.f32 %v10149_v47, %v10079_v4 }
 0x690   : > { %2673 = vrot.lane.b32.xlu0 %v2626_v3, %s7850_s30  ;;  %2665 = vrot.lane.b32.xlu2 %v2618_v1, %s7850_s30  ;;  %v7613_v3 = vld [vmem:[%s7946_s14 + $0xb0] sm:$0xff]  ;;  %v2564_v1 = vmul.f32 %v9473_v63, %v10079_v4 }
 0x691   : > { %2663 = vrot.lane.b32.xlu1 %v2616_v60, %s7850_s30  ;;  %v2569_v26 = vmul.f32 %v7613_v3, %v10083_v53  ;;  %v2641_v14 = vrot.slane %v2568_v54, 1 }
 0x692   : > { %v2633_v60 = vrot.slane %v2564_v1, 1  ;;  %v2574_v1 = vmul.f32 %v10061_v12, %v9512_v57  ;;  %v2762_v57 = vperm.slane %v6917_v17, 2 }
 0x693   : > { %v2643_v36 = vrot.slane %v2569_v26, 1  ;;  %v2760_v26 = vperm.slane %v6917_v17, 0 }
 0x694   : > { %v2634_v63 = vsel %vm1499_vm2, %v2625_v55, %v2633_v60 }
 0x695   : > { %v2644_v5 = vsel %vm1499_vm2, %v2635_v58, %v2643_v36 }
 0x698   : > { %2679 = vrot.lane.b32.xlu0 %v2632_v2, %s7850_s30  ;;  %2671 = vrot.lane.b32.xlu2 %v2624_v34, %s7850_s30  ;;  %v7615_v2 = vld [vmem:[%s7946_s14 + $0xc8] sm:$0x1]  ;;  %v10159_v34 = vld [vmem:[%s7946_s14 + $0xa0] sm:$0xff] }
 0x699   : > { %2669 = vrot.lane.b32.xlu1 %v2622_v46, %s7850_s30  ;;  %v2572_v27 = vmul.f32 %v7615_v2, %v10079_v4  ;;  %v2567_v25 = vmul.f32 %v10159_v34, %v10059_v44  ;;  %v2642_v4 = vsel %vm1499_vm2, %v2633_v60, %v2641_v14  ;;  %v2653_v60 = vrot.slane %v2574_v1, 1 }
 0x69b   : > { %v2649_v46 = vrot.slane %v2572_v27, 1  ;;  %v2639_v37 = vrot.slane %v2567_v25, 1 }
 0x69d   : > { %v2650_v43 = vsel %vm1499_vm2, %v2641_v14, %v2649_v46  ;;  %v2640_v55 = vsel %vm1499_vm2, %v2631_v48, %v2639_v37  ;;  %v7618_v48 = vld [vmem:[%s7946_s14 + $0xd0] sm:$0x1] }
 0x69e   : > { %v2573_v58 = vmul.f32 %v7618_v48, %v10083_v53 }
 0x6a0   : > { %2685 = vrot.lane.b32.xlu0 %v2638_v52, %s7850_s30  ;;  %2677 = vrot.lane.b32.xlu2 %v2630_v13, %s7850_s30  ;;  %v2571_v52 = vmul.f32 %v7617_v7, %v10059_v44  ;;  %v2570_v13 = vmul.f32 %v9500_v8, %v10061_v12  ;;  %v2761_v12 = vperm.slane %v6917_v17, 1 }
 0x6a1   : > { %2675 = vrot.lane.b32.xlu1 %v2628_v21, %s7850_s30 }
 0x6a2   : > { %v2647_v3 = vrot.slane %v2571_v52, 1  ;;  %v2645_v21 = vrot.slane %v2570_v13, 1 }
 0x6a4   : > { %v2648_v44 = vsel %vm1499_vm2, %v2639_v37, %v2647_v3  ;;  %v2646_v8 = vsel %vm1499_vm2, %v2637_v9, %v2645_v21 }
 0x6a8   : > { %2691 = vrot.lane.b32.xlu0 %v2644_v5, %s7850_s30  ;;  %2683 = vrot.lane.b32.xlu2 %v2636_v0, %s7850_s30  ;;  %v2651_v5 = vrot.slane %v2573_v58, 1  ;;  %v2654_v0 = vsel %vm1499_vm2, %v2645_v21, %v2653_v60 }
 0x6a9   : > { %2681 = vrot.lane.b32.xlu1 %v2634_v63, %s7850_s30 }
 0x6aa   : > { %v2652_v54 = vsel %vm1499_vm2, %v2643_v36, %v2651_v5 }
 0x6b0   : > { %2697 = vrot.lane.b32.xlu0 %v2650_v43, %s7850_s30  ;;  %2689 = vrot.lane.b32.xlu2 %v2642_v4, %s7850_s30 }
 0x6b1   : > { %2687 = vrot.lane.b32.xlu1 %v2640_v55, %s7850_s30 }
 0x6b8   : > { %2763 = vrot.lane.b32.xlu0 %v2760_v26, %s7849_s26  ;;  %2695 = vrot.lane.b32.xlu2 %v2648_v44, %s7850_s30 }
 0x6b9   : > { %2693 = vrot.lane.b32.xlu1 %v2646_v8, %s7850_s30 }
 0x6c0   : > { %2701 = vrot.lane.b32.xlu2 %v2654_v0, %s7850_s30 }
 0x6c1   : > { %2699 = vrot.lane.b32.xlu1 %v2652_v54, %s7850_s30 }
 0x6c8   : > { %2767 = vrot.lane.b32.xlu2 %v2762_v57, %s7849_s26 }
 0x6c9   : > { %2765 = vrot.lane.b32.xlu1 %v2761_v12, %s7849_s26 }
 0x6e2   : > { %v10192_v9 = vpop.permute.xlu2 %2659 }
 0x6e3   : > { %17123 = vst [vmem:[#allocation223_spill] sm:$0xff] %v10192_v9  ;;  %v7625_v9 = vld [vmem:[%s7946_s14 + $0x280] sm:$0x1] }
 0x6ea   : > { %v10194_v53 = vpop.permute.xlu0 %2655  ;;  %v10196_v2 = vpop.permute.xlu2 %2665 }
 0x6eb   : > { %17124 = vst [vmem:[#allocation224_spill] sm:$0xff] %v10194_v53 }
 0x6ec   : > { %17125 = vst [vmem:[#allocation225_spill] sm:$0xff] %v10196_v2 }
 0x6f2   : > { %v10198_v27 = vpop.permute.xlu0 %2661  ;;  %v10200_v63 = vpop.permute.xlu2 %2671 }
 0x6f3   : > { %17126 = vst [vmem:[#allocation226_spill] sm:$0xff] %v10198_v27 }
 0x6f4   : > { %17127 = vst [vmem:[#allocation227_spill] sm:$0xff] %v10200_v63 }
 0x6fa   : > { %v10202_v25 = vpop.permute.xlu0 %2667  ;;  %v10204_v36 = vpop.permute.xlu2 %2677 }
 0x6fb   : > { %17128 = vst [vmem:[#allocation228_spill] sm:$0xff] %v10202_v25  ;;  %v10206_v14 = vpop.permute.xlu1 %2657 }
 0x6fc   : > { %17129 = vst [vmem:[#allocation229_spill] sm:$0xff] %v10204_v36 }
 0x6fd   : > { %17130 = vst [vmem:[#allocation230_spill] sm:$0xff] %v10206_v14 }
 0x702   : > { %v10208_v46 = vpop.permute.xlu0 %2673  ;;  %v10212_v43 = vpop.permute.xlu2 %2683 }
 0x703   : > { %17131 = vst [vmem:[#allocation231_spill] sm:$0xff] %v10208_v46  ;;  %v10210_v37 = vpop.permute.xlu1 %2663 }
 0x704   : > { %17132 = vst [vmem:[#allocation232_spill] sm:$0xff] %v10210_v37 }
 0x705   : > { %17133 = vst [vmem:[#allocation233_spill] sm:$0xff] %v10212_v43 }
 0x70a   : > { %v10214_v4 = vpop.permute.xlu0 %2679  ;;  %v10218_v52 = vpop.permute.xlu2 %2689 }
 0x70b   : > { %17134 = vst [vmem:[#allocation234_spill] sm:$0xff] %v10214_v4  ;;  %v10216_v7 = vpop.permute.xlu1 %2669 }
 0x70c   : > { %17135 = vst [vmem:[#allocation235_spill] sm:$0xff] %v10216_v7 }
 0x712   : > { %v10220_v55 = vpop.permute.xlu0 %2685  ;;  %v10224_v17 = vpop.permute.xlu2 %2695 }
 0x713   : > { %v10222_v13 = vpop.permute.xlu1 %2675 }
 0x714   : > { %17136 = vst [vmem:[#allocation236_spill] sm:$0xff] %v10222_v13 }
 0x71a   : > { %v10226_v3 = vpop.permute.xlu0 %2691  ;;  %v10230_v21 = vpop.permute.xlu2 %2701 }
 0x71b   : > { %v10228_v26 = vpop.permute.xlu1 %2681  ;;  %17138 = vst [vmem:[#allocation238_spill] sm:$0xff] %v10230_v21 }
 0x71c   : > { %17137 = vst [vmem:[#allocation237_spill] sm:$0xff] %v10228_v26 }
 0x722   : > { %v10232_v44 = vpop.permute.xlu0 %2697  ;;  %v10238_v48 = vpop.permute.xlu2 %2767 }
 0x723   : > { %v10234_v1 = vpop.permute.xlu1 %2687  ;;  %v2778_v57 = vmul.f32 %v9583_v50, %v10238_v48  ;;  %v2782_v12 = vmul.f32 %v9595_v10, %v10238_v48 }
 0x725   : > { %v2840_v4 = vrot.slane %v2778_v57, 1  ;;  %v2841_v26 = vrot.slane %v2782_v12, 1 }
 0x72a   : > { %v10236_v8 = vpop.permute.xlu0 %2763 }
 0x72b   : > { %v10240_v58 = vpop.permute.xlu1 %2693  ;;  %v2775_v60 = vmul.f32 %v9576_v49, %v10236_v8  ;;  %v2779_v5 = vmul.f32 %v9588_v41, %v10236_v8  ;;  %v2842_v49 = vsel %vm1499_vm2, %v2840_v4, %v2841_v26 }
 0x72c   : > { %17139 = vst [vmem:[#allocation239_spill] sm:$0xff] %v10240_v58  ;;  %v7636_v58 = vld [vmem:[%s7946_s14 + $0x260] sm:$0xff] }
 0x72d   : > { %v2831_v0 = vrot.slane %v2775_v60, 1  ;;  %v2832_v54 = vrot.slane %v2779_v5, 1 }
 0x72f   : > { %v2833_v21 = vsel %vm1499_vm2, %v2831_v0, %v2832_v54 }
 0x730   : > { %2883 = vrot.lane.b32.xlu0 %v2833_v21, %s7850_s30 }
 0x733   : > { %v10252_v63 = vpop.permute.xlu1 %2699 }
 0x734   : > { %17140 = vst [vmem:[#allocation240_spill] sm:$0xff] %v10252_v63 }
 0x738   : > { %2889 = vrot.lane.b32.xlu0 %v2842_v49, %s7850_s30 }
 0x73b   : > { %v2766_v41 = vpop.permute.xlu1 %2765 }
 0x73c   : > { %v10258_v60 = vsel %vm948_vm1, %v10236_v8, %v2766_v41  ;;  %v10262_v50 = vsel %vm948_vm1, %v2766_v41, %v10238_v48 }
 0x73d   : > { %v2781_v10 = vmul.f32 %v9622_v20, %v10262_v50  ;;  %v2785_v21 = vmul.f32 %v9634_v62, %v10262_v50  ;;  %v2777_v4 = vmul.f32 %v9606_v39, %v10262_v50  ;;  %v2776_v5 = vmul.f32 %v9609_v61, %v10258_v60 }
 0x73e   : > { %v2780_v0 = vmul.f32 %v9629_v22, %v10258_v60  ;;  %v2784_v62 = vmul.f32 %v9641_v59, %v10258_v60  ;;  %v2788_v39 = vmul.f32 %v9654_v16, %v10258_v60  ;;  %v2783_v22 = vmul.f32 %v9646_v6, %v10236_v8 }
 0x73f   : > { %v2838_v57 = vrot.slane %v2781_v10, 1  ;;  %v2847_v12 = vrot.slane %v2785_v21, 1  ;;  %v2837_v49 = vrot.slane %v2777_v4, 1  ;;  %v2834_v41 = vrot.slane %v2776_v5, 1 }
 0x740   : > { %v2835_v27 = vrot.slane %v2780_v0, 1  ;;  %v2845_v10 = vrot.slane %v2784_v62, 1  ;;  %v2853_v21 = vrot.slane %v2788_v39, 1  ;;  %v2843_v4 = vrot.slane %v2783_v22, 1  ;;  %v10291_v0 = vld [vmem:[%s7946_s14 + $0x160] sm:$0xff] }
 0x741   : > { %v2848_v20 = vsel %vm1499_vm2, %v2838_v57, %v2847_v12  ;;  %v2839_v37 = vsel %vm1499_vm2, %v2837_v49, %v2838_v57  ;;  %v2787_v16 = vmul.f32 %v9662_v35, %v10236_v8  ;;  %v2786_v57 = vmul.f32 %v9667_v33, %v10238_v48  ;;  %v17141_v39 = vld [vmem:[#allocation148_spill] sm:$0xff] }
 0x742   : > { %2895 = vrot.lane.b32.xlu0 %v2848_v20, %s7850_s30  ;;  %2887 = vrot.lane.b32.xlu2 %v2839_v37, %s7850_s30  ;;  %v2836_v61 = vsel %vm1499_vm2, %v2834_v41, %v2835_v27  ;;  %v2854_v5 = vsel %vm1499_vm2, %v2845_v10, %v2853_v21  ;;  %v2846_v59 = vsel %vm1499_vm2, %v2835_v27, %v2845_v10 }
 0x743   : > { %2885 = vrot.lane.b32.xlu1 %v2836_v61, %s7850_s30  ;;  %v2791_v37 = vmul.f32 %v10291_v0, %v10236_v8  ;;  %v2844_v6 = vsel %vm1499_vm2, %v2832_v54, %v2843_v4  ;;  %v2851_v27 = vrot.slane %v2787_v16, 1  ;;  %v2849_v41 = vrot.slane %v2786_v57, 1  ;;  %v17142_v54 = vld [vmem:[#allocation145_spill] sm:$0xff]  ;;  %v17143_v16 = vld [vmem:[#allocation159_spill] sm:$0xff] }
 0x744   : > { %v2790_v62 = vmul.f32 %v9680_v18, %v10238_v48  ;;  %v2794_v61 = vmul.f32 %v17141_v39, %v10238_v48  ;;  %v2789_v22 = vmul.f32 %v17142_v54, %v10262_v50  ;;  %v7621_v54 = vld [vmem:[%s7946_s14 + $0x1a8] sm:$0x1] }
 0x745   : > { %v2859_v49 = vrot.slane %v2791_v37, 1  ;;  %v2852_v20 = vsel %vm1499_vm2, %v2843_v4, %v2851_v27  ;;  %v2850_v33 = vsel %vm1499_vm2, %v2841_v26, %v2849_v41  ;;  %v2793_v37 = vmul.f32 %v17143_v16, %v10262_v50 }
 0x746   : > { %v2857_v10 = vrot.slane %v2790_v62, 1  ;;  %v2855_v4 = vrot.slane %v2789_v22, 1  ;;  %v2800_v22 = vmul.f32 %v7621_v54, %v10258_v60 }
 0x747   : > { %v2860_v35 = vsel %vm1499_vm2, %v2851_v27, %v2859_v49  ;;  %v17144_v27 = vld [vmem:[#allocation138_spill] sm:$0xff] }
 0x748   : > { %v2858_v18 = vsel %vm1499_vm2, %v2849_v41, %v2857_v10  ;;  %v2856_v26 = vsel %vm1499_vm2, %v2847_v12, %v2855_v4  ;;  %v2877_v16 = vrot.slane %v2800_v22, 1 }
 0x74a   : > { %2901 = vrot.lane.b32.xlu0 %v2854_v5, %s7850_s30  ;;  %2893 = vrot.lane.b32.xlu2 %v2846_v59, %s7850_s30  ;;  %v2865_v5 = vrot.slane %v2794_v61, 1 }
 0x74b   : > { %2891 = vrot.lane.b32.xlu1 %v2844_v6, %s7850_s30  ;;  %v7620_v6 = vld [vmem:[%s7946_s14 + $0x190] sm:$0xff] }
 0x74c   : > { %v2866_v59 = vsel %vm1499_vm2, %v2857_v10, %v2865_v5  ;;  %v2797_v57 = vmul.f32 %v7620_v6, %v10262_v50  ;;  %v17145_v10 = vld [vmem:[#allocation14_spill] sm:$0xff]  ;;  %v7622_v6 = vld [vmem:[%s7946_s14 + $0x1a0] sm:$0x1] }
 0x74e   : > { %v2871_v62 = vrot.slane %v2797_v57, 1  ;;  %v2798_v57 = vmul.f32 %v9739_v30, %v10238_v48 }
 0x752   : > { %2907 = vrot.lane.b32.xlu0 %v2860_v35, %s7850_s30  ;;  %2899 = vrot.lane.b32.xlu2 %v2852_v20, %s7850_s30  ;;  %v2792_v35 = vmul.f32 %v17144_v27, %v10258_v60  ;;  %v2863_v20 = vrot.slane %v2793_v37, 1 }
 0x753   : > { %2897 = vrot.lane.b32.xlu1 %v2850_v33, %s7850_s30  ;;  %v2796_v33 = vmul.f32 %v9719_v24, %v10258_v60  ;;  %v2799_v60 = vmul.f32 %v7622_v6, %v10236_v8 }
 0x754   : > { %v2861_v41 = vrot.slane %v2792_v35, 1  ;;  %v2872_v39 = vsel %vm1499_vm2, %v2863_v20, %v2871_v62  ;;  %v2864_v61 = vsel %vm1499_vm2, %v2855_v4, %v2863_v20  ;;  %v2873_v20 = vrot.slane %v2798_v57, 1 }
 0x755   : > { %v2875_v27 = vrot.slane %v2799_v60, 1 }
 0x756   : > { %v2862_v12 = vsel %vm1499_vm2, %v2853_v21, %v2861_v41  ;;  %v2874_v30 = vsel %vm1499_vm2, %v2865_v5, %v2873_v20 }
 0x75a   : > { %2913 = vrot.lane.b32.xlu0 %v2866_v59, %s7850_s30  ;;  %2905 = vrot.lane.b32.xlu2 %v2858_v18, %s7850_s30  ;;  %v2795_v59 = vmul.f32 %v17145_v10, %v10236_v8  ;;  %v2869_v18 = vrot.slane %v2796_v33, 1 }
 0x75b   : > { %2903 = vrot.lane.b32.xlu1 %v2856_v26, %s7850_s30  ;;  %v6918_v26 = vld [vmem:[%s16313_s1 + $0x31] ss:$8 sm:$0x7] }
 0x75c   : > { %v2867_v4 = vrot.slane %v2795_v59, 1  ;;  %v2878_v37 = vsel %vm1499_vm2, %v2869_v18, %v2877_v16  ;;  %v2870_v24 = vsel %vm1499_vm2, %v2861_v41, %v2869_v18  ;;  %v2988_v35 = vperm.slane %v6918_v26, 0 }
 0x75d   : > { %v2802_v41 = vmul.f32 %v9751_v19, %v10238_v48  ;;  %v2990_v19 = vperm.slane %v6918_v26, 2  ;;  %v2989_v48 = vperm.slane %v6918_v26, 1 }
 0x75e   : > { %v2868_v21 = vsel %vm1499_vm2, %v2859_v49, %v2867_v4  ;;  %v2876_v8 = vsel %vm1499_vm2, %v2867_v4, %v2875_v27  ;;  %v7623_v49 = vld [vmem:[%s7946_s14 + $0x1b0] sm:$0x1] }
 0x762   : > { %2919 = vrot.lane.b32.xlu0 %v2872_v39, %s7850_s30  ;;  %2911 = vrot.lane.b32.xlu2 %v2864_v61, %s7850_s30  ;;  %v2801_v39 = vmul.f32 %v7623_v49, %v10262_v50  ;;  %v2881_v61 = vrot.slane %v2802_v41, 1 }
 0x763   : > { %2909 = vrot.lane.b32.xlu1 %v2862_v12, %s7850_s30 }
 0x764   : > { %v2879_v33 = vrot.slane %v2801_v39, 1  ;;  %v2882_v54 = vsel %vm1499_vm2, %v2873_v20, %v2881_v61 }
 0x766   : > { %v2880_v22 = vsel %vm1499_vm2, %v2871_v62, %v2879_v33  ;;  %v17163_v33 = vld [vmem:[#allocation181_spill] sm:$0xff] }
 0x76a   : > { %2925 = vrot.lane.b32.xlu0 %v2878_v37, %s7850_s30  ;;  %2917 = vrot.lane.b32.xlu2 %v2870_v24, %s7850_s30 }
 0x76b   : > { %2915 = vrot.lane.b32.xlu1 %v2868_v21, %s7850_s30 }
 0x772   : > { %2991 = vrot.lane.b32.xlu0 %v2988_v35, %s7849_s26  ;;  %2923 = vrot.lane.b32.xlu2 %v2876_v8, %s7850_s30 }
 0x773   : > { %2921 = vrot.lane.b32.xlu1 %v2874_v30, %s7850_s30 }
 0x77a   : > { %2929 = vrot.lane.b32.xlu2 %v2882_v54, %s7850_s30 }
 0x77b   : > { %2927 = vrot.lane.b32.xlu1 %v2880_v22, %s7850_s30  ;;  %v17164_v22 = vld [vmem:[#allocation183_spill] sm:$0xff] }
 0x782   : > { %2995 = vrot.lane.b32.xlu2 %v2990_v19, %s7849_s26 }
 0x783   : > { %2993 = vrot.lane.b32.xlu1 %v2989_v48, %s7849_s26 }
 0x79c   : > { %v10365_v5 = vpop.permute.xlu2 %2887 }
 0x79d   : > { %17146 = vst [vmem:[#allocation148_spill] sm:$0xff] %v10365_v5 }
 0x7a2   : > { %v10367_v50 = vpop.permute.xlu0 %2883 }
 0x7a3   : > { %17147 = vst [vmem:[#allocation145_spill] sm:$0xff] %v10367_v50 }
 0x7a4   : > { %v10369_v12 = vpop.permute.xlu2 %2893 }
 0x7a5   : > { %17148 = vst [vmem:[#allocation159_spill] sm:$0xff] %v10369_v12 }
 0x7aa   : > { %v10371_v10 = vpop.permute.xlu0 %2889 }
 0x7ab   : > { %17149 = vst [vmem:[#allocation138_spill] sm:$0xff] %v10371_v10 }
 0x7ac   : > { %v10373_v59 = vpop.permute.xlu2 %2899 }
 0x7ad   : > { %17150 = vst [vmem:[#allocation14_spill] sm:$0xff] %v10373_v59  ;;  %v17166_v59 = vld [vmem:[#allocation184_spill] sm:$0xff] }
 0x7b4   : > { %v10375_v18 = vpop.permute.xlu0 %2895  ;;  %v10377_v62 = vpop.permute.xlu2 %2905 }
 0x7b5   : > { %17151 = vst [vmem:[#allocation241_spill] sm:$0xff] %v10375_v18  ;;  %v10379_v16 = vpop.permute.xlu1 %2885 }
 0x7b6   : > { %17152 = vst [vmem:[#allocation242_spill] sm:$0xff] %v10377_v62 }
 0x7b7   : > { %17153 = vst [vmem:[#allocation243_spill] sm:$0xff] %v10379_v16 }
 0x7bc   : > { %v10381_v4 = vpop.permute.xlu0 %2901  ;;  %v10385_v24 = vpop.permute.xlu2 %2911 }
 0x7bd   : > { %17154 = vst [vmem:[#allocation244_spill] sm:$0xff] %v10381_v4  ;;  %v10383_v37 = vpop.permute.xlu1 %2891  ;;  %v10668_v4 = vld [vmem:[%s7946_s14 + $0x90] sm:$0xff] }
 0x7be   : > { %17155 = vst [vmem:[#allocation245_spill] sm:$0xff] %v10383_v37 }
 0x7bf   : > { %17156 = vst [vmem:[#allocation246_spill] sm:$0xff] %v10385_v24 }
 0x7c4   : > { %v10387_v6 = vpop.permute.xlu0 %2907  ;;  %v10391_v21 = vpop.permute.xlu2 %2917 }
 0x7c5   : > { %17157 = vst [vmem:[#allocation247_spill] sm:$0xff] %v10387_v6  ;;  %v10389_v60 = vpop.permute.xlu1 %2897 }
 0x7c6   : > { %17158 = vst [vmem:[#allocation248_spill] sm:$0xff] %v10389_v60 }
 0x7cc   : > { %v10393_v57 = vpop.permute.xlu0 %2913  ;;  %v10397_v27 = vpop.permute.xlu2 %2923 }
 0x7cd   : > { %v10395_v26 = vpop.permute.xlu1 %2903 }
 0x7ce   : > { %17159 = vst [vmem:[#allocation249_spill] sm:$0xff] %v10395_v26 }
 0x7d4   : > { %v10399_v35 = vpop.permute.xlu0 %2919  ;;  %v10403_v8 = vpop.permute.xlu2 %2929 }
 0x7d5   : > { %v10401_v20 = vpop.permute.xlu1 %2909  ;;  %17161 = vst [vmem:[#allocation251_spill] sm:$0xff] %v10403_v8  ;;  %v17165_v8 = vld [vmem:[#allocation182_spill] sm:$0xff] }
 0x7d6   : > { %17160 = vst [vmem:[#allocation250_spill] sm:$0xff] %v10401_v20 }
 0x7dc   : > { %v10405_v41 = vpop.permute.xlu0 %2925  ;;  %v10411_v39 = vpop.permute.xlu2 %2995 }
 0x7dd   : > { %v10407_v30 = vpop.permute.xlu1 %2915  ;;  %v3006_v20 = vmul.f32 %v17165_v8, %v10411_v39  ;;  %v3010_v10 = vmul.f32 %v17166_v59, %v10411_v39  ;;  %v17168_v8 = vld [vmem:[#allocation188_spill] sm:$0xff] }
 0x7df   : > { %v3068_v12 = vrot.slane %v3006_v20, 1  ;;  %v3069_v50 = vrot.slane %v3010_v10, 1  ;;  %v17169_v20 = vld [vmem:[#allocation186_spill] sm:$0xff] }
 0x7e4   : > { %v10409_v49 = vpop.permute.xlu0 %2991 }
 0x7e5   : > { %v10413_v61 = vpop.permute.xlu1 %2921  ;;  %v3003_v54 = vmul.f32 %v17163_v33, %v10409_v49  ;;  %v3007_v19 = vmul.f32 %v17164_v22, %v10409_v49  ;;  %v3070_v33 = vsel %vm1499_vm2, %v3068_v12, %v3069_v50 }
 0x7e6   : > { %17162 = vst [vmem:[#allocation252_spill] sm:$0xff] %v10413_v61 }
 0x7e7   : > { %v3059_v48 = vrot.slane %v3003_v54, 1  ;;  %v3060_v6 = vrot.slane %v3007_v19, 1  ;;  %v17170_v19 = vld [vmem:[#allocation187_spill] sm:$0xff] }
 0x7e9   : > { %v3061_v37 = vsel %vm1499_vm2, %v3059_v48, %v3060_v6 }
 0x7ea   : > { %3111 = vrot.lane.b32.xlu0 %v3061_v37, %s7850_s30 }
 0x7ed   : > { %v10425_v53 = vpop.permute.xlu1 %2927 }
 0x7ee   : > { %17167 = vst [vmem:[#allocation181_spill] sm:$0xff] %v10425_v53 }
 0x7f2   : > { %3117 = vrot.lane.b32.xlu0 %v3070_v33, %s7850_s30  ;;  %v17171_v33 = vld [vmem:[#allocation189_spill] sm:$0xff] }
 0x7f5   : > { %v2994_v54 = vpop.permute.xlu1 %2993 }
 0x7f6   : > { %v10431_v22 = vsel %vm948_vm1, %v10409_v49, %v2994_v54  ;;  %v10435_v59 = vsel %vm948_vm1, %v2994_v54, %v10411_v39 }
 0x7f7   : > { %v3009_v37 = vmul.f32 %v17168_v8, %v10435_v59  ;;  %v3013_v10 = vmul.f32 %v9873_v56, %v10435_v59  ;;  %v3005_v12 = vmul.f32 %v17169_v20, %v10435_v59  ;;  %v3004_v48 = vmul.f32 %v17170_v19, %v10431_v22  ;;  %v17172_v56 = vld [vmem:[#allocation190_spill] sm:$0xff]  ;;  %v17173_v20 = vld [vmem:[#allocation192_spill] sm:$0xff] }
 0x7f8   : > { %v3008_v2 = vmul.f32 %v17171_v33, %v10431_v22  ;;  %v3012_v5 = vmul.f32 %v17172_v56, %v10431_v22  ;;  %v3016_v14 = vmul.f32 %v17173_v20, %v10431_v22  ;;  %v17175_v33 = vld [vmem:[#allocation193_spill] sm:$0xff] }
 0x7f9   : > { %v3066_v18 = vrot.slane %v3009_v37, 1  ;;  %v3075_v60 = vrot.slane %v3013_v10, 1  ;;  %v3065_v25 = vrot.slane %v3005_v12, 1  ;;  %v3062_v54 = vrot.slane %v3004_v48, 1  ;;  %v17174_v10 = vld [vmem:[#allocation191_spill] sm:$0xff] }
 0x7fa   : > { %v3063_v7 = vrot.slane %v3008_v2, 1  ;;  %v3011_v12 = vmul.f32 %v17174_v10, %v10409_v49  ;;  %v3073_v2 = vrot.slane %v3012_v5, 1  ;;  %v3081_v19 = vrot.slane %v3016_v14, 1  ;;  %v17177_v5 = vld [vmem:[#allocation194_spill] sm:$0xff] }
 0x7fb   : > { %v3076_v16 = vsel %vm1499_vm2, %v3066_v18, %v3075_v60  ;;  %v3067_v8 = vsel %vm1499_vm2, %v3065_v25, %v3066_v18  ;;  %v3015_v56 = vmul.f32 %v17175_v33, %v10409_v49  ;;  %v3014_v14 = vmul.f32 %v17177_v5, %v10411_v39 }
 0x7fc   : > { %3123 = vrot.lane.b32.xlu0 %v3076_v16, %s7850_s30  ;;  %3115 = vrot.lane.b32.xlu2 %v3067_v8, %s7850_s30  ;;  %v3064_v37 = vsel %vm1499_vm2, %v3062_v54, %v3063_v7  ;;  %v3071_v25 = vrot.slane %v3011_v12, 1  ;;  %v3082_v18 = vsel %vm1499_vm2, %v3073_v2, %v3081_v19  ;;  %v3074_v48 = vsel %vm1499_vm2, %v3063_v7, %v3073_v2  ;;  %v17176_v16 = vld [vmem:[#allocation195_spill] sm:$0xff]  ;;  %v17178_v2 = vld [vmem:[#allocation196_spill] sm:$0xff] }
 0x7fd   : > { %3113 = vrot.lane.b32.xlu1 %v3064_v37, %s7850_s30  ;;  %v3019_v8 = vmul.f32 %v17176_v16, %v10409_v49  ;;  %v3079_v20 = vrot.slane %v3015_v56, 1  ;;  %v3077_v7 = vrot.slane %v3014_v14, 1  ;;  %v3018_v33 = vmul.f32 %v17178_v2, %v10411_v39  ;;  %v17180_v56 = vld [vmem:[#allocation197_spill] sm:$0xff] }
 0x7fe   : > { %v3072_v54 = vsel %vm1499_vm2, %v3060_v6, %v3071_v25  ;;  %v3017_v16 = vmul.f32 %v17180_v56, %v10435_v59 }
 0x7ff   : > { %v3087_v37 = vrot.slane %v3019_v8, 1  ;;  %v3080_v12 = vsel %vm1499_vm2, %v3071_v25, %v3079_v20  ;;  %v3078_v6 = vsel %vm1499_vm2, %v3069_v50, %v3077_v7  ;;  %v3085_v8 = vrot.slane %v3018_v33, 1  ;;  %v17183_v33 = vld [vmem:[#allocation200_spill] sm:$0xff] }
 0x800   : > { %v3083_v25 = vrot.slane %v3017_v16, 1 }
 0x801   : > { %v3088_v10 = vsel %vm1499_vm2, %v3079_v20, %v3087_v37  ;;  %v3086_v14 = vsel %vm1499_vm2, %v3077_v7, %v3085_v8  ;;  %v17181_v20 = vld [vmem:[#allocation199_spill] sm:$0xff] }
 0x802   : > { %v3084_v50 = vsel %vm1499_vm2, %v3075_v60, %v3083_v25 }
 0x804   : > { %3129 = vrot.lane.b32.xlu0 %v3082_v18, %s7850_s30  ;;  %3121 = vrot.lane.b32.xlu2 %v3074_v48, %s7850_s30  ;;  %v17179_v18 = vld [vmem:[#allocation198_spill] sm:$0xff] }
 0x805   : > { %3119 = vrot.lane.b32.xlu1 %v3072_v54, %s7850_s30  ;;  %v3022_v48 = vmul.f32 %v17179_v18, %v10411_v39  ;;  %v3020_v18 = vmul.f32 %v17183_v33, %v10431_v22 }
 0x807   : > { %v3093_v54 = vrot.slane %v3022_v48, 1  ;;  %v3089_v7 = vrot.slane %v3020_v18, 1 }
 0x809   : > { %v3094_v5 = vsel %vm1499_vm2, %v3085_v8, %v3093_v54  ;;  %v17184_v8 = vld [vmem:[#allocation202_spill] sm:$0xff]  ;;  %v3090_v60 = vsel %vm1499_vm2, %v3081_v19, %v3089_v7 }
 0x80c   : > { %3135 = vrot.lane.b32.xlu0 %v3088_v10, %s7850_s30  ;;  %3127 = vrot.lane.b32.xlu2 %v3080_v12, %s7850_s30  ;;  %v3021_v10 = vmul.f32 %v17181_v20, %v10435_v59  ;;  %v17182_v12 = vld [vmem:[#allocation201_spill] sm:$0xff] }
 0x80d   : > { %3125 = vrot.lane.b32.xlu1 %v3078_v6, %s7850_s30  ;;  %v3025_v2 = vmul.f32 %v17182_v12, %v10435_v59  ;;  %v7624_v20 = vld [vmem:[%s7946_s14 + $0x288] sm:$0x1] }
 0x80e   : > { %v3091_v48 = vrot.slane %v3021_v10, 1  ;;  %v17185_v10 = vld [vmem:[#allocation203_spill] sm:$0xff] }
 0x80f   : > { %v3099_v6 = vrot.slane %v3025_v2, 1  ;;  %v3023_v12 = vmul.f32 %v17185_v10, %v10409_v49 }
 0x810   : > { %v3092_v16 = vsel %vm1499_vm2, %v3083_v25, %v3091_v48 }
 0x811   : > { %v3100_v56 = vsel %vm1499_vm2, %v3091_v48, %v3099_v6  ;;  %v3095_v25 = vrot.slane %v3023_v12, 1 }
 0x813   : > { %v3096_v19 = vsel %vm1499_vm2, %v3087_v37, %v3095_v25  ;;  %v7626_v37 = vld [vmem:[%s7946_s14 + $0x290] sm:$0x1] }
 0x814   : > { %3141 = vrot.lane.b32.xlu0 %v3094_v5, %s7850_s30  ;;  %3133 = vrot.lane.b32.xlu2 %v3086_v14, %s7850_s30  ;;  %v3024_v5 = vmul.f32 %v17184_v8, %v10431_v22  ;;  %v3028_v14 = vmul.f32 %v7624_v20, %v10431_v22  ;;  %v3027_v22 = vmul.f32 %v7625_v9, %v10409_v49 }
 0x815   : > { %3131 = vrot.lane.b32.xlu1 %v3084_v50, %s7850_s30  ;;  %v3030_v49 = vmul.f32 %v9996_v40, %v10411_v39 }
 0x816   : > { %v3097_v2 = vrot.slane %v3024_v5, 1  ;;  %v3105_v50 = vrot.slane %v3028_v14, 1  ;;  %v3029_v14 = vmul.f32 %v7626_v37, %v10435_v59 }
 0x818   : > { %v3106_v18 = vsel %vm1499_vm2, %v3097_v2, %v3105_v50  ;;  %v3098_v48 = vsel %vm1499_vm2, %v3089_v7, %v3097_v2  ;;  %v3103_v7 = vrot.slane %v3027_v22, 1  ;;  %v3107_v10 = vrot.slane %v3029_v14, 1  ;;  %v10551_v22 = vld [vmem:[%s7946_s14 + $0x88] sm:$0xff] }
 0x819   : > { %17192 = vst [vmem:[#allocation189_spill] sm:$0xff] %v10551_v22 }
 0x81a   : > { %v3104_v9 = vsel %vm1499_vm2, %v3095_v25, %v3103_v7  ;;  %v3108_v40 = vsel %vm1499_vm2, %v3099_v6, %v3107_v10  ;;  %v6919_v6 = vld [vmem:[%s16313_s1 + $0x32] ss:$8 sm:$0x7] }
 0x81c   : > { %3147 = vrot.lane.b32.xlu0 %v3100_v56, %s7850_s30  ;;  %3139 = vrot.lane.b32.xlu2 %v3092_v16, %s7850_s30  ;;  %v3026_v56 = vmul.f32 %v9984_v11, %v10411_v39  ;;  %v6934_v16 = vld [vmem:[%s16313_s1 + $0x35] ss:$8 sm:$0x7] }
 0x81d   : > { %3137 = vrot.lane.b32.xlu1 %v3090_v60, %s7850_s30  ;;  %v3615_v5 = vperm.slane %v6934_v16, 0  ;;  %v3109_v60 = vrot.slane %v3030_v49, 1  ;;  %v3617_v39 = vperm.slane %v6934_v16, 2  ;;  %v3616_v2 = vperm.slane %v6934_v16, 1 }
 0x81e   : > { %v3101_v20 = vrot.slane %v3026_v56, 1 }
 0x820   : > { %v3102_v11 = vsel %vm1499_vm2, %v3093_v54, %v3101_v20  ;;  %v3110_v12 = vsel %vm1499_vm2, %v3101_v20, %v3109_v60 }
 0x824   : > { %3153 = vrot.lane.b32.xlu0 %v3106_v18, %s7850_s30  ;;  %3145 = vrot.lane.b32.xlu2 %v3098_v48, %s7850_s30  ;;  %v10548_v48 = vperm.slane %v6919_v6, 1 }
 0x825   : > { %3143 = vrot.lane.b32.xlu1 %v3096_v19, %s7850_s30 }
 0x826   : > { %17191 = vst [vmem:[#allocation187_spill] sm:$0xff] %v10548_v48  ;;  %v10555_v19 = vmul.f32 %v10551_v22, %v10548_v48  ;;  %v10559_v56 = vmul.f32 %v10149_v47, %v10548_v48  ;;  %v10576_v47 = vperm.slane %v6919_v6, 0 }
 0x828   : > { %17193 = vst [vmem:[#allocation190_spill] sm:$0xff] %v10555_v19  ;;  %v16534_v16 = vrot.slane %v10555_v19, 2  ;;  %v16535_v7 = vrot.slane %v10559_v56, 2  ;;  %v10584_v37 = vmul.f32 %v10112_v45, %v10576_v47  ;;  %v17206_v19 = vld [vmem:[#allocation173_spill] sm:$0xff] }
 0x829   : > { %17197 = vst [vmem:[#allocation195_spill] sm:$0xff] %v10576_v47 }
 0x82a   : > { %v10574_v49 = vsel %vm3270_vm5, %v16534_v16, %v16535_v7  ;;  %17198 = vst [vmem:[#allocation194_spill] sm:$0xff] %v10584_v37  ;;  %v16541_v45 = vrot.slane %v10584_v37, 2  ;;  %v6933_v16 = vld [vmem:[%s16313_s1 + $0x34] ss:$8 sm:$0x7] }
 0x82b   : > { %v10605_v60 = vperm.slane %v6933_v16, 1 }
 0x82c   : > { %3618 = vrot.lane.b32.xlu0 %v3615_v5, %s7847_s9  ;;  %3151 = vrot.lane.b32.xlu2 %v3104_v9, %s7850_s30 }
 0x82d   : > { %3149 = vrot.lane.b32.xlu1 %v3102_v11, %s7850_s30  ;;  %v10580_v11 = vmul.f32 %v10159_v34, %v10576_v47  ;;  %17205 = vst [vmem:[#allocation201_spill] sm:$0xff] %v10605_v60  ;;  %v10634_v37 = vmul.f32 %v17183_v33, %v10605_v60 }
 0x834   : > { %3157 = vrot.lane.b32.xlu2 %v3110_v12, %s7850_s30  ;;  %v6926_v12 = vld [vmem:[%s16313_s1 + $0x33] ss:$8 sm:$0x7] }
 0x835   : > { %3155 = vrot.lane.b32.xlu1 %v3108_v40, %s7850_s30  ;;  %v17201_v40 = vld [vmem:[#allocation110_spill] sm:$0xff]  ;;  %v10603_v7 = vperm.slane %v6926_v12, 1  ;;  %v10674_v26 = vperm.slane %v6926_v12, 2 }
 0x836   : > { %17213 = vst [vmem:[#allocation110_spill] sm:$0xff] %v10634_v37 }
 0x837   : > { %17204 = vst [vmem:[#allocation199_spill] sm:$0xff] %v10603_v7 }
 0x838   : > { %17223 = vst [vmem:[#allocation257_spill] sm:$0xff] %v10674_v26 }
 0x83c   : > { %3622 = vrot.lane.b32.xlu2 %v3617_v39, %s7847_s9  ;;  %v17202_v39 = vld [vmem:[#allocation91_spill] sm:$0xff] }
 0x83d   : > { %3620 = vrot.lane.b32.xlu1 %v3616_v2, %s7847_s9  ;;  %v2026_v34 = vsel %vm533_vm3, %v17202_v39, %v17201_v40  ;;  %v10618_v39 = vld [vmem:[%s7946_s14 + $0x168] sm:$0xff] }
 0x83e   : > { %17209 = vst [vmem:[#allocation200_spill] sm:$0xff] %v10618_v39 }
 0x856   : > { %v10535_v59 = vpop.permute.xlu2 %3115 }
 0x857   : > { %17186 = vst [vmem:[#allocation183_spill] sm:$0xff] %v10535_v59 }
 0x85c   : > { %v10537_v54 = vpop.permute.xlu0 %3111 }
 0x85d   : > { %17187 = vst [vmem:[#allocation182_spill] sm:$0xff] %v10537_v54  ;;  %v17211_v54 = vld [vmem:[#allocation46_spill] sm:$0xff] }
 0x85e   : > { %v10539_v50 = vpop.permute.xlu2 %3121 }
 0x85f   : > { %17188 = vst [vmem:[#allocation184_spill] sm:$0xff] %v10539_v50  ;;  %v10622_v50 = vmul.f32 %v10618_v39, %v10603_v7  ;;  %v17238_v39 = vld [vmem:[#allocation43_spill] sm:$0xff] }
 0x861   : > { %17210 = vst [vmem:[#allocation202_spill] sm:$0xff] %v10622_v50  ;;  %v17225_v13 = vrot.slane %v10622_v50, 2  ;;  %v7632_v50 = vld [vmem:[%s7946_s14 + $0x240] sm:$0xff] }
 0x864   : > { %v10541_v25 = vpop.permute.xlu0 %3117 }
 0x865   : > { %17189 = vst [vmem:[#allocation188_spill] sm:$0xff] %v10541_v25 }
 0x866   : > { %v10543_v18 = vpop.permute.xlu2 %3127 }
 0x867   : > { %17190 = vst [vmem:[#allocation186_spill] sm:$0xff] %v10543_v18  ;;  %v17207_v18 = vld [vmem:[#allocation168_spill] sm:$0xff] }
 0x868   : > { %v2256_v25 = vsel %vm533_vm3, %v17207_v18, %v17206_v19  ;;  %v10641_v18 = vmul.f32 %v17184_v8, %v10605_v60  ;;  %v10657_v8 = vperm.slane %v6926_v12, 0 }
 0x86a   : > { %17219 = vst [vmem:[#allocation253_spill] sm:$0xff] %v10657_v8  ;;  %v10695_v12 = vmul.f32 %v10291_v0, %v10657_v8  ;;  %v10718_v0 = vld [vmem:[%s7946_s14 + $0x180] sm:$0xff] }
 0x86b   : > { %17235 = vst [vmem:[#allocation265_spill] sm:$0xff] %v10718_v0 }
 0x86c   : > { %17228 = vst [vmem:[#allocation258_spill] sm:$0xff] %v10695_v12 }
 0x86e   : > { %v10563_v5 = vpop.permute.xlu0 %3123  ;;  %v10565_v20 = vpop.permute.xlu2 %3133 }
 0x86f   : > { %17194 = vst [vmem:[#allocation192_spill] sm:$0xff] %v10563_v5  ;;  %v10567_v9 = vpop.permute.xlu1 %3113  ;;  %v2062_v5 = vadd.f32 %v2026_v34, %v17211_v54  ;;  %v17215_v54 = vld [vmem:[#allocation112_spill] sm:$0xff]  ;;  %v17216_v34 = vld [vmem:[#allocation109_spill] sm:$0xff] }
 0x870   : > { %17195 = vst [vmem:[#allocation191_spill] sm:$0xff] %v10565_v20  ;;  %v2028_v59 = vsel %vm533_vm3, %v17216_v34, %v17215_v54  ;;  %v10659_v20 = vperm.slane %v6933_v16, 0  ;;  %v7637_v54 = vld [vmem:[%s7946_s14 + $0x230] sm:$0xff] }
 0x871   : > { %17196 = vst [vmem:[#allocation193_spill] sm:$0xff] %v10567_v9  ;;  %v10626_v9 = vld [vmem:[%s7946_s14 + $0x188] sm:$0xff] }
 0x872   : > { %17212 = vst [vmem:[#allocation203_spill] sm:$0xff] %v10626_v9  ;;  %v10630_v19 = vmul.f32 %v10626_v9, %v10603_v7  ;;  %v10732_v32 = vmul.f32 %v7636_v58, %v10659_v20 }
 0x873   : > { %17220 = vst [vmem:[#allocation254_spill] sm:$0xff] %v10659_v20 }
 0x874   : > { %v17224_v62 = vrot.slane %v10630_v19, 2  ;;  %v16569_v58 = vrot.slane %v10732_v32, 2 }
 0x876   : > { %v10586_v14 = vpop.permute.xlu0 %3129  ;;  %v10597_v2 = vpop.permute.xlu2 %3139 }
 0x877   : > { %17199 = vst [vmem:[#allocation196_spill] sm:$0xff] %v10586_v14  ;;  %v10589_v10 = vpop.permute.xlu1 %3119  ;;  %v2292_v14 = vadd.f32 %v2256_v25, %v2062_v5  ;;  %v2486_v5 = vsel %vm533_vm3, %v10033_v28, %v10043_v42  ;;  %v10681_v25 = vsel %vm3270_vm5, %v17225_v13, %v17224_v62  ;;  %v2714_v42 = vsel %vm1051_vm4, %v10212_v43, %v10220_v55  ;;  %v10704_v55 = vld [vmem:[%s7946_s14 + $0x150] sm:$0xff] }
 0x878   : > { %17200 = vst [vmem:[#allocation198_spill] sm:$0xff] %v10589_v10  ;;  %v17208_v10 = vrot.slane %v10580_v11, 2  ;;  %v17226_v28 = vrot.slane %v10641_v18, 2  ;;  %v10699_v13 = vmul.f32 %v7632_v50, %v10659_v20  ;;  %v10701_v62 = vperm.slane %v6933_v16, 2 }
 0x879   : > { %17203 = vst [vmem:[#allocation197_spill] sm:$0xff] %v10597_v2  ;;  %v10722_v50 = vmul.f32 %v10718_v0, %v10657_v8  ;;  %v2522_v16 = vadd.f32 %v2486_v5, %v2292_v14  ;;  %v2942_v43 = vsel %vm1051_vm4, %v10385_v24, %v10393_v57  ;;  %v7638_v0 = vld [vmem:[%s7946_s14 + $0x250] sm:$0xff] }
 0x87a   : > { %v10615_v40 = vsel %vm3270_vm5, %v16541_v45, %v17208_v10  ;;  %v10636_v10 = vperm.slane %v6919_v6, 2  ;;  %v10651_v6 = vld [vmem:[%s7946_s14 + $0x70] sm:$0xff]  ;;  %17229 = vst [vmem:[#allocation259_spill] sm:$0xff] %v10699_v13  ;;  %v10737_v9 = vmul.f32 %v7637_v54, %v10701_v62  ;;  %v10741_v14 = vmul.f32 %v7638_v0, %v10701_v62 }
 0x87b   : > { %17230 = vst [vmem:[#allocation260_spill] sm:$0xff] %v10701_v62  ;;  %v16566_v57 = vrot.slane %v10722_v50, 2  ;;  %v2750_v5 = vadd.f32 %v2714_v42, %v2522_v16  ;;  %v2488_v42 = vsel %vm533_vm3, %v10039_v23, %v10049_v29 }
 0x87c   : > { %17214 = vst [vmem:[#allocation173_spill] sm:$0xff] %v10636_v10  ;;  %v10655_v45 = vmul.f32 %v10651_v6, %v10636_v10 }
 0x87d   : > { %17231 = vst [vmem:[#allocation261_spill] sm:$0xff] %v10704_v55  ;;  %v2978_v16 = vadd.f32 %v2942_v43, %v2750_v5 }
 0x87e   : > { %v10648_v33 = vpop.permute.xlu0 %3135  ;;  %17218 = vst [vmem:[#allocation109_spill] sm:$0xff] %v10655_v45  ;;  %v10727_v61 = vpop.permute.xlu2 %3145  ;;  %v17244_v62 = vrot.slane %v10655_v45, 2  ;;  %v17248_v45 = vld [vmem:[#allocation132_spill] sm:$0xff] }
 0x87f   : > { %17217 = vst [vmem:[#allocation46_spill] sm:$0xff] %v10648_v33  ;;  %v10665_v46 = vpop.permute.xlu1 %3125  ;;  %v10672_v33 = vmul.f32 %v10668_v4, %v10636_v10  ;;  %v17241_v10 = vrot.slane %v10695_v12, 2 }
 0x880   : > { %17221 = vst [vmem:[#allocation255_spill] sm:$0xff] %v10665_v46  ;;  %v17227_v46 = vrot.slane %v10634_v37, 2  ;;  %v10708_v37 = vmul.f32 %v10704_v55, %v10674_v26  ;;  %v17240_v55 = vld [vmem:[#allocation171_spill] sm:$0xff] }
 0x881   : > { %17222 = vst [vmem:[#allocation256_spill] sm:$0xff] %v10672_v33  ;;  %v17243_v0 = vrot.slane %v10672_v33, 2 }
 0x882   : > { %v10691_v36 = vsel %vm3270_vm5, %v17227_v46, %v17226_v28  ;;  %17232 = vst [vmem:[#allocation262_spill] sm:$0xff] %v10708_v37  ;;  %v10711_v28 = vld [vmem:[%s7946_s14 + $0x170] sm:$0xff] }
 0x883   : > { %17233 = vst [vmem:[#allocation263_spill] sm:$0xff] %v10711_v28  ;;  %v10715_v46 = vmul.f32 %v10711_v28, %v10674_v26  ;;  %v2064_v28 = vadd.f32 %v2028_v59, %v17238_v39  ;;  %v17239_v26 = vld [vmem:[#allocation176_spill] sm:$0xff]  ;;  %v10761_v59 = vsel %vm3270_vm5, %v17241_v10, %v16566_v57  ;;  %v17242_v39 = vrot.slane %v10699_v13, 2 }
 0x884   : > { %17236 = vst [vmem:[#allocation266_spill] sm:$0xff] %v10737_v9  ;;  %v2258_v54 = vsel %vm533_vm3, %v17240_v55, %v17239_v26  ;;  %v3297_v43 = vsel %vm3270_vm5, %v17244_v62, %v17243_v0  ;;  %v16577_v57 = vrot.slane %v10741_v14, 2  ;;  %v17247_v62 = vrot.slane %v10708_v37, 2 }
 0x885   : > { %17234 = vst [vmem:[#allocation264_spill] sm:$0xff] %v10715_v46  ;;  %v10768_v22 = vsel %vm3270_vm5, %v17242_v39, %v16569_v58  ;;  %v2294_v13 = vadd.f32 %v2258_v54, %v2064_v28  ;;  %v2716_v39 = vsel %vm1051_vm4, %v10218_v52, %v10226_v3  ;;  %v17246_v58 = vrot.slane %v10715_v46, 2  ;;  %v17254_v46 = vld [vmem:[#allocation22_spill] sm:$0xff] }
 0x886   : > { %17237 = vst [vmem:[#allocation267_spill] sm:$0xff] %v10741_v14  ;;  %v3142_v24 = vpop.permute.xlu0 %3141  ;;  %v2944_v28 = vsel %vm1051_vm4, %v10391_v21, %v10399_v35  ;;  %v17250_v54 = vrot.slane %v10737_v9, 2  ;;  %v17255_v9 = vld [vmem:[#allocation177_spill] sm:$0xff] }
 0x887   : > { %v3170_v5 = vsel %vm1051_vm4, %v10597_v2, %v3142_v24  ;;  %v10777_v12 = vpop.permute.xlu1 %3131  ;;  %v3429_v0 = vsel %vm3270_vm5, %v17247_v62, %v17246_v58  ;;  %v2524_v24 = vadd.f32 %v2488_v42, %v2294_v13  ;;  %v10804_v42 = vld [vmem:[%s7946_s14 + $0xc0] sm:$0x3]  ;;  %v17253_v62 = vld [vmem:[#allocation174_spill] sm:$0xff] }
 0x888   : > { %17245 = vst [vmem:[#allocation43_spill] sm:$0xff] %v10777_v12  ;;  %v3206_v29 = vadd.f32 %v3170_v5, %v2978_v16  ;;  %v17249_v12 = vld [vmem:[#allocation129_spill] sm:$0xff]  ;;  %v3561_v16 = vsel %vm3270_vm5, %v17250_v54, %v16577_v57  ;;  %v17251_v5 = vld [vmem:[#allocation111_spill] sm:$0xff]  ;;  %v2257_v54 = vsel %vm533_vm3, %v17255_v9, %v17240_v55  ;;  %v3246_v9 = vmul.f32 %v10576_v47, %v10804_v42 }
 0x889   : > { %v2030_v10 = vsel %vm533_vm3, %v17249_v12, %v17248_v45  ;;  %v2027_v13 = vsel %vm533_vm3, %v17251_v5, %v17216_v34  ;;  %v2752_v58 = vadd.f32 %v2716_v39, %v2524_v24  ;;  %v17252_v12 = vld [vmem:[#allocation179_spill] sm:$0xff]  ;;  %v10818_v39 = vld [vmem:[%s7946_s14 + $0x1a0] sm:$0x3] }
 0x88a   : > { %v3339_v2 = vadd.f32 %v3297_v43, %v3206_v29  ;;  %v3152_v29 = vpop.permute.xlu2 %3151  ;;  %v2260_v37 = vsel %vm533_vm3, %v17253_v62, %v17252_v12  ;;  %v2066_v14 = vadd.f32 %v2030_v10, %v17254_v46  ;;  %v17256_v24 = vld [vmem:[#allocation19_spill] sm:$0xff]  ;;  %v6930_v5 = vld [vmem:[%s7946_s14 + $0x280] sm:$0x3]  ;;  %v2715_v62 = vsel %vm1051_vm4, %v10234_v1, %v10218_v52 }
 0x88b   : > { %v2980_v57 = vadd.f32 %v2944_v28, %v2752_v58  ;;  %v2487_v28 = vsel %vm533_vm3, %v10051_v38, %v10039_v23  ;;  %v3379_v58 = vmul.f32 %v10818_v39, %v10657_v8  ;;  %v2946_v23 = vsel %vm1051_vm4, %v10397_v27, %v10405_v41  ;;  %v11209_v8 = vld [vmem:[%s7946_s14 + $0x128] sm:$0xff] }
 0x88c   : > { %v3471_v43 = vadd.f32 %v3429_v0, %v3339_v2  ;;  %v2063_v2 = vadd.f32 %v2027_v13, %v17256_v24  ;;  %v2490_v0 = vsel %vm533_vm3, %v10045_v51, %v10055_v31  ;;  %v2296_v55 = vadd.f32 %v2260_v37, %v2066_v14 }
 0x88d   : > { %v2718_v51 = vsel %vm1051_vm4, %v10224_v17, %v10232_v44  ;;  %v3304_v38 = vrot.slane %v3246_v9, 2  ;;  %v2943_v17 = vsel %vm1051_vm4, %v10407_v30, %v10391_v21  ;;  %v17259_v9 = vrot.slane %v10580_v11, 2 }
 0x88e   : > { %v10813_v33 = vpop.permute.xlu0 %3147  ;;  %v10815_v34 = vadd.f32 %v3561_v16, %v3471_v43  ;;  %v2293_v13 = vadd.f32 %v2257_v54, %v2063_v2  ;;  %v2526_v43 = vadd.f32 %v2490_v0, %v2296_v55  ;;  %v3436_v0 = vrot.slane %v3379_v58, 2  ;;  %v17261_v58 = vld [vmem:[#allocation60_spill] sm:$0xff] }
 0x88f   : > { %v3172_v46 = vsel %vm1051_vm4, %v10727_v61, %v10813_v33  ;;  %v10827_v10 = vpop.permute.xlu1 %3137  ;;  %v3305_v55 = vsel %vm3270_vm5, %v17259_v9, %v3304_v38  ;;  %v2031_v11 = vsel %vm533_vm3, %v17248_v45, %v17261_v58  ;;  %v17264_v38 = vld [vmem:[#allocation7_spill] sm:$0xff] }
 0x890   : > { %17257 = vst [vmem:[#allocation176_spill] sm:$0xff] %v10827_v10  ;;  %v3208_v16 = vadd.f32 %v3172_v46, %v2980_v57  ;;  %v2523_v14 = vadd.f32 %v2487_v28, %v2293_v13  ;;  %v3511_v57 = vmul.f32 %v6930_v5, %v10659_v20  ;;  %v2754_v54 = vadd.f32 %v2718_v51, %v2526_v43 }
 0x891   : > { %v17262_v43 = vrot.slane %v10732_v32, 2  ;;  %v3610_v32 = vld [vmem:[%s7946_s14 + $0x18] sm:$0xfc] }
 0x892   : > { %v3341_v37 = vadd.f32 %v10574_v49, %v3208_v16  ;;  %v2751_v2 = vadd.f32 %v2715_v62, %v2523_v14  ;;  %v2982_v52 = vadd.f32 %v2946_v23, %v2754_v54  ;;  %v10852_v1 = vpop.permute.xlu2 %3157  ;;  %v3568_v30 = vrot.slane %v3511_v57, 2  ;;  %v10877_v14 = vld [vmem:[%s7946_s14 + $0xc8] sm:$0x3]  ;;  %v3213_v54 = vld [vmem:[%s7946_s14] sm:$0xfc] }
 0x893   : > { %17258 = vst [vmem:[#allocation171_spill] sm:$0xff] %v10852_v1  ;;  %v2067_v57 = vadd.f32 %v2031_v11, %v17264_v38  ;;  %v3247_v9 = vmul.f32 %v10548_v48, %v10877_v14  ;;  %v6935_v1 = vld [vmem:[%s7946_s14 + $0xf8] sm:$0xfc] }
 0x894   : > { %v3473_v24 = vadd.f32 %v10681_v25, %v3341_v37  ;;  %v2979_v27 = vadd.f32 %v2943_v17, %v2751_v2  ;;  %v3569_v62 = vsel %vm3270_vm5, %v17262_v43, %v3568_v30  ;;  %v10893_v2 = vld [vmem:[%s7946_s14 + $0x20] sm:$0xff]  ;;  %v7640_v30 = vld [vmem:[%s7946_s14 + $0x38] sm:$0xff] }
 0x895   : > { %v3306_v11 = vrot.slane %v3247_v9, 2 }
 0x896   : > { %v3154_v49 = vpop.permute.xlu0 %3153  ;;  %v10855_v46 = vadd.f32 %v10691_v36, %v3473_v24  ;;  %v17260_v36 = vrot.slane %v10722_v50, 2 }
 0x897   : > { %v3174_v28 = vsel %vm1051_vm4, %v3152_v29, %v3154_v49  ;;  %v3144_v21 = vpop.permute.xlu1 %3143 }
 0x898   : > { %v3210_v25 = vadd.f32 %v3174_v28, %v2982_v52  ;;  %v3171_v16 = vsel %vm1051_vm4, %v3144_v21, %v10727_v61  ;;  %v3437_v13 = vsel %vm3270_vm5, %v17260_v36, %v3436_v0  ;;  %v17263_v61 = vld [vmem:[#allocation185_spill] sm:$0xff] }
 0x899   : > { %v3207_v5 = vadd.f32 %v3171_v16, %v2979_v27  ;;  %v2261_v50 = vsel %vm533_vm3, %v17252_v12, %v17263_v61  ;;  %v10900_v0 = vld [vmem:[%s7946_s14 + $0x1a8] sm:$0x3]  ;;  %v2491_v27 = vsel %vm533_vm3, %v10055_v31, %v10073_v15  ;;  %v11159_v15 = vld [vmem:[%s7946_s14 + $0x100] sm:$0xff] }
 0x89a   : > { %v3343_v51 = vadd.f32 %v3305_v55, %v3210_v25  ;;  %v2297_v52 = vadd.f32 %v2261_v50, %v2067_v57  ;;  %v6931_v16 = vld [vmem:[%s7946_s14 + $0x288] sm:$0x3]  ;;  %v3380_v31 = vmul.f32 %v10900_v0, %v10603_v7 }
 0x89b   : > { %v3340_v29 = vadd.f32 %v10615_v40, %v3207_v5  ;;  %v10884_v40 = vpop.permute.xlu2 %3622  ;;  %v2719_v5 = vsel %vm1051_vm4, %v10232_v44, %v10252_v63 }
 0x89c   : > { %v3475_v37 = vadd.f32 %v3437_v13, %v3343_v51  ;;  %v3633_v21 = vmul.f32 %v10884_v40, %v3610_v32  ;;  %v10911_v25 = vmul.f32 %v7640_v30, %v10884_v40  ;;  %v2527_v36 = vadd.f32 %v2491_v27, %v2297_v52 }
 0x89d   : > { %v3472_v23 = vadd.f32 %v10761_v59, %v3340_v29  ;;  %v2947_v51 = vsel %vm1051_vm4, %v10405_v41, %v10425_v53  ;;  %v3512_v29 = vmul.f32 %v6931_v16, %v10605_v60  ;;  %v3438_v50 = vrot.slane %v3380_v31, 2  ;;  %v3215_v16 = vld [vmem:[%s7946_s14 + $0x10] sm:$0xfc] }
 0x89e   : > { %v10882_v45 = vpop.permute.xlu0 %3618  ;;  %v10887_v17 = vadd.f32 %v3569_v62, %v3475_v37  ;;  %v2755_v43 = vadd.f32 %v2719_v5, %v2527_v36  ;;  %v3695_v62 = vrot.slane %v3633_v21, 2  ;;  %v3696_v44 = vrot.slane %v10911_v25, 2  ;;  %v3214_v5 = vld [vmem:[%s7946_s14 + $0x8] sm:$0xfc]  ;;  %v10961_v36 = vld [vmem:[%s7946_s14 + $0x30] sm:$0xff] }
 0x89f   : > { %v10889_v24 = vpop.permute.xlu1 %3149  ;;  %v3630_v12 = vmul.f32 %v10882_v45, %v3213_v54  ;;  %v10897_v59 = vmul.f32 %v10893_v2, %v10882_v45  ;;  %v10929_v37 = vadd.f32 %v10768_v22, %v3472_v23  ;;  %v17266_v41 = vrot.slane %v10559_v56, 2 }
 0x8a0   : > { %v2983_v38 = vadd.f32 %v2947_v51, %v2755_v43  ;;  %v3697_v22 = vsel %vm3270_vm5, %v3695_v62, %v3696_v44  ;;  %v17267_v23 = vrot.slane %v10630_v19, 2  ;;  %v17268_v56 = vrot.slane %v10641_v18, 2  ;;  %v10975_v43 = vld [vmem:[%s7946_s14 + $0x28] sm:$0xff] }
 0x8a1   : > { %v3686_v55 = vrot.slane %v3630_v12, 2  ;;  %v3687_v28 = vrot.slane %v10897_v59, 2  ;;  %v3307_v54 = vsel %vm3270_vm5, %v17266_v41, %v3306_v11  ;;  %v3570_v12 = vrot.slane %v3512_v29, 2 }
 0x8a2   : > { %v3439_v27 = vsel %vm3270_vm5, %v17267_v23, %v3438_v50 }
 0x8a3   : > { %v3688_v13 = vsel %vm3270_vm5, %v3686_v55, %v3687_v28  ;;  %v3571_v55 = vsel %vm3270_vm5, %v17268_v56, %v3570_v12 }
 0x8a4   : > { %3738 = vrot.lane.b32.xlu0 %v3688_v13, %s7848_s15  ;;  %v10966_v13 = vld [vmem:[%s7946_s14 + $0x50] sm:$0xff] }
 0x8a7   : > { %v10931_v57 = vpop.permute.xlu1 %3155 }
 0x8a8   : > { %17265 = vst [vmem:[#allocation132_spill] sm:$0xff] %v10931_v57  ;;  %v3175_v32 = vsel %vm1051_vm4, %v3154_v49, %v10931_v57 }
 0x8a9   : > { %v3211_v52 = vadd.f32 %v3175_v32, %v2983_v38 }
 0x8ab   : > { %v3344_v9 = vadd.f32 %v3307_v54, %v3211_v52 }
 0x8ac   : > { %3744 = vrot.lane.b32.xlu0 %v3697_v22, %s7848_s15  ;;  %v10983_v22 = vld [vmem:[%s7946_s14 + $0x48] sm:$0xff] }
 0x8ad   : > { %v3476_v49 = vadd.f32 %v3439_v27, %v3344_v9  ;;  %v10988_v27 = vld [vmem:[%s7946_s14 + $0x68] sm:$0xff] }
 0x8af   : > { %v3621_v21 = vpop.permute.xlu1 %3620  ;;  %v10948_v30 = vadd.f32 %v3571_v55, %v3476_v49  ;;  %v10996_v55 = vld [vmem:[%s7946_s14 + $0x40] sm:$0xff] }
 0x8b0   : > { %v10954_v31 = vsel %vm430_vm0, %v10882_v45, %v3621_v21  ;;  %v10958_v19 = vsel %vm430_vm0, %v3621_v21, %v10884_v40  ;;  %v3638_v49 = vmul.f32 %v10996_v55, %v10882_v45 }
 0x8b1   : > { %17269 = vst [vmem:[#allocation129_spill] sm:$0xff] %v10948_v30  ;;  %v3636_v18 = vmul.f32 %v10961_v36, %v10958_v19  ;;  %v10970_v51 = vmul.f32 %v10966_v13, %v10958_v19  ;;  %v3632_v11 = vmul.f32 %v10958_v19, %v3215_v16  ;;  %v3631_v29 = vmul.f32 %v10954_v31, %v3214_v5 }
 0x8b2   : > { %v3635_v62 = vmul.f32 %v10975_v43, %v10954_v31  ;;  %v3639_v23 = vmul.f32 %v10983_v22, %v10954_v31  ;;  %v3643_v9 = vmul.f32 %v10988_v27, %v10954_v31  ;;  %v3698_v5 = vrot.slane %v3638_v49, 2  ;;  %v11021_v49 = vld [vmem:[%s7946_s14 + $0x78] sm:$0xff] }
 0x8b3   : > { %v3693_v50 = vrot.slane %v3636_v18, 2  ;;  %v3702_v38 = vrot.slane %v10970_v51, 2  ;;  %v3692_v41 = vrot.slane %v3632_v11, 2  ;;  %v3689_v54 = vrot.slane %v3631_v29, 2  ;;  %v11004_v11 = vld [vmem:[%s7946_s14 + $0x60] sm:$0xff] }
 0x8b4   : > { %v3690_v32 = vrot.slane %v3635_v62, 2  ;;  %v3700_v21 = vrot.slane %v3639_v23, 2  ;;  %v3708_v16 = vrot.slane %v3643_v9, 2  ;;  %17270 = vst [vmem:[#allocation111_spill] sm:$0xff] %v11004_v11  ;;  %v3642_v29 = vmul.f32 %v11004_v11, %v10882_v45  ;;  %v7648_v62 = vld [vmem:[%s7946_s14 + $0x80] sm:$0xff] }
 0x8b5   : > { %v3703_v12 = vsel %vm3270_vm5, %v3693_v50, %v3702_v38  ;;  %v3694_v52 = vsel %vm3270_vm5, %v3692_v41, %v3693_v50  ;;  %v3646_v50 = vmul.f32 %v7648_v62, %v10882_v45  ;;  %v3699_v41 = vsel %vm3270_vm5, %v3687_v28, %v3698_v5  ;;  %v17335_v11 = vld [vmem:[#allocation21_spill] sm:$0xff] }
 0x8b6   : > { %3750 = vrot.lane.b32.xlu0 %v3703_v12, %s7848_s15  ;;  %3742 = vrot.lane.b32.xlu2 %v3694_v52, %s7848_s15  ;;  %v3691_v56 = vsel %vm3270_vm5, %v3689_v54, %v3690_v32  ;;  %v3709_v18 = vsel %vm3270_vm5, %v3700_v21, %v3708_v16  ;;  %v3701_v51 = vsel %vm3270_vm5, %v3690_v32, %v3700_v21  ;;  %v7649_v54 = vld [vmem:[%s7946_s14 + $0x58] sm:$0xff]  ;;  %v3706_v12 = vrot.slane %v3642_v29, 2 }
 0x8b7   : > { %3740 = vrot.lane.b32.xlu1 %v3691_v56, %s7848_s15  ;;  %v3641_v32 = vmul.f32 %v7649_v54, %v10884_v40  ;;  %v3714_v52 = vrot.slane %v3646_v50, 2  ;;  %v3645_v59 = vmul.f32 %v11021_v49, %v10884_v40  ;;  %v11026_v21 = vld [vmem:[%s7946_s14 + $0x98] sm:$0xff]  ;;  %v3648_v54 = vmul.f32 %v10668_v4, %v10958_v19 }
 0x8b8   : > { %v3707_v56 = vsel %vm3270_vm5, %v3698_v5, %v3706_v12  ;;  %v3649_v28 = vmul.f32 %v11026_v21, %v10884_v40  ;;  %v3644_v5 = vmul.f32 %v10651_v6, %v10958_v19 }
 0x8b9   : > { %v3704_v23 = vrot.slane %v3641_v32, 2  ;;  %v3715_v9 = vsel %vm3270_vm5, %v3706_v12, %v3714_v52  ;;  %v11043_v32 = vld [vmem:[%s7946_s14 + $0xb0] sm:$0xff] }
 0x8ba   : > { %v3720_v29 = vrot.slane %v3649_v28, 2  ;;  %v3710_v62 = vrot.slane %v3644_v5, 2  ;;  %v3652_v25 = vmul.f32 %v11043_v32, %v10958_v19  ;;  %v11056_v28 = vld [vmem:[%s7946_s14 + $0xa8] sm:$0xff] }
 0x8bc   : > { %v3711_v6 = vsel %vm3270_vm5, %v3702_v38, %v3710_v62  ;;  %v3655_v38 = vmul.f32 %v10954_v31, %v10877_v14 }
 0x8be   : > { %3756 = vrot.lane.b32.xlu0 %v3709_v18, %s7848_s15  ;;  %3748 = vrot.lane.b32.xlu2 %v3701_v51, %s7848_s15  ;;  %v3705_v18 = vsel %vm3270_vm5, %v3696_v44, %v3704_v23  ;;  %v3712_v51 = vrot.slane %v3645_v59, 2  ;;  %v17271_v44 = vld [vmem:[#allocation189_spill] sm:$0xff] }
 0x8bf   : > { %3746 = vrot.lane.b32.xlu1 %v3699_v41, %s7848_s15  ;;  %v3647_v12 = vmul.f32 %v17271_v44, %v10954_v31 }
 0x8c0   : > { %v3721_v50 = vsel %vm3270_vm5, %v3712_v51, %v3720_v29  ;;  %v3713_v41 = vsel %vm3270_vm5, %v3704_v23, %v3712_v51  ;;  %v3718_v23 = vrot.slane %v3648_v54, 2  ;;  %v7654_v51 = vld [vmem:[%s7946_s14 + $0xa0] sm:$0xff] }
 0x8c1   : > { %v3716_v4 = vrot.slane %v3647_v12, 2  ;;  %v6937_v12 = vld [vmem:[%s16313_s1 + $0x36] ss:$8 sm:$0x7] }
 0x8c2   : > { %v3719_v59 = vsel %vm3270_vm5, %v3710_v62, %v3718_v23 }
 0x8c3   : > { %v3717_v5 = vsel %vm3270_vm5, %v3708_v16, %v3716_v4 }
 0x8c6   : > { %3762 = vrot.lane.b32.xlu0 %v3715_v9, %s7848_s15  ;;  %3754 = vrot.lane.b32.xlu2 %v3707_v56, %s7848_s15  ;;  %v3726_v9 = vrot.slane %v3652_v25, 2 }
 0x8c7   : > { %3752 = vrot.lane.b32.xlu1 %v3705_v18, %s7848_s15  ;;  %v3651_v18 = vmul.f32 %v11056_v28, %v10954_v31  ;;  %v3654_v31 = vmul.f32 %v10882_v45, %v10804_v42 }
 0x8c8   : > { %v3727_v56 = vsel %vm3270_vm5, %v3718_v23, %v3726_v9 }
 0x8c9   : > { %v3724_v62 = vrot.slane %v3651_v18, 2  ;;  %v3730_v23 = vrot.slane %v3654_v31, 2 }
 0x8cb   : > { %v3725_v14 = vsel %vm3270_vm5, %v3716_v4, %v3724_v62  ;;  %v3845_v4 = vperm.slane %v6937_v12, 0 }
 0x8ce   : > { %3768 = vrot.lane.b32.xlu0 %v3721_v50, %s7848_s15  ;;  %3760 = vrot.lane.b32.xlu2 %v3713_v41, %s7848_s15  ;;  %v3650_v50 = vmul.f32 %v7654_v51, %v10882_v45  ;;  %v3732_v41 = vrot.slane %v3655_v38, 2  ;;  %v11085_v45 = vld [vmem:[%s7946_s14 + $0xd8] sm:$0x3] }
 0x8cf   : > { %3758 = vrot.lane.b32.xlu1 %v3711_v6, %s7848_s15  ;;  %v11076_v6 = vld [vmem:[%s7946_s14 + $0xb8] sm:$0xff]  ;;  %17273 = vst [vmem:[#allocation174_spill] sm:$0xff] %v11085_v45 }
 0x8d0   : > { %v3722_v54 = vrot.slane %v3650_v50, 2  ;;  %v3733_v25 = vsel %vm3270_vm5, %v3724_v62, %v3732_v41  ;;  %17272 = vst [vmem:[#allocation179_spill] sm:$0xff] %v11076_v6  ;;  %v3653_v44 = vmul.f32 %v11076_v6, %v10884_v40  ;;  %v3846_v41 = vperm.slane %v6937_v12, 1 }
 0x8d2   : > { %v3723_v16 = vsel %vm3270_vm5, %v3714_v52, %v3722_v54  ;;  %v3728_v42 = vrot.slane %v3653_v44, 2  ;;  %v3731_v52 = vsel %vm3270_vm5, %v3722_v54, %v3730_v23 }
 0x8d4   : > { %v3729_v18 = vsel %vm3270_vm5, %v3720_v29, %v3728_v42 }
 0x8d6   : > { %3774 = vrot.lane.b32.xlu0 %v3727_v56, %s7848_s15  ;;  %3766 = vrot.lane.b32.xlu2 %v3719_v59, %s7848_s15  ;;  %v11088_v56 = vld [vmem:[%s7946_s14 + $0xd0] sm:$0x3]  ;;  %v3657_v59 = vmul.f32 %v10884_v40, %v11085_v45  ;;  %v3847_v40 = vperm.slane %v6937_v12, 2  ;;  %v11401_v45 = vld [vmem:[%s7946_s14 + $0x1d8] sm:$0xfc] }
 0x8d7   : > { %3764 = vrot.lane.b32.xlu1 %v3717_v5, %s7848_s15  ;;  %17274 = vst [vmem:[#allocation22_spill] sm:$0xff] %v11088_v56  ;;  %v3656_v38 = vmul.f32 %v10958_v19, %v11088_v56 }
 0x8d8   : > { %v3736_v5 = vrot.slane %v3657_v59, 2 }
 0x8d9   : > { %v3734_v51 = vrot.slane %v3656_v38, 2 }
 0x8da   : > { %v3737_v50 = vsel %vm3270_vm5, %v3728_v42, %v3736_v5 }
 0x8db   : > { %v3735_v62 = vsel %vm3270_vm5, %v3726_v9, %v3734_v51 }
 0x8de   : > { %3780 = vrot.lane.b32.xlu0 %v3733_v25, %s7848_s15  ;;  %3772 = vrot.lane.b32.xlu2 %v3725_v14, %s7848_s15 }
 0x8df   : > { %3770 = vrot.lane.b32.xlu1 %v3723_v16, %s7848_s15 }
 0x8e6   : > { %3848 = vrot.lane.b32.xlu0 %v3845_v4, %s7847_s9  ;;  %3778 = vrot.lane.b32.xlu2 %v3731_v52, %s7848_s15 }
 0x8e7   : > { %3776 = vrot.lane.b32.xlu1 %v3729_v18, %s7848_s15 }
 0x8ee   : > { %3784 = vrot.lane.b32.xlu2 %v3737_v50, %s7848_s15 }
 0x8ef   : > { %3782 = vrot.lane.b32.xlu1 %v3735_v62, %s7848_s15 }
 0x8f6   : > { %3852 = vrot.lane.b32.xlu2 %v3847_v40, %s7847_s9 }
 0x8f7   : > { %3850 = vrot.lane.b32.xlu1 %v3846_v41, %s7847_s9  ;;  %v6920_v41 = vld [vmem:[%s7946_s14 + $0xe0] sm:$0xfc] }
 0x910   : > { %v11105_v29 = vpop.permute.xlu2 %3742 }
 0x911   : > { %17275 = vst [vmem:[#allocation177_spill] sm:$0xff] %v11105_v29 }
 0x916   : > { %v11107_v19 = vpop.permute.xlu0 %3738 }
 0x917   : > { %17276 = vst [vmem:[#allocation19_spill] sm:$0xff] %v11107_v19  ;;  %v11203_v19 = vld [vmem:[%s7946_s14 + $0x108] sm:$0xff] }
 0x918   : > { %v11109_v54 = vpop.permute.xlu2 %3748 }
 0x919   : > { %17277 = vst [vmem:[#allocation7_spill] sm:$0xff] %v11109_v54  ;;  %v6921_v54 = vld [vmem:[%s7946_s14 + $0xe8] sm:$0xfc] }
 0x91e   : > { %v11111_v25 = vpop.permute.xlu0 %3744 }
 0x91f   : > { %17278 = vst [vmem:[#allocation189_spill] sm:$0xff] %v11111_v25 }
 0x920   : > { %v11113_v14 = vpop.permute.xlu2 %3754 }
 0x921   : > { %17279 = vst [vmem:[#allocation268_spill] sm:$0xff] %v11113_v14 }
 0x928   : > { %v11115_v31 = vpop.permute.xlu0 %3750  ;;  %v11117_v9 = vpop.permute.xlu2 %3760 }
 0x929   : > { %17280 = vst [vmem:[#allocation269_spill] sm:$0xff] %v11115_v31  ;;  %v11119_v16 = vpop.permute.xlu1 %3740 }
 0x92a   : > { %17281 = vst [vmem:[#allocation270_spill] sm:$0xff] %v11117_v9 }
 0x92b   : > { %17282 = vst [vmem:[#allocation271_spill] sm:$0xff] %v11119_v16 }
 0x930   : > { %v11121_v44 = vpop.permute.xlu0 %3756  ;;  %v11125_v23 = vpop.permute.xlu2 %3766 }
 0x931   : > { %17283 = vst [vmem:[#allocation272_spill] sm:$0xff] %v11121_v44  ;;  %v11123_v12 = vpop.permute.xlu1 %3746  ;;  %v11216_v44 = vld [vmem:[%s7946_s14 + $0x148] sm:$0xff] }
 0x932   : > { %17284 = vst [vmem:[#allocation273_spill] sm:$0xff] %v11123_v12 }
 0x933   : > { %17285 = vst [vmem:[#allocation274_spill] sm:$0xff] %v11125_v23 }
 0x934   : > { %17294 = vst [vmem:[#allocation283_spill] sm:$0xff] %v11216_v44 }
 0x938   : > { %v11127_v4 = vpop.permute.xlu0 %3762  ;;  %v11131_v52 = vpop.permute.xlu2 %3772 }
 0x939   : > { %17286 = vst [vmem:[#allocation275_spill] sm:$0xff] %v11127_v4  ;;  %v11129_v42 = vpop.permute.xlu1 %3752 }
 0x93a   : > { %17287 = vst [vmem:[#allocation276_spill] sm:$0xff] %v11129_v42 }
 0x940   : > { %v11133_v59 = vpop.permute.xlu0 %3768  ;;  %v11137_v38 = vpop.permute.xlu2 %3778 }
 0x941   : > { %v11135_v18 = vpop.permute.xlu1 %3758 }
 0x942   : > { %17288 = vst [vmem:[#allocation277_spill] sm:$0xff] %v11135_v18 }
 0x948   : > { %v11139_v5 = vpop.permute.xlu0 %3774  ;;  %v11143_v50 = vpop.permute.xlu2 %3784 }
 0x949   : > { %v11141_v51 = vpop.permute.xlu1 %3764  ;;  %17290 = vst [vmem:[#allocation279_spill] sm:$0xff] %v11143_v50 }
 0x94a   : > { %17289 = vst [vmem:[#allocation278_spill] sm:$0xff] %v11141_v51  ;;  %v7657_v51 = vld [vmem:[%s7946_s14 + $0x118] sm:$0xff] }
 0x950   : > { %v11145_v62 = vpop.permute.xlu0 %3780  ;;  %v11152_v57 = vpop.permute.xlu2 %3852 }
 0x951   : > { %17291 = vst [vmem:[#allocation280_spill] sm:$0xff] %v11145_v62  ;;  %v11147_v40 = vpop.permute.xlu1 %3770  ;;  %v3863_v4 = vmul.f32 %v6935_v1, %v11152_v57  ;;  %v11169_v10 = vmul.f32 %v7657_v51, %v11152_v57 }
 0x952   : > { %17292 = vst [vmem:[#allocation281_spill] sm:$0xff] %v11152_v57 }
 0x953   : > { %v3925_v14 = vrot.slane %v3863_v4, 2  ;;  %v3926_v25 = vrot.slane %v11169_v10, 2  ;;  %v11189_v4 = vld [vmem:[%s7946_s14 + $0x110] sm:$0xff] }
 0x958   : > { %v11150_v30 = vpop.permute.xlu0 %3848 }
 0x959   : > { %v11155_v53 = vpop.permute.xlu1 %3776  ;;  %v3860_v63 = vmul.f32 %v6920_v41, %v11150_v30  ;;  %v11163_v50 = vmul.f32 %v11159_v15, %v11150_v30 }
 0x95b   : > { %v3916_v61 = vrot.slane %v3860_v63, 2  ;;  %v3917_v58 = vrot.slane %v11163_v50, 2  ;;  %v3927_v63 = vsel %vm3270_vm5, %v3925_v14, %v3926_v25  ;;  %v6922_v50 = vld [vmem:[%s7946_s14 + $0xf0] sm:$0xfc] }
 0x95c   : > { %v11194_v14 = vld [vmem:[%s7946_s14 + $0x130] sm:$0xff] }
 0x95d   : > { %v3918_v41 = vsel %vm3270_vm5, %v3916_v61, %v3917_v58 }
 0x95e   : > { %3968 = vrot.lane.b32.xlu0 %v3918_v41, %s7848_s15 }
 0x961   : > { %v11174_v12 = vpop.permute.xlu1 %3782 }
 0x962   : > { %17293 = vst [vmem:[#allocation282_spill] sm:$0xff] %v11174_v12 }
 0x966   : > { %3974 = vrot.lane.b32.xlu0 %v3927_v63, %s7848_s15 }
 0x969   : > { %v3851_v1 = vpop.permute.xlu1 %3850 }
 0x96a   : > { %v11182_v51 = vsel %vm430_vm0, %v11150_v30, %v3851_v1  ;;  %v11186_v61 = vsel %vm430_vm0, %v3851_v1, %v11152_v57 }
 0x96b   : > { %v3866_v10 = vmul.f32 %v11189_v4, %v11186_v61  ;;  %v11198_v41 = vmul.f32 %v11194_v14, %v11186_v61  ;;  %v3862_v63 = vmul.f32 %v6922_v50, %v11186_v61  ;;  %v3861_v12 = vmul.f32 %v6921_v54, %v11182_v51 }
 0x96c   : > { %v3865_v1 = vmul.f32 %v11203_v19, %v11182_v51  ;;  %v3869_v50 = vmul.f32 %v11209_v8, %v11182_v51 }
 0x96d   : > { %v3923_v31 = vrot.slane %v3866_v10, 2  ;;  %v3932_v42 = vrot.slane %v11198_v41, 2  ;;  %v3922_v20 = vrot.slane %v3862_v63, 2  ;;  %v3919_v16 = vrot.slane %v3861_v12, 2  ;;  %v11223_v41 = vld [vmem:[%s7946_s14 + $0x190] sm:$0xff] }
 0x96e   : > { %v3920_v29 = vrot.slane %v3865_v1, 2  ;;  %v11220_v10 = vmul.f32 %v11216_v44, %v11182_v51  ;;  %v3882_v12 = vmul.f32 %v11223_v41, %v11186_v61  ;;  %v6925_v1 = vld [vmem:[%s7946_s14 + $0x1b0] sm:$0x3]  ;;  %v3930_v18 = vrot.slane %v3869_v50, 2  ;;  %v7665_v44 = vld [vmem:[%s7946_s14 + $0x138] sm:$0xff] }
 0x96f   : > { %v3933_v54 = vsel %vm3270_vm5, %v3923_v31, %v3932_v42  ;;  %v3924_v47 = vsel %vm3270_vm5, %v3922_v20, %v3923_v31  ;;  %v7664_v20 = vld [vmem:[%s7946_s14 + $0x120] sm:$0xff]  ;;  %v3886_v7 = vmul.f32 %v6925_v1, %v11186_v61 }
 0x970   : > { %3980 = vrot.lane.b32.xlu0 %v3933_v54, %s7848_s15  ;;  %3972 = vrot.lane.b32.xlu2 %v3924_v47, %s7848_s15  ;;  %v3921_v63 = vsel %vm3270_vm5, %v3919_v16, %v3920_v29  ;;  %v3868_v31 = vmul.f32 %v7664_v20, %v11150_v30  ;;  %v3956_v60 = vrot.slane %v3882_v12, 2  ;;  %v3938_v9 = vrot.slane %v11220_v10, 2  ;;  %v7667_v10 = vld [vmem:[%s7946_s14 + $0x160] sm:$0xff] }
 0x971   : > { %3970 = vrot.lane.b32.xlu1 %v3921_v63, %s7848_s15  ;;  %v3964_v54 = vrot.slane %v3886_v7, 2  ;;  %v3871_v47 = vmul.f32 %v7665_v44, %v11152_v57  ;;  %v3931_v56 = vsel %vm3270_vm5, %v3920_v29, %v3930_v18  ;;  %v11244_v63 = vld [vmem:[%s7946_s14 + $0x140] sm:$0xff]  ;;  %v3876_v7 = vmul.f32 %v7667_v10, %v11150_v30  ;;  %v11263_v10 = vld [vmem:[%s7946_s14 + $0x178] sm:$0xff] }
 0x972   : > { %v3928_v48 = vrot.slane %v3868_v31, 2  ;;  %v3939_v20 = vsel %vm3270_vm5, %v3930_v18, %v3938_v9  ;;  %17296 = vst [vmem:[#allocation285_spill] sm:$0xff] %v11244_v63  ;;  %v3872_v50 = vmul.f32 %v11244_v63, %v11150_v30  ;;  %v17323_v63 = vld [vmem:[#allocation68_spill] sm:$0xff] }
 0x973   : > { %v11239_v16 = vsel %vm3270_vm5, %v3956_v60, %v3964_v54  ;;  %v3934_v12 = vrot.slane %v3871_v47, 2  ;;  %v3944_v29 = vrot.slane %v3876_v7, 2  ;;  %17298 = vst [vmem:[#allocation287_spill] sm:$0xff] %v11263_v10 }
 0x974   : > { %17295 = vst [vmem:[#allocation284_spill] sm:$0xff] %v11239_v16  ;;  %v3929_v44 = vsel %vm3270_vm5, %v3917_v58, %v3928_v48  ;;  %v3936_v31 = vrot.slane %v3872_v50, 2  ;;  %v11258_v16 = vld [vmem:[%s7946_s14 + $0x158] sm:$0xff]  ;;  %v11267_v58 = vmul.f32 %v11263_v10, %v11152_v57 }
 0x975   : > { %v3935_v18 = vsel %vm3270_vm5, %v3926_v25, %v3934_v12  ;;  %17297 = vst [vmem:[#allocation286_spill] sm:$0xff] %v11258_v16  ;;  %v17324_v10 = vld [vmem:[#allocation136_spill] sm:$0xff] }
 0x976   : > { %v3945_v1 = vsel %vm3270_vm5, %v3936_v31, %v3944_v29  ;;  %v3937_v54 = vsel %vm3270_vm5, %v3928_v48, %v3936_v31  ;;  %v16606_v47 = vrot.slane %v11267_v58, 2  ;;  %v17300_v31 = vld [vmem:[#allocation263_spill] sm:$0xff] }
 0x978   : > { %3986 = vrot.lane.b32.xlu0 %v3939_v20, %s7848_s15  ;;  %3978 = vrot.lane.b32.xlu2 %v3931_v56, %s7848_s15  ;;  %v3875_v20 = vmul.f32 %v11258_v16, %v11152_v57  ;;  %v17299_v56 = vld [vmem:[#allocation261_spill] sm:$0xff] }
 0x979   : > { %3976 = vrot.lane.b32.xlu1 %v3929_v44, %s7848_s15  ;;  %v3874_v25 = vmul.f32 %v17299_v56, %v11186_v61 }
 0x97a   : > { %v3942_v48 = vrot.slane %v3875_v20, 2 }
 0x97b   : > { %v3940_v50 = vrot.slane %v3874_v25, 2 }
 0x97c   : > { %v3951_v7 = vsel %vm3270_vm5, %v3942_v48, %v16606_v47  ;;  %v3943_v44 = vsel %vm3270_vm5, %v3934_v12, %v3942_v48  ;;  %v17302_v48 = vld [vmem:[#allocation203_spill] sm:$0xff] }
 0x980   : > { %3992 = vrot.lane.b32.xlu0 %v3945_v1, %s7848_s15  ;;  %3984 = vrot.lane.b32.xlu2 %v3937_v54, %s7848_s15  ;;  %v3878_v1 = vmul.f32 %v17300_v31, %v11186_v61  ;;  %v3941_v54 = vsel %vm3270_vm5, %v3932_v42, %v3940_v50  ;;  %v3881_v61 = vmul.f32 %v17302_v48, %v11182_v51 }
 0x981   : > { %3982 = vrot.lane.b32.xlu1 %v3935_v18, %s7848_s15  ;;  %v17301_v18 = vld [vmem:[#allocation200_spill] sm:$0xff] }
 0x982   : > { %v3877_v20 = vmul.f32 %v17301_v18, %v11182_v51  ;;  %v3948_v56 = vrot.slane %v3878_v1, 2  ;;  %v3954_v31 = vrot.slane %v3881_v61, 2  ;;  %v6943_v61 = vld [vmem:[%s16313_s1 + $0x4a] ss:$8 sm:$0x7] }
 0x984   : > { %v3946_v25 = vrot.slane %v3877_v20, 2  ;;  %v3957_v47 = vsel %vm3270_vm5, %v3948_v56, %v3956_v60  ;;  %v3949_v12 = vsel %vm3270_vm5, %v3940_v50, %v3948_v56  ;;  %v6940_v60 = vld [vmem:[%s16313_s1 + $0x37] ss:$8 sm:$0x7] }
 0x985   : > { %v4075_v50 = vperm.slane %v6940_v60, 0  ;;  %v4077_v20 = vperm.slane %v6940_v60, 2  ;;  %v4076_v56 = vperm.slane %v6940_v60, 1  ;;  %v3885_v60 = vmul.f32 %v10900_v0, %v11182_v51 }
 0x986   : > { %v3947_v42 = vsel %vm3270_vm5, %v3938_v9, %v3946_v25 }
 0x988   : > { %3998 = vrot.lane.b32.xlu0 %v3951_v7, %s7848_s15  ;;  %3990 = vrot.lane.b32.xlu2 %v3943_v44, %s7848_s15  ;;  %v17303_v7 = vld [vmem:[#allocation265_spill] sm:$0xff] }
 0x989   : > { %3988 = vrot.lane.b32.xlu1 %v3941_v54, %s7848_s15  ;;  %v3880_v44 = vmul.f32 %v17303_v7, %v11150_v30  ;;  %v3955_v54 = vsel %vm3270_vm5, %v3946_v25, %v3954_v31  ;;  %v6942_v25 = vld [vmem:[%s16313_s1 + $0x49] ss:$8 sm:$0x7] }
 0x98a   : > { %v4533_v7 = vperm.slane %v6942_v25, 2 }
 0x98b   : > { %v3952_v1 = vrot.slane %v3880_v44, 2  ;;  %v4532_v44 = vperm.slane %v6942_v25, 1 }
 0x98d   : > { %v3953_v9 = vsel %vm3270_vm5, %v3944_v29, %v3952_v1  ;;  %v4531_v29 = vperm.slane %v6942_v25, 0 }
 0x990   : > { %4004 = vrot.lane.b32.xlu0 %v3957_v47, %s7848_s15  ;;  %3996 = vrot.lane.b32.xlu2 %v3949_v12, %s7848_s15  ;;  %v6941_v47 = vld [vmem:[%s16313_s1 + $0x48] ss:$8 sm:$0x7] }
 0x991   : > { %3994 = vrot.lane.b32.xlu1 %v3947_v42, %s7848_s15  ;;  %v4303_v18 = vperm.slane %v6941_v47, 0  ;;  %v4305_v12 = vperm.slane %v6941_v47, 2  ;;  %v4304_v48 = vperm.slane %v6941_v47, 1  ;;  %v4759_v42 = vperm.slane %v6943_v61, 0 }
 0x998   : > { %4078 = vrot.lane.b32.xlu0 %v4075_v50, %s7847_s9  ;;  %4002 = vrot.lane.b32.xlu2 %v3955_v54, %s7848_s15  ;;  %v3962_v50 = vrot.slane %v3885_v60, 2  ;;  %v4761_v54 = vperm.slane %v6943_v61, 2 }
 0x999   : > { %4000 = vrot.lane.b32.xlu1 %v3953_v9, %s7848_s15  ;;  %v4760_v9 = vperm.slane %v6943_v61, 1 }
 0x99a   : > { %v3963_v47 = vsel %vm3270_vm5, %v3954_v31, %v3962_v50  ;;  %v7671_v50 = vld [vmem:[%s7946_s14] sm:$0xff] }
 0x9a0   : > { %4306 = vrot.lane.b32.xlu0 %v4303_v18, %s7849_s26  ;;  %4082 = vrot.lane.b32.xlu2 %v4077_v20, %s7847_s9  ;;  %v3884_v18 = vmul.f32 %v10818_v39, %v11150_v30  ;;  %v11331_v20 = vld [vmem:[%s7946_s14 + $0x198] sm:$0xff]  ;;  %v17306_v39 = vrot.slane %v11267_v58, 2 }
 0x9a1   : > { %4080 = vrot.lane.b32.xlu1 %v4076_v56, %s7847_s9  ;;  %17304 = vst [vmem:[#allocation261_spill] sm:$0xff] %v11331_v20  ;;  %v11335_v0 = vmul.f32 %v11331_v20, %v11152_v57  ;;  %v7674_v57 = vld [vmem:[%s7946_s14 + $0xf0] sm:$0xff]  ;;  %s7797_s9 = sshra.s32 %s6779_s7, 4  ;;  %s7798_s9 = int_to_ptr.hbm [resolvable:$true] %s7797_s9 }
 0x9a2   : > { %v3960_v51 = vrot.slane %v3884_v18, 2  ;;  %v17317_v18 = vld [vmem:[#allocation66_spill] sm:$0xff]  ;;  %p7804_p0 = scmp.lt.s32.totalorder %s7798_s9, %s16317_s5 }
 0x9a3   : > { %17305 = vst [vmem:[#allocation263_spill] sm:$0xff] %v11335_v0  ;;  %v16607_v56 = vrot.slane %v11335_v0, 2 }
 0x9a4   : > { %v3961_v31 = vsel %vm3270_vm5, %v3952_v1, %v3960_v51 }
 0x9a5   : > { %v3959_v30 = vsel %vm3270_vm5, %v17306_v39, %v16607_v56  ;;  %v17318_v56 = vld [vmem:[#allocation61_spill] sm:$0xff] }
 0x9a8   : > { %4534 = vrot.lane.b32.xlu0 %v4531_v29, %s7849_s26  ;;  %4310 = vrot.lane.b32.xlu2 %v4305_v12, %s7849_s26 }
 0x9a9   : > { %4308 = vrot.lane.b32.xlu1 %v4304_v48, %s7849_s26 }
 0x9b0   : > { %4762 = vrot.lane.b32.xlu0 %v4759_v42, %s7849_s26  ;;  %4538 = vrot.lane.b32.xlu2 %v4533_v7, %s7849_s26 }
 0x9b1   : > { %4536 = vrot.lane.b32.xlu1 %v4532_v44, %s7849_s26 }
 0x9b8   : > { %4010 = vrot.lane.b32.xlu0 %v3963_v47, %s7848_s15  ;;  %4766 = vrot.lane.b32.xlu2 %v4761_v54, %s7849_s26  ;;  %v17316_v54 = vld [vmem:[#allocation65_spill] sm:$0xff] }
 0x9b9   : > { %4764 = vrot.lane.b32.xlu1 %v4760_v9, %s7849_s26  ;;  %v248_v9 = vmul.f32 %v7671_v50, %v17316_v54  ;;  %v7672_v47 = vld [vmem:[%s7946_s14 + $0xe0] sm:$0xff]  ;;  %s7799_s26 = scalar_lea.hbm %s7798_s9, 1 }
 0x9ba   : > { %v312_v51 = vmul.f32 %v7672_v47, %v17317_v18  ;;  %v7676_v47 = vld [vmem:[%s7946_s14 + $0x8] sm:$0xff]  ;;  %p7800_p11 = scmp.ne.s32.totalorder %s7798_s9, %s7799_s26 }
 0x9bc   : > { %p7801_p12 = pnand %p7800_p11, %p7919_p5 }
 0x9be   : > { %p7802_p13 = pneg %p7801_p12 }
 0x9c0   : > { %4008 = vrot.lane.b32.xlu2 %v3961_v31, %s7848_s15 }
 0x9c1   : > { %4006 = vrot.lane.b32.xlu1 %v3959_v30, %s7848_s15  ;;  %v7673_v30 = vld [vmem:[%s7946_s14 + $0x10] sm:$0xff] }
 0x9c2   : > { %v250_v0 = vmul.f32 %v7673_v30, %v17318_v56  ;;  %v251_v30 = vmul.f32 %v10893_v2, %v17316_v54 }
 0x9ca   : > { %v11347_v25 = vpop.permute.xlu2 %3972 }
 0x9cb   : > { %17307 = vst [vmem:[#allocation200_spill] sm:$0xff] %v11347_v25 }
 0x9d0   : > { %v11349_v29 = vpop.permute.xlu0 %3968 }
 0x9d1   : > { %17308 = vst [vmem:[#allocation203_spill] sm:$0xff] %v11349_v29 }
 0x9d2   : > { %v11351_v12 = vpop.permute.xlu2 %3978 }
 0x9d3   : > { %17309 = vst [vmem:[#allocation265_spill] sm:$0xff] %v11351_v12  ;;  %v7675_v12 = vld [vmem:[%s7946_s14 + $0x1c0] sm:$0xff] }
 0x9d8   : > { %v11353_v48 = vpop.permute.xlu0 %3974 }
 0x9d9   : > { %17310 = vst [vmem:[#allocation288_spill] sm:$0xff] %v11353_v48 }
 0x9da   : > { %v11355_v1 = vpop.permute.xlu2 %3984 }
 0x9db   : > { %17311 = vst [vmem:[#allocation289_spill] sm:$0xff] %v11355_v1  ;;  %v17319_v1 = vld [vmem:[#allocation62_spill] sm:$0xff] }
 0x9dc   : > { %v314_v48 = vmul.f32 %v7674_v57, %v17319_v1  ;;  %v315_v57 = vmul.f32 %v11159_v15, %v17317_v18  ;;  %17325 = vst [vmem:[#allocation62_spill] sm:$0xff] %v11401_v45  ;;  %v7679_v15 = vld [vmem:[%s7946_s14 + $0x1d0] sm:$0xff]  ;;  %v17326_v18 = vld [vmem:[#allocation69_spill] sm:$0xff] }
 0x9e2   : > { %v11357_v61 = vpop.permute.xlu0 %3980  ;;  %v3991_v58 = vpop.permute.xlu2 %3990 }
 0x9e3   : > { %17312 = vst [vmem:[#allocation290_spill] sm:$0xff] %v11357_v61  ;;  %v11359_v42 = vpop.permute.xlu1 %3970  ;;  %v330_v61 = vadd.f32 %v312_v51, %v248_v9  ;;  %v332_v9 = vadd.f32 %v314_v48, %v250_v0  ;;  %v3797_v51 = vsel %vm533_vm3, %v11125_v23, %v11133_v59  ;;  %v333_v0 = vadd.f32 %v315_v57, %v251_v30  ;;  %v11406_v48 = vld [vmem:[%s7946_s14 + $0x1e0] sm:$0xff] }
 0x9e4   : > { %17313 = vst [vmem:[#allocation291_spill] sm:$0xff] %v11359_v42  ;;  %v17322_v42 = vld [vmem:[#allocation67_spill] sm:$0xff] }
 0x9e5   : > { %v249_v25 = vmul.f32 %v7676_v47, %v17322_v42  ;;  %v252_v2 = vmul.f32 %v10975_v43, %v17322_v42 }
 0x9ea   : > { %v11361_v7 = vpop.permute.xlu0 %3986  ;;  %v11363_v44 = vpop.permute.xlu2 %3996 }
 0x9eb   : > { %17314 = vst [vmem:[#allocation292_spill] sm:$0xff] %v11361_v7  ;;  %v11365_v60 = vpop.permute.xlu1 %3976  ;;  %v7677_v7 = vld [vmem:[%s7946_s14 + $0xe8] sm:$0xff] }
 0x9ec   : > { %17315 = vst [vmem:[#allocation293_spill] sm:$0xff] %v11365_v60  ;;  %v17320_v60 = vld [vmem:[#allocation70_spill] sm:$0xff]  ;;  %v313_v20 = vmul.f32 %v7677_v7, %v17323_v63  ;;  %v316_v7 = vmul.f32 %v11203_v19, %v17323_v63  ;;  %v253_v19 = vmul.f32 %v10961_v36, %v17318_v56 }
 0x9ed   : > { %v376_v29 = vmul.f32 %v7675_v12, %v17320_v60  ;;  %v379_v59 = vmul.f32 %v11406_v48, %v17320_v60  ;;  %v11433_v60 = vld [vmem:[%s7946_s14 + $0x1f8] sm:$0xff] }
 0x9ee   : > { %v331_v16 = vadd.f32 %v313_v20, %v249_v25  ;;  %v317_v20 = vmul.f32 %v11189_v4, %v17319_v1  ;;  %v11413_v25 = vld [vmem:[%s7946_s14 + $0x1e8] sm:$0xff]  ;;  %v319_v4 = vmul.f32 %v11209_v8, %v17323_v63  ;;  %17328 = vst [vmem:[#allocation294_spill] sm:$0xff] %v11433_v60 }
 0x9ef   : > { %v394_v12 = vadd.f32 %v376_v29, %v330_v61  ;;  %v378_v29 = vmul.f32 %v7679_v15, %v17326_v18  ;;  %v380_v43 = vmul.f32 %v11413_v25, %v17324_v10  ;;  %v255_v61 = vmul.f32 %v10983_v22, %v17322_v42 }
 0x9f0   : > { %v334_v22 = vadd.f32 %v316_v7, %v252_v2  ;;  %v256_v42 = vmul.f32 %v10966_v13, %v17318_v56  ;;  %v17331_v2 = vld [vmem:[#allocation18_spill] sm:$0xff] }
 0x9f1   : > { %v337_v13 = vadd.f32 %v319_v4, %v255_v61  ;;  %v11463_v56 = vld [vmem:[%s7946_s14 + $0x208] sm:$0xff] }
 0x9f2   : > { %v11371_v31 = vpop.permute.xlu0 %3992  ;;  %v11373_v39 = vpop.permute.xlu2 %4002 }
 0x9f3   : > { %v11381_v50 = vpop.permute.xlu1 %3982 }
 0x9f4   : > { %17321 = vst [vmem:[#allocation61_spill] sm:$0xff] %v11381_v50  ;;  %v7678_v50 = vld [vmem:[%s7946_s14 + $0x1c8] sm:$0xff] }
 0x9f5   : > { %v377_v47 = vmul.f32 %v7678_v50, %v17324_v10  ;;  %v3833_v50 = vadd.f32 %v3797_v51, %v10815_v34 }
 0x9fa   : > { %v3999_v30 = vpop.permute.xlu0 %3998  ;;  %v11422_v57 = vpop.permute.xlu2 %4082 }
 0x9fb   : > { %v4027_v15 = vsel %vm533_vm3, %v11363_v44, %v3999_v30  ;;  %v11428_v23 = vpop.permute.xlu1 %3988  ;;  %v4093_v36 = vmul.f32 %v11401_v45, %v11422_v57  ;;  %v11437_v34 = vmul.f32 %v11433_v60, %v11422_v57  ;;  %v7683_v30 = vld [vmem:[%s7946_s14 + $0x238] sm:$0xff]  ;;  %v320_v45 = vmul.f32 %v11194_v14, %v17319_v1 }
 0x9fc   : > { %17327 = vst [vmem:[#allocation69_spill] sm:$0xff] %v11428_v23  ;;  %v11439_v51 = vadd.f32 %v4027_v15, %v3833_v50  ;;  %v11443_v8 = vsel %vm533_vm3, %v11428_v23, %v3991_v58  ;;  %v11447_v63 = vmul.f32 %v7683_v30, %v11422_v57  ;;  %v17332_v50 = vld [vmem:[#allocation10_spill] sm:$0xff]  ;;  %v396_v58 = vadd.f32 %v378_v29, %v332_v9 }
 0x9fd   : > { %17330 = vst [vmem:[#allocation296_spill] sm:$0xff] %v11443_v8  ;;  %v4155_v60 = vrot.slane %v4093_v36, 2  ;;  %v16632_v7 = vrot.slane %v11437_v34, 2  ;;  %v534_v15 = vsel %vm533_vm3, %v17332_v50, %v17331_v2  ;;  %v335_v23 = vadd.f32 %v317_v20, %v253_v19  ;;  %v7686_v19 = vld [vmem:[%s7946_s14 + $0x258] sm:$0xff]  ;;  %v11480_v8 = vld [vmem:[%s7946_s14 + $0x210] sm:$0xff] }
 0x9fe   : > { %17329 = vst [vmem:[#allocation295_spill] sm:$0xff] %v11439_v51  ;;  %v11458_v51 = vld [vmem:[%s7946_s14 + $0x1f0] sm:$0xff]  ;;  %v383_v14 = vmul.f32 %v11463_v56, %v17324_v10  ;;  %v3799_v1 = vsel %vm533_vm3, %v11131_v52, %v11139_v5  ;;  %v395_v29 = vadd.f32 %v377_v47, %v331_v16  ;;  %v397_v36 = vadd.f32 %v379_v59, %v333_v0 }
 0x9ff   : > { %v381_v30 = vmul.f32 %v11458_v51, %v17326_v18  ;;  %v4157_v9 = vsel %vm3270_vm5, %v4155_v60, %v16632_v7  ;;  %v16633_v20 = vrot.slane %v11447_v63, 2  ;;  %v11477_v61 = vmul.f32 %v7686_v19, %v11422_v57  ;;  %17334 = vst [vmem:[#allocation10_spill] sm:$0xff] %v11480_v8  ;;  %v17345_v19 = vld [vmem:[#allocation130_spill] sm:$0xff] }
 0xa00   : > { %4204 = vrot.lane.b32.xlu2 %v4157_v9, %s7848_s15  ;;  %v570_v4 = vadd.f32 %v534_v15, %v394_v12  ;;  %v398_v50 = vadd.f32 %v380_v43, %v334_v22  ;;  %v338_v10 = vadd.f32 %v320_v45, %v256_v42  ;;  %v384_v6 = vmul.f32 %v11480_v8, %v17326_v18  ;;  %v17336_v9 = vld [vmem:[#allocation8_spill] sm:$0xff]  ;;  %v17338_v12 = vld [vmem:[#allocation13_spill] sm:$0xff]  ;;  %v17350_v7 = vld [vmem:[#allocation6_spill] sm:$0xff] }
 0xa01   : > { %17333 = vst [vmem:[#allocation18_spill] sm:$0xff] %v11477_v61  ;;  %v535_v16 = vsel %vm533_vm3, %v17331_v2, %v17335_v11  ;;  %v399_v60 = vadd.f32 %v381_v30, %v335_v23  ;;  %v3835_v47 = vadd.f32 %v3799_v1, %v10855_v46  ;;  %v16631_v59 = vrot.slane %v11477_v61, 2  ;;  %v17337_v42 = vld [vmem:[#allocation24_spill] sm:$0xff]  ;;  %v17343_v30 = vld [vmem:[#allocation29_spill] sm:$0xff] }
 0xa02   : > { %v11488_v0 = vpop.permute.xlu0 %4004  ;;  %v536_v45 = vsel %vm533_vm3, %v17335_v11, %v17336_v9  ;;  %v537_v43 = vsel %vm533_vm3, %v17338_v12, %v17337_v42  ;;  %v401_v18 = vadd.f32 %v383_v14, %v337_v13  ;;  %v538_v13 = vsel %vm533_vm3, %v17337_v42, %v17343_v30  ;;  %v17344_v14 = vld [vmem:[#allocation16_spill] sm:$0xff] }
 0xa03   : > { %v4029_v22 = vsel %vm533_vm3, %v11373_v39, %v11488_v0  ;;  %v3995_v23 = vpop.permute.xlu1 %3994  ;;  %v11515_v11 = vsel %vm3270_vm5, %v16633_v20, %v16631_v59  ;;  %v402_v1 = vadd.f32 %v384_v6, %v338_v10  ;;  %v571_v9 = vadd.f32 %v535_v16, %v395_v29  ;;  %v17352_v10 = vld [vmem:[#allocation37_spill] sm:$0xff]  ;;  %v17354_v29 = vld [vmem:[#allocation180_spill] sm:$0xff] }
 0xa04   : > { %v11500_v2 = vadd.f32 %v4029_v22, %v3835_v47  ;;  %v11504_v46 = vsel %vm533_vm3, %v11371_v31, %v3995_v23  ;;  %v11508_v15 = vsel %vm533_vm3, %v3995_v23, %v11363_v44  ;;  %17342 = vst [vmem:[#allocation13_spill] sm:$0xff] %v11515_v11  ;;  %v539_v31 = vsel %vm533_vm3, %v17343_v30, %v17344_v14  ;;  %v17346_v47 = vld [vmem:[#allocation112_spill] sm:$0xff]  ;;  %v17348_v22 = vld [vmem:[#allocation33_spill] sm:$0xff] }
 0xa05   : > { %17340 = vst [vmem:[#allocation8_spill] sm:$0xff] %v11504_v46  ;;  %v2029_v44 = vsel %vm533_vm3, %v17346_v47, %v17345_v19  ;;  %v11528_v12 = vmul.f32 %v10996_v55, %v17316_v54  ;;  %v17349_v23 = vld [vmem:[#allocation32_spill] sm:$0xff]  ;;  %v542_v42 = vsel %vm533_vm3, %v17348_v22, %v17350_v7  ;;  %v11536_v20 = vadd.f32 %v536_v45, %v396_v58  ;;  %v17353_v30 = vld [vmem:[#allocation25_spill] sm:$0xff]  ;;  %v17355_v47 = vld [vmem:[#allocation38_spill] sm:$0xff] }
 0xa06   : > { %17339 = vst [vmem:[#allocation21_spill] sm:$0xff] %v11500_v2  ;;  %v541_v59 = vsel %vm533_vm3, %v17349_v23, %v17348_v22  ;;  %v573_v6 = vadd.f32 %v537_v43, %v397_v36  ;;  %v711_v14 = vsel %vm533_vm3, %v17353_v30, %v17352_v10  ;;  %v2259_v55 = vsel %vm533_vm3, %v17239_v26, %v17354_v29  ;;  %v17356_v36 = vld [vmem:[#allocation41_spill] sm:$0xff]  ;;  %v17358_v30 = vld [vmem:[#allocation219_spill] sm:$0xff]  ;;  %v17395_v61 = vld [vmem:[#allocation80_spill] sm:$0xff] }
 0xa07   : > { %17341 = vst [vmem:[#allocation24_spill] sm:$0xff] %v11508_v15  ;;  %v574_v16 = vadd.f32 %v538_v13, %v398_v50  ;;  %v575_v19 = vadd.f32 %v539_v31, %v399_v60  ;;  %v2065_v2 = vadd.f32 %v2029_v44, %v17355_v47  ;;  %v3798_v7 = vsel %vm533_vm3, %v11147_v40, %v11131_v52  ;;  %v17357_v22 = vld [vmem:[#allocation221_spill] sm:$0xff]  ;;  %v17359_v50 = vld [vmem:[#allocation28_spill] sm:$0xff]  ;;  %v17360_v13 = vld [vmem:[#allocation42_spill] sm:$0xff] }
 0xa08   : > { %17347 = vst [vmem:[#allocation29_spill] sm:$0xff] %v11528_v12  ;;  %v577_v58 = vadd.f32 %v541_v59, %v401_v18  ;;  %v578_v45 = vadd.f32 %v542_v42, %v402_v1  ;;  %v712_v43 = vsel %vm533_vm3, %v17352_v10, %v17356_v36  ;;  %v2489_v15 = vsel %vm533_vm3, %v17358_v30, %v17357_v22  ;;  %v17361_v31 = vld [vmem:[#allocation17_spill] sm:$0xff]  ;;  %v17362_v18 = vld [vmem:[#allocation239_spill] sm:$0xff]  ;;  %v17397_v12 = vld [vmem:[#allocation264_spill] sm:$0xff] }
 0xa09   : > { %17351 = vst [vmem:[#allocation16_spill] sm:$0xff] %v11536_v20  ;;  %v11554_v26 = vadd.f32 %v711_v14, %v573_v6  ;;  %v713_v60 = vsel %vm533_vm3, %v17356_v36, %v17359_v50  ;;  %v708_v52 = vsel %vm533_vm3, %v17361_v31, %v17360_v13  ;;  %v2295_v40 = vadd.f32 %v2259_v55, %v2065_v2  ;;  %v17363_v44 = vld [vmem:[#allocation173_spill] sm:$0xff]  ;;  %v7688_v14 = vld [vmem:[%s7946_s14 + $0x278] sm:$0xff]  ;;  %v17366_v2 = vld [vmem:[#allocation34_spill] sm:$0xff] }
 0xa0a   : > { %v11562_v59 = vpop.permute.xlu0 %4078  ;;  %v2717_v1 = vsel %vm1051_vm4, %v10226_v3, %v17362_v18  ;;  %v11569_v42 = vmul.f32 %v11043_v32, %v17363_v44  ;;  %v3834_v6 = vadd.f32 %v3798_v7, %v10929_v37  ;;  %v11574_v29 = vmul.f32 %v7688_v14, %v11422_v57  ;;  %v11581_v3 = vpop.permute.xlu2 %4310  ;;  %v17367_v30 = vld [vmem:[#allocation45_spill] sm:$0xff]  ;;  %v17368_v37 = vld [vmem:[#allocation44_spill] sm:$0xff]  ;;  %v17369_v50 = vld [vmem:[#allocation15_spill] sm:$0xff] }
 0xa0b   : > { %v4001_v10 = vpop.permute.xlu1 %4000  ;;  %v11576_v47 = vadd.f32 %v712_v43, %v574_v16  ;;  %v709_v55 = vsel %vm533_vm3, %v17360_v13, %v17366_v2  ;;  %v2525_v36 = vadd.f32 %v2489_v15, %v2295_v40  ;;  %v715_v7 = vsel %vm533_vm3, %v17368_v37, %v17367_v30  ;;  %v17370_v16 = vld [vmem:[#allocation252_spill] sm:$0xff]  ;;  %v17372_v14 = vld [vmem:[#allocation257_spill] sm:$0xff]  ;;  %v11648_v37 = vld [vmem:[%s7946_s14 + $0x1d0] sm:$0xfc] }
 0xa0c   : > { %17364 = vst [vmem:[#allocation130_spill] sm:$0xff] %v11569_v42  ;;  %v4028_v22 = vsel %vm533_vm3, %v4001_v10, %v11373_v39  ;;  %v716_v31 = vsel %vm533_vm3, %v17367_v30, %v17369_v50  ;;  %v2945_v43 = vsel %vm1051_vm4, %v10399_v35, %v17370_v16  ;;  %v11596_v15 = vadd.f32 %v713_v60, %v575_v19  ;;  %v6939_v10 = vld [vmem:[%s7946_s14 + $0x298] sm:$0x3]  ;;  %v17377_v16 = vld [vmem:[#allocation78_spill] sm:$0xff]  ;;  %v17378_v46 = vld [vmem:[#allocation73_spill] sm:$0xff] }
 0xa0d   : > { %17365 = vst [vmem:[#allocation112_spill] sm:$0xff] %v11574_v29  ;;  %v11594_v18 = vadd.f32 %v4028_v22, %v3834_v6  ;;  %v744_v13 = vadd.f32 %v708_v52, %v570_v4  ;;  %v2753_v40 = vadd.f32 %v2717_v1, %v2525_v36  ;;  %v11600_v39 = vmul.f32 %v11223_v41, %v17372_v14  ;;  %v17374_v1 = vld [vmem:[#allocation77_spill] sm:$0xff]  ;;  %v17375_v36 = vld [vmem:[#allocation74_spill] sm:$0xff]  ;;  %v17376_v22 = vld [vmem:[#allocation72_spill] sm:$0xff] }
 0xa0e   : > { %v3173_v30 = vsel %vm1051_vm4, %v10813_v33, %v10889_v24  ;;  %v4117_v6 = vmul.f32 %v6939_v10, %v11422_v57  ;;  %v745_v19 = vadd.f32 %v709_v55, %v571_v9  ;;  %v751_v60 = vadd.f32 %v715_v7, %v577_v58  ;;  %v17379_v9 = vld [vmem:[#allocation79_spill] sm:$0xff]  ;;  %v17384_v10 = vld [vmem:[#allocation82_spill] sm:$0xff]  ;;  %17392 = vst [vmem:[#allocation41_spill] sm:$0xff] %v11648_v37 }
 0xa0f   : > { %17371 = vst [vmem:[#allocation33_spill] sm:$0xff] %v11594_v18  ;;  %v752_v4 = vadd.f32 %v716_v31, %v578_v45  ;;  %v2981_v52 = vadd.f32 %v2945_v43, %v2753_v40  ;;  %v882_v41 = vsel %vm533_vm3, %v17375_v36, %v17374_v1  ;;  %v883_v50 = vsel %vm533_vm3, %v17374_v1, %v17376_v22  ;;  %v11623_v7 = vld [vmem:[%s7946_s14 + $0x270] sm:$0xff]  ;;  %v17381_v31 = vld [vmem:[#allocation260_spill] sm:$0xff]  ;;  %v17385_v1 = vld [vmem:[#allocation85_spill] sm:$0xff] }
 0xa10   : > { %17373 = vst [vmem:[#allocation6_spill] sm:$0xff] %v11600_v39  ;;  %v886_v33 = vsel %vm533_vm3, %v17378_v46, %v17377_v16  ;;  %v4196_v24 = vrot.slane %v4117_v6, 2  ;;  %v885_v58 = vsel %vm533_vm3, %v17379_v9, %v17378_v46  ;;  %v11627_v43 = vmul.f32 %v11623_v7, %v17381_v31  ;;  %v17386_v36 = vld [vmem:[#allocation81_spill] sm:$0xff]  ;;  %v11694_v31 = vld [vmem:[%s7946_s14 + $0x1c8] sm:$0xfc] }
 0xa11   : > { %v3209_v45 = vadd.f32 %v3173_v30, %v2981_v52  ;;  %17380 = vst [vmem:[#allocation37_spill] sm:$0xff] %v11623_v7  ;;  %v887_v6 = vsel %vm533_vm3, %v17377_v16, %v17384_v10  ;;  %v889_v46 = vsel %vm533_vm3, %v17386_v36, %v17385_v1  ;;  %v17387_v30 = vrot.slane %v11569_v42, 2  ;;  %v17388_v52 = vld [vmem:[#allocation256_spill] sm:$0xff]  ;;  %v11672_v42 = vld [vmem:[%s7946_s14 + $0x230] sm:$0xff] }
 0xa12   : > { %17382 = vst [vmem:[#allocation25_spill] sm:$0xff] %v11627_v43  ;;  %v11629_v40 = vpop.permute.xlu0 %4306  ;;  %v17389_v9 = vrot.slane %v17388_v52, 2  ;;  %v17390_v18 = vrot.slane %v11574_v29, 2  ;;  %v11659_v52 = vld [vmem:[%s7946_s14 + $0x220] sm:$0xff]  ;;  %v17396_v23 = vrot.slane %v11600_v39, 2  ;;  %v17398_v22 = vrot.slane %v17397_v12, 2  ;;  %v11691_v11 = vpop.permute.xlu2 %4538 }
 0xa13   : > { %17383 = vst [vmem:[#allocation180_spill] sm:$0xff] %v11629_v40  ;;  %v4081_v35 = vpop.permute.xlu1 %4080  ;;  %v16643_v2 = vrot.slane %v11627_v43, 2  ;;  %v17413_v39 = vrot.slane %v11447_v63, 2  ;;  %v11817_v63 = vmul.f32 %v11021_v49, %v11581_v3 }
 0xa14   : > { %v3303_v55 = vsel %vm3270_vm5, %v17389_v9, %v17387_v30  ;;  %v11645_v54 = vsel %vm3270_vm5, %v17390_v18, %v4196_v24  ;;  %v11652_v16 = vsel %vm430_vm0, %v11562_v59, %v4081_v35  ;;  %v11656_v10 = vsel %vm430_vm0, %v4081_v35, %v11422_v57  ;;  %17393 = vst [vmem:[#allocation221_spill] sm:$0xff] %v11659_v52  ;;  %v7691_v9 = vld [vmem:[%s7946_s14 + $0x240] sm:$0xff] }
 0xa15   : > { %17391 = vst [vmem:[#allocation38_spill] sm:$0xff] %v11645_v54  ;;  %v11663_v30 = vmul.f32 %v11659_v52, %v11562_v59  ;;  %v11667_v18 = vmul.f32 %v7691_v9, %v11562_v59  ;;  %v4100_v24 = vmul.f32 %v11480_v8, %v11656_v10  ;;  %v11676_v35 = vmul.f32 %v11672_v42, %v11656_v10  ;;  %v11698_v8 = vld [vmem:[%s7946_s14 + $0x218] sm:$0xff] }
 0xa16   : > { %v4096_v54 = vmul.f32 %v11458_v51, %v11656_v10  ;;  %v4092_v36 = vmul.f32 %v11648_v37, %v11656_v10  ;;  %v890_v9 = vsel %vm533_vm3, %v17385_v1, %v17395_v61  ;;  %v3342_v29 = vadd.f32 %v3303_v55, %v3209_v45  ;;  %17399 = vst [vmem:[#allocation28_spill] sm:$0xff] %v11694_v31 }
 0xa17   : > { %17394 = vst [vmem:[#allocation219_spill] sm:$0xff] %v11667_v18  ;;  %v3435_v20 = vsel %vm3270_vm5, %v17398_v22, %v17396_v23  ;;  %v4162_v14 = vrot.slane %v4100_v24, 2  ;;  %v16642_v52 = vrot.slane %v11676_v35, 2  ;;  %v4101_v61 = vmul.f32 %v11698_v8, %v11422_v57 }
 0xa18   : > { %v4153_v44 = vrot.slane %v4096_v54, 2  ;;  %v4152_v37 = vrot.slane %v4092_v36, 2  ;;  %17400 = vst [vmem:[#allocation42_spill] sm:$0xff] %v11698_v8  ;;  %v4091_v12 = vmul.f32 %v11694_v31, %v11652_v16  ;;  %v16645_v23 = vrot.slane %v11663_v30, 2 }
 0xa19   : > { %v16644_v22 = vrot.slane %v11667_v18, 2  ;;  %v4171_v45 = vsel %vm3270_vm5, %v4162_v14, %v16642_v52  ;;  %v11713_v1 = vmul.f32 %v11413_v25, %v11652_v16  ;;  %v11715_v57 = vadd.f32 %v882_v41, %v744_v13 }
 0xa1a   : > { %v4163_v55 = vsel %vm3270_vm5, %v4153_v44, %v4162_v14  ;;  %v4154_v54 = vsel %vm3270_vm5, %v4152_v37, %v4153_v44  ;;  %v11717_v36 = vadd.f32 %v883_v50, %v745_v19  ;;  %v11720_v24 = vadd.f32 %v886_v33, %v11576_v47  ;;  %4218 = vrot.lane.b32.xlu2 %v4171_v45, %s7848_s15  ;;  %v11724_v52 = vpop.permute.xlu0 %4534  ;;  %v11738_v50 = vld [vmem:[%s7946_s14 + $0x228] sm:$0xff]  ;;  %v11801_v43 = vpop.permute.xlu2 %4766 }
 0xa1b   : > { %4210 = vrot.lane.b32.xlu0 %v4163_v55, %s7848_s15  ;;  %17401 = vst [vmem:[#allocation17_spill] sm:$0xff] %v11724_v52  ;;  %v11727_v44 = vadd.f32 %v885_v58, %v11554_v26  ;;  %v11730_v37 = vadd.f32 %v887_v6, %v11596_v15  ;;  %v11732_v13 = vadd.f32 %v889_v46, %v751_v60  ;;  %v4309_v47 = vpop.permute.xlu1 %4308  ;;  %v4164_v41 = vrot.slane %v4101_v61, 2  ;;  %v17404_v60 = vld [vmem:[#allocation267_spill] sm:$0xff]  ;;  %v17407_v46 = vld [vmem:[#allocation96_spill] sm:$0xff]  ;;  %v17408_v61 = vld [vmem:[#allocation94_spill] sm:$0xff] }
 0xa1c   : > { %v11734_v14 = vadd.f32 %v890_v9, %v752_v4  ;;  %4202 = vrot.lane.b32.xlu1 %v4154_v54, %s7848_s15  ;;  %v3474_v19 = vadd.f32 %v3435_v20, %v3342_v29  ;;  %17402 = vst [vmem:[#allocation239_spill] sm:$0xff] %v11738_v50  ;;  %v11742_v26 = vmul.f32 %v11738_v50, %v11652_v16  ;;  %v17405_v4 = vrot.slane %v17404_v60, 2  ;;  %v17406_v6 = vld [vmem:[#allocation99_spill] sm:$0xff]  ;;  %v11770_v55 = vld [vmem:[%s7946_s14 + $0x1c0] sm:$0xfc]  ;;  %v11773_v54 = vld [vmem:[%s7946_s14 + $0x248] sm:$0xff] }
 0xa1d   : > { %v11749_v15 = vsel %vm3270_vm5, %v16645_v23, %v16644_v22  ;;  %v4149_v29 = vrot.slane %v4091_v12, 2  ;;  %v4094_v58 = vmul.f32 %v11406_v48, %v11562_v59  ;;  %v11762_v9 = vsel %vm1051_vm4, %v17407_v46, %v17406_v6  ;;  %17409 = vst [vmem:[#allocation15_spill] sm:$0xff] %v11770_v55  ;;  %v11780_v60 = vld [vmem:[%s7946_s14 + $0x250] sm:$0xff] }
 0xa1e   : > { %17403 = vst [vmem:[#allocation45_spill] sm:$0xff] %v11749_v15  ;;  %v3567_v20 = vsel %vm3270_vm5, %v17405_v4, %v16643_v2  ;;  %v11767_v45 = vsel %vm1051_vm4, %v17406_v6, %v17408_v61  ;;  %v11777_v12 = vmul.f32 %v11773_v54, %v11652_v16  ;;  %v11784_v4 = vmul.f32 %v11780_v60, %v11656_v10  ;;  %v11795_v2 = vld [vmem:[%s7946_s14 + $0x200] sm:$0xff] }
 0xa1f   : > { %17410 = vst [vmem:[#allocation252_spill] sm:$0xff] %v11773_v54  ;;  %v11788_v46 = vsel %vm948_vm1, %v11629_v40, %v4309_v47  ;;  %v11792_v6 = vsel %vm948_vm1, %v4309_v47, %v11581_v3  ;;  %v4098_v22 = vmul.f32 %v11795_v2, %v11562_v59  ;;  %v4090_v23 = vmul.f32 %v11770_v55, %v11562_v59  ;;  %v7710_v54 = vld [vmem:[%s7946_s14 + $0xc8] sm:$0x3] }
 0xa20   : > { %17411 = vst [vmem:[#allocation77_spill] sm:$0xff] %v11777_v12  ;;  %v3606_v33 = vadd.f32 %v3567_v20, %v3474_v19  ;;  %v4173_v18 = vsel %vm3270_vm5, %v4164_v41, %v17413_v39  ;;  %v17414_v61 = vrot.slane %v11437_v34, 2  ;;  %v4168_v15 = vrot.slane %v11742_v26, 2  ;;  %v7698_v39 = vld [vmem:[%s7946_s14 + $0x70] sm:$0xff]  ;;  %v7701_v26 = vld [vmem:[%s7946_s14 + $0x38] sm:$0xff] }
 0xa21   : > { %17412 = vst [vmem:[#allocation74_spill] sm:$0xff] %v11784_v4  ;;  %v17415_v31 = vrot.slane %v11713_v1, 2  ;;  %v4147_v50 = vrot.slane %v4094_v58, 2  ;;  %v4099_v19 = vmul.f32 %v11463_v56, %v11652_v16  ;;  %v4146_v20 = vrot.slane %v4090_v23, 2 }
 0xa22   : > { %v4165_v47 = vsel %vm3270_vm5, %v17414_v61, %v4164_v41  ;;  %v11821_v34 = vpop.permute.xlu0 %4762  ;;  %v11829_v41 = vmul.f32 %v10988_v27, %v11788_v46  ;;  %v7700_v61 = vld [vmem:[%s7946_s14 + $0x88] sm:$0xff]  ;;  %v3801_v27 = vsel %vm533_vm3, %v11137_v38, %v11145_v62  ;;  %v11847_v49 = vmul.f32 %v7701_v26, %v11581_v3 }
 0xa23   : > { %v4151_v8 = vsel %vm3270_vm5, %v4149_v29, %v17415_v31  ;;  %4220 = vrot.lane.b32.xlu0 %v4173_v18, %s7848_s15  ;;  %v11825_v31 = vmul.f32 %v7698_v39, %v11792_v6  ;;  %v11834_v18 = vpop.permute.xlu1 %4536  ;;  %v7699_v29 = vld [vmem:[%s7946_s14 + $0x18] sm:$0xfc]  ;;  %v11840_v39 = vmul.f32 %v7700_v61, %v11788_v46  ;;  %v17417_v23 = vrot.slane %v11777_v12, 2 }
 0xa24   : > { %4200 = vrot.lane.b32.xlu2 %v4151_v8, %s7848_s15  ;;  %4212 = vrot.lane.b32.xlu1 %v4165_v47, %s7848_s15  ;;  %v4158_v8 = vrot.slane %v4098_v22, 2  ;;  %v4321_v58 = vmul.f32 %v7699_v29, %v11581_v3  ;;  %v3800_v29 = vsel %vm533_vm3, %v11139_v5, %v11155_v53  ;;  %v4160_v61 = vrot.slane %v4099_v19, 2  ;;  %v7702_v53 = vld [vmem:[%s7946_s14 + $0x90] sm:$0xff] }
 0xa25   : > { %17416 = vst [vmem:[#allocation78_spill] sm:$0xff] %v11840_v39  ;;  %v11853_v22 = vsel %vm3270_vm5, %v4168_v15, %v17417_v23  ;;  %v17419_v38 = vrot.slane %v11784_v4, 2  ;;  %v17420_v62 = vrot.slane %v11676_v35, 2  ;;  %v16658_v23 = vrot.slane %v11840_v39, 2  ;;  %v7708_v39 = vld [vmem:[%s7946_s14 + $0x288] sm:$0x3] }
 0xa26   : > { %17418 = vst [vmem:[#allocation73_spill] sm:$0xff] %v11853_v22  ;;  %v11870_v12 = vmul.f32 %v11026_v21, %v11581_v3  ;;  %v11874_v5 = vmul.f32 %v7702_v53, %v11792_v6  ;;  %v4159_v19 = vsel %vm3270_vm5, %v4147_v50, %v4158_v8  ;;  %v4148_v35 = vsel %vm3270_vm5, %v4146_v20, %v4147_v50  ;;  %v11896_v20 = vld [vmem:[%s7946_s14 + $0x268] sm:$0xff] }
 0xa27   : > { %v11864_v26 = vsel %vm3270_vm5, %v17420_v62, %v17419_v38  ;;  %v17424_v62 = vrot.slane %v11663_v30, 2  ;;  %v4383_v47 = vrot.slane %v4321_v58, 2  ;;  %v16661_v55 = vrot.slane %v11847_v49, 2  ;;  %17427 = vst [vmem:[#allocation80_spill] sm:$0xff] %v11896_v20  ;;  %v17445_v22 = vld [vmem:[#allocation174_spill] sm:$0xff] }
 0xa28   : > { %17421 = vst [vmem:[#allocation79_spill] sm:$0xff] %v11864_v26  ;;  %v17425_v21 = vrot.slane %v11829_v41, 2  ;;  %v16657_v53 = vrot.slane %v11870_v12, 2  ;;  %v16659_v26 = vrot.slane %v11874_v5, 2  ;;  %v3837_v50 = vadd.f32 %v3801_v27, %v10887_v17 }
 0xa29   : > { %17422 = vst [vmem:[#allocation82_spill] sm:$0xff] %v11870_v12  ;;  %v4167_v38 = vsel %vm3270_vm5, %v4158_v8, %v17424_v62  ;;  %v11892_v30 = vadd.f32 %v3800_v29, %v3606_v33  ;;  %v4169_v8 = vsel %vm3270_vm5, %v4160_v61, %v4168_v15  ;;  %v11900_v58 = vmul.f32 %v11896_v20, %v11652_v16  ;;  %v4009_v62 = vpop.permute.xlu2 %4008  ;;  %v7704_v29 = vld [vmem:[%s7946_s14 + $0x260] sm:$0xff]  ;;  %v17443_v12 = vld [vmem:[#allocation179_spill] sm:$0xff]  ;;  %v12056_v20 = vld [vmem:[%s7946_s14 + $0x8] sm:$0xfc] }
 0xa2a   : > { %17423 = vst [vmem:[#allocation85_spill] sm:$0xff] %v11874_v5  ;;  %v11887_v4 = vsel %vm3270_vm5, %v17425_v21, %v16658_v23  ;;  %v11904_v21 = vpop.permute.xlu0 %4010  ;;  %v17430_v17 = vrot.slane %v11817_v63, 2  ;;  %v17432_v33 = vrot.slane %v11825_v31, 2  ;;  %v11972_v5 = vmul.f32 %v17443_v12, %v11581_v3 }
 0xa2b   : > { %17426 = vst [vmem:[#allocation256_spill] sm:$0xff] %v11887_v4  ;;  %4206 = vrot.lane.b32.xlu0 %v4159_v19, %s7848_s15  ;;  %v11922_v19 = vmul.f32 %v7704_v29, %v11562_v59  ;;  %v11938_v29 = vmul.f32 %v11056_v28, %v11788_v46 }
 0xa2c   : > { %17428 = vst [vmem:[#allocation264_spill] sm:$0xff] %v11900_v58  ;;  %4214 = vrot.lane.b32.xlu2 %v4167_v38, %s7848_s15  ;;  %v11911_v15 = vsel %vm3270_vm5, %v17430_v17, %v16657_v53  ;;  %v11918_v27 = vsel %vm3270_vm5, %v17432_v33, %v16659_v26  ;;  %4198 = vrot.lane.b32.xlu1 %v4148_v35, %s7848_s15  ;;  %v11927_v17 = vpop.permute.xlu1 %4764  ;;  %v17435_v53 = vrot.slane %v11713_v1, 2  ;;  %v11946_v26 = vld [vmem:[%s7946_s14 + $0x50] sm:$0xff] }
 0xa2d   : > { %17429 = vst [vmem:[#allocation267_spill] sm:$0xff] %v11904_v21  ;;  %v4031_v38 = vsel %vm533_vm3, %v4009_v62, %v11904_v21  ;;  %v11934_v33 = vmul.f32 %v11623_v7, %v11656_v10  ;;  %v4385_v62 = vsel %vm3270_vm5, %v4383_v47, %v16661_v55  ;;  %v4328_v1 = vmul.f32 %v11946_v26, %v11792_v6  ;;  %v11955_v21 = vld [vmem:[%s7946_s14 + $0x30] sm:$0xff] }
 0xa2e   : > { %17431 = vst [vmem:[#allocation99_spill] sm:$0xff] %v11911_v15  ;;  %v4161_v23 = vsel %vm3270_vm5, %v17435_v53, %v4160_v61  ;;  %v11940_v35 = vadd.f32 %v4031_v38, %v3837_v50  ;;  %v17439_v61 = vld [vmem:[#allocation111_spill] sm:$0xff]  ;;  %v4324_v28 = vmul.f32 %v11955_v21, %v11792_v6  ;;  %v11964_v47 = vmul.f32 %v11043_v32, %v11792_v6  ;;  %v11967_v55 = vld [vmem:[%s7946_s14 + $0x290] sm:$0x3] }
 0xa2f   : > { %17433 = vst [vmem:[#allocation96_spill] sm:$0xff] %v11918_v27  ;;  %v11952_v53 = vmul.f32 %v17439_v61, %v11629_v40  ;;  %v7707_v50 = vld [vmem:[%s7946_s14 + $0x10] sm:$0xfc]  ;;  %v4115_v27 = vmul.f32 %v7708_v39, %v11652_v16  ;;  %v4116_v4 = vmul.f32 %v11967_v55, %v11656_v10  ;;  %v4345_v61 = vmul.f32 %v11581_v3, %v17445_v22  ;;  %v7711_v39 = vld [vmem:[%s7946_s14 + $0x80] sm:$0xff] }
 0xa30   : > { %17434 = vst [vmem:[#allocation297_spill] sm:$0xff] %v11922_v19  ;;  %v4320_v38 = vmul.f32 %v7707_v50, %v11792_v6  ;;  %v7709_v50 = vld [vmem:[%s7946_s14 + $0x280] sm:$0x3]  ;;  %v4343_v16 = vmul.f32 %v7710_v54, %v11788_v46  ;;  %v17446_v10 = vrot.slane %v11900_v58, 2 }
 0xa31   : > { %17436 = vst [vmem:[#allocation298_spill] sm:$0xff] %v11934_v33  ;;  %v4192_v12 = vrot.slane %v4115_v27, 2  ;;  %v4194_v32 = vrot.slane %v4116_v4, 2  ;;  %v4424_v15 = vrot.slane %v4345_v61, 2  ;;  %v17448_v27 = vrot.slane %v11922_v19, 2  ;;  %v17509_v19 = vld [vmem:[#allocation64_spill] sm:$0xff] }
 0xa32   : > { %17437 = vst [vmem:[#allocation299_spill] sm:$0xff] %v11938_v29  ;;  %v4381_v61 = vrot.slane %v4324_v28, 2  ;;  %v17455_v28 = vld [vmem:[#allocation100_spill] sm:$0xff] }
 0xa33   : > { %17438 = vst [vmem:[#allocation300_spill] sm:$0xff] %v11940_v35  ;;  %v4114_v35 = vmul.f32 %v7709_v50, %v11562_v59  ;;  %v11989_v59 = vmul.f32 %v7711_v39, %v11629_v40  ;;  %4216 = vrot.lane.b32.xlu0 %v4169_v8, %s7848_s15  ;;  %v11997_v22 = vsel %vm3270_vm5, %v17446_v10, %v4192_v12  ;;  %v17450_v39 = vld [vmem:[#allocation22_spill] sm:$0xff]  ;;  %v4390_v8 = vrot.slane %v4328_v1, 2 }
 0xa34   : > { %17440 = vst [vmem:[#allocation111_spill] sm:$0xff] %v11955_v21  ;;  %4432 = vrot.lane.b32.xlu2 %v4385_v62, %s7850_s30  ;;  %v4344_v50 = vmul.f32 %v11792_v6, %v17450_v39  ;;  %4208 = vrot.lane.b32.xlu1 %v4161_v23, %s7848_s15  ;;  %v4007_v4 = vpop.permute.xlu1 %4006  ;;  %v4380_v62 = vrot.slane %v4320_v38, 2  ;;  %v17453_v6 = vrot.slane %v11938_v29, 2  ;;  %v1088_v1 = vadd.f32 %v11762_v9, %v11715_v57  ;;  %v17456_v38 = vld [vmem:[#allocation95_spill] sm:$0xff] }
 0xa35   : > { %17441 = vst [vmem:[#allocation301_spill] sm:$0xff] %v11964_v47  ;;  %v4190_v7 = vrot.slane %v4114_v35, 2  ;;  %v4420_v35 = vrot.slane %v4343_v16, 2  ;;  %v4030_v12 = vsel %vm533_vm3, %v11488_v0, %v4007_v4  ;;  %v17451_v16 = vrot.slane %v11934_v33, 2 }
 0xa36   : > { %17442 = vst [vmem:[#allocation302_spill] sm:$0xff] %v11967_v55  ;;  %v1089_v0 = vadd.f32 %v11767_v45, %v11717_v36  ;;  %v17459_v39 = vrot.slane %v11952_v53, 2  ;;  %v17461_v57 = vrot.slane %v11972_v5, 2  ;;  %v4422_v9 = vrot.slane %v4344_v50, 2  ;;  %v12061_v50 = vld [vmem:[%s7946_s14 + $0x28] sm:$0xff] }
 0xa37   : > { %17444 = vst [vmem:[#allocation179_spill] sm:$0xff] %v11972_v5  ;;  %v12002_v54 = vsel %vm3270_vm5, %v17448_v27, %v4190_v7  ;;  %v4402_v7 = vrot.slane %v11989_v59, 2  ;;  %v12014_v10 = vsel %vm3270_vm5, %v17451_v16, %v4194_v32  ;;  %v12019_v23 = vsel %vm3270_vm5, %v17453_v6, %v4420_v35  ;;  %v17458_v27 = vld [vmem:[#allocation101_spill] sm:$0xff]  ;;  %v7712_v16 = vld [vmem:[%s7946_s14 + $0x58] sm:$0xff] }
 0xa38   : > { %17447 = vst [vmem:[#allocation174_spill] sm:$0xff] %v11997_v22  ;;  %v1056_v59 = vsel %vm1051_vm4, %v17456_v38, %v17455_v28  ;;  %v12029_v32 = vadd.f32 %v4030_v12, %v11892_v30  ;;  %v1055_v35 = vsel %vm1051_vm4, %v17458_v27, %v17456_v38  ;;  %v12042_v36 = vsel %vm3270_vm5, %v17461_v57, %v4424_v15  ;;  %v7713_v38 = vld [vmem:[%s7946_s14 + $0xa0] sm:$0xff]  ;;  %v17489_v22 = vld [vmem:[#allocation287_spill] sm:$0xff] }
 0xa39   : > { %17449 = vst [vmem:[#allocation303_spill] sm:$0xff] %v12002_v54  ;;  %v12037_v4 = vsel %vm3270_vm5, %v17459_v39, %v4402_v7  ;;  %v17463_v45 = vrot.slane %v11825_v31, 2  ;;  %v4391_v12 = vsel %vm3270_vm5, %v4381_v61, %v4390_v8  ;;  %v4329_v6 = vmul.f32 %v7712_v16, %v11581_v3  ;;  %v17470_v16 = vld [vmem:[#allocation107_spill] sm:$0xff] }
 0xa3a   : > { %17452 = vst [vmem:[#allocation22_spill] sm:$0xff] %v12014_v10  ;;  %v12052_v27 = vmul.f32 %v7713_v38, %v11629_v40  ;;  %v4382_v39 = vsel %vm3270_vm5, %v4380_v62, %v4381_v61  ;;  %v4319_v15 = vmul.f32 %v12056_v20, %v11788_v46  ;;  %v12065_v31 = vmul.f32 %v12061_v50, %v11788_v46  ;;  %v17469_v62 = vld [vmem:[#allocation104_spill] sm:$0xff]  ;;  %v17471_v38 = vld [vmem:[#allocation103_spill] sm:$0xff] }
 0xa3b   : > { %17454 = vst [vmem:[#allocation304_spill] sm:$0xff] %v12019_v23  ;;  %v4399_v30 = vsel %vm3270_vm5, %v4390_v8, %v17463_v45  ;;  %v17467_v8 = vrot.slane %v11964_v47, 2  ;;  %v1092_v57 = vadd.f32 %v1056_v59, %v11720_v24  ;;  %v1091_v61 = vadd.f32 %v1055_v35, %v11727_v44  ;;  %4438 = vrot.lane.b32.xlu0 %v4391_v12, %s7850_s30  ;;  %v17473_v44 = vld [vmem:[#allocation118_spill] sm:$0xff]  ;;  %v17475_v35 = vld [vmem:[#allocation113_spill] sm:$0xff]  ;;  %v17479_v12 = vld [vmem:[#allocation119_spill] sm:$0xff] }
 0xa3c   : > { %17457 = vst [vmem:[#allocation100_spill] sm:$0xff] %v12029_v32  ;;  %v1057_v45 = vsel %vm1051_vm4, %v17455_v28, %v17469_v62  ;;  %v1059_v32 = vsel %vm1051_vm4, %v17471_v38, %v17470_v16  ;;  %v12091_v24 = vsel %vm948_vm1, %v11834_v18, %v11691_v11  ;;  %4446 = vrot.lane.b32.xlu2 %v4399_v30, %s7850_s30  ;;  %v17474_v28 = vld [vmem:[#allocation115_spill] sm:$0xff]  ;;  %v4377_v30 = vrot.slane %v4319_v15, 2  ;;  %v7724_v47 = vld [vmem:[%s7946_s14 + $0xf8] sm:$0xfc] }
 0xa3d   : > { %17460 = vst [vmem:[#allocation95_spill] sm:$0xff] %v12037_v4  ;;  %v12070_v3 = vsel %vm3270_vm5, %v17467_v8, %v4422_v9  ;;  %v12086_v9 = vsel %vm948_vm1, %v11724_v52, %v11834_v18  ;;  %v1220_v59 = vsel %vm1051_vm4, %v17474_v28, %v17473_v44  ;;  %4430 = vrot.lane.b32.xlu1 %v4382_v39, %s7850_s30  ;;  %v4392_v8 = vrot.slane %v4329_v6, 2  ;;  %v7716_v39 = vld [vmem:[%s7946_s14 + $0x150] sm:$0xff] }
 0xa3e   : > { %17462 = vst [vmem:[#allocation101_spill] sm:$0xff] %v12042_v36  ;;  %v17472_v36 = vld [vmem:[#allocation102_spill] sm:$0xff]  ;;  %v1093_v18 = vadd.f32 %v1057_v45, %v11730_v37  ;;  %v1095_v28 = vadd.f32 %v1059_v32, %v11732_v13  ;;  %v12113_v6 = vmul.f32 %v7716_v39, %v12091_v24  ;;  %v17477_v62 = vld [vmem:[#allocation283_spill] sm:$0xff]  ;;  %v12119_v15 = vadd.f32 %v1220_v59, %v1088_v1  ;;  %v17481_v32 = vld [vmem:[#allocation121_spill] sm:$0xff] }
 0xa3f   : > { %17464 = vst [vmem:[#allocation305_spill] sm:$0xff] %v12052_v27  ;;  %v1060_v23 = vsel %vm1051_vm4, %v17470_v16, %v17472_v36  ;;  %v1221_v36 = vsel %vm1051_vm4, %v17473_v44, %v17475_v35  ;;  %v17476_v16 = vld [vmem:[#allocation286_spill] sm:$0xff]  ;;  %v12117_v37 = vmul.f32 %v17477_v62, %v12086_v9  ;;  %v12133_v62 = vld [vmem:[%s7946_s14 + $0x20] sm:$0xff]  ;;  %v12158_v5 = vmul.f32 %v17489_v22, %v11691_v11  ;;  %v7735_v4 = vld [vmem:[%s7946_s14 + $0xf0] sm:$0xfc] }
 0xa40   : > { %17465 = vst [vmem:[#allocation306_spill] sm:$0xff] %v12056_v20  ;;  %v1096_v44 = vadd.f32 %v1060_v23, %v11734_v14  ;;  %v12121_v45 = vadd.f32 %v1221_v36, %v1089_v0  ;;  %v17482_v23 = vrot.slane %v11817_v63, 2  ;;  %v4322_v1 = vmul.f32 %v12133_v62, %v11629_v40  ;;  %v12138_v0 = vld [vmem:[%s7946_s14 + $0x40] sm:$0xff] }
 0xa41   : > { %17466 = vst [vmem:[#allocation307_spill] sm:$0xff] %v12061_v50  ;;  %v4326_v59 = vmul.f32 %v12138_v0, %v11629_v40  ;;  %v17485_v36 = vrot.slane %v12052_v27, 2  ;;  %v17487_v63 = vrot.slane %v12065_v31, 2  ;;  %v17495_v22 = vrot.slane %v11847_v49, 2 }
 0xa42   : > { %17468 = vst [vmem:[#allocation308_spill] sm:$0xff] %v12070_v3  ;;  %v12107_v3 = vmul.f32 %v17476_v16, %v11691_v11  ;;  %v17480_v16 = vld [vmem:[#allocation114_spill] sm:$0xff]  ;;  %v4401_v39 = vsel %vm3270_vm5, %v4392_v8, %v17482_v23  ;;  %v4548_v20 = vmul.f32 %v7735_v4, %v12091_v24 }
 0xa43   : > { %17478 = vst [vmem:[#allocation104_spill] sm:$0xff] %v12117_v37  ;;  %v1224_v13 = vsel %vm1051_vm4, %v17480_v16, %v17479_v12  ;;  %v1223_v14 = vsel %vm1051_vm4, %v17481_v32, %v17480_v16  ;;  %v12145_v10 = vsel %vm3270_vm5, %v4402_v7, %v17485_v36  ;;  %v4379_v16 = vsel %vm3270_vm5, %v4377_v30, %v17487_v63  ;;  %v12151_v32 = vld [vmem:[%s7946_s14] sm:$0xfc]  ;;  %v7720_v36 = vld [vmem:[%s7946_s14 + $0x170] sm:$0xff]  ;;  %v7721_v30 = vld [vmem:[%s7946_s14 + $0x168] sm:$0xff] }
 0xa44   : > { %17483 = vst [vmem:[#allocation107_spill] sm:$0xff] %v12133_v62  ;;  %v4318_v23 = vmul.f32 %v12151_v32, %v11629_v40  ;;  %v16672_v54 = vrot.slane %v12107_v3, 2  ;;  %v12168_v63 = vmul.f32 %v7721_v30, %v12086_v9  ;;  %v12170_v38 = vadd.f32 %v1224_v13, %v1092_v57  ;;  %4448 = vrot.lane.b32.xlu0 %v4401_v39, %s7850_s30  ;;  %v17498_v39 = vld [vmem:[#allocation122_spill] sm:$0xff]  ;;  %v17501_v7 = vld [vmem:[#allocation55_spill] sm:$0xff] }
 0xa45   : > { %17484 = vst [vmem:[#allocation102_spill] sm:$0xff] %v12138_v0  ;;  %v12172_v40 = vadd.f32 %v1223_v14, %v1091_v61  ;;  %v4393_v27 = vsel %vm3270_vm5, %v17495_v22, %v4392_v8  ;;  %4428 = vrot.lane.b32.xlu2 %v4379_v16, %s7850_s30  ;;  %v4375_v30 = vrot.slane %v4322_v1, 2  ;;  %v4386_v57 = vrot.slane %v4326_v59, 2  ;;  %v17496_v14 = vld [vmem:[#allocation123_spill] sm:$0xff]  ;;  %v17497_v8 = vld [vmem:[#allocation126_spill] sm:$0xff]  ;;  %v17500_v1 = vld [vmem:[#allocation120_spill] sm:$0xff] }
 0xa46   : > { %17486 = vst [vmem:[#allocation118_spill] sm:$0xff] %v12145_v10  ;;  %v12164_v10 = vmul.f32 %v7720_v36, %v12091_v24  ;;  %v16671_v36 = vrot.slane %v12158_v5, 2  ;;  %4440 = vrot.lane.b32.xlu1 %v4393_v27, %s7850_s30  ;;  %v1225_v49 = vsel %vm1051_vm4, %v17479_v12, %v17496_v14  ;;  %v1227_v16 = vsel %vm1051_vm4, %v17498_v39, %v17497_v8  ;;  %v7723_v39 = vld [vmem:[%s7946_s14 + $0x8] sm:$0xfe] }
 0xa47   : > { %17488 = vst [vmem:[#allocation115_spill] sm:$0xff] %v12151_v32  ;;  %v4374_v22 = vrot.slane %v4318_v23, 2  ;;  %v1228_v59 = vsel %vm1051_vm4, %v17497_v8, %v17500_v1  ;;  %v12201_v13 = vmul.f32 %v11955_v21, %v17501_v7  ;;  %v17503_v12 = vrot.slane %v12113_v6, 2  ;;  %v7722_v8 = vld [vmem:[%s7946_s14] sm:$0xfe]  ;;  %v12323_v32 = vld [vmem:[%s7946_s14 + $0x110] sm:$0xff] }
 0xa48   : > { %17490 = vst [vmem:[#allocation286_spill] sm:$0xff] %v12158_v5  ;;  %v16677_v61 = vrot.slane %v12164_v10, 2  ;;  %v12194_v27 = vsel %vm3270_vm5, %v16672_v54, %v16671_v36  ;;  %v17505_v14 = vrot.slane %v12168_v63, 2  ;;  %v17506_v36 = vrot.slane %v12117_v37, 2  ;;  %v17508_v1 = vld [vmem:[#allocation133_spill] sm:$0xff] }
 0xa49   : > { %17491 = vst [vmem:[#allocation283_spill] sm:$0xff] %v12164_v10  ;;  %v12219_v5 = vmul.f32 %v7722_v8, %v17508_v1  ;;  %v12223_v10 = vmul.f32 %v7723_v39, %v17509_v19  ;;  %v4387_v8 = vsel %vm3270_vm5, %v4375_v30, %v4386_v57  ;;  %v17510_v39 = vrot.slane %v11952_v53, 2  ;;  %v7737_v37 = vld [vmem:[%s7946_s14 + $0x1a8] sm:$0x3] }
 0xa4a   : > { %17492 = vst [vmem:[#allocation119_spill] sm:$0xff] %v12168_v63  ;;  %v12208_v23 = vsel %vm3270_vm5, %v17503_v12, %v16677_v61  ;;  %v12215_v54 = vsel %vm3270_vm5, %v17506_v36, %v17505_v14  ;;  %v4549_v12 = vmul.f32 %v7724_v47, %v11691_v11  ;;  %v7725_v61 = vld [vmem:[%s7946_s14 + $0x118] sm:$0xff]  ;;  %v12233_v36 = vmul.f32 %v12133_v62, %v17508_v1  ;;  %v12317_v62 = vld [vmem:[%s7946_s14 + $0x130] sm:$0xff] }
 0xa4b   : > { %17493 = vst [vmem:[#allocation114_spill] sm:$0xff] %v12170_v38  ;;  %v12229_v63 = vmul.f32 %v7725_v61, %v11691_v11  ;;  %v12237_v14 = vmul.f32 %v12061_v50, %v17509_v19  ;;  %v4395_v29 = vsel %vm3270_vm5, %v4386_v57, %v17510_v39  ;;  %v12243_v47 = vadd.f32 %v1225_v49, %v1093_v18  ;;  %v12248_v61 = vld [vmem:[%s7946_s14 + $0x48] sm:$0xff]  ;;  %v7727_v57 = vld [vmem:[%s7946_s14 + $0xe0] sm:$0xfe]  ;;  %v17515_v49 = vld [vmem:[#allocation151_spill] sm:$0xff] }
 0xa4c   : > { %17494 = vst [vmem:[#allocation121_spill] sm:$0xff] %v12172_v40  ;;  %v12245_v33 = vadd.f32 %v1227_v16, %v1095_v28  ;;  %v12252_v35 = vmul.f32 %v12248_v61, %v17509_v19  ;;  %v4376_v58 = vsel %vm3270_vm5, %v4374_v22, %v4375_v30  ;;  %v12260_v53 = vmul.f32 %v12138_v0, %v17508_v1  ;;  %v17516_v39 = vld [vmem:[#allocation261_spill] sm:$0xff]  ;;  %v17521_v28 = vld [vmem:[#allocation150_spill] sm:$0xff] }
 0xa4d   : > { %17499 = vst [vmem:[#allocation287_spill] sm:$0xff] %v12194_v27  ;;  %v4327_v18 = vmul.f32 %v12248_v61, %v11788_v46  ;;  %v12267_v16 = vmul.f32 %v7727_v57, %v17515_v49  ;;  %4434 = vrot.lane.b32.xlu0 %v4387_v8, %s7850_s30  ;;  %4442 = vrot.lane.b32.xlu2 %v4395_v29, %s7850_s30  ;;  %v1503_v46 = vrot.slane %v12223_v10, 1  ;;  %v12282_v29 = vld [vmem:[%s7946_s14 + $0x100] sm:$0xff]  ;;  %v7729_v10 = vld [vmem:[%s7946_s14 + $0x188] sm:$0xff]  ;;  %v17524_v27 = vrot.slane %v12229_v63, 2 }
 0xa4e   : > { %17502 = vst [vmem:[#allocation123_spill] sm:$0xff] %v12201_v13  ;;  %4426 = vrot.lane.b32.xlu1 %v4376_v58, %s7850_s30  ;;  %v12278_v57 = vmul.f32 %v17516_v39, %v11691_v11  ;;  %v7730_v58 = vld [vmem:[%s7946_s14 + $0x190] sm:$0xff]  ;;  %v7731_v8 = vld [vmem:[%s7946_s14 + $0xe8] sm:$0xfe]  ;;  %v4552_v21 = vmul.f32 %v12323_v32, %v12091_v24  ;;  %v17526_v40 = vrot.slane %v11829_v41, 2  ;;  %v7738_v38 = vld [vmem:[%s7946_s14 + $0x160] sm:$0xff] }
 0xa4f   : > { %17504 = vst [vmem:[#allocation126_spill] sm:$0xff] %v12208_v23  ;;  %v12294_v39 = vmul.f32 %v7730_v58, %v12091_v24  ;;  %v12299_v22 = vmul.f32 %v7731_v8, %v17521_v28  ;;  %v4388_v30 = vrot.slane %v4327_v18, 2  ;;  %v17522_v1 = vld [vmem:[#allocation285_spill] sm:$0xff]  ;;  %v1632_v58 = vrot.slane %v12267_v16, 1  ;;  %v6936_v18 = vld [vmem:[%s7946_s14 + $0x1b8] sm:$0x3] }
 0xa50   : > { %17507 = vst [vmem:[#allocation120_spill] sm:$0xff] %v12215_v54  ;;  %v12255_v54 = vadd.f32 %v1228_v59, %v1096_v44  ;;  %v4611_v44 = vrot.slane %v4549_v12, 2  ;;  %v1504_v59 = vrot.slane %v12237_v14, 1  ;;  %v12286_v12 = vmul.f32 %v12282_v29, %v17515_v49  ;;  %v12306_v0 = vld [vmem:[%s7946_s14 + $0x108] sm:$0xff] }
 0xa51   : > { %17511 = vst [vmem:[#allocation64_spill] sm:$0xff] %v12243_v47  ;;  %v12290_v14 = vmul.f32 %v7729_v10, %v12086_v9  ;;  %v12303_v23 = vmul.f32 %v17522_v1, %v11724_v52  ;;  %v12310_v10 = vmul.f32 %v12306_v0, %v17521_v28  ;;  %v4556_v1 = vmul.f32 %v12317_v62, %v12091_v24 }
 0xa52   : > { %17512 = vst [vmem:[#allocation309_spill] sm:$0xff] %v12245_v33  ;;  %v4613_v8 = vsel %vm3270_vm5, %v4611_v44, %v17524_v27  ;;  %v4573_v50 = vmul.f32 %v6936_v18, %v11691_v11  ;;  %v16692_v44 = vrot.slane %v12294_v39, 2  ;;  %v4571_v47 = vmul.f32 %v7737_v37, %v12086_v9 }
 0xa53   : > { %17513 = vst [vmem:[#allocation310_spill] sm:$0xff] %v12248_v61  ;;  %v7736_v61 = vld [vmem:[%s7946_s14 + $0x1b0] sm:$0x3]  ;;  %v4397_v55 = vsel %vm3270_vm5, %v4388_v30, %v17526_v40  ;;  %v12343_v16 = vmul.f32 %v7738_v38, %v11724_v52  ;;  %v4618_v40 = vrot.slane %v4556_v1, 2  ;;  %v4609_v4 = vrot.slane %v4552_v21, 2 }
 0xa54   : > { %17514 = vst [vmem:[#allocation311_spill] sm:$0xff] %v12260_v53  ;;  %v4572_v33 = vmul.f32 %v7736_v61, %v12091_v24  ;;  %v4652_v18 = vrot.slane %v4573_v50, 2  ;;  %v17527_v24 = vrot.slane %v12065_v31, 2  ;;  %v4648_v37 = vrot.slane %v4571_v47, 2 }
 0xa55   : > { %17517 = vst [vmem:[#allocation261_spill] sm:$0xff] %v12278_v57  ;;  %4444 = vrot.lane.b32.xlu0 %v4397_v55, %s7850_s30  ;;  %4660 = vrot.lane.b32.xlu2 %v4613_v8, %s7850_s30  ;;  %v4630_v38 = vrot.slane %v12343_v16, 2  ;;  %v17528_v50 = vrot.slane %v12278_v57, 2  ;;  %v17530_v55 = vld [vmem:[#allocation137_spill] sm:$0xff]  ;;  %v17532_v21 = vrot.slane %v12290_v14, 2  ;;  %v17534_v8 = vrot.slane %v12233_v36, 1 }
 0xa56   : > { %17518 = vst [vmem:[#allocation312_spill] sm:$0xff] %v12282_v29  ;;  %v4389_v61 = vsel %vm3270_vm5, %v17527_v24, %v4388_v30  ;;  %v4650_v41 = vrot.slane %v4572_v33, 2  ;;  %v12360_v31 = vmul.f32 %v12323_v32, %v17530_v55  ;;  %v4608_v30 = vrot.slane %v4548_v20, 2  ;;  %v7739_v36 = vld [vmem:[%s7946_s14 + $0x180] sm:$0xff] }
 0xa57   : > { %17519 = vst [vmem:[#allocation313_spill] sm:$0xff] %v12290_v14  ;;  %4436 = vrot.lane.b32.xlu1 %v4389_v61, %s7850_s30  ;;  %v12356_v27 = vsel %vm3270_vm5, %v17528_v50, %v4652_v18  ;;  %v12370_v47 = vsel %vm3270_vm5, %v17532_v21, %v4648_v37  ;;  %v17535_v1 = vrot.slane %v12219_v5, 1  ;;  %v1635_v20 = vrot.slane %v12299_v22, 1  ;;  %v17545_v18 = vld [vmem:[#allocation153_spill] sm:$0xff] }
 0xa58   : > { %17520 = vst [vmem:[#allocation314_spill] sm:$0xff] %v12294_v39  ;;  %v12365_v33 = vsel %vm3270_vm5, %v16692_v44, %v4650_v41  ;;  %v17536_v24 = vrot.slane %v12303_v23, 2  ;;  %v12387_v41 = vsel %vm1499_vm2, %v1503_v46, %v1504_v59  ;;  %v17538_v37 = vrot.slane %v12252_v35, 1 }
 0xa59   : > { %17523 = vst [vmem:[#allocation150_spill] sm:$0xff] %v12306_v0  ;;  %v12377_v16 = vsel %vm1499_vm2, %v17535_v1, %v17534_v8  ;;  %v17539_v50 = vrot.slane %v12260_v53, 1  ;;  %v17540_v22 = vmov %v17534_v8  ;;  %v17541_v8 = vld [vmem:[#allocation143_spill] sm:$0xff]  ;;  %v17542_v46 = vrot.slane %v12286_v12, 1  ;;  %v12435_v53 = vld [vmem:[%s7946_s14 + $0xe8] sm:$0xfc] }
 0xa5a   : > { %17525 = vst [vmem:[#allocation285_spill] sm:$0xff] %v12323_v32  ;;  %v12384_v61 = vsel %vm3270_vm5, %v17536_v24, %v4630_v38  ;;  %v12392_v5 = vsel %vm1499_vm2, %v1504_v59, %v17538_v37  ;;  %v12403_v1 = vmul.f32 %v11458_v51, %v17541_v8  ;;  %v17543_v59 = vrot.slane %v12113_v6, 2 }
 0xa5b   : > { %17529 = vst [vmem:[#allocation315_spill] sm:$0xff] %v12356_v27  ;;  %v12399_v21 = vsel %vm1499_vm2, %v17540_v22, %v17539_v50  ;;  %v12408_v24 = vsel %vm1499_vm2, %v1632_v58, %v17542_v46  ;;  %v4619_v44 = vsel %vm3270_vm5, %v4609_v4, %v4618_v40  ;;  %v12416_v50 = vmul.f32 %v7739_v36, %v11724_v52  ;;  %v7740_v22 = vld [vmem:[%s7946_s14 + $0x1c0] sm:$0xfe] }
 0xa5c   : > { %17531 = vst [vmem:[#allocation316_spill] sm:$0xff] %v12365_v33  ;;  %v4627_v37 = vsel %vm3270_vm5, %v4618_v40, %v17543_v59  ;;  %v1722_v27 = vmul.f32 %v7740_v22, %v17545_v18  ;;  %v17546_v33 = vld [vmem:[#allocation152_spill] sm:$0xff]  ;;  %v12424_v58 = vmul.f32 %v11406_v48, %v17545_v18  ;;  %v4610_v6 = vsel %vm3270_vm5, %v4608_v30, %v4609_v4  ;;  %v12447_v22 = vld [vmem:[%s7946_s14 + $0x128] sm:$0xff] }
 0xa5d   : > { %17533 = vst [vmem:[#allocation317_spill] sm:$0xff] %v12370_v47  ;;  %v7741_v47 = vld [vmem:[%s7946_s14 + $0x1c8] sm:$0xfe]  ;;  %v17547_v46 = vrot.slane %v12310_v10, 1  ;;  %v7742_v59 = vld [vmem:[%s7946_s14 + $0x138] sm:$0xff]  ;;  %v12441_v48 = vmul.f32 %v12306_v0, %v12086_v9  ;;  %v1726_v30 = vmul.f32 %v11413_v25, %v17546_v33  ;;  %4674 = vrot.lane.b32.xlu2 %v4627_v37, %s7850_s30  ;;  %4666 = vrot.lane.b32.xlu0 %v4619_v44, %s7850_s30  ;;  %v17552_v32 = vrot.slane %v12416_v50, 2 }
 0xa5e   : > { %17537 = vst [vmem:[#allocation318_spill] sm:$0xff] %v12384_v61  ;;  %v1723_v39 = vmul.f32 %v7741_v47, %v17546_v33  ;;  %v4557_v36 = vmul.f32 %v7742_v59, %v11691_v11  ;;  %v4547_v47 = vmul.f32 %v12435_v53, %v12086_v9  ;;  %v12456_v11 = vsel %vm948_vm1, %v11927_v17, %v11801_v43  ;;  %v12467_v59 = vld [vmem:[%s7946_s14 + $0x120] sm:$0xff] }
 0xa5f   : > { %17544 = vst [vmem:[#allocation319_spill] sm:$0xff] %v12416_v50  ;;  %v12430_v40 = vsel %vm1499_vm2, %v1635_v20, %v17547_v46  ;;  %v12451_v20 = vmul.f32 %v12447_v22, %v17521_v28  ;;  %v1465_v46 = vmul.f32 %v11946_v26, %v17501_v7  ;;  %v12464_v25 = vmul.f32 %v11463_v56, %v17546_v33 }
 0xa60   : > { %17548 = vst [vmem:[#allocation152_spill] sm:$0xff] %v12435_v53  ;;  %v12471_v4 = vmul.f32 %v12467_v59, %v17515_v49  ;;  %4658 = vrot.lane.b32.xlu1 %v4610_v6, %s7850_s30  ;;  %v1764_v37 = vrot.slane %v1722_v27, 1  ;;  %v1765_v44 = vrot.slane %v12424_v58, 1  ;;  %v1767_v14 = vrot.slane %v1723_v39, 1  ;;  %v17584_v53 = vld [vmem:[#allocation56_spill] sm:$0xff] }
 0xa61   : > { %17549 = vst [vmem:[#allocation320_spill] sm:$0xff] %v12467_v59  ;;  %v12478_v7 = vmul.f32 %v11795_v2, %v17545_v18  ;;  %v4620_v56 = vrot.slane %v4557_v36, 2  ;;  %v4605_v61 = vrot.slane %v4547_v47, 2  ;;  %v12483_v49 = vmul.f32 %v11672_v42, %v12456_v11  ;;  %v12498_v42 = vld [vmem:[%s7946_s14 + $0x68] sm:$0xff]  ;;  %v12511_v36 = vld [vmem:[%s7946_s14 + $0xe0] sm:$0xfc] }
 0xa62   : > { %17550 = vst [vmem:[#allocation321_spill] sm:$0xff] %v12471_v4  ;;  %v1768_v6 = vrot.slane %v1726_v30, 1  ;;  %v4550_v58 = vmul.f32 %v12282_v29, %v11724_v52  ;;  %v4554_v39 = vmul.f32 %v12467_v59, %v11724_v52  ;;  %v1513_v57 = vrot.slane %v1465_v46, 1 }
 0xa63   : > { %17551 = vst [vmem:[#allocation322_spill] sm:$0xff] %v12478_v7  ;;  %v12495_v18 = vsel %vm3270_vm5, %v4630_v38, %v17552_v32  ;;  %v12502_v30 = vmul.f32 %v12498_v42, %v17509_v19  ;;  %v12508_v46 = vsel %vm948_vm1, %v11821_v34, %v11927_v17  ;;  %v4546_v47 = vmul.f32 %v12511_v36, %v11724_v52 }
 0xa64   : > { %17553 = vst [vmem:[#allocation323_spill] sm:$0xff] %v12495_v18  ;;  %v17558_v32 = vrot.slane %v12107_v3, 2  ;;  %v17559_v50 = vrot.slane %v12441_v48, 2  ;;  %v16707_v27 = vrot.slane %v12483_v49, 2  ;;  %v4792_v18 = vmul.f32 %v11780_v60, %v12456_v11 }
 0xa65   : > { %17554 = vst [vmem:[#allocation324_spill] sm:$0xff] %v12498_v42  ;;  %v12525_v17 = vsel %vm1499_vm2, %v1764_v37, %v1765_v44  ;;  %v17560_v52 = vrot.slane %v12229_v63, 2  ;;  %v4614_v59 = vrot.slane %v4554_v39, 2  ;;  %v17562_v60 = vrot.slane %v12310_v10, 1  ;;  %v17563_v63 = vld [vmem:[#allocation252_spill] sm:$0xff]  ;;  %v17586_v42 = vld [vmem:[#allocation134_spill] sm:$0xff] }
 0xa66   : > { %17555 = vst [vmem:[#allocation325_spill] sm:$0xff] %v12502_v30  ;;  %v4629_v38 = vsel %vm3270_vm5, %v4620_v56, %v17558_v32  ;;  %v4607_v19 = vsel %vm3270_vm5, %v4605_v61, %v17559_v50  ;;  %v4603_v32 = vrot.slane %v4550_v58, 2  ;;  %v12533_v61 = vsel %vm1499_vm2, %v1767_v14, %v1768_v6 }
 0xa67   : > { %17556 = vst [vmem:[#allocation326_spill] sm:$0xff] %v12508_v46  ;;  %4676 = vrot.lane.b32.xlu0 %v4629_v38, %s7850_s30  ;;  %v4621_v3 = vsel %vm3270_vm5, %v17560_v52, %v4620_v56  ;;  %4656 = vrot.lane.b32.xlu2 %v4607_v19, %s7850_s30  ;;  %v17561_v50 = vrot.slane %v12451_v20, 1  ;;  %v12545_v38 = vmul.f32 %v17563_v63, %v12508_v46  ;;  %v4862_v52 = vrot.slane %v4792_v18, 2 }
 0xa68   : > { %17557 = vst [vmem:[#allocation327_spill] sm:$0xff] %v12511_v36  ;;  %4668 = vrot.lane.b32.xlu1 %v4621_v3, %s7850_s30  ;;  %v17564_v56 = vrot.slane %v12201_v13, 1  ;;  %v17565_v14 = vrot.slane %v12464_v25, 1  ;;  %v17566_v10 = vrot.slane %v12471_v4, 1  ;;  %v17567_v19 = vrot.slane %v12286_v12, 1  ;;  %v17575_v13 = vld [vmem:[#allocation37_spill] sm:$0xff] }
 0xa69   : > { %v12540_v37 = vsel %vm1499_vm2, %v17562_v60, %v17561_v50  ;;  %v4602_v50 = vrot.slane %v4546_v47, 2  ;;  %v17568_v60 = vrot.slane %v12478_v7, 1  ;;  %v12577_v12 = vsel %vm3270_vm5, %v16707_v27, %v4862_v52  ;;  %v17574_v7 = vld [vmem:[#allocation294_spill] sm:$0xff]  ;;  %v17583_v36 = vld [vmem:[#allocation63_spill] sm:$0xff] }
 0xa6a   : > { %v12550_v58 = vsel %vm1499_vm2, %v17564_v56, %v1513_v57  ;;  %v12555_v39 = vsel %vm1499_vm2, %v1768_v6, %v17565_v14  ;;  %v12562_v3 = vsel %vm1499_vm2, %v17567_v19, %v17566_v10  ;;  %v12572_v6 = vmul.f32 %v12317_v62, %v17530_v55  ;;  %17569 = vst [vmem:[#allocation252_spill] sm:$0xff] %v12577_v12  ;;  %v17570_v56 = vld [vmem:[#allocation71_spill] sm:$0xff] }
 0xa6b   : > { %v12568_v63 = vsel %vm1499_vm2, %v1765_v44, %v17568_v60  ;;  %v17571_v14 = vld [vmem:[#allocation35_spill] sm:$0xff]  ;;  %v4615_v10 = vsel %vm3270_vm5, %v4603_v32, %v4614_v59  ;;  %v17572_v19 = vrot.slane %v12303_v23, 2  ;;  %v17573_v60 = vld [vmem:[#allocation62_spill] sm:$0xff]  ;;  %v12590_v4 = vmul.f32 %v17574_v7, %v11801_v43 }
 0xa6c   : > { %v1396_v47 = vsel %vm1051_vm4, %v17571_v14, %v17570_v56  ;;  %v4777_v18 = vmul.f32 %v17573_v60, %v11801_v43  ;;  %v12595_v55 = vmul.f32 %v17575_v13, %v12456_v11  ;;  %v17576_v56 = vld [vmem:[#allocation80_spill] sm:$0xff]  ;;  %v17578_v23 = vld [vmem:[#allocation59_spill] sm:$0xff]  ;;  %v12609_v7 = vld [vmem:[%s7946_s14 + $0x148] sm:$0xff]  ;;  %v4604_v13 = vsel %vm3270_vm5, %v4602_v50, %v4603_v32 }
 0xa6d   : > { %v4623_v44 = vsel %vm3270_vm5, %v4614_v59, %v17572_v19  ;;  %v12599_v12 = vmul.f32 %v17576_v56, %v12508_v46  ;;  %v17579_v29 = vrot.slane %v17578_v23, 1  ;;  %v17580_v19 = vld [vmem:[#allocation10_spill] sm:$0xff]  ;;  %17581 = vst [vmem:[#allocation35_spill] sm:$0xff] %v12609_v7  ;;  %v12613_v27 = vmul.f32 %v12609_v7, %v17521_v28 }
 0xa6e   : > { %v12606_v60 = vmul.f32 %v17580_v19, %v17541_v8  ;;  %v1388_v56 = vsel %vm1051_vm4, %v17584_v53, %v17583_v36  ;;  %v4555_v23 = vmul.f32 %v12447_v22, %v12086_v9  ;;  %v17585_v8 = vld [vmem:[#allocation53_spill] sm:$0xff]  ;;  %v17587_v28 = vld [vmem:[#allocation54_spill] sm:$0xff]  ;;  %v1432_v32 = vadd.f32 %v1396_v47, %v12255_v54  ;;  %v12633_v9 = vpop.permute.xlu2 %4204 }
 0xa6f   : > { %17577 = vst [vmem:[#allocation71_spill] sm:$0xff] %v12599_v12  ;;  %v1520_v59 = vsel %vm1499_vm2, %v1513_v57, %v17579_v29  ;;  %v4870_v57 = vrot.slane %v12595_v55, 2  ;;  %v16718_v29 = vrot.slane %v12599_v12, 2  ;;  %v1389_v0 = vsel %vm1051_vm4, %v17583_v36, %v17585_v8  ;;  %4662 = vrot.lane.b32.xlu0 %v4615_v10, %s7850_s30  ;;  %4670 = vrot.lane.b32.xlu2 %v4623_v44, %s7850_s30  ;;  %v17593_v12 = vld [vmem:[#allocation114_spill] sm:$0xff] }
 0xa70   : > { %17582 = vst [vmem:[#allocation62_spill] sm:$0xff] %v12613_v27  ;;  %v1392_v7 = vsel %vm1051_vm4, %v17587_v28, %v17586_v42  ;;  %4654 = vrot.lane.b32.xlu1 %v4604_v13, %s7850_s30  ;;  %v4839_v53 = vrot.slane %v4777_v18, 2  ;;  %v17589_v54 = vrot.slane %v12545_v38, 2  ;;  %v1424_v10 = vadd.f32 %v1388_v56, %v12119_v15  ;;  %v17595_v56 = vld [vmem:[#allocation26_spill] sm:$0xff] }
 0xa71   : > { %v12638_v36 = vsel %vm3270_vm5, %v4862_v52, %v4870_v57  ;;  %v17591_v44 = vrot.slane %v12502_v30, 1  ;;  %v17592_v50 = vrot.slane %v12252_v35, 1  ;;  %v1645_v13 = vrot.slane %v12572_v6, 1  ;;  %v17606_v30 = vld [vmem:[#allocation104_spill] sm:$0xff] }
 0xa72   : > { %17588 = vst [vmem:[#allocation294_spill] sm:$0xff] %v12638_v36  ;;  %v12645_v47 = vsel %vm3270_vm5, %v17589_v54, %v16718_v29  ;;  %v1425_v55 = vadd.f32 %v1389_v0, %v12121_v45  ;;  %v1428_v36 = vadd.f32 %v1392_v7, %v17593_v12  ;;  %v4616_v54 = vrot.slane %v4555_v23, 2  ;;  %v17594_v29 = vld [vmem:[#allocation144_spill] sm:$0xff]  ;;  %v17598_v45 = vld [vmem:[#allocation147_spill] sm:$0xff] }
 0xa73   : > { %17590 = vst [vmem:[#allocation37_spill] sm:$0xff] %v12645_v47  ;;  %v1518_v18 = vsel %vm1499_vm2, %v17592_v50, %v17591_v44  ;;  %v1391_v15 = vsel %vm1051_vm4, %v17594_v29, %v17587_v28  ;;  %v1393_v35 = vsel %vm1051_vm4, %v17586_v42, %v17595_v56  ;;  %v1565_v50 = vadd.f32 %v1520_v59, %v1432_v32  ;;  %v17596_v44 = vld [vmem:[#allocation141_spill] sm:$0xff]  ;;  %v17600_v59 = vld [vmem:[#allocation239_spill] sm:$0xff] }
 0xa74   : > { %v17597_v6 = vrot.slane %v17596_v44, 1  ;;  %v1395_v0 = vsel %vm1051_vm4, %v17598_v45, %v17571_v14  ;;  %v17599_v12 = vrot.slane %v12590_v4, 2  ;;  %v4784_v23 = vmul.f32 %v17580_v19, %v12456_v11  ;;  %v17602_v32 = vld [vmem:[#allocation41_spill] sm:$0xff]  ;;  %v17603_v14 = vld [vmem:[#allocation302_spill] sm:$0xff]  ;;  %v17605_v19 = vld [vmem:[#allocation64_spill] sm:$0xff] }
 0xa75   : > { %v4780_v29 = vmul.f32 %v11458_v51, %v12456_v11  ;;  %v1557_v42 = vadd.f32 %v12377_v16, %v1424_v10  ;;  %v12680_v28 = vmul.f32 %v17600_v59, %v17546_v33  ;;  %v4776_v56 = vmul.f32 %v17602_v32, %v12456_v11  ;;  %v17608_v10 = vld [vmem:[#allocation309_spill] sm:$0xff] }
 0xa76   : > { %v1652_v52 = vsel %vm1499_vm2, %v1645_v13, %v17597_v6  ;;  %v4841_v7 = vsel %vm3270_vm5, %v4839_v53, %v17599_v12  ;;  %v4800_v44 = vmul.f32 %v17603_v14, %v12456_v11  ;;  %v1558_v53 = vadd.f32 %v12387_v41, %v1425_v55  ;;  %v17604_v6 = vld [vmem:[#allocation121_spill] sm:$0xff]  ;;  %v17610_v55 = vld [vmem:[#allocation146_spill] sm:$0xff] }
 0xa77   : > { %17601 = vst [vmem:[#allocation80_spill] sm:$0xff] %v12680_v28  ;;  %v1427_v12 = vadd.f32 %v1391_v15, %v17604_v6  ;;  %v1429_v8 = vadd.f32 %v1393_v35, %v17605_v19  ;;  %v17607_v51 = vrot.slane %v17606_v30, 2  ;;  %v1431_v47 = vadd.f32 %v1395_v0, %v17608_v10  ;;  %4888 = vrot.lane.b32.xlu2 %v4841_v7, %s7850_s30  ;;  %v17618_v6 = vld [vmem:[#allocation92_spill] sm:$0xff] }
 0xa78   : > { %v1697_v33 = vadd.f32 %v1652_v52, %v1565_v50  ;;  %v17609_v32 = vrot.slane %v12441_v48, 2  ;;  %v4878_v41 = vrot.slane %v4800_v44, 2  ;;  %v1561_v11 = vadd.f32 %v12392_v5, %v1428_v36  ;;  %v12713_v36 = vpop.permute.xlu2 %4218  ;;  %v17619_v10 = vld [vmem:[#allocation164_spill] sm:$0xff] }
 0xa79   : > { %v4625_v16 = vsel %vm3270_vm5, %v4616_v54, %v17607_v51  ;;  %v17611_v15 = vrot.slane %v17610_v55, 1  ;;  %v17612_v30 = vrot.slane %v12606_v60, 1  ;;  %v4846_v52 = vrot.slane %v4784_v23, 2 }
 0xa7a   : > { %4672 = vrot.lane.b32.xlu0 %v4625_v16, %s7850_s30  ;;  %v4617_v45 = vsel %vm3270_vm5, %v17609_v32, %v4616_v54  ;;  %v4837_v50 = vrot.slane %v4780_v29, 2  ;;  %v17613_v0 = vrot.slane %v12360_v31, 1  ;;  %v17614_v54 = vrot.slane %v12613_v27, 1  ;;  %v17620_v32 = vld [vmem:[#allocation172_spill] sm:$0xff]  ;;  %v17680_v27 = vld [vmem:[#allocation199_spill] sm:$0xff] }
 0xa7b   : > { %v1784_v35 = vsel %vm1499_vm2, %v17612_v30, %v17611_v15  ;;  %4664 = vrot.lane.b32.xlu1 %v4617_v45, %s7850_s30  ;;  %v17615_v7 = vrot.slane %v12451_v20, 1  ;;  %v4836_v14 = vrot.slane %v4776_v56, 2  ;;  %v12716_v44 = vsel %vm3270_vm5, %v4870_v57, %v4878_v41  ;;  %v17624_v41 = vld [vmem:[#allocation217_spill] sm:$0xff] }
 0xa7c   : > { %v1646_v48 = vsel %vm1499_vm2, %v17613_v0, %v1645_v13  ;;  %17616 = vst [vmem:[#allocation59_spill] sm:$0xff] %v12716_v44  ;;  %v1560_v45 = vadd.f32 %v12399_v21, %v1427_v12  ;;  %v1690_v23 = vadd.f32 %v12430_v40, %v1558_v53  ;;  %v1689_v29 = vadd.f32 %v12408_v24, %v1557_v42  ;;  %v17617_v13 = vld [vmem:[#allocation50_spill] sm:$0xff] }
 0xa7d   : > { %v1650_v5 = vsel %vm1499_vm2, %v17615_v7, %v17614_v54  ;;  %v2023_v19 = vsel %vm533_vm3, %v17618_v6, %v17617_v13  ;;  %v1562_v20 = vadd.f32 %v12550_v58, %v1429_v8  ;;  %v1564_v51 = vadd.f32 %v1518_v18, %v1431_v47  ;;  %v17622_v58 = vld [vmem:[#allocation42_spill] sm:$0xff]  ;;  %v7749_v18 = vld [vmem:[%s7946_s14 + $0x238] sm:$0xff] }
 0xa7e   : > { %v16720_v56 = vrot.slane %v12680_v28, 1  ;;  %v1829_v16 = vadd.f32 %v1784_v35, %v1697_v33  ;;  %v1693_v57 = vadd.f32 %v12540_v37, %v1561_v11  ;;  %v2253_v21 = vsel %vm533_vm3, %v17620_v32, %v17619_v10  ;;  %v17623_v33 = vld [vmem:[#allocation210_spill] sm:$0xff]  ;;  %v17625_v11 = vld [vmem:[#allocation28_spill] sm:$0xff] }
 0xa7f   : > { %v17621_v40 = vrot.slane %v12483_v49, 2  ;;  %v4847_v42 = vsel %vm3270_vm5, %v4837_v50, %v4846_v52  ;;  %v4838_v8 = vsel %vm3270_vm5, %v4836_v14, %v4837_v50  ;;  %v4785_v47 = vmul.f32 %v17622_v58, %v11801_v43  ;;  %v12748_v15 = vld [vmem:[%s7946_s14 + $0x1e8] sm:$0xff]  ;;  %v17679_v28 = vld [vmem:[#allocation196_spill] sm:$0xff] }
 0xa80   : > { %v2059_v53 = vadd.f32 %v2023_v19, %v1829_v16  ;;  %v12739_v12 = vmul.f32 %v7749_v18, %v11801_v43  ;;  %v1692_v37 = vadd.f32 %v12562_v3, %v1560_v45  ;;  %v2483_v49 = vsel %vm533_vm3, %v17624_v41, %v17623_v33  ;;  %v17630_v45 = vld [vmem:[#allocation236_spill] sm:$0xff]  ;;  %v17631_v16 = vld [vmem:[#allocation242_spill] sm:$0xff]  ;;  %v17637_v18 = vld [vmem:[#allocation39_spill] sm:$0xff] }
 0xa81   : > { %v4855_v24 = vsel %vm3270_vm5, %v4846_v52, %v17621_v40  ;;  %v4775_v55 = vmul.f32 %v17625_v11, %v12508_v46  ;;  %v12752_v30 = vmul.f32 %v12748_v15, %v12508_v46  ;;  %v1694_v35 = vadd.f32 %v1646_v48, %v1562_v20 }
 0xa82   : > { %v1696_v52 = vadd.f32 %v1650_v5, %v1564_v51  ;;  %v2289_v50 = vadd.f32 %v2253_v21, %v2059_v53  ;;  %4902 = vrot.lane.b32.xlu2 %v4855_v24, %s7850_s30  ;;  %4894 = vrot.lane.b32.xlu0 %v4847_v42, %s7850_s30  ;;  %v1822_v3 = vadd.f32 %v12533_v61, %v1690_v23  ;;  %v17626_v0 = vrot.slane %v12606_v60, 1  ;;  %v17629_v5 = vld [vmem:[#allocation229_spill] sm:$0xff]  ;;  %v12772_v60 = vpop.permute.xlu2 %4200  ;;  %v17633_v53 = vld [vmem:[#allocation48_spill] sm:$0xff] }
 0xa83   : > { %v17627_v54 = vrot.slane %v12403_v1, 1  ;;  %v17628_v14 = vrot.slane %v12464_v25, 1  ;;  %v2711_v13 = vsel %vm1051_vm4, %v17630_v45, %v17629_v5  ;;  %4886 = vrot.lane.b32.xlu1 %v4838_v8, %s7850_s30  ;;  %v1821_v61 = vadd.f32 %v12525_v17, %v1689_v29  ;;  %v17632_v25 = vld [vmem:[#allocation249_spill] sm:$0xff] }
 0xa84   : > { %v2519_v23 = vadd.f32 %v2483_v49, %v2289_v50  ;;  %v4848_v19 = vrot.slane %v4785_v47, 2  ;;  %v16721_v20 = vrot.slane %v12739_v12, 2  ;;  %v1825_v51 = vadd.f32 %v12555_v39, %v1693_v57  ;;  %v17634_v8 = vld [vmem:[#allocation9_spill] sm:$0xff]  ;;  %v17635_v47 = vld [vmem:[#allocation86_spill] sm:$0xff]  ;;  %v17636_v57 = vld [vmem:[#allocation52_spill] sm:$0xff] }
 0xa85   : > { %v1778_v7 = vsel %vm1499_vm2, %v17627_v54, %v17626_v0  ;;  %v1782_v48 = vsel %vm1499_vm2, %v17628_v14, %v16720_v56  ;;  %v2939_v10 = vsel %vm1051_vm4, %v17632_v25, %v17631_v16  ;;  %v4833_v21 = vrot.slane %v4775_v55, 2  ;;  %v17638_v49 = vld [vmem:[#allocation173_spill] sm:$0xff] }
 0xa86   : > { %v16726_v40 = vrot.slane %v12752_v30, 2  ;;  %v1824_v24 = vadd.f32 %v12568_v63, %v1692_v37  ;;  %v1826_v42 = vadd.f32 %v1778_v7, %v1694_v35  ;;  %v1828_v17 = vadd.f32 %v1782_v48, %v1696_v52  ;;  %v17639_v63 = vld [vmem:[#allocation90_spill] sm:$0xff]  ;;  %v17640_v35 = vld [vmem:[#allocation191_spill] sm:$0xff]  ;;  %v12807_v7 = vld [vmem:[%s7946_s14 + $0x1e0] sm:$0xff] }
 0xa87   : > { %v2747_v29 = vadd.f32 %v2711_v13, %v2519_v23  ;;  %v2015_v58 = vsel %vm533_vm3, %v17634_v8, %v17633_v53  ;;  %v2016_v39 = vsel %vm533_vm3, %v17633_v53, %v17635_v47  ;;  %v2019_v33 = vsel %vm533_vm3, %v17637_v18, %v17636_v57  ;;  %v17641_v52 = vld [vmem:[#allocation43_spill] sm:$0xff]  ;;  %v17642_v48 = vld [vmem:[#allocation221_spill] sm:$0xff] }
 0xa88   : > { %v12792_v11 = vmul.f32 %v11946_v26, %v17638_v49  ;;  %v2018_v37 = vsel %vm533_vm3, %v17639_v63, %v17637_v18  ;;  %v3167_v50 = vsel %vm1051_vm4, %v17641_v52, %v17640_v35  ;;  %v4857_v0 = vsel %vm3270_vm5, %v4848_v19, %v16721_v20  ;;  %v17643_v13 = vld [vmem:[#allocation257_spill] sm:$0xff]  ;;  %v17647_v18 = vld [vmem:[#allocation51_spill] sm:$0xff] }
 0xa89   : > { %v2975_v55 = vadd.f32 %v2939_v10, %v2747_v29  ;;  %v4835_v54 = vsel %vm3270_vm5, %v4833_v21, %v16726_v40  ;;  %v4778_v26 = vmul.f32 %v12807_v7, %v11821_v34  ;;  %v4782_v14 = vmul.f32 %v11795_v2, %v11821_v34  ;;  %v17645_v21 = vld [vmem:[#allocation15_spill] sm:$0xff]  ;;  %v17646_v53 = vld [vmem:[#allocation89_spill] sm:$0xff]  ;;  %v17676_v40 = vld [vmem:[#allocation204_spill] sm:$0xff] }
 0xa8a   : > { %v12815_v5 = vmul.f32 %v17642_v48, %v11821_v34  ;;  %v12819_v23 = vmul.f32 %v12317_v62, %v17643_v13  ;;  %4904 = vrot.lane.b32.xlu0 %v4857_v0, %s7850_s30  ;;  %v17644_v16 = vrot.slane %v12590_v4, 2  ;;  %4884 = vrot.lane.b32.xlu2 %v4835_v54, %s7850_s30  ;;  %v4774_v29 = vmul.f32 %v17645_v21, %v11821_v34  ;;  %v12836_v54 = vpop.permute.xlu2 %4214 }
 0xa8b   : > { %v2051_v2 = vadd.f32 %v2015_v58, %v1821_v61  ;;  %v2020_v8 = vsel %vm533_vm3, %v17636_v57, %v17646_v53  ;;  %v2022_v62 = vsel %vm533_vm3, %v17647_v18, %v17618_v6  ;;  %v16722_v63 = vrot.slane %v12792_v11, 2  ;;  %v17648_v61 = vld [vmem:[#allocation109_spill] sm:$0xff]  ;;  %v17654_v53 = vld [vmem:[#allocation140_spill] sm:$0xff]  ;;  %v17704_v18 = vld [vmem:[#allocation215_spill] sm:$0xff] }
 0xa8c   : > { %v4849_v10 = vsel %vm3270_vm5, %v17644_v16, %v4848_v19  ;;  %v2052_v4 = vadd.f32 %v2016_v39, %v1822_v3  ;;  %v2055_v19 = vadd.f32 %v2019_v33, %v1825_v51  ;;  %v2054_v35 = vadd.f32 %v2018_v37, %v1824_v24  ;;  %v17650_v24 = vld [vmem:[#allocation163_spill] sm:$0xff]  ;;  %v17651_v39 = vld [vmem:[#allocation160_spill] sm:$0xff]  ;;  %v17652_v37 = vld [vmem:[#allocation142_spill] sm:$0xff] }
 0xa8d   : > { %4896 = vrot.lane.b32.xlu1 %v4849_v10, %s7850_s30  ;;  %v3203_v0 = vadd.f32 %v3167_v50, %v2975_v55  ;;  %v17649_v58 = vrot.slane %v17648_v61, 2  ;;  %v4831_v48 = vrot.slane %v4778_v26, 2  ;;  %v4842_v16 = vrot.slane %v4782_v14, 2  ;;  %v17653_v50 = vld [vmem:[#allocation165_spill] sm:$0xff]  ;;  %v7752_v14 = vld [vmem:[%s7946_s14 + $0x210] sm:$0xff]  ;;  %v17655_v61 = vld [vmem:[#allocation260_spill] sm:$0xff] }
 0xa8e   : > { %v16723_v6 = vrot.slane %v12815_v5, 2  ;;  %v2056_v21 = vadd.f32 %v2020_v8, %v1826_v42  ;;  %v2058_v10 = vadd.f32 %v2022_v62, %v1828_v17  ;;  %v16724_v3 = vrot.slane %v12819_v23, 2  ;;  %v17656_v42 = vld [vmem:[#allocation166_spill] sm:$0xff] }
 0xa8f   : > { %v3291_v57 = vsel %vm3270_vm5, %v16722_v63, %v17649_v58  ;;  %v4830_v51 = vrot.slane %v4774_v29, 2  ;;  %v2245_v33 = vsel %vm533_vm3, %v17651_v39, %v17650_v24  ;;  %v2246_v55 = vsel %vm533_vm3, %v17650_v24, %v17652_v37  ;;  %v17657_v29 = vld [vmem:[#allocation167_spill] sm:$0xff]  ;;  %v17658_v39 = vld [vmem:[#allocation262_spill] sm:$0xff] }
 0xa90   : > { %v2249_v26 = vsel %vm533_vm3, %v17654_v53, %v17653_v50  ;;  %v12856_v58 = vmul.f32 %v7752_v14, %v17655_v61  ;;  %v2248_v17 = vsel %vm533_vm3, %v17656_v42, %v17654_v53  ;;  %v2252_v8 = vsel %vm533_vm3, %v17657_v29, %v17620_v32  ;;  %v12874_v63 = vld [vmem:[%s7946_s14 + $0x208] sm:$0xff] }
 0xa91   : > { %v3336_v62 = vadd.f32 %v3291_v57, %v3203_v0  ;;  %v17659_v56 = vrot.slane %v17658_v39, 2  ;;  %v4843_v20 = vsel %vm3270_vm5, %v4831_v48, %v4842_v16  ;;  %v4851_v14 = vsel %vm3270_vm5, %v4842_v16, %v16723_v6  ;;  %v17660_v16 = vld [vmem:[#allocation169_spill] sm:$0xff] }
 0xa92   : > { %v4783_v53 = vmul.f32 %v12874_v63, %v12508_v46  ;;  %v12880_v32 = vmul.f32 %v17600_v59, %v12508_v46  ;;  %v2281_v0 = vadd.f32 %v2245_v33, %v2051_v2  ;;  %v2282_v57 = vadd.f32 %v2246_v55, %v2052_v4  ;;  %4890 = vrot.lane.b32.xlu0 %v4843_v20, %s7850_s30  ;;  %v17661_v6 = vld [vmem:[#allocation213_spill] sm:$0xff]  ;;  %v17662_v4 = vld [vmem:[#allocation231_spill] sm:$0xff]  ;;  %v12902_v33 = vpop.permute.xlu2 %4432 }
 0xa93   : > { %v3423_v24 = vsel %vm3270_vm5, %v16724_v3, %v17659_v56  ;;  %v4832_v56 = vsel %vm3270_vm5, %v4830_v51, %v4831_v48  ;;  %4898 = vrot.lane.b32.xlu2 %v4851_v14, %s7850_s30  ;;  %v12885_v42 = vadd.f32 %v2249_v26, %v2055_v19  ;;  %v2250_v39 = vsel %vm533_vm3, %v17653_v50, %v17660_v16  ;;  %v12900_v51 = vpop.permute.xlu0 %4210  ;;  %v17664_v55 = vld [vmem:[#allocation187_spill] sm:$0xff]  ;;  %v17665_v50 = vld [vmem:[#allocation324_spill] sm:$0xff]  ;;  %v17670_v16 = vld [vmem:[#allocation209_spill] sm:$0xff] }
 0xa94   : > { %v2482_v3 = vsel %vm533_vm3, %v17661_v6, %v17624_v41  ;;  %v16725_v59 = vrot.slane %v12856_v58, 2  ;;  %v12895_v2 = vadd.f32 %v2248_v17, %v2054_v35  ;;  %v2288_v20 = vadd.f32 %v2252_v8, %v2058_v10  ;;  %17663 = vst [vmem:[#allocation10_spill] sm:$0xff] %v12902_v33  ;;  %v17667_v41 = vld [vmem:[#allocation266_spill] sm:$0xff]  ;;  %v4203_v10 = vpop.permute.xlu1 %4202 }
 0xa95   : > { %4882 = vrot.lane.b32.xlu1 %v4832_v56, %s7850_s30  ;;  %v2710_v19 = vsel %vm1051_vm4, %v17662_v4, %v17630_v45  ;;  %v3468_v48 = vadd.f32 %v3423_v24, %v3336_v62  ;;  %v12906_v26 = vmul.f32 %v17665_v50, %v17664_v55  ;;  %v17668_v14 = vrot.slane %v17667_v41, 2  ;;  %v17671_v50 = vld [vmem:[#allocation206_spill] sm:$0xff] }
 0xa96   : > { %v4844_v17 = vrot.slane %v4783_v53, 2  ;;  %v12914_v45 = vadd.f32 %v2250_v39, %v2056_v21  ;;  %v2518_v62 = vadd.f32 %v2482_v3, %v2288_v20  ;;  %v12918_v24 = vsel %vm533_vm3, %v12772_v60, %v4203_v10  ;;  %v17673_v21 = vld [vmem:[#allocation310_spill] sm:$0xff]  ;;  %v17675_v20 = vld [vmem:[#allocation277_spill] sm:$0xff] }
 0xa97   : > { %17666 = vst [vmem:[#allocation63_spill] sm:$0xff] %v12906_v26  ;;  %v3555_v35 = vsel %vm3270_vm5, %v16725_v59, %v17668_v14  ;;  %v12922_v56 = vsel %vm533_vm3, %v4203_v10, %v12633_v9  ;;  %v2475_v41 = vsel %vm533_vm3, %v17671_v50, %v17670_v16  ;;  %v17672_v14 = vld [vmem:[#allocation244_spill] sm:$0xff]  ;;  %v12932_v39 = vmul.f32 %v17673_v21, %v17664_v55  ;;  %v17674_v3 = vld [vmem:[#allocation270_spill] sm:$0xff]  ;;  %v17677_v10 = vld [vmem:[#allocation223_spill] sm:$0xff] }
 0xa98   : > { %17669 = vst [vmem:[#allocation56_spill] sm:$0xff] %v12922_v56  ;;  %v2938_v53 = vsel %vm1051_vm4, %v17672_v14, %v17632_v25  ;;  %v3794_v59 = vsel %vm533_vm3, %v17675_v20, %v17674_v3  ;;  %v2476_v9 = vsel %vm533_vm3, %v17670_v16, %v17676_v40  ;;  %v17678_v8 = vld [vmem:[#allocation230_spill] sm:$0xff]  ;;  %v2746_v44 = vadd.f32 %v2710_v19, %v2518_v62  ;;  %v17681_v56 = vld [vmem:[#allocation35_spill] sm:$0xff] }
 0xa99   : > { %v2704_v50 = vsel %vm1051_vm4, %v17678_v8, %v17677_v10  ;;  %v3600_v46 = vadd.f32 %v3555_v35, %v3468_v48  ;;  %v16730_v25 = vrot.slane %v12906_v26, 2  ;;  %v3166_v21 = vsel %vm1051_vm4, %v17679_v28, %v17641_v52  ;;  %v17685_v35 = vld [vmem:[#allocation73_spill] sm:$0xff]  ;;  %v17686_v52 = vld [vmem:[#allocation307_spill] sm:$0xff] }
 0xa9a   : > { %v12949_v14 = vmul.f32 %v17681_v56, %v17680_v27  ;;  %v17683_v3 = vrot.slane %v12880_v32, 2  ;;  %v2974_v33 = vadd.f32 %v2938_v53, %v2746_v44  ;;  %v17684_v19 = vrot.slane %v12752_v30, 2  ;;  %v17688_v53 = vld [vmem:[#allocation296_spill] sm:$0xff] }
 0xa9b   : > { %v3830_v4 = vadd.f32 %v3794_v59, %v3600_v46  ;;  %4224 = vrot.lane.b32.xlu2 %v17685_v35, %s7848_s15  ;;  %v12962_v62 = vmul.f32 %v17686_v52, %v17664_v55  ;;  %v16731_v56 = vrot.slane %v12932_v39, 2  ;;  %v12969_v46 = vmul.f32 %v12447_v22, %v17680_v27  ;;  %v12975_v35 = vpop.permute.xlu2 %4446  ;;  %v12984_v52 = vld [vmem:[%s7946_s14 + $0x228] sm:$0xff] }
 0xa9c   : > { %17682 = vst [vmem:[#allocation134_spill] sm:$0xff] %v12949_v14  ;;  %v4853_v16 = vsel %vm3270_vm5, %v4844_v17, %v17683_v3  ;;  %v4845_v48 = vsel %vm3270_vm5, %v17684_v19, %v4844_v17  ;;  %v17687_v3 = vld [vmem:[#allocation306_spill] sm:$0xff]  ;;  %v12972_v30 = vadd.f32 %v2475_v41, %v2281_v0  ;;  %v2512_v59 = vadd.f32 %v2476_v9, %v2282_v57  ;;  %v4221_v19 = vpop.permute.xlu0 %4220  ;;  %v17692_v41 = vld [vmem:[#allocation148_spill] sm:$0xff]  ;;  %v17693_v9 = vld [vmem:[#allocation243_spill] sm:$0xff] }
 0xa9d   : > { %4900 = vrot.lane.b32.xlu0 %v4853_v16, %s7850_s30  ;;  %v3229_v44 = vmul.f32 %v17687_v3, %v17664_v55  ;;  %4892 = vrot.lane.b32.xlu1 %v4845_v48, %s7850_s30  ;;  %v3202_v17 = vadd.f32 %v3166_v21, %v2974_v33  ;;  %v4060_v16 = vadd.f32 %v17688_v53, %v3830_v4  ;;  %v17690_v48 = vld [vmem:[#allocation201_spill] sm:$0xff]  ;;  %v4213_v4 = vpop.permute.xlu1 %4212  ;;  %v17702_v6 = vrot.slane %v12969_v46, 2 }
 0xa9e   : > { %v3289_v55 = vsel %vm3270_vm5, %v16731_v56, %v16730_v25  ;;  %17689 = vst [vmem:[#allocation54_spill] sm:$0xff] %v12984_v52  ;;  %v12988_v0 = vmul.f32 %v12984_v52, %v17690_v48  ;;  %v4254_v57 = vsel %vm533_vm3, %v12713_v36, %v4221_v19  ;;  %v2740_v33 = vadd.f32 %v2704_v50, %v2512_v59  ;;  %v17695_v50 = vld [vmem:[#allocation183_spill] sm:$0xff]  ;;  %v17696_v59 = vld [vmem:[#allocation193_spill] sm:$0xff] }
 0xa9f   : > { %v2932_v21 = vsel %vm1051_vm4, %v17693_v9, %v17692_v41  ;;  %v12995_v3 = vadd.f32 %v4254_v57, %v4060_v16  ;;  %v12999_v53 = vsel %vm533_vm3, %v12900_v51, %v4213_v4  ;;  %v3274_v56 = vrot.slane %v3229_v44, 2  ;;  %v17697_v16 = vld [vmem:[#allocation150_spill] sm:$0xff]  ;;  %v17698_v4 = vld [vmem:[#allocation152_spill] sm:$0xff]  ;;  %v17699_v25 = vld [vmem:[#allocation211_spill] sm:$0xff] }
 0xaa0   : > { %17691 = vst [vmem:[#allocation114_spill] sm:$0xff] %v12988_v0  ;;  %v13005_v19 = vmul.f32 %v12874_v63, %v17690_v48  ;;  %v3160_v26 = vsel %vm1051_vm4, %v17696_v59, %v17695_v50  ;;  %v3335_v52 = vadd.f32 %v3289_v55, %v3202_v17  ;;  %v13012_v57 = vmul.f32 %v17697_v16, %v17680_v27  ;;  %v17700_v44 = vld [vmem:[#allocation205_spill] sm:$0xff]  ;;  %v17703_v55 = vld [vmem:[#allocation212_spill] sm:$0xff] }
 0xaa1   : > { %17694 = vst [vmem:[#allocation144_spill] sm:$0xff] %v12995_v3  ;;  %v3362_v3 = vmul.f32 %v17698_v4, %v17680_v27  ;;  %v2479_v22 = vsel %vm533_vm3, %v17700_v44, %v17699_v25  ;;  %v2968_v28 = vadd.f32 %v2932_v21, %v2740_v33  ;;  %v17701_v63 = vrot.slane %v12949_v14, 2  ;;  %v17705_v4 = vld [vmem:[#allocation235_spill] sm:$0xff]  ;;  %v17706_v50 = vld [vmem:[#allocation228_spill] sm:$0xff] }
 0xaa2   : > { %v2478_v16 = vsel %vm533_vm3, %v17703_v55, %v17700_v44  ;;  %v2480_v27 = vsel %vm533_vm3, %v17699_v25, %v17704_v18  ;;  %v2708_v33 = vsel %vm1051_vm4, %v17706_v50, %v17705_v4  ;;  %v17707_v21 = vld [vmem:[#allocation79_spill] sm:$0xff]  ;;  %v13043_v44 = vmul.f32 %v12748_v15, %v17690_v48  ;;  %v17710_v25 = vld [vmem:[#allocation45_spill] sm:$0xff]  ;;  %v17719_v55 = vld [vmem:[#allocation192_spill] sm:$0xff] }
 0xaa3   : > { %v3421_v29 = vsel %vm3270_vm5, %v17702_v6, %v17701_v63  ;;  %v17708_v14 = vld [vmem:[#allocation95_spill] sm:$0xff]  ;;  %v17709_v6 = vrot.slane %v12962_v62, 2  ;;  %v3196_v17 = vadd.f32 %v3160_v26, %v2968_v28  ;;  %v16735_v18 = vrot.slane %v13005_v19, 2  ;;  %v13051_v40 = vpop.permute.xlu2 %4428 }
 0xaa4   : > { %4450 = vrot.lane.b32.xlu2 %v17708_v14, %s7850_s30  ;;  %v3406_v4 = vrot.slane %v3362_v3, 2  ;;  %v3467_v41 = vadd.f32 %v3421_v29, %v3335_v52  ;;  %v4207_v10 = vpop.permute.xlu0 %4206  ;;  %v13054_v28 = vadd.f32 %v2479_v22, %v12885_v42  ;;  %v13057_v15 = vadd.f32 %v2478_v16, %v12895_v2  ;;  %v17713_v29 = vld [vmem:[#allocation241_spill] sm:$0xff] }
 0xaa5   : > { %4226 = vrot.lane.b32.xlu0 %v17707_v21, %s7848_s15  ;;  %v3276_v63 = vsel %vm3270_vm5, %v3274_v56, %v17709_v6  ;;  %4222 = vrot.lane.b32.xlu1 %v17710_v25, %s7848_s15  ;;  %v7755_v21 = vld [vmem:[%s7946_s14 + $0x1c8] sm:$0xfc]  ;;  %v2516_v26 = vadd.f32 %v2480_v27, %v12914_v45  ;;  %v17711_v56 = vrot.slane %v12988_v0, 2  ;;  %v4199_v6 = vpop.permute.xlu1 %4198  ;;  %v17714_v25 = vld [vmem:[#allocation111_spill] sm:$0xff]  ;;  %v17716_v2 = vld [vmem:[#allocation285_spill] sm:$0xff]  ;;  %v17720_v0 = vrot.slane %v13012_v57, 2 }
 0xaa6   : > { %v3494_v14 = vmul.f32 %v7755_v21, %v17690_v48  ;;  %v17712_v48 = vld [vmem:[#allocation248_spill] sm:$0xff]  ;;  %v13070_v42 = vmul.f32 %v17714_v25, %v17638_v49  ;;  %v13074_v22 = vmul.f32 %v17716_v2, %v17643_v13  ;;  %v13078_v45 = vsel %vm533_vm3, %v4199_v6, %v12772_v60  ;;  %v17723_v6 = vld [vmem:[#allocation69_spill] sm:$0xff] }
 0xaa7   : > { %v3553_v3 = vsel %vm3270_vm5, %v16735_v18, %v17711_v56  ;;  %v2936_v52 = vsel %vm1051_vm4, %v17713_v29, %v17712_v48  ;;  %v2744_v16 = vadd.f32 %v2708_v33, %v2516_v26  ;;  %v3329_v27 = vadd.f32 %v3276_v63, %v3196_v17  ;;  %v17717_v56 = vld [vmem:[#allocation272_spill] sm:$0xff]  ;;  %v17718_v18 = vld [vmem:[#allocation255_spill] sm:$0xff]  ;;  %v17721_v33 = vld [vmem:[#allocation225_spill] sm:$0xff] }
 0xaa8   : > { %17715 = vst [vmem:[#allocation26_spill] sm:$0xff] %v13070_v42  ;;  %v3793_v48 = vsel %vm533_vm3, %v17717_v56, %v17675_v20  ;;  %v3164_v25 = vsel %vm1051_vm4, %v17719_v55, %v17718_v18  ;;  %v3408_v2 = vsel %vm3270_vm5, %v3406_v4, %v17720_v0  ;;  %v3538_v13 = vrot.slane %v3494_v14, 2  ;;  %v17722_v63 = vld [vmem:[#allocation224_spill] sm:$0xff]  ;;  %v17725_v56 = vld [vmem:[#allocation145_spill] sm:$0xff]  ;;  %v17727_v14 = vld [vmem:[#allocation99_spill] sm:$0xff] }
 0xaa9   : > { %v3599_v60 = vadd.f32 %v3553_v3, %v3467_v41  ;;  %v2707_v17 = vsel %vm1051_vm4, %v17721_v33, %v17706_v50  ;;  %v2703_v26 = vsel %vm1051_vm4, %v17722_v63, %v17678_v8  ;;  %v2972_v20 = vadd.f32 %v2936_v52, %v2744_v16  ;;  %v17724_v21 = vld [vmem:[#allocation292_spill] sm:$0xff]  ;;  %v17728_v8 = vld [vmem:[#allocation195_spill] sm:$0xff] }
 0xaaa   : > { %v4023_v18 = vsel %vm533_vm3, %v17724_v21, %v17723_v6  ;;  %v2931_v49 = vsel %vm1051_vm4, %v17725_v56, %v17693_v9  ;;  %v16739_v0 = vrot.slane %v13070_v42, 2  ;;  %v17726_v50 = vld [vmem:[#allocation256_spill] sm:$0xff]  ;;  %v17729_v3 = vld [vmem:[#allocation115_spill] sm:$0xff]  ;;  %v3461_v9 = vadd.f32 %v3408_v2, %v3329_v27  ;;  %v17730_v56 = vld [vmem:[#allocation13_spill] sm:$0xff] }
 0xaab   : > { %v3829_v4 = vadd.f32 %v3793_v48, %v3599_v60  ;;  %v3228_v52 = vmul.f32 %v17729_v3, %v17728_v8  ;;  %v3200_v16 = vadd.f32 %v3164_v25, %v2972_v20  ;;  %v7756_v63 = vld [vmem:[%s7946_s14 + $0x1f0] sm:$0xff]  ;;  %v17733_v25 = vrot.slane %v13043_v44, 2  ;;  %v13128_v27 = vpop.permute.xlu2 %4442  ;;  %v17735_v2 = vld [vmem:[#allocation253_spill] sm:$0xff] }
 0xaac   : > { %4456 = vrot.lane.b32.xlu2 %v17727_v14, %s7850_s30  ;;  %v13112_v6 = vmul.f32 %v7756_v63, %v17655_v61  ;;  %v17731_v48 = vld [vmem:[#allocation107_spill] sm:$0xff]  ;;  %v4217_v63 = vpop.permute.xlu0 %4216  ;;  %17734 = vst [vmem:[#allocation141_spill] sm:$0xff] %v13128_v27  ;;  %v17741_v61 = vld [vmem:[#allocation182_spill] sm:$0xff] }
 0xaad   : > { %4452 = vrot.lane.b32.xlu0 %v17726_v50, %s7850_s30  ;;  %4228 = vrot.lane.b32.xlu1 %v17730_v56, %s7848_s15  ;;  %v13118_v60 = vmul.f32 %v17731_v48, %v17728_v8  ;;  %v17732_v50 = vrot.slane %v12792_v11, 2  ;;  %v3540_v20 = vsel %vm3270_vm5, %v3538_v13, %v17733_v25  ;;  %v4059_v3 = vadd.f32 %v4023_v18, %v3829_v4  ;;  %v17736_v56 = vld [vmem:[#allocation327_spill] sm:$0xff]  ;;  %v17737_v48 = vld [vmem:[#allocation312_spill] sm:$0xff]  ;;  %v17739_v13 = vld [vmem:[#allocation177_spill] sm:$0xff] }
 0xaae   : > { %v3361_v41 = vmul.f32 %v17736_v56, %v17735_v2  ;;  %v13134_v21 = vmul.f32 %v17737_v48, %v17735_v2  ;;  %v13138_v11 = vsel %vm533_vm3, %v12836_v54, %v4217_v63  ;;  %v17740_v18 = vld [vmem:[#allocation271_spill] sm:$0xff]  ;;  %v2739_v54 = vadd.f32 %v2703_v26, %v12972_v30  ;;  %v17746_v30 = vld [vmem:[#allocation232_spill] sm:$0xff] }
 0xaaf   : > { %v3285_v14 = vsel %vm3270_vm5, %v16739_v0, %v17732_v50  ;;  %17738 = vst [vmem:[#allocation239_spill] sm:$0xff] %v13138_v11  ;;  %v4253_v50 = vsel %vm533_vm3, %v4217_v63, %v12713_v36  ;;  %v4209_v0 = vpop.permute.xlu1 %4208  ;;  %v3787_v4 = vsel %vm533_vm3, %v17740_v18, %v17739_v13  ;;  %v3271_v11 = vrot.slane %v3228_v52, 2 }
 0xab0   : > { %v13145_v25 = vadd.f32 %v4253_v50, %v4059_v3  ;;  %v13148_v56 = vsel %vm533_vm3, %v4207_v10, %v4209_v0  ;;  %v13152_v48 = vsel %vm533_vm3, %v4209_v0, %v12900_v51  ;;  %v3333_v27 = vadd.f32 %v3285_v14, %v3200_v16  ;;  %v17744_v51 = vld [vmem:[#allocation200_spill] sm:$0xff]  ;;  %v17745_v0 = vld [vmem:[#allocation291_spill] sm:$0xff]  ;;  %v17747_v16 = vld [vmem:[#allocation102_spill] sm:$0xff] }
 0xab1   : > { %v3593_v36 = vadd.f32 %v3540_v20, %v3461_v9  ;;  %v3272_v63 = vrot.slane %v13118_v60, 2  ;;  %v3159_v3 = vsel %vm1051_vm4, %v17741_v61, %v17696_v59  ;;  %v17742_v50 = vrot.slane %v12819_v23, 2  ;;  %v7757_v14 = vld [vmem:[%s7946_s14 + $0x1c0] sm:$0xfc]  ;;  %v17748_v20 = vld [vmem:[#allocation254_spill] sm:$0xff] }
 0xab2   : > { %v17743_v10 = vrot.slane %v13074_v22, 2  ;;  %v4017_v42 = vsel %vm533_vm3, %v17745_v0, %v17744_v51  ;;  %v2706_v26 = vsel %vm1051_vm4, %v17746_v30, %v17721_v33  ;;  %v2967_v52 = vadd.f32 %v2931_v49, %v2739_v54  ;;  %v17750_v51 = vld [vmem:[#allocation126_spill] sm:$0xff] }
 0xab3   : > { %v13172_v9 = vmul.f32 %v17747_v16, %v17728_v8  ;;  %v3823_v61 = vadd.f32 %v3787_v4, %v3593_v36  ;;  %v16742_v23 = vrot.slane %v13112_v6, 2  ;;  %v3403_v59 = vrot.slane %v3361_v41, 2  ;;  %v17751_v41 = vld [vmem:[#allocation96_spill] sm:$0xff] }
 0xab4   : > { %v3417_v13 = vsel %vm3270_vm5, %v17743_v10, %v17742_v50  ;;  %v16743_v60 = vrot.slane %v13134_v21, 2  ;;  %v3493_v50 = vmul.f32 %v7757_v14, %v17748_v20  ;;  %v17749_v10 = vld [vmem:[#allocation318_spill] sm:$0xff]  ;;  %4682 = vrot.lane.b32.xlu2 %v17750_v51, %s7850_s30  ;;  %v3195_v49 = vadd.f32 %v3159_v3, %v2967_v52  ;;  %v13196_v51 = vpop.permute.xlu0 %4438  ;;  %v17755_v52 = vld [vmem:[#allocation276_spill] sm:$0xff] }
 0xab5   : > { %4678 = vrot.lane.b32.xlu0 %v17749_v10, %s7850_s30  ;;  %v13184_v33 = vmul.f32 %v12807_v7, %v17748_v20  ;;  %v3465_v4 = vadd.f32 %v3417_v13, %v3333_v27  ;;  %v4053_v54 = vadd.f32 %v4017_v42, %v3823_v61  ;;  %4454 = vrot.lane.b32.xlu1 %v17751_v41, %s7850_s30  ;;  %v17752_v14 = vrot.slane %v12856_v58, 2  ;;  %v13198_v7 = vpop.permute.xlu2 %4660  ;;  %v17753_v42 = vld [vmem:[#allocation159_spill] sm:$0xff]  ;;  %v17756_v61 = vld [vmem:[#allocation269_spill] sm:$0xff] }
 0xab6   : > { %v2743_v36 = vadd.f32 %v2707_v17, %v13054_v28  ;;  %v2742_v30 = vadd.f32 %v2706_v26, %v13057_v15  ;;  %v3273_v16 = vsel %vm3270_vm5, %v3271_v11, %v3272_v63  ;;  %v2935_v27 = vsel %vm1051_vm4, %v17753_v42, %v17713_v29  ;;  %v17754_v28 = vld [vmem:[#allocation245_spill] sm:$0xff]  ;;  %v17765_v17 = vld [vmem:[#allocation20_spill] sm:$0xff] }
 0xab7   : > { %v3549_v3 = vsel %vm3270_vm5, %v16742_v23, %v17752_v14  ;;  %v2934_v15 = vsel %vm1051_vm4, %v17754_v28, %v17753_v42  ;;  %v4283_v58 = vadd.f32 %v12918_v24, %v4053_v54  ;;  %v13208_v11 = vpop.permute.xlu1 %4430  ;;  %v3405_v13 = vsel %vm3270_vm5, %v3403_v59, %v16743_v60  ;;  %v17758_v42 = vld [vmem:[#allocation184_spill] sm:$0xff]  ;;  %v17761_v60 = vld [vmem:[#allocation61_spill] sm:$0xff] }
 0xab8   : > { %v3535_v26 = vrot.slane %v3493_v50, 2  ;;  %v3791_v10 = vsel %vm533_vm3, %v17756_v61, %v17755_v52  ;;  %v4475_v29 = vsel %vm1051_vm4, %v13051_v40, %v13208_v11  ;;  %v3328_v41 = vadd.f32 %v3273_v16, %v3195_v49  ;;  %v17759_v50 = vld [vmem:[#allocation198_spill] sm:$0xff]  ;;  %v17760_v52 = vld [vmem:[#allocation320_spill] sm:$0xff] }
 0xab9   : > { %v3597_v24 = vadd.f32 %v3549_v3, %v3465_v4  ;;  %v13220_v54 = vadd.f32 %v4475_v29, %v4283_v58  ;;  %v3163_v59 = vsel %vm1051_vm4, %v17758_v42, %v17719_v55  ;;  %v3162_v28 = vsel %vm1051_vm4, %v17759_v50, %v17758_v42  ;;  %v17762_v49 = vld [vmem:[#allocation290_spill] sm:$0xff] }
 0xaba   : > { %v13230_v23 = vmul.f32 %v17760_v52, %v17735_v2  ;;  %v4021_v16 = vsel %vm533_vm3, %v17762_v49, %v17761_v60  ;;  %v2971_v14 = vadd.f32 %v2935_v27, %v2743_v36  ;;  %v2970_v4 = vadd.f32 %v2934_v15, %v2742_v30  ;;  %v17766_v42 = vld [vmem:[#allocation34_spill] sm:$0xff]  ;;  %v17769_v36 = vld [vmem:[#allocation287_spill] sm:$0xff] }
 0xabb   : > { %17757 = vst [vmem:[#allocation41_spill] sm:$0xff] %v13220_v54  ;;  %v3827_v3 = vadd.f32 %v3791_v10, %v3597_v24  ;;  %v17763_v58 = vrot.slane %v12545_v38, 2  ;;  %v17764_v29 = vrot.slane %v12880_v32, 2  ;;  %v710_v50 = vsel %vm533_vm3, %v17766_v42, %v17765_v17  ;;  %v7758_v38 = vld [vmem:[%s7946_s14 + $0x240] sm:$0xff] }
 0xabc   : > { %v17767_v54 = vrot.slane %v12932_v39, 2  ;;  %v17768_v2 = vrot.slane %v12962_v62, 2  ;;  %v13253_v32 = vmul.f32 %v7758_v38, %v11821_v34  ;;  %v3199_v30 = vadd.f32 %v3163_v59, %v2971_v14  ;;  %v17770_v39 = vld [vmem:[#allocation120_spill] sm:$0xff]  ;;  %v17778_v38 = vld [vmem:[#allocation94_spill] sm:$0xff] }
 0xabd   : > { %v4861_v55 = vsel %vm3270_vm5, %v17764_v29, %v17763_v58  ;;  %4684 = vrot.lane.b32.xlu0 %v17769_v36, %s7850_s30  ;;  %v3198_v27 = vadd.f32 %v3162_v28, %v2970_v4  ;;  %v3460_v15 = vadd.f32 %v3405_v13, %v3328_v41  ;;  %v4057_v17 = vadd.f32 %v4021_v16, %v3827_v3  ;;  %v13265_v58 = vld [vmem:[%s7946_s14 + $0x200] sm:$0xff]  ;;  %v13271_v13 = vpop.permute.xlu0 %4448  ;;  %v13273_v41 = vpop.permute.xlu2 %4674  ;;  %v17774_v16 = vld [vmem:[#allocation75_spill] sm:$0xff] }
 0xabe   : > { %v3283_v60 = vsel %vm3270_vm5, %v17768_v2, %v17767_v54  ;;  %4908 = vrot.lane.b32.xlu2 %v4861_v55, %s7850_s30  ;;  %4680 = vrot.lane.b32.xlu1 %v17770_v39, %s7850_s30  ;;  %v17771_v62 = vrot.slane %v13172_v9, 2  ;;  %v17772_v10 = vrot.slane %v13184_v33, 2  ;;  %v16750_v54 = vrot.slane %v13230_v23, 2  ;;  %v17773_v59 = vld [vmem:[#allocation16_spill] sm:$0xff]  ;;  %v7760_v3 = vld [vmem:[%s7946_s14 + $0x10] sm:$0xfe] }
 0xabf   : > { %v13269_v14 = vmul.f32 %v13265_v58, %v17748_v20  ;;  %v746_v28 = vadd.f32 %v710_v50, %v17773_v59  ;;  %v4287_v55 = vadd.f32 %v12999_v53, %v4057_v17  ;;  %v4441_v42 = vpop.permute.xlu1 %4440  ;;  %v17777_v36 = vld [vmem:[#allocation97_spill] sm:$0xff]  ;;  %v16745_v59 = vrot.slane %v13253_v32, 2 }
 0xac0   : > { %v3281_v2 = vsel %vm3270_vm5, %v3272_v63, %v17771_v62  ;;  %v3537_v24 = vsel %vm3270_vm5, %v3535_v26, %v17772_v10  ;;  %v17775_v63 = vld [vmem:[#allocation72_spill] sm:$0xff]  ;;  %v17776_v26 = vld [vmem:[#allocation55_spill] sm:$0xff]  ;;  %v1054_v39 = vsel %vm1051_vm4, %v17778_v38, %v17777_v36  ;;  %v4479_v50 = vsel %vm1051_vm4, %v13196_v51, %v4441_v42 }
 0xac1   : > { %v884_v4 = vsel %vm533_vm3, %v17775_v63, %v17774_v16  ;;  %v1459_v29 = vmul.f32 %v7760_v3, %v17776_v26  ;;  %v17779_v62 = vld [vmem:[#allocation19_spill] sm:$0xff]  ;;  %v3332_v16 = vadd.f32 %v3283_v60, %v3199_v30  ;;  %v3331_v63 = vadd.f32 %v3281_v2, %v3198_v27  ;;  %v17784_v2 = vld [vmem:[#allocation264_spill] sm:$0xff] }
 0xac2   : > { %v3786_v10 = vsel %vm533_vm3, %v17779_v62, %v17740_v18  ;;  %v3592_v3 = vadd.f32 %v3537_v24, %v3460_v15  ;;  %v13291_v26 = vadd.f32 %v4479_v50, %v4287_v55  ;;  %v17780_v53 = vrot.slane %v12969_v46, 2  ;;  %v17783_v60 = vld [vmem:[#allocation203_spill] sm:$0xff]  ;;  %v17786_v24 = vld [vmem:[#allocation77_spill] sm:$0xff]  ;;  %v17788_v50 = vld [vmem:[#allocation116_spill] sm:$0xff] }
 0xac3   : > { %v17781_v17 = vrot.slane %v13012_v57, 2  ;;  %v16748_v38 = vrot.slane %v13269_v14, 2  ;;  %v17782_v18 = vrot.slane %v13134_v21, 2  ;;  %v4016_v30 = vsel %vm533_vm3, %v17783_v60, %v17745_v0 }
 0xac4   : > { %v920_v27 = vadd.f32 %v884_v4, %v746_v28  ;;  %v1506_v15 = vrot.slane %v1459_v29, 1  ;;  %v3822_v46 = vadd.f32 %v3786_v10, %v3592_v3  ;;  %v17785_v57 = vrot.slane %v17784_v2, 2  ;;  %v7761_v4 = vld [vmem:[%s7946_s14 + $0x258] sm:$0xff]  ;;  %v17792_v2 = vld [vmem:[#allocation58_spill] sm:$0xff] }
 0xac5   : > { %v3415_v36 = vsel %vm3270_vm5, %v17781_v17, %v17780_v53  ;;  %v3413_v42 = vsel %vm3270_vm5, %v17782_v18, %v16750_v54  ;;  %v17787_v55 = vrot.slane %v17786_v24, 2  ;;  %v17789_v53 = vld [vmem:[#allocation113_spill] sm:$0xff]  ;;  %v17790_v17 = vld [vmem:[#allocation252_spill] sm:$0xff]  ;;  %v17791_v0 = vrot.slane %v12815_v5, 2 }
 0xac6   : > { %v1222_v21 = vsel %vm1051_vm4, %v17789_v53, %v17788_v50  ;;  %4910 = vrot.lane.b32.xlu0 %v17790_v17, %s7850_s30  ;;  %v13325_v29 = vmul.f32 %v7761_v4, %v11801_v43  ;;  %v1090_v10 = vadd.f32 %v1054_v39, %v920_v27  ;;  %v3464_v3 = vadd.f32 %v3415_v36, %v3332_v16  ;;  %v17794_v5 = vld [vmem:[#allocation137_spill] sm:$0xff]  ;;  %v13343_v36 = vpop.permute.xlu2 %4656  ;;  %v17801_v4 = vld [vmem:[#allocation7_spill] sm:$0xff] }
 0xac7   : > { %v4185_v62 = vsel %vm3270_vm5, %v17787_v55, %v17785_v57  ;;  %v4859_v28 = vsel %vm3270_vm5, %v17791_v0, %v16745_v59  ;;  %v3463_v18 = vadd.f32 %v3413_v42, %v3331_v63  ;;  %v4052_v60 = vadd.f32 %v4016_v30, %v3822_v46  ;;  %v17793_v57 = vld [vmem:[#allocation53_spill] sm:$0xff]  ;;  %v7762_v55 = vld [vmem:[%s7946_s14 + $0xf0] sm:$0xfe]  ;;  %v4435_v63 = vpop.permute.xlu0 %4434 }
 0xac8   : > { %4232 = vrot.lane.b32.xlu2 %v4185_v62, %s7848_s15  ;;  %4906 = vrot.lane.b32.xlu1 %v4859_v28, %s7850_s30  ;;  %v1390_v24 = vsel %vm1051_vm4, %v17793_v57, %v17792_v2  ;;  %v1592_v50 = vmul.f32 %v7762_v55, %v17794_v5  ;;  %v17795_v53 = vrot.slane %v13005_v19, 2  ;;  %v17796_v62 = vrot.slane %v13043_v44, 2  ;;  %v17798_v42 = vld [vmem:[#allocation66_spill] sm:$0xff]  ;;  %v17799_v46 = vld [vmem:[#allocation123_spill] sm:$0xff]  ;;  %v4427_v28 = vpop.permute.xlu1 %4426  ;;  %v17802_v2 = vld [vmem:[#allocation273_spill] sm:$0xff] }
 0xac9   : > { %v17797_v39 = vrot.slane %v13184_v33, 2  ;;  %v318_v30 = vmul.f32 %v17760_v52, %v17798_v42  ;;  %v1258_v27 = vadd.f32 %v1222_v21, %v1090_v10  ;;  %v17800_v19 = vrot.slane %v17799_v46, 1  ;;  %v17805_v46 = vld [vmem:[#allocation293_spill] sm:$0xff]  ;;  %v17877_v59 = vld [vmem:[#allocation283_spill] sm:$0xff] }
 0xaca   : > { %v3547_v17 = vsel %vm3270_vm5, %v17796_v62, %v17795_v53  ;;  %v4282_v0 = vadd.f32 %v13078_v45, %v4052_v60  ;;  %v3790_v33 = vsel %vm533_vm3, %v17801_v4, %v17756_v61  ;;  %v3789_v57 = vsel %vm533_vm3, %v17802_v2, %v17801_v4  ;;  %v7763_v60 = vld [vmem:[%s7946_s14 + $0x1d0] sm:$0xfe]  ;;  %v17804_v61 = vld [vmem:[#allocation265_spill] sm:$0xff] }
 0xacb   : > { %v3545_v16 = vsel %vm3270_vm5, %v17797_v39, %v16748_v38  ;;  %v1508_v44 = vsel %vm1499_vm2, %v1506_v15, %v17800_v19  ;;  %v4474_v55 = vsel %vm1051_vm4, %v4427_v28, %v13051_v40  ;;  %v16747_v52 = vrot.slane %v13325_v29, 2  ;;  %v17803_v53 = vld [vmem:[#allocation143_spill] sm:$0xff]  ;;  %v17806_v4 = vld [vmem:[#allocation298_spill] sm:$0xff] }
 0xacc   : > { %v1426_v21 = vadd.f32 %v1390_v24, %v1258_v27  ;;  %v3596_v10 = vadd.f32 %v3547_v17, %v3464_v3  ;;  %v3595_v5 = vadd.f32 %v3545_v16, %v3463_v18  ;;  %v13360_v15 = vadd.f32 %v4474_v55, %v4282_v0  ;;  %v17808_v3 = vld [vmem:[#allocation74_spill] sm:$0xff] }
 0xacd   : > { %v1638_v45 = vrot.slane %v1592_v50, 1  ;;  %v1724_v62 = vmul.f32 %v7763_v60, %v17803_v53  ;;  %v4020_v39 = vsel %vm533_vm3, %v17804_v61, %v17762_v49  ;;  %v4019_v19 = vsel %vm533_vm3, %v17805_v46, %v17804_v61  ;;  %v17810_v50 = vld [vmem:[#allocation299_spill] sm:$0xff]  ;;  %v17812_v27 = vld [vmem:[#allocation78_spill] sm:$0xff] }
 0xace   : > { %v3826_v40 = vadd.f32 %v3790_v33, %v3596_v10  ;;  %v3825_v28 = vadd.f32 %v3789_v57, %v3595_v5  ;;  %v17807_v24 = vrot.slane %v17806_v4, 2  ;;  %v17809_v18 = vrot.slane %v17808_v3, 2  ;;  %v17815_v5 = vld [vmem:[#allocation29_spill] sm:$0xff]  ;;  %v17816_v53 = vld [vmem:[#allocation70_spill] sm:$0xff]  ;;  %v13396_v3 = vpop.permute.xlu2 %4670 }
 0xacf   : > { %v17811_v16 = vrot.slane %v17810_v50, 2  ;;  %v17813_v0 = vrot.slane %v17812_v27, 2  ;;  %v17814_v49 = vrot.slane %v12739_v12, 2  ;;  %v1559_v57 = vadd.f32 %v1508_v44, %v1426_v21  ;;  %v13394_v12 = vpop.permute.xlu0 %4444  ;;  %v17821_v50 = vld [vmem:[#allocation301_spill] sm:$0xff] }
 0xad0   : > { %v4187_v17 = vsel %vm3270_vm5, %v17809_v18, %v17807_v24  ;;  %v4056_v55 = vadd.f32 %v4020_v39, %v3826_v40  ;;  %v4055_v10 = vadd.f32 %v4019_v19, %v3825_v28  ;;  %v336_v60 = vadd.f32 %v318_v30, %v17815_v5  ;;  %v4437_v39 = vpop.permute.xlu1 %4436  ;;  %v17819_v18 = vld [vmem:[#allocation32_spill] sm:$0xff] }
 0xad1   : > { %v4413_v2 = vsel %vm3270_vm5, %v17813_v0, %v17811_v16  ;;  %4234 = vrot.lane.b32.xlu0 %v4187_v17, %s7848_s15  ;;  %v4865_v33 = vsel %vm3270_vm5, %v17814_v49, %v16747_v52  ;;  %v382_v61 = vmul.f32 %v13265_v58, %v17816_v53  ;;  %v17817_v46 = vrot.slane %v12360_v31, 1  ;;  %v17820_v17 = vld [vmem:[#allocation5_spill] sm:$0xff]  ;;  %v17827_v49 = vld [vmem:[#allocation219_spill] sm:$0xff] }
 0xad2   : > { %4460 = vrot.lane.b32.xlu2 %v4413_v2, %s7850_s30  ;;  %4912 = vrot.lane.b32.xlu1 %v4865_v33, %s7850_s30  ;;  %v1770_v24 = vrot.slane %v1724_v62, 1  ;;  %v4285_v44 = vadd.f32 %v13148_v56, %v4055_v10  ;;  %v4286_v21 = vadd.f32 %v13152_v48, %v4056_v55  ;;  %v4481_v30 = vsel %vm1051_vm4, %v13394_v12, %v12975_v35  ;;  %v17825_v0 = vld [vmem:[#allocation297_spill] sm:$0xff]  ;;  %v17830_v10 = vld [vmem:[#allocation112_spill] sm:$0xff] }
 0xad3   : > { %v1640_v4 = vsel %vm1499_vm2, %v1638_v45, %v17817_v46  ;;  %v13404_v58 = vadd.f32 %v4481_v30, %v13145_v25  ;;  %v4477_v31 = vsel %vm1051_vm4, %v4435_v63, %v4437_v39  ;;  %v4478_v45 = vsel %vm1051_vm4, %v4437_v39, %v13196_v51  ;;  %v17823_v63 = vld [vmem:[#allocation85_spill] sm:$0xff]  ;;  %v17836_v30 = vld [vmem:[#allocation162_spill] sm:$0xff] }
 0xad4   : > { %v1691_v62 = vadd.f32 %v1640_v4, %v1559_v57  ;;  %v13409_v19 = vadd.f32 %v4477_v31, %v4285_v44  ;;  %v13411_v40 = vadd.f32 %v4478_v45, %v4286_v21  ;;  %v400_v56 = vadd.f32 %v382_v61, %v336_v60  ;;  %v17829_v55 = vld [vmem:[#allocation49_spill] sm:$0xff]  ;;  %v17832_v60 = vld [vmem:[#allocation18_spill] sm:$0xff]  ;;  %v17834_v4 = vld [vmem:[#allocation44_spill] sm:$0xff] }
 0xad5   : > { %v17818_v48 = vrot.slane %v12403_v1, 1  ;;  %v540_v25 = vsel %vm533_vm3, %v17820_v17, %v17819_v18  ;;  %v17822_v16 = vrot.slane %v17821_v50, 2  ;;  %v17824_v27 = vrot.slane %v17823_v63, 2  ;;  %v17838_v18 = vld [vmem:[#allocation76_spill] sm:$0xff] }
 0xad6   : > { %v17826_v2 = vrot.slane %v17825_v0, 2  ;;  %v17828_v33 = vrot.slane %v17827_v49, 2  ;;  %v2017_v1 = vsel %vm533_vm3, %v17635_v47, %v17829_v55  ;;  %v17831_v5 = vrot.slane %v17830_v10, 2  ;;  %v13448_v45 = vpop.permute.xlu2 %4888  ;;  %v17840_v63 = vld [vmem:[#allocation204_spill] sm:$0xff]  ;;  %v17843_v0 = vld [vmem:[#allocation133_spill] sm:$0xff]  ;;  %v17845_v55 = vld [vmem:[#allocation223_spill] sm:$0xff] }
 0xad7   : > { %v1772_v28 = vsel %vm1499_vm2, %v1770_v24, %v17818_v48  ;;  %v4415_v51 = vsel %vm3270_vm5, %v17824_v27, %v17822_v16  ;;  %v17833_v61 = vrot.slane %v17832_v60, 2  ;;  %v17835_v24 = vld [vmem:[#allocation12_spill] sm:$0xff]  ;;  %v576_v47 = vadd.f32 %v540_v25, %v400_v56  ;;  %v13446_v31 = vpop.permute.xlu0 %4666  ;;  %v17837_v48 = vld [vmem:[#allocation81_spill] sm:$0xff]  ;;  %v17841_v25 = vld [vmem:[#allocation103_spill] sm:$0xff] }
 0xad8   : > { %v4183_v57 = vsel %vm3270_vm5, %v17828_v33, %v17826_v2  ;;  %v714_v44 = vsel %vm533_vm3, %v17835_v24, %v17834_v4  ;;  %v1823_v21 = vadd.f32 %v1772_v28, %v1691_v62  ;;  %v2247_v39 = vsel %vm533_vm3, %v17652_v37, %v17836_v30  ;;  %v13453_v16 = vpop.permute.xlu1 %4658  ;;  %v17839_v28 = vld [vmem:[#allocation208_spill] sm:$0xff]  ;;  %v17842_v27 = vld [vmem:[#allocation98_spill] sm:$0xff]  ;;  %v7765_v10 = vld [vmem:[%s7946_s14 + $0x10] sm:$0xfc] }
 0xad9   : > { %4462 = vrot.lane.b32.xlu0 %v4415_v51, %s7850_s30  ;;  %v4189_v46 = vsel %vm3270_vm5, %v17833_v61, %v17831_v5  ;;  %v888_v17 = vsel %vm533_vm3, %v17838_v18, %v17837_v48  ;;  %v750_v62 = vadd.f32 %v714_v44, %v576_v47  ;;  %v2477_v56 = vsel %vm533_vm3, %v17840_v63, %v17839_v28  ;;  %v13462_v51 = vld [vmem:[%s7946_s14 + $0x60] sm:$0xff]  ;;  %v17847_v61 = vld [vmem:[#allocation122_spill] sm:$0xff]  ;;  %v17851_v47 = vld [vmem:[#allocation119_spill] sm:$0xff] }
 0xada   : > { %4230 = vrot.lane.b32.xlu2 %v4183_v57, %s7848_s15  ;;  %4236 = vrot.lane.b32.xlu1 %v4189_v46, %s7848_s15  ;;  %v2053_v50 = vadd.f32 %v2017_v1, %v1823_v21  ;;  %v1058_v37 = vsel %vm1051_vm4, %v17842_v27, %v17841_v25  ;;  %v13466_v2 = vmul.f32 %v13462_v51, %v17843_v0  ;;  %v17844_v57 = vld [vmem:[#allocation226_spill] sm:$0xff]  ;;  %v17846_v5 = vld [vmem:[#allocation173_spill] sm:$0xff]  ;;  %v17852_v30 = vrot.slane %v17851_v47, 2  ;;  %v17858_v25 = vld [vmem:[#allocation148_spill] sm:$0xff] }
 0xadb   : > { %v924_v33 = vadd.f32 %v888_v17, %v750_v62  ;;  %v2705_v1 = vsel %vm1051_vm4, %v17845_v55, %v17844_v57  ;;  %v3230_v60 = vmul.f32 %v7765_v10, %v17846_v5  ;;  %v17848_v46 = vld [vmem:[#allocation117_spill] sm:$0xff]  ;;  %v17855_v17 = vld [vmem:[#allocation286_spill] sm:$0xff] }
 0xadc   : > { %v2283_v49 = vadd.f32 %v2247_v39, %v2053_v50  ;;  %v1226_v4 = vsel %vm1051_vm4, %v17848_v46, %v17847_v61  ;;  %v17849_v44 = vld [vmem:[#allocation313_spill] sm:$0xff]  ;;  %v17856_v50 = vrot.slane %v17855_v17, 2  ;;  %v17857_v63 = vld [vmem:[#allocation138_spill] sm:$0xff]  ;;  %v16746_v10 = vrot.slane %v13466_v2, 1  ;;  %v17863_v61 = vld [vmem:[#allocation147_spill] sm:$0xff] }
 0xadd   : > { %v17850_v21 = vrot.slane %v17849_v44, 2  ;;  %v17853_v48 = vld [vmem:[#allocation261_spill] sm:$0xff]  ;;  %v1094_v28 = vadd.f32 %v1058_v37, %v924_v33  ;;  %v2933_v27 = vsel %vm1051_vm4, %v17858_v25, %v17857_v63  ;;  %v17865_v44 = vld [vmem:[#allocation151_spill] sm:$0xff] }
 0xade   : > { %v2513_v24 = vadd.f32 %v2477_v56, %v2283_v49  ;;  %v17854_v18 = vrot.slane %v17853_v48, 2  ;;  %v17859_v56 = vld [vmem:[#allocation179_spill] sm:$0xff]  ;;  %v17861_v49 = vld [vmem:[#allocation82_spill] sm:$0xff]  ;;  %v17864_v46 = vld [vmem:[#allocation57_spill] sm:$0xff] }
 0xadf   : > { %v4641_v39 = vsel %vm3270_vm5, %v17852_v30, %v17850_v21  ;;  %v17860_v0 = vrot.slane %v17859_v56, 2  ;;  %v17862_v57 = vrot.slane %v17861_v49, 2  ;;  %v1394_v37 = vsel %vm1051_vm4, %v17864_v46, %v17863_v61  ;;  %v13501_v33 = vld [vmem:[%s7946_s14 + $0x140] sm:$0xff]  ;;  %v13513_v25 = vpop.permute.xlu0 %4676  ;;  %v13515_v56 = vpop.permute.xlu2 %4902 }
 0xae0   : > { %v4645_v62 = vsel %vm3270_vm5, %v17856_v50, %v17854_v18  ;;  %v13505_v21 = vmul.f32 %v13501_v33, %v17865_v44  ;;  %v2741_v47 = vadd.f32 %v2705_v1, %v2513_v24  ;;  %v1262_v30 = vadd.f32 %v1226_v4, %v1094_v28  ;;  %v17866_v48 = vld [vmem:[#allocation188_spill] sm:$0xff]  ;;  %v17867_v18 = vld [vmem:[#allocation183_spill] sm:$0xff]  ;;  %v13517_v49 = vpop.permute.xlu1 %4668  ;;  %v17872_v44 = vld [vmem:[#allocation26_spill] sm:$0xff] }
 0xae1   : > { %4688 = vrot.lane.b32.xlu0 %v4641_v39, %s7850_s30  ;;  %v4417_v55 = vsel %vm3270_vm5, %v17862_v57, %v17860_v0  ;;  %v3277_v39 = vrot.slane %v3230_v60, 2  ;;  %v3161_v17 = vsel %vm1051_vm4, %v17867_v18, %v17866_v48  ;;  %v7767_v50 = vld [vmem:[%s7946_s14 + $0xf0] sm:$0xfc]  ;;  %v13526_v57 = vld [vmem:[%s7946_s14 + $0x220] sm:$0xff] }
 0xae2   : > { %4692 = vrot.lane.b32.xlu2 %v4645_v62, %s7850_s30  ;;  %4464 = vrot.lane.b32.xlu1 %v4417_v55, %s7850_s30  ;;  %v17868_v62 = vld [vmem:[#allocation257_spill] sm:$0xff]  ;;  %v2969_v0 = vadd.f32 %v2933_v27, %v2741_v47  ;;  %v1430_v1 = vadd.f32 %v1394_v37, %v1262_v30  ;;  %v17869_v4 = vld [vmem:[#allocation311_spill] sm:$0xff]  ;;  %v16749_v28 = vrot.slane %v13505_v21, 1  ;;  %v17873_v27 = vrot.slane %v17872_v44, 2  ;;  %v17874_v48 = vld [vmem:[#allocation260_spill] sm:$0xff] }
 0xae3   : > { %v3363_v63 = vmul.f32 %v7767_v50, %v17868_v62  ;;  %v17870_v60 = vrot.slane %v17869_v4, 1  ;;  %v17871_v55 = vld [vmem:[#allocation153_spill] sm:$0xff]  ;;  %v7769_v30 = vld [vmem:[%s7946_s14 + $0x1d0] sm:$0xfc]  ;;  %v17875_v4 = vld [vmem:[#allocation314_spill] sm:$0xff] }
 0xae4   : > { %v13530_v61 = vmul.f32 %v13526_v57, %v17871_v55  ;;  %v3197_v46 = vadd.f32 %v3161_v17, %v2969_v0  ;;  %v3279_v47 = vsel %vm3270_vm5, %v3277_v39, %v17873_v27  ;;  %v3495_v18 = vmul.f32 %v7769_v30, %v17874_v48  ;;  %v17879_v55 = vld [vmem:[#allocation321_spill] sm:$0xff]  ;;  %v17901_v62 = vld [vmem:[#allocation244_spill] sm:$0xff] }
 0xae5   : > { %v1516_v24 = vsel %vm1499_vm2, %v17870_v60, %v16746_v10  ;;  %v3409_v37 = vrot.slane %v3363_v63, 2  ;;  %v17876_v60 = vrot.slane %v17875_v4, 2  ;;  %v17878_v10 = vrot.slane %v17877_v59, 2 }
 0xae6   : > { %v1563_v50 = vadd.f32 %v1516_v24, %v1430_v1  ;;  %v17880_v38 = vrot.slane %v17879_v55, 1  ;;  %v16751_v0 = vrot.slane %v13530_v61, 1  ;;  %v3330_v39 = vadd.f32 %v3279_v47, %v3197_v46  ;;  %v17887_v55 = vld [vmem:[#allocation189_spill] sm:$0xff] }
 0xae7   : > { %v4643_v52 = vsel %vm3270_vm5, %v17878_v10, %v17876_v60  ;;  %v17881_v63 = vrot.slane %v13074_v22, 2  ;;  %v3541_v24 = vrot.slane %v3495_v18, 2  ;;  %v13552_v44 = vpop.permute.xlu0 %4662  ;;  %v13554_v59 = vpop.permute.xlu2 %4884  ;;  %v17886_v18 = vld [vmem:[#allocation31_spill] sm:$0xff] }
 0xae8   : > { %v1648_v17 = vsel %vm1499_vm2, %v17880_v38, %v16749_v28  ;;  %v13556_v10 = vpop.permute.xlu1 %4654  ;;  %v17882_v38 = vld [vmem:[#allocation322_spill] sm:$0xff]  ;;  %v17890_v28 = vld [vmem:[#allocation161_spill] sm:$0xff] }
 0xae9   : > { %v3411_v1 = vsel %vm3270_vm5, %v3409_v37, %v17881_v63  ;;  %v1695_v27 = vadd.f32 %v1648_v17, %v1563_v50  ;;  %v17883_v30 = vrot.slane %v17882_v38, 1  ;;  %v17885_v37 = vld [vmem:[#allocation51_spill] sm:$0xff]  ;;  %v17888_v63 = vld [vmem:[#allocation177_spill] sm:$0xff] }
 0xaea   : > { %4690 = vrot.lane.b32.xlu1 %v4643_v52, %s7850_s30  ;;  %v3462_v47 = vadd.f32 %v3411_v1, %v3330_v39  ;;  %v17884_v52 = vrot.slane %v13112_v6, 2  ;;  %v2021_v4 = vsel %vm533_vm3, %v17886_v18, %v17885_v37  ;;  %v3788_v50 = vsel %vm533_vm3, %v17888_v63, %v17887_v55  ;;  %v17889_v17 = vld [vmem:[#allocation167_spill] sm:$0xff]  ;;  %v17891_v1 = vld [vmem:[#allocation288_spill] sm:$0xff] }
 0xaeb   : > { %v1780_v46 = vsel %vm1499_vm2, %v17883_v30, %v16751_v0  ;;  %v2251_v38 = vsel %vm533_vm3, %v17890_v28, %v17889_v17  ;;  %v17892_v6 = vld [vmem:[#allocation200_spill] sm:$0xff]  ;;  %v17897_v17 = vld [vmem:[#allocation65_spill] sm:$0xff] }
 0xaec   : > { %v3543_v22 = vsel %vm3270_vm5, %v3541_v24, %v17884_v52  ;;  %v1827_v60 = vadd.f32 %v1780_v46, %v1695_v27  ;;  %v4018_v24 = vsel %vm533_vm3, %v17892_v6, %v17891_v1  ;;  %v17893_v27 = vld [vmem:[#allocation213_spill] sm:$0xff]  ;;  %v17894_v46 = vld [vmem:[#allocation207_spill] sm:$0xff]  ;;  %v257_v1 = vmul.f32 %v13462_v51, %v17897_v17  ;;  %v17900_v0 = vld [vmem:[#allocation68_spill] sm:$0xff] }
 0xaed   : > { %v3594_v54 = vadd.f32 %v3543_v22, %v3462_v47  ;;  %v2481_v37 = vsel %vm533_vm3, %v17894_v46, %v17893_v27  ;;  %v13589_v47 = vmul.f32 %v13462_v51, %v17728_v8  ;;  %v17895_v22 = vld [vmem:[#allocation231_spill] sm:$0xff]  ;;  %v321_v6 = vmul.f32 %v13501_v33, %v17798_v42  ;;  %v7771_v46 = vld [vmem:[%s7946_s14 + $0x148] sm:$0xff] }
 0xaee   : > { %v2057_v39 = vadd.f32 %v2021_v4, %v1827_v60  ;;  %v17896_v4 = vld [vmem:[#allocation227_spill] sm:$0xff]  ;;  %v322_v48 = vmul.f32 %v7771_v46, %v17900_v0  ;;  %v17905_v0 = vld [vmem:[#allocation186_spill] sm:$0xff] }
 0xaef   : > { %v13578_v30 = vpop.permute.xlu0 %4672  ;;  %v13580_v52 = vpop.permute.xlu2 %4898  ;;  %v3824_v18 = vadd.f32 %v3788_v50, %v3594_v54  ;;  %v2709_v60 = vsel %vm1051_vm4, %v17896_v4, %v17895_v22  ;;  %v17898_v54 = vld [vmem:[#allocation10_spill] sm:$0xff] }
 0xaf0   : > { %v13585_v55 = vpop.permute.xlu1 %4664  ;;  %v2287_v28 = vadd.f32 %v2251_v38, %v2057_v39  ;;  %v4476_v50 = vsel %vm1051_vm4, %v13208_v11, %v17898_v54  ;;  %v7770_v38 = vld [vmem:[%s7946_s14 + $0x68] sm:$0xff]  ;;  %v17899_v39 = vld [vmem:[#allocation67_spill] sm:$0xff]  ;;  %v13616_v11 = vld [vmem:[%s16314_s2] sm:$0x7] }
 0xaf1   : > { %v4054_v63 = vadd.f32 %v4018_v24, %v3824_v18  ;;  %v258_v8 = vmul.f32 %v7770_v38, %v17899_v39  ;;  %v17902_v22 = vld [vmem:[#allocation14_spill] sm:$0xff]  ;;  %v17903_v18 = vld [vmem:[#allocation56_spill] sm:$0xff]  ;;  %v17906_v54 = vld [vmem:[#allocation253_spill] sm:$0xff] }
 0xaf2   : > { %v2517_v27 = vadd.f32 %v2481_v37, %v2287_v28  ;;  %v2937_v24 = vsel %vm1051_vm4, %v17902_v22, %v17901_v62  ;;  %v4704_v37 = vsel %vm1051_vm4, %v13453_v16, %v13198_v7  ;;  %v17904_v28 = vld [vmem:[#allocation196_spill] sm:$0xff]  ;;  %v13623_v62 = vmul.f32 %v13501_v33, %v17906_v54  ;;  %v17912_v54 = vld [vmem:[#allocation11_spill] sm:$0xff] }
 0xaf3   : > { %v4284_v51 = vadd.f32 %v17903_v18, %v4054_v63  ;;  %v3165_v17 = vsel %vm1051_vm4, %v17905_v0, %v17904_v28  ;;  %v339_v63 = vadd.f32 %v321_v6, %v257_v1  ;;  %v340_v46 = vadd.f32 %v322_v48, %v258_v8  ;;  %v17907_v22 = vld [vmem:[#allocation136_spill] sm:$0xff]  ;;  %v17908_v18 = vld [vmem:[#allocation54_spill] sm:$0xff] }
 0xaf4   : > { %v2745_v4 = vadd.f32 %v2709_v60, %v2517_v27  ;;  %v385_v27 = vmul.f32 %v13526_v57, %v17816_v53  ;;  %v386_v42 = vmul.f32 %v17908_v18, %v17907_v22  ;;  %v13634_v28 = vperm.slane %v13616_v11, 2  ;;  %v17911_v0 = vld [vmem:[#allocation36_spill] sm:$0xff]  ;;  %v17916_v22 = vld [vmem:[#allocation47_spill] sm:$0xff] }
 0xaf5   : > { %v4512_v60 = vadd.f32 %v4476_v50, %v4284_v51  ;;  %v17909_v1 = vrot.slane %v13589_v47, 2  ;;  %v17910_v6 = vrot.slane %v13172_v9, 2  ;;  %v3418_v8 = vrot.slane %v13623_v62, 2  ;;  %v17917_v18 = vld [vmem:[#allocation23_spill] sm:$0xff]  ;;  %v18007_v62 = vld [vmem:[#allocation33_spill] sm:$0xff] }
 0xaf6   : > { %v2973_v38 = vadd.f32 %v2937_v24, %v2745_v4  ;;  %v13649_v24 = vmul.f32 %v13526_v57, %v17748_v20  ;;  %v4482_v51 = vsel %vm1051_vm4, %v12975_v35, %v13271_v13  ;;  %v404_v9 = vadd.f32 %v386_v42, %v340_v46  ;;  %v17913_v20 = vld [vmem:[#allocation27_spill] sm:$0xff]  ;;  %v17914_v35 = vld [vmem:[#allocation144_spill] sm:$0xff] }
 0xaf7   : > { %v13627_v7 = vpop.permute.xlu0 %4894  ;;  %v13629_v39 = vpop.permute.xlu2 %4224  ;;  %v4740_v5 = vadd.f32 %v4704_v37, %v4512_v60  ;;  %v3287_v53 = vsel %vm3270_vm5, %v17910_v6, %v17909_v1  ;;  %v403_v37 = vadd.f32 %v385_v27, %v339_v63  ;;  %v544_v57 = vsel %vm533_vm3, %v17911_v0, %v17913_v20 }
 0xaf8   : > { %v13636_v33 = vpop.permute.xlu1 %4886  ;;  %v3201_v50 = vadd.f32 %v3165_v17, %v2973_v38  ;;  %v543_v17 = vsel %vm533_vm3, %v17912_v54, %v17911_v0  ;;  %v4518_v13 = vadd.f32 %v4482_v51, %v17914_v35  ;;  %v17915_v42 = vrot.slane %v13230_v23, 2  ;;  %v17919_v0 = vld [vmem:[#allocation87_spill] sm:$0xff]  ;;  %v17920_v54 = vld [vmem:[#allocation84_spill] sm:$0xff] }
 0xaf9   : > { %v4932_v48 = vsel %vm1051_vm4, %v13636_v33, %v13448_v45  ;;  %v4710_v45 = vsel %vm1051_vm4, %v13273_v41, %v13513_v25  ;;  %v3550_v63 = vrot.slane %v13649_v24, 2  ;;  %v579_v46 = vadd.f32 %v543_v17, %v403_v37  ;;  %v7776_v24 = vld [vmem:[%s7946_s14 + $0x1a0] sm:$0x3] }
 0xafa   : > { %v4968_v4 = vadd.f32 %v4932_v48, %v4740_v5  ;;  %v3334_v38 = vadd.f32 %v3287_v53, %v3201_v50  ;;  %v4707_v5 = vsel %vm1051_vm4, %v13446_v31, %v13517_v49  ;;  %v3419_v25 = vsel %vm3270_vm5, %v17915_v42, %v3418_v8  ;;  %v17918_v48 = vld [vmem:[#allocation40_spill] sm:$0xff]  ;;  %v17922_v42 = vld [vmem:[#allocation83_spill] sm:$0xff] }
 0xafb   : > { %v717_v1 = vsel %vm533_vm3, %v17917_v18, %v17916_v22  ;;  %v4746_v6 = vadd.f32 %v4710_v45, %v4518_v13  ;;  %v580_v49 = vadd.f32 %v544_v57, %v404_v9  ;;  %v718_v23 = vsel %vm533_vm3, %v17916_v22, %v17918_v48  ;;  %v17923_v18 = vld [vmem:[#allocation108_spill] sm:$0xff] }
 0xafc   : > { %v13661_v60 = vadd.f32 %v13634_v28, %v4968_v4  ;;  %v4743_v51 = vadd.f32 %v4707_v5, %v13291_v26  ;;  %v891_v17 = vsel %vm533_vm3, %v17920_v54, %v17919_v0  ;;  %v3466_v45 = vadd.f32 %v3419_v25, %v3334_v38  ;;  %v17927_v54 = vld [vmem:[#allocation292_spill] sm:$0xff] }
 0xafd   : > { %v753_v57 = vadd.f32 %v717_v1, %v579_v46  ;;  %v17921_v26 = vrot.slane %v13269_v14, 2  ;;  %v754_v5 = vadd.f32 %v718_v23, %v580_v49  ;;  %v892_v22 = vsel %vm533_vm3, %v17919_v0, %v17922_v42  ;;  %v17925_v1 = vld [vmem:[#allocation272_spill] sm:$0xff]  ;;  %v17930_v42 = vld [vmem:[#allocation127_spill] sm:$0xff] }
 0xafe   : > { %v5012_v27 = vmax.f32 %v13661_v60, 0.0  ;;  %v4702_v23 = vsel %vm1051_vm4, %v13556_v10, %v13343_v36  ;;  %v4703_v10 = vsel %vm1051_vm4, %v13343_v36, %v13453_v16 }
 0xaff   : > { %v4905_v53 = vpop.permute.xlu0 %4904  ;;  %v13680_v50 = vpop.permute.xlu2 %4450  ;;  %v3551_v35 = vsel %vm3270_vm5, %v17921_v26, %v3550_v63  ;;  %v927_v25 = vadd.f32 %v891_v17, %v753_v57  ;;  %v928_v0 = vadd.f32 %v892_v22, %v754_v5  ;;  %v17928_v17 = vld [vmem:[#allocation289_spill] sm:$0xff] }
 0xb00   : > { %v4938_v4 = vsel %vm1051_vm4, %v13515_v56, %v4905_v53  ;;  %5050 = vrot.lane.b32.xlu0 %v5012_v27, %s7848_s15  ;;  %v4897_v37 = vpop.permute.xlu1 %4896  ;;  %v17926_v53 = vld [vmem:[#allocation268_spill] sm:$0xff]  ;;  %v3598_v49 = vadd.f32 %v3551_v35, %v3466_v45  ;;  %v17929_v57 = vld [vmem:[#allocation105_spill] sm:$0xff] }
 0xb01   : > { %v4974_v9 = vadd.f32 %v4938_v4, %v4746_v6  ;;  %v4935_v20 = vsel %vm1051_vm4, %v13627_v7, %v4897_v37  ;;  %v17924_v6 = vld [vmem:[#allocation106_spill] sm:$0xff]  ;;  %v3792_v14 = vsel %vm533_vm3, %v17926_v53, %v17925_v1  ;;  %v7772_v4 = vld [vmem:[%s7946_s14 + $0x278] sm:$0xff]  ;;  %v1062_v45 = vsel %vm1051_vm4, %v17923_v18, %v17929_v57  ;;  %v17931_v22 = vld [vmem:[#allocation125_spill] sm:$0xff] }
 0xb02   : > { %v4971_v13 = vadd.f32 %v4935_v20, %v4743_v51  ;;  %v1061_v46 = vsel %vm1051_vm4, %v17924_v6, %v17923_v18  ;;  %v13722_v37 = vmul.f32 %v7772_v4, %v11801_v43  ;;  %v3828_v35 = vadd.f32 %v3792_v14, %v3598_v49  ;;  %v17932_v1 = vld [vmem:[#allocation124_spill] sm:$0xff]  ;;  %v17935_v4 = vld [vmem:[#allocation41_spill] sm:$0xff] }
 0xb03   : > { %v13705_v38 = vadd.f32 %v13634_v28, %v4974_v9  ;;  %v4022_v9 = vsel %vm533_vm3, %v17928_v17, %v17927_v54  ;;  %v1097_v26 = vadd.f32 %v1061_v46, %v927_v25  ;;  %v1229_v6 = vsel %vm1051_vm4, %v17931_v22, %v17930_v42  ;;  %v17933_v46 = vld [vmem:[#allocation118_spill] sm:$0xff] }
 0xb04   : > { %v13714_v48 = vadd.f32 %v13634_v28, %v4971_v13  ;;  %v1230_v25 = vsel %vm1051_vm4, %v17930_v42, %v17932_v1  ;;  %v4738_v18 = vadd.f32 %v4702_v23, %v13360_v15  ;;  %v4058_v16 = vadd.f32 %v4022_v9, %v3828_v35  ;;  %v17934_v15 = vld [vmem:[#allocation141_spill] sm:$0xff]  ;;  %v17936_v35 = vld [vmem:[#allocation239_spill] sm:$0xff] }
 0xb05   : > { %v5018_v51 = vmax.f32 %v13705_v38, 0.0  ;;  %v4931_v53 = vsel %vm1051_vm4, %v13554_v59, %v13636_v33  ;;  %v4872_v49 = vrot.slane %v13722_v37, 2  ;;  %v4480_v23 = vsel %vm1051_vm4, %v17934_v15, %v13394_v12 }
 0xb06   : > { %v5015_v20 = vmax.f32 %v13714_v48, 0.0  ;;  %v4739_v54 = vadd.f32 %v4703_v10, %v17935_v4  ;;  %v13762_v17 = vperm.slane %v13616_v11, 0  ;;  %v1098_v9 = vadd.f32 %v1062_v45, %v928_v0 }
 0xb07   : > { %v4891_v13 = vpop.permute.xlu0 %4890  ;;  %5062 = vrot.lane.b32.xlu2 %v5018_v51, %s7848_s15  ;;  %v13737_v5 = vpop.permute.xlu2 %4456  ;;  %v4288_v42 = vadd.f32 %v17936_v35, %v4058_v16  ;;  %v4708_v33 = vsel %vm1051_vm4, %v13396_v3, %v13578_v30  ;;  %v4709_v12 = vsel %vm1051_vm4, %v13578_v30, %v13273_v41  ;;  %v4705_v10 = vsel %vm1051_vm4, %v13552_v44, %v13585_v55  ;;  %v17937_v3 = vld [vmem:[#allocation30_spill] sm:$0xff] }
 0xb08   : > { %4458 = vrot.lane.b32.xlu0 %v17933_v46, %s7850_s30  ;;  %5056 = vrot.lane.b32.xlu1 %v5015_v20, %s7848_s15  ;;  %v4883_v36 = vpop.permute.xlu1 %4882  ;;  %v4706_v0 = vsel %vm1051_vm4, %v13585_v55, %v13446_v31  ;;  %v4967_v45 = vadd.f32 %v4931_v53, %v4739_v54  ;;  %v1265_v22 = vadd.f32 %v1229_v6, %v1097_v26  ;;  %v17938_v46 = vld [vmem:[#allocation158_spill] sm:$0xff]  ;;  %v17940_v44 = vrot.slane %v13325_v29, 2 }
 0xb09   : > { %v4930_v14 = vsel %vm1051_vm4, %v4883_v36, %v13554_v59  ;;  %v13769_v59 = vperm.slane %v13616_v11, 1  ;;  %v1266_v1 = vadd.f32 %v1230_v25, %v1098_v9  ;;  %v1397_v11 = vsel %vm1051_vm4, %v17938_v46, %v17937_v3  ;;  %v17939_v36 = vld [vmem:[#allocation149_spill] sm:$0xff]  ;;  %v17941_v53 = vld [vmem:[#allocation294_spill] sm:$0xff]  ;;  %v17943_v9 = vld [vmem:[#allocation139_spill] sm:$0xff] }
 0xb0a   : > { %v4966_v57 = vadd.f32 %v4930_v14, %v4738_v18  ;;  %v4516_v18 = vadd.f32 %v4480_v23, %v4288_v42  ;;  %v1398_v41 = vsel %vm1051_vm4, %v17937_v3, %v17939_v36  ;;  %v4873_v31 = vsel %vm3270_vm5, %v17940_v44, %v4872_v49  ;;  %v17948_v3 = vld [vmem:[#allocation325_spill] sm:$0xff] }
 0xb0b   : > { %v4745_v26 = vadd.f32 %v4709_v12, %v13404_v58  ;;  %v4741_v6 = vadd.f32 %v4705_v10, %v13409_v19  ;;  %v4742_v25 = vadd.f32 %v4706_v0, %v13411_v40  ;;  %v13802_v15 = vadd.f32 %v13769_v59, %v4967_v45  ;;  %v17942_v58 = vld [vmem:[#allocation37_spill] sm:$0xff] }
 0xb0c   : > { %v13787_v30 = vadd.f32 %v13762_v17, %v4966_v57  ;;  %v4744_v55 = vadd.f32 %v4708_v33, %v4516_v18  ;;  %v17944_v35 = vrot.slane %v17943_v9, 1  ;;  %v1433_v10 = vadd.f32 %v1397_v11, %v1265_v22  ;;  %v17946_v18 = vld [vmem:[#allocation135_spill] sm:$0xff] }
 0xb0d   : > { %v1434_v0 = vadd.f32 %v1398_v41, %v1266_v1  ;;  %v17949_v46 = vrot.slane %v17948_v3, 1  ;;  %v5011_v36 = vmax.f32 %v13802_v15, 0.0  ;;  %v17960_v3 = vld [vmem:[#allocation156_spill] sm:$0xff] }
 0xb0f   : > { %v4901_v16 = vpop.permute.xlu0 %4900  ;;  %4918 = vrot.lane.b32.xlu2 %v17941_v53, %s7850_s30  ;;  %v13799_v14 = vpop.permute.xlu2 %4682 }
 0xb10   : > { %v4936_v29 = vsel %vm1051_vm4, %v13580_v52, %v4901_v16  ;;  %v4937_v23 = vsel %vm1051_vm4, %v4901_v16, %v13515_v56  ;;  %4920 = vrot.lane.b32.xlu0 %v4873_v31, %s7850_s30  ;;  %4916 = vrot.lane.b32.xlu1 %v17942_v58, %s7850_s30  ;;  %v4893_v19 = vpop.permute.xlu1 %4892  ;;  %v17945_v52 = vrot.slane %v13466_v2, 1  ;;  %v5010_v56 = vmax.f32 %v13787_v30, 0.0 }
 0xb11   : > { %v4972_v40 = vadd.f32 %v4936_v29, %v4744_v55  ;;  %v4973_v4 = vadd.f32 %v4937_v23, %v4745_v26  ;;  %v4933_v54 = vsel %vm1051_vm4, %v4891_v13, %v4893_v19  ;;  %v4934_v57 = vsel %vm1051_vm4, %v4893_v19, %v13627_v7  ;;  %v17950_v29 = vld [vmem:[#allocation155_spill] sm:$0xff] }
 0xb12   : > { %v1522_v42 = vsel %vm1499_vm2, %v17945_v52, %v17944_v35  ;;  %v4969_v33 = vadd.f32 %v4933_v54, %v4741_v6  ;;  %v4970_v12 = vadd.f32 %v4934_v57, %v4742_v25  ;;  %v17947_v7 = vrot.slane %v17946_v18, 1  ;;  %v17955_v54 = vld [vmem:[#allocation62_spill] sm:$0xff] }
 0xb13   : > { %v13821_v45 = vadd.f32 %v13762_v17, %v4972_v40  ;;  %v13824_v13 = vadd.f32 %v13769_v59, %v4973_v4  ;;  %v7497_v41 = vpack.i.bf16 %v5011_v36, %v5010_v56  ;;  %v1566_v26 = vadd.f32 %v1522_v42, %v1433_v10  ;;  %v17953_v40 = vld [vmem:[#allocation154_spill] sm:$0xff]  ;;  %v17957_v10 = vld [vmem:[#allocation157_spill] sm:$0xff] }
 0xb14   : > { %v1524_v2 = vsel %vm1499_vm2, %v17949_v46, %v17947_v7  ;;  %v13833_v44 = vadd.f32 %v13762_v17, %v4969_v33  ;;  %v13836_v22 = vadd.f32 %v13769_v59, %v4970_v12  ;;  %v17951_v23 = vrot.slane %v17950_v29, 1 }
 0xb15   : > { %v16752_v1 = vmax.f32 %v13821_v45, 0.0  ;;  %v16753_v11 = vmax.f32 %v13824_v13, 0.0  ;;  %v1567_v6 = vadd.f32 %v1524_v2, %v1434_v0  ;;  %v17952_v58 = vrot.slane %v13505_v21, 1  ;;  %v7773_v21 = vld [vmem:[%s7946_s14 + $0x260] sm:$0xff] }
 0xb16   : > { %v5013_v31 = vmax.f32 %v13833_v44, 0.0  ;;  %v5014_v55 = vmax.f32 %v13836_v22, 0.0  ;;  %v17954_v4 = vrot.slane %v17953_v40, 1  ;;  %v17956_v57 = vrot.slane %v17955_v54, 1  ;;  %v17962_v2 = vld [vmem:[#allocation80_spill] sm:$0xff] }
 0xb17   : > { %v7507_v25 = vpack.i.bf16 %v16753_v11, %v16752_v1  ;;  %v13850_v16 = vpop.permute.xlu0 %4226  ;;  %v1654_v19 = vsel %vm1499_vm2, %v17952_v58, %v17951_v23  ;;  %v13874_v42 = vmul.f32 %v7773_v21, %v11821_v34  ;;  %v17958_v0 = vrot.slane %v17957_v10, 1  ;;  %v17964_v23 = vld [vmem:[#allocation128_spill] sm:$0xff]  ;;  %v17965_v58 = vld [vmem:[#allocation93_spill] sm:$0xff]  ;;  %v17968_v21 = vld [vmem:[#allocation175_spill] sm:$0xff] }
 0xb18   : > { %v13852_v53 = vpop.permute.xlu2 %4908  ;;  %v1656_v9 = vsel %vm1499_vm2, %v17956_v57, %v17954_v4  ;;  %v7502_v35 = vpack.i.bf16 %v5014_v55, %v5013_v31  ;;  %v13868_v52 = vpop.permute.xlu1 %4222  ;;  %7498 = vrot.lane.b32.xlu1 %v7497_v41, %s7848_s15  ;;  %v1698_v33 = vadd.f32 %v1654_v19, %v1566_v26  ;;  %v17959_v18 = vrot.slane %v13530_v61, 1  ;;  %v17966_v26 = vld [vmem:[#allocation91_spill] sm:$0xff]  ;;  %v17969_v10 = vld [vmem:[#allocation170_spill] sm:$0xff] }
 0xb19   : > { %7508 = vrot.lane.b32.xlu0 %v7507_v25, %s7848_s15  ;;  %v1699_v12 = vadd.f32 %v1656_v9, %v1567_v6  ;;  %v17961_v46 = vrot.slane %v17960_v3, 1  ;;  %v17963_v41 = vrot.slane %v17962_v2, 1  ;;  %v4866_v29 = vrot.slane %v13874_v42, 2  ;;  %v7774_v57 = vld [vmem:[%s7946_s14 + $0x1b8] sm:$0x3]  ;;  %v17967_v9 = vld [vmem:[#allocation281_spill] sm:$0xff] }
 0xb1a   : > { %7503 = vrot.lane.b32.xlu2 %v7502_v35, %s7848_s15  ;;  %v1786_v7 = vsel %vm1499_vm2, %v17959_v18, %v17958_v0  ;;  %v2024_v40 = vsel %vm533_vm3, %v17965_v58, %v17964_v23  ;;  %v2025_v6 = vsel %vm533_vm3, %v17964_v23, %v17966_v26  ;;  %v3887_v35 = vmul.f32 %v7774_v57, %v17967_v9  ;;  %v17970_v18 = vld [vmem:[#allocation168_spill] sm:$0xff]  ;;  %v17974_v23 = vld [vmem:[#allocation218_spill] sm:$0xff] }
 0xb1b   : > { %v1788_v25 = vsel %vm1499_vm2, %v17963_v41, %v17961_v46  ;;  %v1830_v19 = vadd.f32 %v1786_v7, %v1698_v33  ;;  %v2254_v0 = vsel %vm533_vm3, %v17969_v10, %v17968_v21  ;;  %v2255_v3 = vsel %vm533_vm3, %v17968_v21, %v17970_v18  ;;  %v17971_v33 = vld [vmem:[#allocation323_spill] sm:$0xff]  ;;  %v17972_v2 = vld [vmem:[#allocation284_spill] sm:$0xff]  ;;  %v17976_v57 = vld [vmem:[#allocation214_spill] sm:$0xff] }
 0xb1c   : > { %v1831_v61 = vadd.f32 %v1788_v25, %v1699_v12  ;;  %v17973_v41 = vrot.slane %v13253_v32, 2  ;;  %v17975_v58 = vld [vmem:[#allocation216_spill] sm:$0xff]  ;;  %v2485_v9 = vsel %vm533_vm3, %v17974_v23, %v17976_v57  ;;  %v17978_v21 = vld [vmem:[#allocation234_spill] sm:$0xff]  ;;  %v17979_v10 = vld [vmem:[#allocation233_spill] sm:$0xff] }
 0xb1d   : > { %v2060_v12 = vadd.f32 %v2024_v40, %v1830_v19  ;;  %v2484_v26 = vsel %vm533_vm3, %v17975_v58, %v17974_v23  ;;  %v3966_v19 = vrot.slane %v3887_v35, 2  ;;  %v17981_v58 = vld [vmem:[#allocation247_spill] sm:$0xff]  ;;  %v17982_v57 = vld [vmem:[#allocation246_spill] sm:$0xff] }
 0xb1e   : > { %v2061_v7 = vadd.f32 %v2025_v6, %v1831_v61  ;;  %v4867_v25 = vsel %vm3270_vm5, %v17973_v41, %v4866_v29  ;;  %v17977_v61 = vld [vmem:[#allocation237_spill] sm:$0xff]  ;;  %v17980_v41 = vld [vmem:[#allocation250_spill] sm:$0xff] }
 0xb1f   : > { %v13894_v4 = vpop.permute.xlu0 %4452  ;;  %v2290_v40 = vadd.f32 %v2254_v0, %v2060_v12  ;;  %v2712_v32 = vsel %vm1051_vm4, %v17978_v21, %v17977_v61  ;;  %v2713_v18 = vsel %vm1051_vm4, %v17977_v61, %v17979_v10  ;;  %v2940_v23 = vsel %vm1051_vm4, %v17981_v58, %v17980_v41  ;;  %v17985_v61 = vld [vmem:[#allocation176_spill] sm:$0xff]  ;;  %v17989_v58 = vld [vmem:[#allocation174_spill] sm:$0xff] }
 0xb20   : > { %v13906_v46 = vpop.permute.xlu1 %4228  ;;  %4686 = vrot.lane.b32.xlu1 %v17971_v33, %s7850_s30  ;;  %v2291_v6 = vadd.f32 %v2255_v3, %v2061_v7  ;;  %v2941_v0 = vsel %vm1051_vm4, %v17980_v41, %v17982_v57  ;;  %v7775_v10 = vld [vmem:[%s7946_s14 + $0xc0] sm:$0x3] }
 0xb21   : > { %4012 = vrot.lane.b32.xlu0 %v17972_v2, %s7848_s15  ;;  %v2520_v33 = vadd.f32 %v2484_v26, %v2290_v40  ;;  %v17986_v26 = vld [vmem:[#allocation46_spill] sm:$0xff]  ;;  %v17987_v40 = vld [vmem:[#allocation197_spill] sm:$0xff] }
 0xb22   : > { %v13896_v54 = vpop.permute.xlu2 %4232  ;;  %4914 = vrot.lane.b32.xlu2 %v4867_v25, %s7850_s30  ;;  %v2521_v2 = vadd.f32 %v2485_v9, %v2291_v6  ;;  %v17983_v25 = vld [vmem:[#allocation263_spill] sm:$0xff]  ;;  %v3168_v9 = vsel %vm1051_vm4, %v17986_v26, %v17985_v61  ;;  %v3169_v6 = vsel %vm1051_vm4, %v17985_v61, %v17987_v40  ;;  %v17993_v61 = vrot.slane %v13589_v47, 2  ;;  %v17994_v40 = vld [vmem:[#allocation190_spill] sm:$0xff] }
 0xb23   : > { %v2748_v3 = vadd.f32 %v2712_v32, %v2520_v33  ;;  %v17984_v21 = vrot.slane %v17983_v25, 2  ;;  %v17988_v32 = vld [vmem:[#allocation180_spill] sm:$0xff] }
 0xb24   : > { %v2749_v35 = vadd.f32 %v2713_v18, %v2521_v2  ;;  %v4342_v18 = vmul.f32 %v7775_v10, %v17988_v32  ;;  %v17995_v10 = vrot.slane %v17994_v40, 2 }
 0xb25   : > { %v3967_v1 = vsel %vm3270_vm5, %v17984_v21, %v3966_v19  ;;  %v2976_v33 = vadd.f32 %v2940_v23, %v2748_v3  ;;  %v17990_v19 = vld [vmem:[#allocation303_spill] sm:$0xff]  ;;  %v17991_v21 = vld [vmem:[#allocation194_spill] sm:$0xff] }
 0xb26   : > { %v2977_v2 = vadd.f32 %v2941_v0, %v2749_v35  ;;  %v17992_v26 = vrot.slane %v17991_v21, 2  ;;  %v17996_v23 = vld [vmem:[#allocation63_spill] sm:$0xff]  ;;  %v4418_v35 = vrot.slane %v4342_v18, 2  ;;  %v18002_v21 = vld [vmem:[#allocation134_spill] sm:$0xff] }
 0xb27   : > { %v4679_v12 = vpop.permute.xlu0 %4678  ;;  %v3204_v57 = vadd.f32 %v3168_v9, %v2976_v33  ;;  %v17997_v0 = vrot.slane %v17996_v23, 2  ;;  %v17998_v9 = vld [vmem:[#allocation258_spill] sm:$0xff] }
 0xb28   : > { %4014 = vrot.lane.b32.xlu1 %v3967_v1, %s7848_s15  ;;  %v13950_v41 = vpop.permute.xlu1 %4454  ;;  %v3205_v25 = vadd.f32 %v3169_v6, %v2977_v2  ;;  %v3293_v1 = vsel %vm3270_vm5, %v17993_v61, %v17992_v26  ;;  %v17999_v6 = vrot.slane %v17998_v9, 2  ;;  %v18000_v33 = vld [vmem:[#allocation202_spill] sm:$0xff]  ;;  %v18003_v26 = vrot.slane %v18002_v21, 2 }
 0xb29   : > { %4240 = vrot.lane.b32.xlu0 %v17989_v58, %s7848_s15  ;;  %v3295_v3 = vsel %vm3270_vm5, %v17997_v0, %v17995_v10  ;;  %v3337_v32 = vadd.f32 %v3293_v1, %v3204_v57  ;;  %v18001_v2 = vrot.slane %v18000_v33, 2  ;;  %v18004_v57 = vld [vmem:[#allocation22_spill] sm:$0xff] }
 0xb2a   : > { %4238 = vrot.lane.b32.xlu2 %v17990_v19, %s7848_s15  ;;  %v3338_v58 = vadd.f32 %v3295_v3, %v3205_v25  ;;  %v3425_v47 = vsel %vm3270_vm5, %v3418_v8, %v17999_v6  ;;  %v18005_v25 = vld [vmem:[#allocation305_spill] sm:$0xff]  ;;  %v18008_v8 = vld [vmem:[#allocation38_spill] sm:$0xff] }
 0xb2b   : > { %v3427_v61 = vsel %vm3270_vm5, %v18003_v26, %v18001_v2  ;;  %v18006_v1 = vrot.slane %v18005_v25, 2  ;;  %v3469_v23 = vadd.f32 %v3425_v47, %v3337_v32  ;;  %v18011_v33 = vld [vmem:[#allocation110_spill] sm:$0xff] }
 0xb2c   : > { %v13936_v7 = vpop.permute.xlu2 %4460  ;;  %v3470_v0 = vadd.f32 %v3427_v61, %v3338_v58  ;;  %v18012_v2 = vrot.slane %v18011_v33, 2  ;;  %v4256_v33 = vsel %vm533_vm3, %v13629_v39, %v13850_v16 }
 0xb2d   : > { %v4419_v40 = vsel %vm3270_vm5, %v18006_v1, %v4418_v35  ;;  %v18013_v35 = vld [vmem:[#allocation114_spill] sm:$0xff] }
 0xb2e   : > { %v18014_v21 = vrot.slane %v18013_v35, 2  ;;  %v18017_v1 = vld [vmem:[#allocation274_spill] sm:$0xff]  ;;  %v18023_v35 = vld [vmem:[#allocation24_spill] sm:$0xff] }
 0xb2f   : > { %v13966_v11 = vpop.permute.xlu0 %4684 }
 0xb30   : > { %4242 = vrot.lane.b32.xlu1 %v18004_v57, %s7848_s15  ;;  %v4681_v3 = vpop.permute.xlu1 %4680  ;;  %v3559_v26 = vsel %vm3270_vm5, %v18014_v21, %v18012_v2  ;;  %v18016_v57 = vld [vmem:[#allocation275_spill] sm:$0xff] }
 0xb31   : > { %4466 = vrot.lane.b32.xlu0 %v4419_v40, %s7850_s30  ;;  %v3602_v47 = vadd.f32 %v3559_v26, %v3470_v0  ;;  %v18018_v40 = vld [vmem:[#allocation17_spill] sm:$0xff]  ;;  %v18021_v0 = vld [vmem:[#allocation308_spill] sm:$0xff] }
 0xb32   : > { %4244 = vrot.lane.b32.xlu2 %v18008_v8, %s7848_s15 }
 0xb34   : > { %v4231_v19 = vpop.permute.xlu2 %4230 }
 0xb35   : > { %v4258_v18 = vsel %vm533_vm3, %v4231_v19, %v13896_v54  ;;  %v18009_v19 = vld [vmem:[#allocation259_spill] sm:$0xff] }
 0xb36   : > { %v13986_v10 = vadd.f32 %v4258_v18, %v18007_v62  ;;  %v18010_v9 = vrot.slane %v18009_v19, 2  ;;  %v18015_v18 = vld [vmem:[#allocation278_spill] sm:$0xff]  ;;  %v18019_v62 = vld [vmem:[#allocation304_spill] sm:$0xff] }
 0xb37   : > { %v3795_v25 = vsel %vm533_vm3, %v18016_v57, %v18015_v18  ;;  %v3796_v32 = vsel %vm533_vm3, %v18015_v18, %v18017_v1  ;;  %v4483_v18 = vsel %vm1051_vm4, %v13680_v50, %v13894_v4  ;;  %v4484_v57 = vsel %vm1051_vm4, %v13894_v4, %v13950_v41 }
 0xb38   : > { %v3557_v6 = vsel %vm3270_vm5, %v3550_v63, %v18010_v9  ;;  %v4911_v61 = vpop.permute.xlu0 %4910  ;;  %v4570_v63 = vmul.f32 %v7776_v24, %v18018_v40  ;;  %4468 = vrot.lane.b32.xlu1 %v18019_v62, %s7850_s30  ;;  %v3832_v19 = vadd.f32 %v3796_v32, %v3602_v47  ;;  %v18020_v9 = vld [vmem:[#allocation101_spill] sm:$0xff]  ;;  %v4712_v32 = vsel %vm1051_vm4, %v4681_v3, %v13799_v14  ;;  %v18024_v40 = vld [vmem:[#allocation319_spill] sm:$0xff] }
 0xb39   : > { %v3601_v58 = vadd.f32 %v3557_v6, %v3469_v23  ;;  %4472 = vrot.lane.b32.xlu0 %v18020_v9, %s7850_s30  ;;  %v4255_v23 = vsel %vm533_vm3, %v13868_v52, %v13629_v39  ;;  %v18022_v6 = vld [vmem:[#allocation8_spill] sm:$0xff]  ;;  %v4711_v52 = vsel %vm1051_vm4, %v4679_v12, %v4681_v3  ;;  %v4940_v4 = vsel %vm1051_vm4, %v13852_v53, %v4911_v61  ;;  %v7777_v3 = vld [vmem:[%s7946_s14 + $0x288] sm:$0x3] }
 0xb3a   : > { %4470 = vrot.lane.b32.xlu2 %v18021_v0, %s7850_s30  ;;  %v4062_v21 = vadd.f32 %v18023_v35, %v3832_v19  ;;  %v4646_v26 = vrot.slane %v4570_v63, 2  ;;  %v4907_v39 = vpop.permute.xlu1 %4906  ;;  %v18025_v63 = vrot.slane %v18024_v40, 2 }
 0xb3b   : > { %v3831_v8 = vadd.f32 %v3795_v25, %v3601_v58  ;;  %v4939_v62 = vsel %vm1051_vm4, %v4907_v39, %v13852_v53  ;;  %v18029_v53 = vld [vmem:[#allocation317_spill] sm:$0xff] }
 0xb3c   : > { %v4292_v25 = vadd.f32 %v4256_v33, %v4062_v21  ;;  %v4647_v50 = vsel %vm3270_vm5, %v18025_v63, %v4646_v26 }
 0xb3d   : > { %v4061_v2 = vadd.f32 %v18022_v6, %v3831_v8  ;;  %v18026_v8 = vld [vmem:[#allocation326_spill] sm:$0xff]  ;;  %v18028_v6 = vld [vmem:[#allocation316_spill] sm:$0xff] }
 0xb3e   : > { %v4520_v47 = vadd.f32 %v4484_v57, %v4292_v25  ;;  %v4799_v19 = vmul.f32 %v7777_v3, %v18026_v8  ;;  %v4485_v25 = vsel %vm1051_vm4, %v13950_v41, %v13737_v5  ;;  %v4713_v41 = vsel %vm1051_vm4, %v13799_v14, %v13966_v11 }
 0xb3f   : > { %v4291_v1 = vadd.f32 %v4255_v23, %v4061_v2  ;;  %v18027_v23 = vld [vmem:[#allocation21_spill] sm:$0xff]  ;;  %v7778_v2 = vld [vmem:[%s7946_s14 + $0x280] sm:$0x3] }
 0xb40   : > { %4694 = vrot.lane.b32.xlu1 %v4647_v50, %s7850_s30  ;;  %v4748_v33 = vadd.f32 %v4712_v32, %v4520_v47  ;;  %v4798_v35 = vmul.f32 %v7778_v2, %v11821_v34  ;;  %v4876_v26 = vrot.slane %v4799_v19, 2 }
 0xb41   : > { %v4519_v58 = vadd.f32 %v4483_v18, %v4291_v1  ;;  %4698 = vrot.lane.b32.xlu0 %v18028_v6, %s7850_s30  ;;  %v4257_v18 = vsel %vm533_vm3, %v13850_v16, %v13906_v46  ;;  %v18031_v16 = vld [vmem:[#allocation315_spill] sm:$0xff] }
 0xb42   : > { %4696 = vrot.lane.b32.xlu2 %v18029_v53, %s7850_s30  ;;  %v4976_v21 = vadd.f32 %v4940_v4, %v4748_v33  ;;  %v4874_v57 = vrot.slane %v4798_v35, 2  ;;  %v18032_v46 = vld [vmem:[#allocation71_spill] sm:$0xff] }
 0xb43   : > { %v14032_v24 = vpop.permute.xlu0 %4234  ;;  %v4747_v9 = vadd.f32 %v4711_v52, %v4519_v58  ;;  %v18030_v52 = vld [vmem:[#allocation295_spill] sm:$0xff]  ;;  %v18033_v40 = vrot.slane %v18032_v46, 2 }
 0xb44   : > { %v4259_v12 = vsel %vm533_vm3, %v13896_v54, %v14032_v24  ;;  %v14061_v1 = vadd.f32 %v13769_v59, %v4976_v21  ;;  %v4293_v32 = vadd.f32 %v4257_v18, %v18030_v52  ;;  %v4913_v58 = vpop.permute.xlu1 %4912  ;;  %v4875_v50 = vsel %vm3270_vm5, %v4866_v29, %v4874_v57  ;;  %v7779_v4 = vld [vmem:[%s7946_s14 + $0x298] sm:$0x3] }
 0xb45   : > { %v4295_v0 = vadd.f32 %v4259_v12, %v18027_v23  ;;  %v4975_v54 = vadd.f32 %v4939_v62, %v4747_v9  ;;  %v4877_v5 = vsel %vm3270_vm5, %v18033_v40, %v4876_v26  ;;  %v4801_v62 = vmul.f32 %v7779_v4, %v11801_v43  ;;  %v18034_v29 = vld [vmem:[#allocation59_spill] sm:$0xff]  ;;  %v4693_v23 = vpop.permute.xlu2 %4692 }
 0xb46   : > { %v4521_v12 = vadd.f32 %v4485_v25, %v4293_v32  ;;  %v5020_v3 = vmax.f32 %v14061_v1, 0.0  ;;  %v4941_v14 = vsel %vm1051_vm4, %v4911_v61, %v4913_v58 }
 0xb47   : > { %v14064_v34 = vadd.f32 %v13762_v17, %v4975_v54  ;;  %v4880_v19 = vrot.slane %v4801_v62, 2 }
 0xb48   : > { %4700 = vrot.lane.b32.xlu1 %v18031_v16, %s7850_s30  ;;  %v4749_v11 = vadd.f32 %v4713_v41, %v4521_v12 }
 0xb49   : > { %4924 = vrot.lane.b32.xlu0 %v4877_v5, %s7850_s30  ;;  %v5019_v8 = vmax.f32 %v14064_v34, 0.0  ;;  %v4881_v43 = vsel %vm3270_vm5, %v4872_v49, %v4880_v19  ;;  %v5417_v34 = vld [vmem:[%s16315_s3 + $0x50] sm:$0xff] }
 0xb4a   : > { %4922 = vrot.lane.b32.xlu2 %v4875_v50, %s7850_s30  ;;  %v4977_v9 = vadd.f32 %v4941_v14, %v4749_v11 }
 0xb4b   : > { %v4463_v39 = vpop.permute.xlu0 %4462  ;;  %v7512_v42 = vpack.i.bf16 %v5020_v3, %v5019_v8 }
 0xb4c   : > { %v4487_v47 = vsel %vm1051_vm4, %v13936_v7, %v4463_v39  ;;  %v14100_v33 = vadd.f32 %v13634_v28, %v4977_v9 }
 0xb4d   : > { %v14077_v63 = vadd.f32 %v4487_v47, %v4295_v0  ;;  %v4237_v0 = vpop.permute.xlu1 %4236  ;;  %v18035_v47 = vld [vmem:[#allocation100_spill] sm:$0xff] }
 0xb4e   : > { %v5021_v61 = vmax.f32 %v14100_v33, 0.0  ;;  %v4260_v25 = vsel %vm533_vm3, %v14032_v24, %v4237_v0  ;;  %v5442_v33 = vld [vmem:[%s16315_s3 + $0x118] sm:$0xff] }
 0xb4f   : > { %v4296_v16 = vadd.f32 %v4260_v25, %v18035_v47 }
 0xb50   : > { %4926 = vrot.lane.b32.xlu1 %v18034_v29, %s7850_s30 }
 0xb51   : > { %7513 = vrot.lane.b32.xlu0 %v7512_v42, %s7848_s15 }
 0xb52   : > { %4928 = vrot.lane.b32.xlu2 %v4881_v43, %s7850_s30 }
 0xb53   : > { %v4689_v2 = vpop.permute.xlu0 %4688 }
 0xb55   : > { %v4465_v49 = vpop.permute.xlu1 %4464 }
 0xb56   : > { %v4488_v58 = vsel %vm1051_vm4, %v4463_v39, %v4465_v49 }
 0xb58   : > { %5068 = vrot.lane.b32.xlu1 %v5021_v61, %s7848_s15 }
 0xb5d   : > { %v4691_v53 = vpop.permute.xlu1 %4690 }
 0xb5e   : > { %v4716_v46 = vsel %vm1051_vm4, %v4691_v53, %v4693_v23  ;;  %v4715_v19 = vsel %vm1051_vm4, %v4689_v2, %v4691_v53  ;;  %v18036_v53 = vmax.f32 %v13824_v13, 0.0 }
 0xb5f   : > { %v4751_v15 = vadd.f32 %v4715_v19, %v14077_v63 }
 0xb61   : > { %v5063_v6 = vpop.permute.xlu2 %5062 }
 0xb62   : > { %v14109_v37 = vmax.f32 %v5018_v51, %v5063_v6 }
 0xb64   : > { %5164 = vrot.lane.b32.xlu1 %v14109_v37, %s7850_s30 }
 0xb69   : > { %v4919_v35 = vpop.permute.xlu2 %4918 }
 0xb72   : > { %v5051_v21 = vpop.permute.xlu0 %5050 }
 0xb73   : > { %v14115_v54 = vmax.f32 %v5012_v27, %v5051_v21 }
 0xb74   : > { %v7504_v26 = vpop.permute.xlu2 %7503 }
 0xb75   : > { %5152 = vrot.lane.b32.xlu2 %v14115_v54, %s7850_s30  ;;  %v7506_v18 = vunpack.i.h.bf16 %v7504_v26  ;;  %v7505_v38 = vunpack.i.l.bf16 %v7504_v26  ;;  %v18037_v26 = vmax.f32 %v13821_v45, 0.0 }
 0xb77   : > { %v5084_v24 = vsel %vm533_vm3, %v7505_v38, %v7506_v18 }
 0xb7a   : > { %v4459_v51 = vpop.permute.xlu0 %4458  ;;  %v5057_v57 = vpop.permute.xlu1 %5056 }
 0xb7b   : > { %v4486_v52 = vsel %vm1051_vm4, %v4459_v51, %v13936_v7  ;;  %v14125_v32 = vmax.f32 %v5015_v20, %v5057_v57  ;;  %v5085_v27 = vsel %vm533_vm3, %v7506_v18, %v5057_v57  ;;  %v4524_v20 = vadd.f32 %v4488_v58, %v4296_v16  ;;  %v18038_v16 = vld [vmem:[#allocation131_spill] sm:$0xff] }
 0xb7c   : > { %v4522_v60 = vadd.f32 %v4486_v52, %v13986_v10  ;;  %v14137_v48 = vmax.f32 %v5014_v55, %v5085_v27  ;;  %v14141_v7 = vmax.f32 %v5013_v31, %v5084_v24  ;;  %v4915_v4 = vpop.permute.xlu2 %4914  ;;  %v18039_v24 = vld [vmem:[#allocation60_spill] sm:$0xff] }
 0xb7d   : > { %5158 = vrot.lane.b32.xlu0 %v14125_v32, %s7850_s30  ;;  %v4752_v10 = vadd.f32 %v4716_v46, %v4524_v20  ;;  %v2032_v46 = vsel %vm533_vm3, %v18039_v24, %v18038_v16  ;;  %v18040_v20 = vld [vmem:[#allocation178_spill] sm:$0xff] }
 0xb7e   : > { %v7522_v5 = vpack.i.bf16 %v14137_v48, %v14141_v7 }
 0xb82   : > { %v4921_v39 = vpop.permute.xlu0 %4920  ;;  %v4917_v40 = vpop.permute.xlu1 %4916 }
 0xb83   : > { %v4944_v41 = vsel %vm1051_vm4, %v4919_v35, %v4921_v39  ;;  %v4943_v49 = vsel %vm1051_vm4, %v4917_v40, %v4919_v35  ;;  %v4942_v51 = vsel %vm1051_vm4, %v4915_v4, %v4917_v40  ;;  %v18042_v40 = vld [vmem:[#allocation88_spill] sm:$0xff]  ;;  %v18044_v4 = vld [vmem:[#allocation222_spill] sm:$0xff] }
 0xb84   : > { %v4980_v50 = vadd.f32 %v4944_v41, %v4752_v10  ;;  %v18041_v10 = vld [vmem:[#allocation185_spill] sm:$0xff] }
 0xb85   : > { %7523 = vrot.lane.b32.xlu0 %v7522_v5, %s7850_s30  ;;  %v2262_v39 = vsel %vm533_vm3, %v18041_v10, %v18040_v20  ;;  %v2068_v5 = vadd.f32 %v2032_v46, %v18042_v40  ;;  %v18053_v46 = vld [vmem:[#allocation130_spill] sm:$0xff] }
 0xb86   : > { %v14148_v22 = vadd.f32 %v13634_v28, %v4980_v50  ;;  %v18043_v50 = vld [vmem:[#allocation220_spill] sm:$0xff]  ;;  %v18054_v20 = vrot.slane %v18053_v46, 2  ;;  %v7782_v40 = vld [vmem:[%s7946_s14 + $0x290] sm:$0x3] }
 0xb88   : > { %v5024_v44 = vmax.f32 %v14148_v22, 0.0  ;;  %v7021_v22 = vld [vmem:[%s16315_s3 + $0x3c0] sm:$0xff] }
 0xb8a   : > { %v7499_v55 = vpop.permute.xlu1 %7498 }
 0xb8b   : > { %v7501_v31 = vunpack.i.h.bf16 %v7499_v55  ;;  %v7500_v62 = vunpack.i.l.bf16 %v7499_v55  ;;  %v7509_v12 = vpop.permute.xlu0 %7508  ;;  %v2492_v55 = vsel %vm533_vm3, %v18044_v4, %v18043_v50 }
 0xb8c   : > { %v7511_v14 = vunpack.i.h.bf16 %v7509_v12  ;;  %v7510_v11 = vunpack.i.l.bf16 %v7509_v12 }
 0xb8d   : > { %v5083_v9 = vsel %vm533_vm3, %v7501_v31, %v5051_v21  ;;  %v5082_v42 = vsel %vm533_vm3, %v7500_v62, %v7501_v31  ;;  %5074 = vrot.lane.b32.xlu0 %v5024_v44, %s7848_s15  ;;  %v2298_v62 = vadd.f32 %v2262_v39, %v2068_v5  ;;  %v18055_v5 = vld [vmem:[#allocation260_spill] sm:$0xff] }
 0xb8e   : > { %v14159_v29 = vmax.f32 %v5011_v36, %v5083_v9  ;;  %v14163_v43 = vmax.f32 %v5010_v56, %v5082_v42  ;;  %v5087_v23 = vsel %vm533_vm3, %v7511_v14, %v5063_v6  ;;  %v5086_v0 = vsel %vm533_vm3, %v7510_v11, %v7511_v14  ;;  %v4239_v36 = vpop.permute.xlu2 %4238  ;;  %v18045_v14 = vld [vmem:[#allocation238_spill] sm:$0xff]  ;;  %v18046_v11 = vld [vmem:[#allocation240_spill] sm:$0xff]  ;;  %v18047_v42 = vld [vmem:[#allocation173_spill] sm:$0xff] }
 0xb8f   : > { %v14170_v21 = vmax.f32 %v18036_v53, %v5087_v23  ;;  %v14174_v18 = vmax.f32 %v18037_v26, %v5086_v0  ;;  %v4979_v6 = vadd.f32 %v4943_v49, %v4751_v15  ;;  %v2720_v19 = vsel %vm1051_vm4, %v18046_v11, %v18045_v14  ;;  %v7780_v9 = vld [vmem:[%s7946_s14 + $0xd0] sm:$0x3]  ;;  %v18048_v49 = vld [vmem:[#allocation251_spill] sm:$0xff]  ;;  %v18049_v53 = vld [vmem:[#allocation181_spill] sm:$0xff] }
 0xb90   : > { %v7517_v30 = vpack.i.bf16 %v14159_v29, %v14163_v43  ;;  %v3248_v23 = vmul.f32 %v7780_v9, %v18047_v42  ;;  %v2528_v0 = vadd.f32 %v2492_v55, %v2298_v62  ;;  %v2948_v26 = vsel %vm1051_vm4, %v18049_v53, %v18048_v49  ;;  %v18056_v62 = vld [vmem:[#allocation6_spill] sm:$0xff] }
 0xb91   : > { %v7527_v56 = vpack.i.bf16 %v14170_v21, %v14174_v18  ;;  %v14186_v63 = vadd.f32 %v13769_v59, %v4979_v6  ;;  %v18051_v6 = vld [vmem:[#allocation132_spill] sm:$0xff]  ;;  %v3513_v50 = vmul.f32 %v7782_v40, %v18055_v5  ;;  %v18057_v14 = vrot.slane %v18056_v62, 2 }
 0xb92   : > { %v4687_v38 = vpop.permute.xlu1 %4686  ;;  %7518 = vrot.lane.b32.xlu2 %v7517_v30, %s7850_s30  ;;  %v2756_v15 = vadd.f32 %v2720_v19, %v2528_v0  ;;  %v3308_v30 = vrot.slane %v3248_v23, 2  ;;  %v18058_v0 = vld [vmem:[#allocation25_spill] sm:$0xff]  ;;  %v18065_v5 = vld [vmem:[#allocation300_spill] sm:$0xff] }
 0xb93   : > { %v4714_v13 = vsel %vm1051_vm4, %v4687_v38, %v4689_v2  ;;  %v4013_v35 = vpop.permute.xlu0 %4012  ;;  %7528 = vrot.lane.b32.xlu1 %v7527_v56, %s7850_s30  ;;  %v5023_v52 = vmax.f32 %v14186_v63, 0.0  ;;  %v18050_v56 = vld [vmem:[#allocation171_spill] sm:$0xff]  ;;  %v3572_v19 = vrot.slane %v3513_v50, 2  ;;  %v18059_v49 = vrot.slane %v18058_v0, 2 }
 0xb94   : > { %v4750_v45 = vadd.f32 %v4714_v13, %v4522_v60  ;;  %v3176_v38 = vsel %vm1051_vm4, %v18051_v6, %v18050_v56  ;;  %v7781_v13 = vld [vmem:[%s7946_s14 + $0x1b0] sm:$0x3]  ;;  %v3309_v10 = vsel %vm3270_vm5, %v18054_v20, %v3308_v30  ;;  %v18062_v56 = vld [vmem:[#allocation279_spill] sm:$0xff]  ;;  %v5451_v20 = vld [vmem:[%s16315_s3 + $0x160] sm:$0xff]  ;;  %s7803_s14 = scalar_lea.hbm %s16317_s5, 2 }
 0xb95   : > { %v3573_v53 = vsel %vm3270_vm5, %v18059_v49, %v3572_v19  ;;  %5499 = vmatpush.msra.mxu2 %v5451_v20  ;;  %v5449_v19 = vld [vmem:[%s16315_s3 + $0x150] sm:$0xff]  ;;  %p7805_p1 = scmp.lt.s32.totalorder %s7803_s14, %s7799_s26 }
 0xb96   : > { %v4978_v57 = vadd.f32 %v4942_v51, %v4750_v45  ;;  %v4245_v27 = vpop.permute.xlu2 %4244  ;;  %v18052_v45 = vld [vmem:[#allocation257_spill] sm:$0xff] }
 0xb97   : > { %v3381_v51 = vmul.f32 %v7781_v13, %v18052_v45  ;;  %p7806_p2 = por %p7805_p1, %p7804_p0 }
 0xb98   : > { %v14189_v25 = vadd.f32 %v13762_v17, %v4978_v57  ;;  %v2984_v57 = vadd.f32 %v2948_v26, %v2756_v15  ;;  %v18060_v26 = vld [vmem:[#allocation282_spill] sm:$0xff]  ;;  %v18061_v15 = vld [vmem:[#allocation280_spill] sm:$0xff] }
 0xb99   : > { %v3440_v39 = vrot.slane %v3381_v51, 2  ;;  %v3802_v30 = vsel %vm533_vm3, %v18061_v15, %v18060_v26  ;;  %v3803_v6 = vsel %vm533_vm3, %v18060_v26, %v18062_v56  ;;  %v18063_v51 = vld [vmem:[#allocation267_spill] sm:$0xff]  ;;  %v5419_v56 = vld [vmem:[%s16315_s3 + $0x60] sm:$0xff]  ;;  %p7807_p3 = pnand %p7806_p2, %p7802_p13 }
 0xb9a   : > { %v5022_v58 = vmax.f32 %v14189_v25, 0.0  ;;  %v4015_v2 = vpop.permute.xlu1 %4014  ;;  %v3212_v24 = vadd.f32 %v3176_v38, %v2984_v57  ;;  %v4032_v57 = vsel %vm533_vm3, %v18063_v51, %v4013_v35  ;;  %v7006_v25 = vld [vmem:[%s16315_s3 + $0x348] sm:$0xff] }
 0xb9b   : > { %v4241_v47 = vpop.permute.xlu0 %4240  ;;  %v3441_v11 = vsel %vm3270_vm5, %v18057_v14, %v3440_v39  ;;  %v18064_v39 = vld [vmem:[#allocation129_spill] sm:$0xff] }
 0xb9c   : > { %v7532_v60 = vpack.i.bf16 %v5022_v58, %v5023_v52  ;;  %v3345_v55 = vadd.f32 %v3309_v10, %v3212_v24  ;;  %v4261_v38 = vsel %vm533_vm3, %v4239_v36, %v4241_v47  ;;  %v4033_v24 = vsel %vm533_vm3, %v4013_v35, %v4015_v2  ;;  %v5450_v10 = vld [vmem:[%s16315_s3 + $0x158] sm:$0xff]  ;;  %v5421_v2 = vld [vmem:[%s16315_s3 + $0x70] sm:$0xff] }
 0xb9d   : > { %v3838_v40 = vadd.f32 %v3802_v30, %v18064_v39  ;;  %v4297_v50 = vadd.f32 %v4261_v38, %v18065_v5  ;;  %v5422_v35 = vld [vmem:[%s16315_s3 + $0x78] sm:$0xff]  ;;  %5500 = vmatpush.msra.mxu2 %v5450_v10  ;;  %v5445_v10 = vld [vmem:[%s16315_s3 + $0x130] sm:$0xff] }
 0xb9e   : > { %7533 = vrot.lane.b32.xlu2 %v7532_v60, %s7848_s15  ;;  %v4471_v12 = vpop.permute.xlu2 %4470  ;;  %v3477_v23 = vadd.f32 %v3441_v11, %v3345_v55  ;;  %5456 = vmatpush.msra.mxu0 %v5422_v35 }
 0xb9f   : > { %5501 = vmatpush.msra.mxu2 %v5449_v19 }
 0xba0   : > { %v3609_v13 = vadd.f32 %v3573_v53, %v3477_v23  ;;  %v4068_v23 = vadd.f32 %v4032_v57, %v3838_v40  ;;  %v5420_v53 = vld [vmem:[%s16315_s3 + $0x68] sm:$0xff]  ;;  %5457 = vmatpush.msra.mxu0 %v5421_v2 }
 0xba2   : > { %v4243_v41 = vpop.permute.xlu1 %4242  ;;  %v3839_v36 = vadd.f32 %v3803_v6, %v3609_v13  ;;  %5458 = vmatpush.msra.mxu0 %v5420_v53  ;;  %v5441_v53 = vld [vmem:[%s16315_s3 + $0x110] sm:$0xff] }
 0xba3   : > { %v4467_v31 = vpop.permute.xlu0 %4466  ;;  %v4263_v62 = vsel %vm533_vm3, %v4243_v41, %v4245_v27 }
 0xba4   : > { %v4069_v0 = vadd.f32 %v4033_v24, %v3839_v36  ;;  %5459 = vmatpush.msra.mxu0 %v5419_v56  ;;  %v5436_v56 = vld [vmem:[%s16315_s3 + $0xe8] sm:$0xff] }
 0xba6   : > { %v4697_v4 = vpop.permute.xlu2 %4696  ;;  %v4299_v15 = vadd.f32 %v4263_v62, %v4069_v0  ;;  %v5418_v0 = vld [vmem:[%s16315_s3 + $0x58] sm:$0xff] }
 0xba7   : > { %5460 = vmatpush.msra.mxu0 %v5418_v0  ;;  %v6970_v0 = vld [vmem:[%s16315_s3 + $0x230] sm:$0xff] }
 0xba9   : > { %5461 = vmatpush.msra.mxu0 %v5417_v34 }
 0xbaa   : > { %v4469_v60 = vpop.permute.xlu1 %4468 }
 0xbab   : > { %v4473_v16 = vpop.permute.xlu0 %4472  ;;  %v4489_v46 = vsel %vm1051_vm4, %v4467_v31, %v4469_v60  ;;  %v4262_v31 = vsel %vm533_vm3, %v4241_v47, %v4243_v41  ;;  %v4490_v47 = vsel %vm1051_vm4, %v4469_v60, %v4471_v12 }
 0xbac   : > { %v4525_v49 = vadd.f32 %v4489_v46, %v4297_v50  ;;  %v4491_v27 = vsel %vm1051_vm4, %v4471_v12, %v4473_v16  ;;  %v4298_v26 = vadd.f32 %v4262_v31, %v4068_v23  ;;  %v5447_v12 = vld [vmem:[%s16315_s3 + $0x140] sm:$0xff] }
 0xbad   : > { %v4527_v38 = vadd.f32 %v4491_v27, %v4299_v15  ;;  %v5414_v27 = vld [vmem:[%s16315_s3 + $0x38] sm:$0xff]  ;;  %v6960_v15 = vld [vmem:[%s16315_s3 + $0x1e0] sm:$0xff] }
 0xbae   : > { %v4923_v45 = vpop.permute.xlu2 %4922  ;;  %v4526_v16 = vadd.f32 %v4490_v47, %v4298_v26  ;;  %v5438_v47 = vld [vmem:[%s16315_s3 + $0xf8] sm:$0xff]  ;;  %v5437_v26 = vld [vmem:[%s16315_s3 + $0xf0] sm:$0xff]  ;;  %5572 = vmatpush.msra.mxu3 %v6960_v15 }
 0xbaf   : > { %5476 = vmatpush.msra.mxu1 %v5438_v47  ;;  %v6952_v47 = vld [vmem:[%s16315_s3 + $0x1a0] sm:$0xff]  ;;  %v6987_v15 = vld [vmem:[%s16315_s3 + $0x2b8] sm:$0xff] }
 0xbb1   : > { %5477 = vmatpush.msra.mxu1 %v5437_v26  ;;  %v6968_v26 = vld [vmem:[%s16315_s3 + $0x220] sm:$0xff] }
 0xbb2   : > { %v4695_v9 = vpop.permute.xlu1 %4694 }
 0xbb3   : > { %v4699_v42 = vpop.permute.xlu0 %4698  ;;  %v4717_v14 = vsel %vm1051_vm4, %v4695_v9, %v4697_v4  ;;  %v5448_v9 = vld [vmem:[%s16315_s3 + $0x148] sm:$0xff]  ;;  %5478 = vmatpush.msra.mxu1 %v5436_v56 }
 0xbb4   : > { %v4753_v30 = vadd.f32 %v4717_v14, %v4525_v49  ;;  %v4718_v6 = vsel %vm1051_vm4, %v4697_v4, %v4699_v42  ;;  %5502 = vmatpush.msra.mxu2 %v5448_v9  ;;  %v5444_v49 = vld [vmem:[%s16315_s3 + $0x128] sm:$0xff]  ;;  %v5413_v9 = vld [vmem:[%s16315_s3 + $0x30] sm:$0xff] }
 0xbb5   : > { %v4754_v57 = vadd.f32 %v4718_v6, %v4526_v16  ;;  %v6959_v6 = vld [vmem:[%s16315_s3 + $0x1d8] sm:$0xff]  ;;  %v5412_v16 = vld [vmem:[%s16315_s3 + $0x28] sm:$0xff] }
 0xbb6   : > { %v4929_v51 = vpop.permute.xlu2 %4928  ;;  %5503 = vmatpush.msra.mxu2 %v5447_v12  ;;  %v5435_v12 = vld [vmem:[%s16315_s3 + $0xe0] sm:$0xff]  ;;  %5573 = vmatpush.msra.mxu3 %v6959_v6 }
 0xbb7   : > { %5479 = vmatpush.msra.mxu1 %v5435_v12  ;;  %v6986_v12 = vld [vmem:[%s16315_s3 + $0x2b0] sm:$0xff] }
 0xbba   : > { %v4701_v55 = vpop.permute.xlu1 %4700 }
 0xbbb   : > { %v4925_v11 = vpop.permute.xlu0 %4924  ;;  %v4719_v60 = vsel %vm1051_vm4, %v4699_v42, %v4701_v55 }
 0xbbc   : > { %v4945_v41 = vsel %vm1051_vm4, %v4923_v45, %v4925_v11  ;;  %v5446_v45 = vld [vmem:[%s16315_s3 + $0x138] sm:$0xff]  ;;  %v4755_v24 = vadd.f32 %v4719_v60, %v4527_v38  ;;  %v6976_v60 = vld [vmem:[%s16315_s3 + $0x260] sm:$0xff]  ;;  %v6958_v38 = vld [vmem:[%s16315_s3 + $0x1d0] sm:$0xff] }
 0xbbd   : > { %v4981_v13 = vadd.f32 %v4945_v41, %v4753_v30  ;;  %5504 = vmatpush.msra.mxu2 %v5446_v45  ;;  %v5440_v41 = vld [vmem:[%s16315_s3 + $0x108] sm:$0xff]  ;;  %v5439_v30 = vld [vmem:[%s16315_s3 + $0x100] sm:$0xff]  ;;  %v5434_v45 = vld [vmem:[%s16315_s3 + $0xd8] sm:$0xff]  ;;  %5574 = vmatpush.msra.mxu3 %v6958_v38 }
 0xbbe   : > { %5480 = vmatpush.msra.mxu1 %v5434_v45 }
 0xbbf   : > { %v14289_v39 = vadd.f32 %v13762_v17, %v4981_v13  ;;  %5505 = vmatpush.msra.mxu2 %v5445_v10  ;;  %v6975_v13 = vld [vmem:[%s16315_s3 + $0x258] sm:$0xff]  ;;  %v5432_v10 = vld [vmem:[%s16315_s3 + $0xc8] sm:$0xff] }
 0xbc1   : > { %v5025_v2 = vmax.f32 %v14289_v39, 0.0  ;;  %5506 = vmatpush.msra.mxu2 %v5444_v49  ;;  %v6989_v49 = vld [vmem:[%s16315_s3 + $0x2c8] sm:$0xff] }
 0xbc2   : > { %v4927_v4 = vpop.permute.xlu1 %4926 }
 0xbc3   : > { %v4946_v42 = vsel %vm1051_vm4, %v4925_v11, %v4927_v4  ;;  %v4947_v46 = vsel %vm1051_vm4, %v4927_v4, %v4929_v51  ;;  %v7514_v20 = vpop.permute.xlu0 %7513  ;;  %v5411_v51 = vld [vmem:[%s16315_s3 + $0x20] sm:$0xff]  ;;  %v5433_v4 = vld [vmem:[%s16315_s3 + $0xd0] sm:$0xff] }
 0xbc4   : > { %v4982_v40 = vadd.f32 %v4946_v42, %v4754_v57  ;;  %v4983_v36 = vadd.f32 %v4947_v46, %v4755_v24  ;;  %v7516_v5 = vunpack.i.h.bf16 %v7514_v20  ;;  %v7515_v50 = vunpack.i.l.bf16 %v7514_v20  ;;  %v6957_v57 = vld [vmem:[%s16315_s3 + $0x1c8] sm:$0xff]  ;;  %v6974_v24 = vld [vmem:[%s16315_s3 + $0x250] sm:$0xff]  ;;  %v5410_v42 = vld [vmem:[%s16315_s3 + $0x18] sm:$0xff]  ;;  %5481 = vmatpush.msra.mxu1 %v5433_v4 }
 0xbc5   : > { %v6956_v46 = vld [vmem:[%s16315_s3 + $0x1c0] sm:$0xff]  ;;  %5575 = vmatpush.msra.mxu3 %v6957_v57  ;;  %v6973_v20 = vld [vmem:[%s16315_s3 + $0x248] sm:$0xff]  ;;  %v5425_v4 = vld [vmem:[%s16315_s3 + $0x90] sm:$0xff] }
 0xbc6   : > { %v14292_v55 = vadd.f32 %v13769_v59, %v4982_v40  ;;  %v14295_v35 = vadd.f32 %v13634_v28, %v4983_v36  ;;  %v5088_v17 = vsel %vm533_vm3, %v7515_v50, %v7516_v5  ;;  %v5409_v40 = vld [vmem:[%s16315_s3 + $0x10] sm:$0xff]  ;;  %v6955_v36 = vld [vmem:[%s16315_s3 + $0x1b8] sm:$0xff]  ;;  %v5431_v50 = vld [vmem:[%s16315_s3 + $0xc0] sm:$0xff]  ;;  %5482 = vmatpush.msra.mxu1 %v5432_v10 }
 0xbc7   : > { %v14311_v59 = vmax.f32 %v5019_v8, %v5088_v17  ;;  %v5416_v8 = vld [vmem:[%s16315_s3 + $0x48] sm:$0xff]  ;;  %5576 = vmatpush.msra.mxu3 %v6956_v46  ;;  %v6984_v10 = vld [vmem:[%s16315_s3 + $0x2a0] sm:$0xff] }
 0xbc8   : > { %v5026_v31 = vmax.f32 %v14292_v55, 0.0  ;;  %v5027_v62 = vmax.f32 %v14295_v35, 0.0  ;;  %5462 = vmatpush.msra.mxu0 %v5416_v8  ;;  %v5408_v17 = vld [vmem:[%s16315_s3 + $0x8] sm:$0xff]  ;;  %5483 = vmatpush.msra.mxu1 %v5431_v50  ;;  %v7025_v35 = vld [vmem:[%s16315_s3 + $0x3e0] sm:$0xff]  ;;  %v7086_v55 = vld [vmem:[%s16315_s3 + $0x5b8] sm:$0xff] }
 0xbc9   : > { %5577 = vmatpush.msra.mxu3 %v6955_v36  ;;  %v6953_v8 = vld [vmem:[%s16315_s3 + $0x1a8] sm:$0xff] }
 0xbca   : > { %v7537_v14 = vpack.i.bf16 %v5026_v31, %v5025_v2  ;;  %v5069_v11 = vpop.permute.xlu1 %5068  ;;  %5080 = vrot.lane.b32.xlu2 %v5027_v62, %s7848_s15  ;;  %v6985_v57 = vld [vmem:[%s16315_s3 + $0x2a8] sm:$0xff] }
 0xbcb   : > { %v5089_v28 = vsel %vm533_vm3, %v7516_v5, %v5069_v11  ;;  %v14329_v1 = vmax.f32 %v5021_v61, %v5069_v11  ;;  %v5415_v61 = vld [vmem:[%s16315_s3 + $0x40] sm:$0xff]  ;;  %v5424_v50 = vld [vmem:[%s16315_s3 + $0x88] sm:$0xff] }
 0xbcc   : > { %v14315_v19 = vmax.f32 %v5020_v3, %v5089_v28  ;;  %7538 = vrot.lane.b32.xlu1 %v7537_v14, %s7848_s15  ;;  %v5443_v3 = vld [vmem:[%s16315_s3 + $0x120] sm:$0xff]  ;;  %5463 = vmatpush.msra.mxu0 %v5415_v61  ;;  %v6954_v14 = vld [vmem:[%s16315_s3 + $0x1b0] sm:$0xff]  ;;  %v6971_v28 = vld [vmem:[%s16315_s3 + $0x238] sm:$0xff]  ;;  %s6766_s15 = scalar_lea.sflag [#allocation3], %s215_s13 }
 0xbcd   : > { %5507 = vmatpush.msra.mxu2 %v5443_v3  ;;  %v6972_v5 = vld [vmem:[%s16315_s3 + $0x240] sm:$0xff]  ;;  %5578 = vmatpush.msra.mxu3 %v6954_v14  ;;  %v5430_v3 = vld [vmem:[%s16315_s3 + $0xb8] sm:$0xff] }
 0xbce   : > { %v7542_v23 = vpack.i.bf16 %v14315_v19, %v14311_v59  ;;  %5464 = vmatpush.msra.mxu0 %v5414_v27  ;;  %5484 = vmatpush.msra.mxu1 %v5430_v3  ;;  %v6988_v61 = vld [vmem:[%s16315_s3 + $0x2c0] sm:$0xff]  ;;  %v5428_v27 = vld [vmem:[%s16315_s3 + $0xa8] sm:$0xff]  ;;  %v6983_v14 = vld [vmem:[%s16315_s3 + $0x298] sm:$0xff] }
 0xbcf   : > { %5508 = vmatpush.msra.mxu2 %v5442_v33  ;;  %v14438_v11 = vpop.permute.xlu2 %5152  ;;  %v6969_v33 = vld [vmem:[%s16315_s3 + $0x228] sm:$0xff]  ;;  %5579 = vmatpush.msra.mxu3 %v6953_v8  ;;  %v5423_v3 = vld [vmem:[%s16315_s3 + $0x80] sm:$0xff] }
 0xbd0   : > { %7543 = vrot.lane.b32.xlu0 %v7542_v23, %s7850_s30  ;;  %5465 = vmatpush.msra.mxu0 %v5413_v9  ;;  %v5407_v23 = vld [vmem:[%s16315_s3] sm:$0xff] }
 0xbd1   : > { %5509 = vmatpush.msra.mxu2 %v5441_v53  ;;  %v5429_v53 = vld [vmem:[%s16315_s3 + $0xb0] sm:$0xff]  ;;  %5580 = vmatpush.msra.mxu3 %v6952_v47 }
 0xbd2   : > { %5466 = vmatpush.msra.mxu0 %v5412_v16  ;;  %5485 = vmatpush.msra.mxu1 %v5429_v53  ;;  %v6950_v16 = vld [vmem:[%s16315_s3 + $0x190] sm:$0xff] }
 0xbd3   : > { %5510 = vmatpush.msra.mxu2 %v5440_v41  ;;  %v5216_v41 = vmax.f32 %v14115_v54, %v14438_v11  ;;  %v6951_v54 = vld [vmem:[%s16315_s3 + $0x198] sm:$0xff] }
 0xbd4   : > { %5170 = vrot.lane.b32.xlu1 %v14329_v1, %s7850_s30  ;;  %5467 = vmatpush.msra.mxu0 %v5411_v51  ;;  %v6966_v51 = vld [vmem:[%s16315_s3 + $0x210] sm:$0xff] }
 0xbd5   : > { %5511 = vmatpush.msra.mxu2 %v5439_v30  ;;  %5486 = vmatpush.msra.mxu1 %v5428_v27  ;;  %v5256_v38 = vrot.slane %v5216_v41, 1 }
 0xbd6   : > { %5468 = vmatpush.msra.mxu0 %v5410_v42  ;;  %v14452_v34 = vpop.permute.xlu1 %5164  ;;  %5581 = vmatpush.msra.mxu3 %v6951_v54 }
 0xbd7   : > { %5592 = vmatpush.msrb.mxu2 %v6976_v60  ;;  %v14479_v9 = vmax.f32 %v14109_v37, %v14452_v34  ;;  %v5427_v37 = vld [vmem:[%s16315_s3 + $0xa0] sm:$0xff]  ;;  %v6967_v60 = vld [vmem:[%s16315_s3 + $0x218] sm:$0xff] }
 0xbd8   : > { %5469 = vmatpush.msra.mxu0 %v5409_v40  ;;  %5487 = vmatpush.msra.mxu1 %v5427_v37  ;;  %v6962_v37 = vld [vmem:[%s16315_s3 + $0x1f0] sm:$0xff] }
 0xbd9   : > { %5593 = vmatpush.msrb.mxu2 %v6975_v13  ;;  %v5263_v13 = vrot.slane %v14479_v9, 1  ;;  %5582 = vmatpush.msra.mxu3 %v6950_v16 }
 0xbda   : > { %5470 = vmatpush.msra.mxu0 %v5408_v17  ;;  %v6964_v17 = vld [vmem:[%s16315_s3 + $0x200] sm:$0xff] }
 0xbdb   : > { %5594 = vmatpush.msrb.mxu2 %v6974_v24  ;;  %v6949_v24 = vld [vmem:[%s16315_s3 + $0x188] sm:$0xff] }
 0xbdc   : > { %5471 = vmatpush.msra.mxu0 %v5407_v23  ;;  %5583 = vmatpush.msra.mxu3 %v6949_v24  ;;  %v7022_v24 = vld [vmem:[%s16315_s3 + $0x3c8] sm:$0xff] }
 0xbdd   : > { %5595 = vmatpush.msrb.mxu2 %v6973_v20  ;;  %v6965_v20 = vld [vmem:[%s16315_s3 + $0x208] sm:$0xff] }
 0xbde   : > { %5615 = vmatpush.msrb.mxu0 %v6989_v49  ;;  %v6947_v49 = vld [vmem:[%s16315_s3 + $0x178] sm:$0xff] }
 0xbdf   : > { %5596 = vmatpush.msrb.mxu2 %v6972_v5  ;;  %v6948_v5 = vld [vmem:[%s16315_s3 + $0x180] sm:$0xff] }
 0xbe0   : > { %5616 = vmatpush.msrb.mxu0 %v6988_v61  ;;  %5584 = vmatpush.msra.mxu3 %v6948_v5  ;;  %v6982_v61 = vld [vmem:[%s16315_s3 + $0x290] sm:$0xff] }
 0xbe1   : > { %5597 = vmatpush.msrb.mxu2 %v6971_v28 }
 0xbe2   : > { %5617 = vmatpush.msrb.mxu0 %v6987_v15  ;;  %5585 = vmatpush.msra.mxu3 %v6947_v49 }
 0xbe3   : > { %5598 = vmatpush.msrb.mxu2 %v6970_v0 }
 0xbe4   : > { %5618 = vmatpush.msrb.mxu0 %v6986_v12  ;;  %v6945_v12 = vld [vmem:[%s16315_s3 + $0x168] sm:$0xff] }
 0xbe5   : > { %5599 = vmatpush.msrb.mxu2 %v6969_v33  ;;  %v6963_v33 = vld [vmem:[%s16315_s3 + $0x1f8] sm:$0xff] }
 0xbe6   : > { %5619 = vmatpush.msrb.mxu0 %v6985_v57  ;;  %v6979_v57 = vld [vmem:[%s16315_s3 + $0x278] sm:$0xff] }
 0xbe7   : > { %5600 = vmatpush.msrb.mxu2 %v6968_v26 }
 0xbe8   : > { %5620 = vmatpush.msrb.mxu0 %v6984_v10 }
 0xbe9   : > { %5601 = vmatpush.msrb.mxu2 %v6967_v60 }
 0xbea   : > { %5621 = vmatpush.msrb.mxu0 %v6983_v14 }
 0xbeb   : > { %5602 = vmatpush.msrb.mxu2 %v6966_v51  ;;  %v6980_v51 = vld [vmem:[%s16315_s3 + $0x280] sm:$0xff] }
 0xbec   : > { %v14495_v56 = vpop.permute.xlu2 %7518  ;;  %5622 = vmatpush.msrb.mxu0 %v6982_v61  ;;  %v7018_v61 = vld [vmem:[%s16315_s3 + $0x3a8] sm:$0xff] }
 0xbed   : > { %5603 = vmatpush.msrb.mxu2 %v6965_v20  ;;  %v7521_v16 = vunpack.i.h.bf16 %v14495_v56 }
 0xbef   : > { %v14487_v30 = vpop.permute.xlu0 %5158  ;;  %5604 = vmatpush.msrb.mxu2 %v6964_v17  ;;  %v7003_v17 = vld [vmem:[%s16315_s3 + $0x330] sm:$0xff] }
 0xbf0   : > { %v5219_v6 = vmax.f32 %v14125_v32, %v14487_v30  ;;  %v5426_v32 = vld [vmem:[%s16315_s3 + $0x98] sm:$0xff] }
 0xbf1   : > { %5488 = vmatpush.msra.mxu1 %v5426_v32  ;;  %5605 = vmatpush.msrb.mxu2 %v6963_v33  ;;  %v7520_v32 = vunpack.i.l.bf16 %v14495_v56 }
 0xbf2   : > { %v5257_v45 = vrot.slane %v5219_v6, 1 }
 0xbf3   : > { %5489 = vmatpush.msra.mxu1 %v5425_v4  ;;  %5606 = vmatpush.msrb.mxu2 %v6962_v37 }
 0xbf4   : > { %v5264_v42 = vsel %vm1499_vm2, %v5257_v45, %v5263_v13  ;;  %v5258_v46 = vsel %vm1499_vm2, %v5256_v38, %v5257_v45  ;;  %v6961_v45 = vld [vmem:[%s16315_s3 + $0x1e8] sm:$0xff] }
 0xbf5   : > { %v14534_v40 = vmax.f32 %v5219_v6, %v5264_v42  ;;  %v5303_v36 = vmax.f32 %v5216_v41, %v5258_v46  ;;  %5490 = vmatpush.msra.mxu1 %v5424_v50  ;;  %v6946_v41 = vld [vmem:[%s16315_s3 + $0x170] sm:$0xff]  ;;  %v6981_v6 = vld [vmem:[%s16315_s3 + $0x288] sm:$0xff]  ;;  %5607 = vmatpush.msrb.mxu2 %v6961_v45  ;;  %v5185_v42 = vsel %vm1051_vm4, %v7521_v16, %v14438_v11 }
 0xbf6   : > { %5586 = vmatpush.msra.mxu3 %v6946_v41  ;;  %5623 = vmatpush.msrb.mxu0 %v6981_v6  ;;  %v5184_v46 = vsel %vm1051_vm4, %v7520_v32, %v7521_v16  ;;  %v5215_v63 = vmax.f32 %v14159_v29, %v5185_v42  ;;  %v7002_v29 = vld [vmem:[%s16315_s3 + $0x328] sm:$0xff]  ;;  %v7017_v6 = vld [vmem:[%s16315_s3 + $0x3a0] sm:$0xff] }
 0xbf7   : > { %v5344_v28 = vrot.slane %v14534_v40, 2  ;;  %v7524_v23 = vpop.permute.xlu0 %7523  ;;  %v5343_v0 = vrot.slane %v5303_v36, 2  ;;  %5491 = vmatpush.msra.mxu1 %v5423_v3  ;;  %v7051_v42 = vld [vmem:[%s16315_s3 + $0x4a8] sm:$0xff] }
 0xbf8   : > { %v7534_v8 = vpop.permute.xlu2 %7533  ;;  %v7526_v26 = vunpack.i.h.bf16 %v7524_v23  ;;  %v7525_v15 = vunpack.i.l.bf16 %v7524_v23  ;;  %5587 = vmatpush.msra.mxu3 %v6945_v12  ;;  %5624 = vmatpush.msrb.mxu0 %v6980_v51  ;;  %v5253_v33 = vrot.slane %v5215_v63, 1  ;;  %v6999_v12 = vld [vmem:[%s16315_s3 + $0x310] sm:$0xff] }
 0xbf9   : > { %v7536_v53 = vunpack.i.h.bf16 %v7534_v8  ;;  %v7535_v47 = vunpack.i.l.bf16 %v7534_v8  ;;  %v5345_v27 = vsel %vm3270_vm5, %v5343_v0, %v5344_v28  ;;  %5682 = vmatpush.msrb.mxu1 %v7006_v25  ;;  %v7015_v25 = vld [vmem:[%s16315_s3 + $0x390] sm:$0xff] }
 0xbfa   : > { %v14567_v54 = vmax.f32 %v5303_v36, %v5345_v27  ;;  %v5186_v56 = vsel %vm1051_vm4, %v7525_v15, %v7526_v26  ;;  %v6978_v36 = vld [vmem:[%s16315_s3 + $0x270] sm:$0xff]  ;;  %5625 = vmatpush.msrb.mxu0 %v6979_v57  ;;  %5702 = vmatpush.msrb.mxu3 %v7022_v24 }
 0xbfb   : > { %v5090_v60 = vsel %vm533_vm3, %v7536_v53, %v7535_v47  ;;  %v5217_v50 = vmax.f32 %v14141_v7, %v5186_v56  ;;  %v5214_v7 = vmax.f32 %v14163_v43, %v5184_v46  ;;  %v7019_v43 = vld [vmem:[%s16315_s3 + $0x3b0] sm:$0xff]  ;;  %v7001_v53 = vld [vmem:[%s16315_s3 + $0x320] sm:$0xff] }
 0xbfc   : > { %v14583_v38 = vmax.f32 %v5022_v58, %v5090_v60  ;;  %6944 = vmatmul.msk.f32.vlgmr.msra.gmra.mxu2 %vm5452_vm6, %v14567_v54  ;;  %v5187_v58 = vsel %vm1051_vm4, %v7526_v26, %v14487_v30  ;;  %v7005_v30 = vld [vmem:[%s16315_s3 + $0x340] sm:$0xff]  ;;  %5626 = vmatpush.msrb.mxu0 %v6978_v36  ;;  %v7052_v56 = vld [vmem:[%s16315_s3 + $0x4b0] sm:$0xff] }
 0xbfd   : > { %v5218_v5 = vmax.f32 %v14137_v48, %v5187_v58  ;;  %v6977_v48 = vld [vmem:[%s16315_s3 + $0x268] sm:$0xff]  ;;  %5683 = vmatpush.msrb.mxu1 %v7005_v30  ;;  %5703 = vmatpush.msrb.mxu3 %v7021_v22  ;;  %v5251_v23 = vrot.slane %v5217_v50, 1  ;;  %v5250_v8 = vrot.slane %v5214_v7, 1  ;;  %v6997_v30 = vld [vmem:[%s16315_s3 + $0x300] sm:$0xff] }
 0xbfe   : > { %5172 = vrot.lane.b32.xlu1 %v14583_v38, %s7850_s30  ;;  %5627 = vmatpush.msrb.mxu0 %v6977_v48  ;;  %v6998_v58 = vld [vmem:[%s16315_s3 + $0x308] sm:$0xff]  ;;  %v7013_v22 = vld [vmem:[%s16315_s3 + $0x380] sm:$0xff] }
 0xbff   : > { %v5075_v4 = vpop.permute.xlu0 %5074  ;;  %v5254_v0 = vrot.slane %v5218_v5, 1  ;;  %v5252_v15 = vsel %vm1499_vm2, %v5250_v8, %v5251_v23  ;;  %5798 = vmatpush.msra.mxu2 %v7052_v56  ;;  %v7033_v8 = vld [vmem:[%s16315_s3 + $0x420] sm:$0xff]  ;;  %v7028_v56 = vld [vmem:[%s16315_s3 + $0x3f8] sm:$0xff] }
 0xc00   : > { %v5091_v20 = vsel %vm533_vm3, %v7535_v47, %v5075_v4  ;;  %v14616_v10 = vmax.f32 %v5024_v44, %v5075_v4  ;;  %v7004_v44 = vld [vmem:[%s16315_s3 + $0x338] sm:$0xff]  ;;  %v5301_v16 = vmax.f32 %v5214_v7, %v5252_v15  ;;  %v7014_v4 = vld [vmem:[%s16315_s3 + $0x388] sm:$0xff]  ;;  %v7009_v15 = vld [vmem:[%s16315_s3 + $0x360] sm:$0xff] }
 0xc01   : > { %v14625_v11 = vmax.f32 %v5023_v52, %v5091_v20  ;;  %v7020_v52 = vld [vmem:[%s16315_s3 + $0x3b8] sm:$0xff]  ;;  %5684 = vmatpush.msrb.mxu1 %v7004_v44  ;;  %v5255_v37 = vsel %vm1499_vm2, %v5253_v33, %v5254_v0  ;;  %5799 = vmatpush.msra.mxu2 %v7051_v42  ;;  %v6994_v33 = vld [vmem:[%s16315_s3 + $0x2e8] sm:$0xff]  ;;  %v7027_v42 = vld [vmem:[%s16315_s3 + $0x3f0] sm:$0xff] }
 0xc02   : > { %5176 = vrot.lane.b32.xlu0 %v14616_v10, %s7850_s30  ;;  %5704 = vmatpush.msrb.mxu3 %v7020_v52  ;;  %v5302_v32 = vmax.f32 %v5215_v63, %v5255_v37  ;;  %v5337_v46 = vrot.slane %v5301_v16, 2  ;;  %v6996_v44 = vld [vmem:[%s16315_s3 + $0x2f8] sm:$0xff]  ;;  %v5567_v37 = vrot.slane %v14567_v54, 4  ;;  %v7047_v54 = vld [vmem:[%s16315_s3 + $0x488] sm:$0xff] }
 0xc03   : > { %5174 = vrot.lane.b32.xlu2 %v14625_v11, %s7850_s30  ;;  %5685 = vmatpush.msrb.mxu1 %v7003_v17  ;;  %v7035_v17 = vld [vmem:[%s16315_s3 + $0x430] sm:$0xff] }
 0xc04   : > { %5705 = vmatpush.msrb.mxu3 %v7019_v43  ;;  %v5340_v36 = vrot.slane %v5302_v32, 2  ;;  %v7034_v43 = vld [vmem:[%s16315_s3 + $0x428] sm:$0xff] }
 0xc05   : > { %v7529_v14 = vpop.permute.xlu1 %7528  ;;  %5686 = vmatpush.msrb.mxu1 %v7002_v29  ;;  %v6995_v29 = vld [vmem:[%s16315_s3 + $0x2f0] sm:$0xff] }
 0xc06   : > { %v7531_v49 = vunpack.i.h.bf16 %v7529_v14  ;;  %v7530_v3 = vunpack.i.l.bf16 %v7529_v14  ;;  %5706 = vmatpush.msrb.mxu3 %v7018_v61  ;;  %v7012_v14 = vld [vmem:[%s16315_s3 + $0x378] sm:$0xff]  ;;  %v7010_v61 = vld [vmem:[%s16315_s3 + $0x368] sm:$0xff] }
 0xc07   : > { %5687 = vmatpush.msrb.mxu1 %v7001_v53  ;;  %v7048_v53 = vld [vmem:[%s16315_s3 + $0x490] sm:$0xff] }
 0xc08   : > { %v5189_v47 = vsel %vm1051_vm4, %v7531_v49, %v14452_v34  ;;  %v5188_v27 = vsel %vm1051_vm4, %v7530_v3, %v7531_v49  ;;  %v7000_v34 = vld [vmem:[%s16315_s3 + $0x318] sm:$0xff]  ;;  %5707 = vmatpush.msrb.mxu3 %v7017_v6  ;;  %v7011_v49 = vld [vmem:[%s16315_s3 + $0x370] sm:$0xff] }
 0xc09   : > { %v14664_v41 = vmax.f32 %v14170_v21, %v5189_v47  ;;  %v14667_v26 = vmax.f32 %v14174_v18, %v5188_v27  ;;  %v7016_v18 = vld [vmem:[%s16315_s3 + $0x398] sm:$0xff]  ;;  %5688 = vmatpush.msrb.mxu1 %v7000_v34  ;;  %v6993_v27 = vld [vmem:[%s16315_s3 + $0x2e0] sm:$0xff]  ;;  %v7031_v6 = vld [vmem:[%s16315_s3 + $0x410] sm:$0xff] }
 0xc0a   : > { %5708 = vmatpush.msrb.mxu3 %v7016_v18  ;;  %v7049_v3 = vld [vmem:[%s16315_s3 + $0x498] sm:$0xff] }
 0xc0b   : > { %v5261_v21 = vrot.slane %v14664_v41, 1  ;;  %v5259_v60 = vrot.slane %v14667_v26, 1  ;;  %5689 = vmatpush.msrb.mxu1 %v6999_v12  ;;  %v7032_v47 = vld [vmem:[%s16315_s3 + $0x418] sm:$0xff]  ;;  %v7030_v12 = vld [vmem:[%s16315_s3 + $0x408] sm:$0xff] }
 0xc0c   : > { %5709 = vmatpush.msrb.mxu3 %v7015_v25  ;;  %v6992_v34 = vld [vmem:[%s16315_s3 + $0x2d8] sm:$0xff] }
 0xc0d   : > { %v5260_v45 = vsel %vm1499_vm2, %v5251_v23, %v5259_v60  ;;  %v5262_v51 = vsel %vm1499_vm2, %v5254_v0, %v5261_v21  ;;  %5690 = vmatpush.msrb.mxu1 %v6998_v58  ;;  %v7008_v18 = vld [vmem:[%s16315_s3 + $0x358] sm:$0xff]  ;;  %v7067_v58 = vld [vmem:[%s16315_s3 + $0x528] sm:$0xff] }
 0xc0e   : > { %v14700_v57 = vmax.f32 %v5217_v50, %v5260_v45  ;;  %v14702_v24 = vmax.f32 %v5218_v5, %v5262_v51  ;;  %v7050_v50 = vld [vmem:[%s16315_s3 + $0x4a0] sm:$0xff]  ;;  %5710 = vmatpush.msrb.mxu3 %v7014_v4  ;;  %v7068_v45 = vld [vmem:[%s16315_s3 + $0x530] sm:$0xff]  ;;  %v7081_v25 = vld [vmem:[%s16315_s3 + $0x598] sm:$0xff] }
 0xc0f   : > { %5691 = vmatpush.msrb.mxu1 %v6997_v30  ;;  %5800 = vmatpush.msra.mxu2 %v7050_v50  ;;  %v7029_v51 = vld [vmem:[%s16315_s3 + $0x400] sm:$0xff]  ;;  %v7080_v4 = vld [vmem:[%s16315_s3 + $0x590] sm:$0xff] }
 0xc10   : > { %v5338_v20 = vrot.slane %v14700_v57, 2  ;;  %v5341_v5 = vrot.slane %v14702_v24, 2  ;;  %5711 = vmatpush.msrb.mxu3 %v7013_v22  ;;  %v7066_v30 = vld [vmem:[%s16315_s3 + $0x520] sm:$0xff]  ;;  %v7065_v22 = vld [vmem:[%s16315_s3 + $0x518] sm:$0xff] }
 0xc11   : > { %5692 = vmatpush.msrb.mxu1 %v6996_v44  ;;  %5801 = vmatpush.msra.mxu2 %v7049_v3  ;;  %v7097_v3 = vld [vmem:[%s16315_s3 + $0x610] sm:$0xff] }
 0xc12   : > { %v5339_v48 = vsel %vm3270_vm5, %v5337_v46, %v5338_v20  ;;  %v5342_v7 = vsel %vm3270_vm5, %v5340_v36, %v5341_v5  ;;  %5712 = vmatpush.msrb.mxu3 %v7012_v14  ;;  %v7079_v46 = vld [vmem:[%s16315_s3 + $0x588] sm:$0xff]  ;;  %v7046_v36 = vld [vmem:[%s16315_s3 + $0x480] sm:$0xff]  ;;  %v7044_v14 = vld [vmem:[%s16315_s3 + $0x470] sm:$0xff] }
 0xc13   : > { %v5388_v63 = vmax.f32 %v5301_v16, %v5339_v48  ;;  %v5389_v52 = vmax.f32 %v5302_v32, %v5342_v7  ;;  %5693 = vmatpush.msrb.mxu1 %v6995_v29  ;;  %5802 = vmatpush.msra.mxu2 %v7048_v53  ;;  %v6991_v16 = vld [vmem:[%s16315_s3 + $0x2d0] sm:$0xff]  ;;  %v7026_v48 = vld [vmem:[%s16315_s3 + $0x3e8] sm:$0xff]  ;;  %v7078_v7 = vld [vmem:[%s16315_s3 + $0x580] sm:$0xff] }
 0xc14   : > { %5713 = vmatpush.msrb.mxu3 %v7011_v49  ;;  %v7007_v32 = vld [vmem:[%s16315_s3 + $0x350] sm:$0xff]  ;;  %v7098_v49 = vld [vmem:[%s16315_s3 + $0x618] sm:$0xff]  ;;  %v7042_v53 = vld [vmem:[%s16315_s3 + $0x460] sm:$0xff] }
 0xc15   : > { %5472 = vmatmul.f32.vlgmr.msra.gmra.mxu0 %v5388_v63  ;;  %5492 = vmatmul.f32.vlgmr.msra.gmra.mxu1 %v5389_v52  ;;  %v5566_v23 = vrot.slane %v5389_v52, 4  ;;  %v5565_v0 = vrot.slane %v5388_v63, 4  ;;  %v7045_v63 = vld [vmem:[%s16315_s3 + $0x478] sm:$0xff]  ;;  %v7064_v52 = vld [vmem:[%s16315_s3 + $0x510] sm:$0xff] }
 0xc16   : > { %5725 = vmatpush.msra.mxu0 %v7035_v17  ;;  %5694 = vmatpush.msrb.mxu1 %v6994_v33  ;;  %v7077_v17 = vld [vmem:[%s16315_s3 + $0x578] sm:$0xff]  ;;  %v7023_v29 = vld [vmem:[%s16315_s3 + $0x3d0] sm:$0xff]  ;;  %v7075_v33 = vld [vmem:[%s16315_s3 + $0x568] sm:$0xff] }
 0xc17   : > { %5588 = vmatmul.f32.vlgmr.msra.gmra.mxu3 %v5565_v0  ;;  %5608 = vmatmul.f32.vlgmr.msrb.gmra.mxu2 %v5566_v23  ;;  %v7063_v23 = vld [vmem:[%s16315_s3 + $0x508] sm:$0xff]  ;;  %v7076_v0 = vld [vmem:[%s16315_s3 + $0x570] sm:$0xff] }
 0xc18   : > { %5726 = vmatpush.msra.mxu0 %v7034_v43  ;;  %5714 = vmatpush.msrb.mxu3 %v7010_v61  ;;  %v7043_v43 = vld [vmem:[%s16315_s3 + $0x468] sm:$0xff] }
 0xc19   : > { %5695 = vmatpush.msrb.mxu1 %v6993_v27  ;;  %5803 = vmatpush.msra.mxu2 %v7047_v54  ;;  %v7096_v61 = vld [vmem:[%s16315_s3 + $0x608] sm:$0xff]  ;;  %v7074_v27 = vld [vmem:[%s16315_s3 + $0x560] sm:$0xff] }
 0xc1a   : > { %5727 = vmatpush.msra.mxu0 %v7033_v8  ;;  %5715 = vmatpush.msrb.mxu3 %v7009_v15  ;;  %v7062_v8 = vld [vmem:[%s16315_s3 + $0x500] sm:$0xff]  ;;  %v7041_v15 = vld [vmem:[%s16315_s3 + $0x458] sm:$0xff]  ;;  %v7059_v54 = vld [vmem:[%s16315_s3 + $0x4e8] sm:$0xff] }
 0xc1b   : > { %5696 = vmatpush.msrb.mxu1 %v6992_v34  ;;  %5804 = vmatpush.msra.mxu2 %v7046_v36  ;;  %v7040_v34 = vld [vmem:[%s16315_s3 + $0x450] sm:$0xff]  ;;  %v7069_v36 = vld [vmem:[%s16315_s3 + $0x538] sm:$0xff] }
 0xc1c   : > { %5728 = vmatpush.msra.mxu0 %v7032_v47  ;;  %5716 = vmatpush.msrb.mxu3 %v7008_v18  ;;  %v7061_v47 = vld [vmem:[%s16315_s3 + $0x4f8] sm:$0xff]  ;;  %v7095_v18 = vld [vmem:[%s16315_s3 + $0x600] sm:$0xff] }
 0xc1d   : > { %6990 = vmatmul.msk.f32.vlgmr.msrb.gmra.mxu0 %vm5452_vm6, %v5567_v37  ;;  %5697 = vmatpush.msrb.mxu1 %v6991_v16  ;;  %v7060_v37 = vld [vmem:[%s16315_s3 + $0x4f0] sm:$0xff]  ;;  %v7039_v16 = vld [vmem:[%s16315_s3 + $0x448] sm:$0xff] }
 0xc1e   : > { %5729 = vmatpush.msra.mxu0 %v7031_v6  ;;  %5717 = vmatpush.msrb.mxu3 %v7007_v32  ;;  %v7073_v6 = vld [vmem:[%s16315_s3 + $0x558] sm:$0xff] }
 0xc1f   : > { %5818 = vmatpush.msra.mxu1 %v7068_v45  ;;  %5805 = vmatpush.msra.mxu2 %v7045_v63  ;;  %v7094_v32 = vld [vmem:[%s16315_s3 + $0x5f8] sm:$0xff]  ;;  %v7058_v45 = vld [vmem:[%s16315_s3 + $0x4e0] sm:$0xff] }
 0xc20   : > { %5730 = vmatpush.msra.mxu0 %v7030_v12  ;;  %5841 = vmatpush.msra.mxu3 %v7081_v25  ;;  %v7072_v12 = vld [vmem:[%s16315_s3 + $0x550] sm:$0xff]  ;;  %v7038_v25 = vld [vmem:[%s16315_s3 + $0x440] sm:$0xff] }
 0xc21   : > { %5819 = vmatpush.msra.mxu1 %v7067_v58  ;;  %5806 = vmatpush.msra.mxu2 %v7044_v14  ;;  %v7093_v58 = vld [vmem:[%s16315_s3 + $0x5f0] sm:$0xff]  ;;  %v7054_v63 = vld [vmem:[%s16315_s3 + $0x4c0] sm:$0xff] }
 0xc22   : > { %5731 = vmatpush.msra.mxu0 %v7029_v51  ;;  %5842 = vmatpush.msra.mxu3 %v7080_v4  ;;  %v7071_v51 = vld [vmem:[%s16315_s3 + $0x548] sm:$0xff]  ;;  %v7070_v4 = vld [vmem:[%s16315_s3 + $0x540] sm:$0xff]  ;;  %v7089_v14 = vld [vmem:[%s16315_s3 + $0x5d0] sm:$0xff] }
 0xc23   : > { %5820 = vmatpush.msra.mxu1 %v7066_v30  ;;  %5807 = vmatpush.msra.mxu2 %v7043_v43  ;;  %v7037_v30 = vld [vmem:[%s16315_s3 + $0x438] sm:$0xff] }
 0xc24   : > { %v14822_v50 = vpop.permute.xlu2 %5080  ;;  %5732 = vmatpush.msra.mxu0 %v7028_v56  ;;  %5843 = vmatpush.msra.mxu3 %v7079_v46  ;;  %v7057_v56 = vld [vmem:[%s16315_s3 + $0x4d8] sm:$0xff]  ;;  %v7056_v46 = vld [vmem:[%s16315_s3 + $0x4d0] sm:$0xff] }
 0xc25   : > { %v14830_v44 = vmax.f32 %v5027_v62, %v14822_v50  ;;  %5821 = vmatpush.msra.mxu1 %v7065_v22  ;;  %v7024_v62 = vld [vmem:[%s16315_s3 + $0x3d8] sm:$0xff]  ;;  %5808 = vmatpush.msra.mxu2 %v7042_v53 }
 0xc26   : > { %5733 = vmatpush.msra.mxu0 %v7027_v42  ;;  %5844 = vmatpush.msra.mxu3 %v7078_v7  ;;  %v7092_v42 = vld [vmem:[%s16315_s3 + $0x5e8] sm:$0xff]  ;;  %v7114_v22 = vld [vmem:[%s16315_s3 + $0x698] sm:$0xff] }
 0xc27   : > { %5182 = vrot.lane.b32.xlu0 %v14830_v44, %s7850_s30  ;;  %5822 = vmatpush.msra.mxu1 %v7064_v52  ;;  %v7055_v7 = vld [vmem:[%s16315_s3 + $0x4c8] sm:$0xff] }
 0xc28   : > { %5734 = vmatpush.msra.mxu0 %v7026_v48  ;;  %5845 = vmatpush.msra.mxu3 %v7077_v17  ;;  %v7091_v48 = vld [vmem:[%s16315_s3 + $0x5e0] sm:$0xff]  ;;  %v7112_v52 = vld [vmem:[%s16315_s3 + $0x688] sm:$0xff] }
 0xc29   : > { %5823 = vmatpush.msra.mxu1 %v7063_v23  ;;  %5809 = vmatpush.msra.mxu2 %v7041_v15  ;;  %v7053_v23 = vld [vmem:[%s16315_s3 + $0x4b8] sm:$0xff] }
 0xc2a   : > { %5735 = vmatpush.msra.mxu0 %v7025_v35  ;;  %5846 = vmatpush.msra.mxu3 %v7076_v0  ;;  %v7113_v35 = vld [vmem:[%s16315_s3 + $0x690] sm:$0xff] }
 0xc2b   : > { %5824 = vmatpush.msra.mxu1 %v7062_v8  ;;  %5810 = vmatpush.msra.mxu2 %v7040_v34 }
 0xc2c   : > { %5736 = vmatpush.msra.mxu0 %v7024_v62  ;;  %5847 = vmatpush.msra.mxu3 %v7075_v33  ;;  %v7090_v62 = vld [vmem:[%s16315_s3 + $0x5d8] sm:$0xff] }
 0xc2d   : > { %5825 = vmatpush.msra.mxu1 %v7061_v47  ;;  %5811 = vmatpush.msra.mxu2 %v7039_v16  ;;  %v7110_v33 = vld [vmem:[%s16315_s3 + $0x678] sm:$0xff]  ;;  %v7107_v16 = vld [vmem:[%s16315_s3 + $0x660] sm:$0xff] }
 0xc2e   : > { %5737 = vmatpush.msra.mxu0 %v7023_v29  ;;  %5848 = vmatpush.msra.mxu3 %v7074_v27  ;;  %v7111_v29 = vld [vmem:[%s16315_s3 + $0x680] sm:$0xff] }
 0xc2f   : > { %5826 = vmatpush.msra.mxu1 %v7060_v37  ;;  %5812 = vmatpush.msra.mxu2 %v7038_v25  ;;  %v7087_v27 = vld [vmem:[%s16315_s3 + $0x5c0] sm:$0xff]  ;;  %v7109_v37 = vld [vmem:[%s16315_s3 + $0x670] sm:$0xff] }
 0xc30   : > { %5908 = vmatpush.msrb.mxu0 %v7098_v49  ;;  %5849 = vmatpush.msra.mxu3 %v7073_v6  ;;  %v7088_v49 = vld [vmem:[%s16315_s3 + $0x5c8] sm:$0xff] }
 0xc31   : > { %5827 = vmatpush.msra.mxu1 %v7059_v54  ;;  %5813 = vmatpush.msra.mxu2 %v7037_v30  ;;  %v7105_v30 = vld [vmem:[%s16315_s3 + $0x650] sm:$0xff] }
 0xc32   : > { %5909 = vmatpush.msrb.mxu0 %v7097_v3  ;;  %5850 = vmatpush.msra.mxu3 %v7072_v12 }
 0xc33   : > { %5828 = vmatpush.msra.mxu1 %v7058_v45  ;;  %5928 = vmatpush.msrb.mxu2 %v7114_v22  ;;  %v7084_v45 = vld [vmem:[%s16315_s3 + $0x5a8] sm:$0xff] }
 0xc34   : > { %5910 = vmatpush.msrb.mxu0 %v7096_v61  ;;  %5851 = vmatpush.msra.mxu3 %v7071_v51 }
 0xc35   : > { %5829 = vmatpush.msra.mxu1 %v7057_v56  ;;  %5929 = vmatpush.msrb.mxu2 %v7113_v35 }
 0xc36   : > { %5911 = vmatpush.msrb.mxu0 %v7095_v18  ;;  %5852 = vmatpush.msra.mxu3 %v7070_v4  ;;  %v7085_v18 = vld [vmem:[%s16315_s3 + $0x5b0] sm:$0xff] }
 0xc37   : > { %5830 = vmatpush.msra.mxu1 %v7056_v46  ;;  %5930 = vmatpush.msrb.mxu2 %v7112_v52  ;;  %v7104_v46 = vld [vmem:[%s16315_s3 + $0x648] sm:$0xff]  ;;  %v7142_v52 = vld [vmem:[%s16315_s3 + $0x770] sm:$0xff] }
 0xc38   : > { %5912 = vmatpush.msrb.mxu0 %v7094_v32  ;;  %5853 = vmatpush.msra.mxu3 %v7069_v36 }
 0xc39   : > { %5831 = vmatpush.msra.mxu1 %v7055_v7  ;;  %5931 = vmatpush.msrb.mxu2 %v7111_v29  ;;  %v7144_v7 = vld [vmem:[%s16315_s3 + $0x780] sm:$0xff] }
 0xc3a   : > { %5913 = vmatpush.msrb.mxu0 %v7093_v58  ;;  %v7083_v58 = vld [vmem:[%s16315_s3 + $0x5a0] sm:$0xff] }
 0xc3b   : > { %5832 = vmatpush.msra.mxu1 %v7054_v63  ;;  %5932 = vmatpush.msrb.mxu2 %v7110_v33  ;;  %v7143_v63 = vld [vmem:[%s16315_s3 + $0x778] sm:$0xff] }
 0xc3c   : > { %5914 = vmatpush.msrb.mxu0 %v7092_v42 }
 0xc3d   : > { %5833 = vmatpush.msra.mxu1 %v7053_v23  ;;  %5933 = vmatpush.msrb.mxu2 %v7109_v37  ;;  %v7125_v23 = vld [vmem:[%s16315_s3 + $0x6f0] sm:$0xff]  ;;  %v7122_v37 = vld [vmem:[%s16315_s3 + $0x6d8] sm:$0xff] }
 0xc3e   : > { %5915 = vmatpush.msrb.mxu0 %v7091_v48  ;;  %v7539_v17 = vpop.permute.xlu1 %7538 }
 0xc3f   : > { %v7541_v0 = vunpack.i.h.bf16 %v7539_v17  ;;  %v7540_v43 = vunpack.i.l.bf16 %v7539_v17  ;;  %v7159_v17 = vld [vmem:[%s16315_s3 + $0x7f8] sm:$0xff] }
 0xc40   : > { %5916 = vmatpush.msrb.mxu0 %v7090_v62 }
 0xc41   : > { %v5092_v3 = vsel %vm533_vm3, %v7540_v43, %v7541_v0  ;;  %v5093_v8 = vsel %vm533_vm3, %v7541_v0, %v14822_v50  ;;  %v7141_v0 = vld [vmem:[%s16315_s3 + $0x768] sm:$0xff]  ;;  %v7158_v43 = vld [vmem:[%s16315_s3 + $0x7f0] sm:$0xff] }
 0xc42   : > { %5917 = vmatpush.msrb.mxu0 %v7089_v14  ;;  %v14992_v61 = vmax.f32 %v5025_v2, %v5092_v3  ;;  %v14996_v53 = vmax.f32 %v5026_v31, %v5093_v8  ;;  %v7544_v47 = vpop.permute.xlu0 %7543  ;;  %v7108_v31 = vld [vmem:[%s16315_s3 + $0x668] sm:$0xff]  ;;  %v7101_v14 = vld [vmem:[%s16315_s3 + $0x630] sm:$0xff]  ;;  %v7140_v3 = vld [vmem:[%s16315_s3 + $0x760] sm:$0xff] }
 0xc43   : > { %v7546_v50 = vunpack.i.h.bf16 %v7544_v47  ;;  %v7545_v15 = vunpack.i.l.bf16 %v7544_v47  ;;  %5934 = vmatpush.msrb.mxu2 %v7108_v31  ;;  %v7157_v8 = vld [vmem:[%s16315_s3 + $0x7e8] sm:$0xff]  ;;  %v7123_v47 = vld [vmem:[%s16315_s3 + $0x6e0] sm:$0xff]  ;;  %v7121_v31 = vld [vmem:[%s16315_s3 + $0x6d0] sm:$0xff] }
 0xc44   : > { %5918 = vmatpush.msrb.mxu0 %v7088_v49  ;;  %v7547_v39 = vpack.i.bf16 %v14996_v53, %v14992_v61  ;;  %v7124_v49 = vld [vmem:[%s16315_s3 + $0x6e8] sm:$0xff] }
 0xc45   : > { %v5190_v2 = vsel %vm1051_vm4, %v7545_v15, %v7546_v50  ;;  %5935 = vmatpush.msrb.mxu2 %v7107_v16  ;;  %v7100_v15 = vld [vmem:[%s16315_s3 + $0x628] sm:$0xff] }
 0xc46   : > { %5919 = vmatpush.msrb.mxu0 %v7087_v27  ;;  %v15014_v6 = vmax.f32 %v14311_v59, %v5190_v2  ;;  %v5171_v34 = vpop.permute.xlu1 %5170  ;;  %7548 = vrot.lane.b32.xlu2 %v7547_v39, %s7850_s30  ;;  %v7139_v27 = vld [vmem:[%s16315_s3 + $0x758] sm:$0xff]  ;;  %v7138_v39 = vld [vmem:[%s16315_s3 + $0x750] sm:$0xff]  ;;  %v7099_v2 = vld [vmem:[%s16315_s3 + $0x620] sm:$0xff] }
 0xc47   : > { %v5191_v54 = vsel %vm1051_vm4, %v7546_v50, %v5171_v34  ;;  %v15022_v12 = vmax.f32 %v14329_v1, %v5171_v34  ;;  %v7106_v1 = vld [vmem:[%s16315_s3 + $0x658] sm:$0xff]  ;;  %v7156_v50 = vld [vmem:[%s16315_s3 + $0x7e0] sm:$0xff]  ;;  %v7137_v34 = vld [vmem:[%s16315_s3 + $0x748] sm:$0xff] }
 0xc48   : > { %5920 = vmatpush.msrb.mxu0 %v7086_v55  ;;  %v5265_v59 = vrot.slane %v15014_v6, 1  ;;  %v15029_v32 = vmax.f32 %v14315_v19, %v5191_v54  ;;  %5936 = vmatpush.msrb.mxu2 %v7106_v1  ;;  %v7155_v55 = vld [vmem:[%s16315_s3 + $0x7d8] sm:$0xff]  ;;  %v7190_v54 = vld [vmem:[%s16315_s3 + $0x8e8] sm:$0xff] }
 0xc49   : > { %v5269_v51 = vrot.slane %v15022_v12, 1  ;;  %v7120_v16 = vld [vmem:[%s16315_s3 + $0x6c8] sm:$0xff] }
 0xc4a   : > { %5921 = vmatpush.msrb.mxu0 %v7085_v18  ;;  %v5267_v25 = vrot.slane %v15029_v32, 1  ;;  %v5266_v19 = vsel %vm1499_vm2, %v5259_v60, %v5265_v59  ;;  %5937 = vmatpush.msrb.mxu2 %v7105_v30  ;;  %v7154_v18 = vld [vmem:[%s16315_s3 + $0x7d0] sm:$0xff]  ;;  %v7153_v1 = vld [vmem:[%s16315_s3 + $0x7c8] sm:$0xff]  ;;  %v7152_v30 = vld [vmem:[%s16315_s3 + $0x7c0] sm:$0xff] }
 0xc4b   : > { %v5270_v56 = vsel %vm1499_vm2, %v5263_v13, %v5269_v51  ;;  %v15053_v4 = vmax.f32 %v14667_v26, %v5266_v19  ;;  %v7189_v19 = vld [vmem:[%s16315_s3 + $0x8e0] sm:$0xff] }
 0xc4c   : > { %5922 = vmatpush.msrb.mxu0 %v7084_v45  ;;  %v5268_v60 = vsel %vm1499_vm2, %v5261_v21, %v5267_v25  ;;  %v15064_v42 = vmax.f32 %v14479_v9, %v5270_v56  ;;  %5938 = vmatpush.msrb.mxu2 %v7104_v46  ;;  %v7136_v45 = vld [vmem:[%s16315_s3 + $0x740] sm:$0xff]  ;;  %v7135_v56 = vld [vmem:[%s16315_s3 + $0x738] sm:$0xff] }
 0xc4d   : > { %v15067_v13 = vmax.f32 %v14664_v41, %v5268_v60  ;;  %v5346_v26 = vrot.slane %v15053_v4, 2  ;;  %v7103_v41 = vld [vmem:[%s16315_s3 + $0x640] sm:$0xff]  ;;  %v7188_v60 = vld [vmem:[%s16315_s3 + $0x8d8] sm:$0xff] }
 0xc4e   : > { %5923 = vmatpush.msrb.mxu0 %v7083_v58  ;;  %v5350_v36 = vrot.slane %v15064_v42, 2  ;;  %5939 = vmatpush.msrb.mxu2 %v7103_v41  ;;  %v7119_v58 = vld [vmem:[%s16315_s3 + $0x6c0] sm:$0xff]  ;;  %v7118_v46 = vld [vmem:[%s16315_s3 + $0x6b8] sm:$0xff] }
 0xc4f   : > { %v5347_v9 = vsel %vm3270_vm5, %v5338_v20, %v5346_v26  ;;  %v5348_v21 = vrot.slane %v15067_v13, 2  ;;  %v7151_v41 = vld [vmem:[%s16315_s3 + $0x7b8] sm:$0xff] }
 0xc50   : > { %v5391_v22 = vmax.f32 %v14700_v57, %v5347_v9  ;;  %v5351_v48 = vsel %vm3270_vm5, %v5344_v28, %v5350_v36  ;;  %v7127_v28 = vld [vmem:[%s16315_s3 + $0x700] sm:$0xff]  ;;  %v7134_v9 = vld [vmem:[%s16315_s3 + $0x730] sm:$0xff] }
 0xc51   : > { %v5393_v20 = vmax.f32 %v14534_v40, %v5351_v48  ;;  %v5349_v35 = vsel %vm3270_vm5, %v5341_v5, %v5348_v21  ;;  %v7160_v40 = vld [vmem:[%s16315_s3 + $0x800] sm:$0xff]  ;;  %v7126_v5 = vld [vmem:[%s16315_s3 + $0x6f8] sm:$0xff]  ;;  %v7117_v48 = vld [vmem:[%s16315_s3 + $0x6b0] sm:$0xff] }
 0xc52   : > { %5698 = vmatmul.f32.vlgmr.msrb.gmra.mxu1 %v5391_v22  ;;  %v5791_v57 = vrot.slane %v5391_v22, 4  ;;  %v5392_v62 = vmax.f32 %v14702_v24, %v5349_v35  ;;  %v7102_v24 = vld [vmem:[%s16315_s3 + $0x638] sm:$0xff]  ;;  %v7187_v22 = vld [vmem:[%s16315_s3 + $0x8d0] sm:$0xff]  ;;  %v7186_v35 = vld [vmem:[%s16315_s3 + $0x8c8] sm:$0xff] }
 0xc53   : > { %7036 = vmatmul.msk.f32.vlgmr.msra.gmra.mxu0 %vm5452_vm6, %v5393_v20  ;;  %6024 = vmatpush.msrb.mxu1 %v7144_v7  ;;  %v5793_v33 = vrot.slane %v5393_v20, 4  ;;  %v7133_v7 = vld [vmem:[%s16315_s3 + $0x728] sm:$0xff]  ;;  %v7150_v20 = vld [vmem:[%s16315_s3 + $0x7b0] sm:$0xff] }
 0xc54   : > { %5718 = vmatmul.f32.vlgmr.msrb.gmra.mxu3 %v5392_v62  ;;  %5814 = vmatmul.f32.vlgmr.msra.gmra.mxu2 %v5791_v57  ;;  %v5792_v29 = vrot.slane %v5392_v62, 4  ;;  %v7116_v57 = vld [vmem:[%s16315_s3 + $0x6a8] sm:$0xff]  ;;  %v7132_v62 = vld [vmem:[%s16315_s3 + $0x720] sm:$0xff] }
 0xc55   : > { %5951 = vmatpush.msrb.mxu3 %v7127_v28  ;;  %6025 = vmatpush.msrb.mxu1 %v7143_v63  ;;  %v7149_v28 = vld [vmem:[%s16315_s3 + $0x7a8] sm:$0xff]  ;;  %v7185_v63 = vld [vmem:[%s16315_s3 + $0x8c0] sm:$0xff] }
 0xc56   : > { %6044 = vmatpush.msra.mxu0 %v7160_v40  ;;  %5940 = vmatpush.msrb.mxu2 %v7102_v24  ;;  %v7115_v40 = vld [vmem:[%s16315_s3 + $0x6a0] sm:$0xff]  ;;  %v7131_v24 = vld [vmem:[%s16315_s3 + $0x718] sm:$0xff] }
 0xc57   : > { %5952 = vmatpush.msrb.mxu3 %v7126_v5  ;;  %6026 = vmatpush.msrb.mxu1 %v7142_v52  ;;  %v7173_v5 = vld [vmem:[%s16315_s3 + $0x868] sm:$0xff]  ;;  %v7148_v52 = vld [vmem:[%s16315_s3 + $0x7a0] sm:$0xff] }
 0xc58   : > { %6045 = vmatpush.msra.mxu0 %v7159_v17  ;;  %5941 = vmatpush.msrb.mxu2 %v7101_v14  ;;  %v7130_v17 = vld [vmem:[%s16315_s3 + $0x710] sm:$0xff]  ;;  %v7184_v14 = vld [vmem:[%s16315_s3 + $0x8b8] sm:$0xff] }
 0xc59   : > { %5953 = vmatpush.msrb.mxu3 %v7125_v23  ;;  %6027 = vmatpush.msrb.mxu1 %v7141_v0  ;;  %v7172_v23 = vld [vmem:[%s16315_s3 + $0x860] sm:$0xff]  ;;  %v7147_v0 = vld [vmem:[%s16315_s3 + $0x798] sm:$0xff] }
 0xc5a   : > { %5834 = vmatmul.f32.vlgmr.msra.gmra.mxu1 %v5792_v29  ;;  %6046 = vmatpush.msra.mxu0 %v7158_v43  ;;  %v7129_v43 = vld [vmem:[%s16315_s3 + $0x708] sm:$0xff]  ;;  %v7183_v29 = vld [vmem:[%s16315_s3 + $0x8b0] sm:$0xff] }
 0xc5b   : > { %5954 = vmatpush.msrb.mxu3 %v7124_v49  ;;  %6028 = vmatpush.msrb.mxu1 %v7140_v3  ;;  %v7171_v49 = vld [vmem:[%s16315_s3 + $0x858] sm:$0xff]  ;;  %v7206_v3 = vld [vmem:[%s16315_s3 + $0x968] sm:$0xff] }
 0xc5c   : > { %7082 = vmatmul.msk.f32.vlgmr.msra.gmra.mxu3 %vm5452_vm6, %v5793_v33  ;;  %6047 = vmatpush.msra.mxu0 %v7157_v8 }
 0xc5d   : > { %5955 = vmatpush.msrb.mxu3 %v7123_v47  ;;  %6029 = vmatpush.msrb.mxu1 %v7139_v27  ;;  %v5175_v8 = vpop.permute.xlu2 %5174  ;;  %v7146_v47 = vld [vmem:[%s16315_s3 + $0x790] sm:$0xff]  ;;  %v7182_v27 = vld [vmem:[%s16315_s3 + $0x8a8] sm:$0xff] }
 0xc5e   : > { %6048 = vmatpush.msra.mxu0 %v7156_v50  ;;  %5942 = vmatpush.msrb.mxu2 %v7100_v15  ;;  %v7170_v15 = vld [vmem:[%s16315_s3 + $0x850] sm:$0xff] }
 0xc5f   : > { %5956 = vmatpush.msrb.mxu3 %v7122_v37  ;;  %6030 = vmatpush.msrb.mxu1 %v7138_v39  ;;  %v7205_v37 = vld [vmem:[%s16315_s3 + $0x960] sm:$0xff] }
 0xc60   : > { %6049 = vmatpush.msra.mxu0 %v7155_v55  ;;  %5943 = vmatpush.msrb.mxu2 %v7099_v2  ;;  %v7145_v55 = vld [vmem:[%s16315_s3 + $0x788] sm:$0xff]  ;;  %v7181_v2 = vld [vmem:[%s16315_s3 + $0x8a0] sm:$0xff] }
 0xc61   : > { %5957 = vmatpush.msrb.mxu3 %v7121_v31  ;;  %6031 = vmatpush.msrb.mxu1 %v7137_v34  ;;  %v7169_v31 = vld [vmem:[%s16315_s3 + $0x848] sm:$0xff] }
 0xc62   : > { %6050 = vmatpush.msra.mxu0 %v7154_v18  ;;  %6134 = vmatpush.msra.mxu2 %v7190_v54  ;;  %v7180_v54 = vld [vmem:[%s16315_s3 + $0x898] sm:$0xff] }
 0xc63   : > { %5958 = vmatpush.msrb.mxu3 %v7120_v16  ;;  %6032 = vmatpush.msrb.mxu1 %v7136_v45 }
 0xc64   : > { %6051 = vmatpush.msra.mxu0 %v7153_v1  ;;  %6135 = vmatpush.msra.mxu2 %v7189_v19  ;;  %v7168_v1 = vld [vmem:[%s16315_s3 + $0x840] sm:$0xff]  ;;  %v7203_v19 = vld [vmem:[%s16315_s3 + $0x950] sm:$0xff] }
 0xc65   : > { %5959 = vmatpush.msrb.mxu3 %v7119_v58  ;;  %6033 = vmatpush.msrb.mxu1 %v7135_v56 }
 0xc66   : > { %6052 = vmatpush.msra.mxu0 %v7152_v30  ;;  %6136 = vmatpush.msra.mxu2 %v7188_v60 }
 0xc67   : > { %5960 = vmatpush.msrb.mxu3 %v7118_v46  ;;  %6034 = vmatpush.msrb.mxu1 %v7134_v9  ;;  %v7167_v46 = vld [vmem:[%s16315_s3 + $0x838] sm:$0xff] }
 0xc68   : > { %6053 = vmatpush.msra.mxu0 %v7151_v41  ;;  %6137 = vmatpush.msra.mxu2 %v7187_v22  ;;  %v7166_v22 = vld [vmem:[%s16315_s3 + $0x830] sm:$0xff] }
 0xc69   : > { %5961 = vmatpush.msrb.mxu3 %v7117_v48  ;;  %6035 = vmatpush.msrb.mxu1 %v7133_v7  ;;  %v7201_v48 = vld [vmem:[%s16315_s3 + $0x940] sm:$0xff] }
 0xc6a   : > { %6054 = vmatpush.msra.mxu0 %v7150_v20  ;;  %6138 = vmatpush.msra.mxu2 %v7186_v35 }
 0xc6b   : > { %5962 = vmatpush.msrb.mxu3 %v7116_v57  ;;  %6036 = vmatpush.msrb.mxu1 %v7132_v62  ;;  %v7165_v57 = vld [vmem:[%s16315_s3 + $0x828] sm:$0xff] }
 0xc6c   : > { %6055 = vmatpush.msra.mxu0 %v7149_v28  ;;  %6139 = vmatpush.msra.mxu2 %v7185_v63  ;;  %v7200_v28 = vld [vmem:[%s16315_s3 + $0x938] sm:$0xff] }
 0xc6d   : > { %5963 = vmatpush.msrb.mxu3 %v7115_v40  ;;  %6037 = vmatpush.msrb.mxu1 %v7131_v24 }
 0xc6e   : > { %6056 = vmatpush.msra.mxu0 %v7148_v52  ;;  %6140 = vmatpush.msra.mxu2 %v7184_v14  ;;  %v7163_v52 = vld [vmem:[%s16315_s3 + $0x818] sm:$0xff] }
 0xc6f   : > { %6067 = vmatpush.msra.mxu3 %v7173_v5  ;;  %6038 = vmatpush.msrb.mxu1 %v7130_v17 }
 0xc70   : > { %v5173_v33 = vpop.permute.xlu1 %5172  ;;  %6057 = vmatpush.msra.mxu0 %v7147_v0  ;;  %6141 = vmatpush.msra.mxu2 %v7183_v29  ;;  %v7198_v0 = vld [vmem:[%s16315_s3 + $0x928] sm:$0xff] }
 0xc71   : > { %6068 = vmatpush.msra.mxu3 %v7172_v23  ;;  %v5192_v50 = vsel %vm1051_vm4, %v5173_v33, %v5175_v8  ;;  %6039 = vmatpush.msrb.mxu1 %v7129_v43  ;;  %v7176_v23 = vld [vmem:[%s16315_s3 + $0x878] sm:$0xff]  ;;  %v7161_v43 = vld [vmem:[%s16315_s3 + $0x808] sm:$0xff]  ;;  %v7175_v33 = vld [vmem:[%s16315_s3 + $0x870] sm:$0xff] }
 0xc72   : > { %v15289_v39 = vmax.f32 %v14583_v38, %v5192_v50  ;;  %6058 = vmatpush.msra.mxu0 %v7146_v47  ;;  %v7204_v38 = vld [vmem:[%s16315_s3 + $0x958] sm:$0xff]  ;;  %6142 = vmatpush.msra.mxu2 %v7182_v27  ;;  %v7218_v47 = vld [vmem:[%s16315_s3 + $0x9c8] sm:$0xff] }
 0xc73   : > { %6069 = vmatpush.msra.mxu3 %v7171_v49  ;;  %6154 = vmatpush.msra.mxu1 %v7206_v3  ;;  %v7219_v49 = vld [vmem:[%s16315_s3 + $0x9d0] sm:$0xff]  ;;  %v7231_v27 = vld [vmem:[%s16315_s3 + $0xa28] sm:$0xff]  ;;  %v7196_v50 = vld [vmem:[%s16315_s3 + $0x918] sm:$0xff] }
 0xc74   : > { %v5271_v34 = vrot.slane %v15289_v39, 1  ;;  %v5177_v18 = vpop.permute.xlu0 %5176  ;;  %6059 = vmatpush.msra.mxu0 %v7145_v55  ;;  %6143 = vmatpush.msra.mxu2 %v7181_v2  ;;  %v7232_v3 = vld [vmem:[%s16315_s3 + $0xa30] sm:$0xff]  ;;  %v7230_v55 = vld [vmem:[%s16315_s3 + $0xa20] sm:$0xff] }
 0xc75   : > { %6070 = vmatpush.msra.mxu3 %v7170_v15  ;;  %6155 = vmatpush.msra.mxu1 %v7205_v37  ;;  %v5193_v16 = vsel %vm1051_vm4, %v5175_v8, %v5177_v18  ;;  %v15309_v45 = vmax.f32 %v14616_v10, %v5177_v18  ;;  %v7179_v10 = vld [vmem:[%s16315_s3 + $0x890] sm:$0xff]  ;;  %v7197_v8 = vld [vmem:[%s16315_s3 + $0x920] sm:$0xff]  ;;  %v7229_v18 = vld [vmem:[%s16315_s3 + $0xa18] sm:$0xff] }
 0xc76   : > { %v5272_v58 = vsel %vm1499_vm2, %v5265_v59, %v5271_v34  ;;  %v15323_v56 = vmax.f32 %v14625_v11, %v5193_v16  ;;  %v7202_v11 = vld [vmem:[%s16315_s3 + $0x948] sm:$0xff]  ;;  %6144 = vmatpush.msra.mxu2 %v7180_v54  ;;  %v7217_v37 = vld [vmem:[%s16315_s3 + $0x9c0] sm:$0xff]  ;;  %v7195_v2 = vld [vmem:[%s16315_s3 + $0x910] sm:$0xff] }
 0xc77   : > { %6071 = vmatpush.msra.mxu3 %v7169_v31  ;;  %6156 = vmatpush.msra.mxu1 %v7204_v38  ;;  %v15329_v30 = vmax.f32 %v15014_v6, %v5272_v58  ;;  %v5275_v60 = vrot.slane %v15309_v45, 1  ;;  %v7178_v6 = vld [vmem:[%s16315_s3 + $0x888] sm:$0xff]  ;;  %v7252_v31 = vld [vmem:[%s16315_s3 + $0xad0] sm:$0xff]  ;;  %v7216_v38 = vld [vmem:[%s16315_s3 + $0x9b8] sm:$0xff] }
 0xc78   : > { %v5273_v59 = vrot.slane %v15323_v56, 1  ;;  %6145 = vmatpush.msra.mxu2 %v7179_v10  ;;  %v7194_v54 = vld [vmem:[%s16315_s3 + $0x908] sm:$0xff]  ;;  %v7193_v58 = vld [vmem:[%s16315_s3 + $0x900] sm:$0xff] }
 0xc79   : > { %6072 = vmatpush.msra.mxu3 %v7168_v1  ;;  %6157 = vmatpush.msra.mxu1 %v7203_v19  ;;  %v5352_v9 = vrot.slane %v15329_v30, 2  ;;  %v5276_v41 = vsel %vm1499_vm2, %v5269_v51, %v5275_v60  ;;  %v7177_v51 = vld [vmem:[%s16315_s3 + $0x880] sm:$0xff]  ;;  %v7251_v16 = vld [vmem:[%s16315_s3 + $0xac8] sm:$0xff]  ;;  %v7215_v1 = vld [vmem:[%s16315_s3 + $0x9b0] sm:$0xff] }
 0xc7a   : > { %v5274_v7 = vsel %vm1499_vm2, %v5267_v25, %v5273_v59  ;;  %v15360_v20 = vmax.f32 %v15022_v12, %v5276_v41  ;;  %6146 = vmatpush.msra.mxu2 %v7178_v6  ;;  %v7228_v19 = vld [vmem:[%s16315_s3 + $0xa10] sm:$0xff]  ;;  %v7250_v10 = vld [vmem:[%s16315_s3 + $0xac0] sm:$0xff]  ;;  %v7192_v6 = vld [vmem:[%s16315_s3 + $0x8f8] sm:$0xff] }
 0xc7b   : > { %6073 = vmatpush.msra.mxu3 %v7167_v46  ;;  %6158 = vmatpush.msra.mxu1 %v7202_v11  ;;  %v15366_v35 = vmax.f32 %v15029_v32, %v5274_v7  ;;  %v5353_v12 = vsel %vm3270_vm5, %v5346_v26, %v5352_v9  ;;  %v7236_v32 = vld [vmem:[%s16315_s3 + $0xa50] sm:$0xff]  ;;  %v7164_v26 = vld [vmem:[%s16315_s3 + $0x820] sm:$0xff]  ;;  %v7214_v46 = vld [vmem:[%s16315_s3 + $0x9a8] sm:$0xff] }
 0xc7c   : > { %v5356_v25 = vrot.slane %v15360_v20, 2  ;;  %v5394_v62 = vmax.f32 %v15053_v4, %v5353_v12  ;;  %6147 = vmatpush.msra.mxu2 %v7177_v51  ;;  %v7235_v4 = vld [vmem:[%s16315_s3 + $0xa48] sm:$0xff]  ;;  %v7249_v41 = vld [vmem:[%s16315_s3 + $0xab8] sm:$0xff]  ;;  %v7191_v7 = vld [vmem:[%s16315_s3 + $0x8f0] sm:$0xff] }
 0xc7d   : > { %6074 = vmatpush.msra.mxu3 %v7166_v22  ;;  %6159 = vmatpush.msra.mxu1 %v7201_v48  ;;  %v5354_v63 = vrot.slane %v15366_v35, 2  ;;  %v7227_v11 = vld [vmem:[%s16315_s3 + $0xa08] sm:$0xff]  ;;  %v7213_v22 = vld [vmem:[%s16315_s3 + $0x9a0] sm:$0xff]  ;;  %v7248_v51 = vld [vmem:[%s16315_s3 + $0xab0] sm:$0xff] }
 0xc7e   : > { %5924 = vmatmul.f32.vlgmr.msrb.gmra.mxu0 %v5394_v62  ;;  %v6017_v40 = vrot.slane %v5394_v62, 4  ;;  %v5357_v24 = vsel %vm3270_vm5, %v5350_v36, %v5356_v25  ;;  %v7234_v36 = vld [vmem:[%s16315_s3 + $0xa40] sm:$0xff]  ;;  %6148 = vmatpush.msra.mxu2 %v7176_v23  ;;  %v7225_v12 = vld [vmem:[%s16315_s3 + $0x9f8] sm:$0xff]  ;;  %v7244_v23 = vld [vmem:[%s16315_s3 + $0xa90] sm:$0xff] }
 0xc7f   : > { %6075 = vmatpush.msra.mxu3 %v7165_v57  ;;  %6250 = vmatpush.msrb.mxu0 %v7236_v32  ;;  %v5396_v5 = vmax.f32 %v15064_v42, %v5357_v24  ;;  %v5355_v17 = vsel %vm3270_vm5, %v5348_v21, %v5354_v63  ;;  %v7199_v42 = vld [vmem:[%s16315_s3 + $0x930] sm:$0xff]  ;;  %v7226_v48 = vld [vmem:[%s16315_s3 + $0xa00] sm:$0xff]  ;;  %v7212_v57 = vld [vmem:[%s16315_s3 + $0x998] sm:$0xff] }
 0xc80   : > { %6160 = vmatpush.msra.mxu1 %v7200_v28  ;;  %v5395_v14 = vmax.f32 %v15067_v13, %v5355_v17  ;;  %v7162_v21 = vld [vmem:[%s16315_s3 + $0x810] sm:$0xff]  ;;  %v7233_v13 = vld [vmem:[%s16315_s3 + $0xa38] sm:$0xff]  ;;  %6149 = vmatpush.msra.mxu2 %v7175_v33  ;;  %v7247_v32 = vld [vmem:[%s16315_s3 + $0xaa8] sm:$0xff] }
 0xc81   : > { %6076 = vmatpush.msra.mxu3 %v7164_v26  ;;  %6040 = vmatmul.f32.vlgmr.msrb.gmra.mxu1 %v6017_v40  ;;  %v6019_v15 = vrot.slane %v5396_v5, 4  ;;  %v7265_v62 = vld [vmem:[%s16315_s3 + $0xb38] sm:$0xff]  ;;  %v7211_v28 = vld [vmem:[%s16315_s3 + $0x990] sm:$0xff]  ;;  %v7210_v24 = vld [vmem:[%s16315_s3 + $0x988] sm:$0xff] }
 0xc82   : > { %6251 = vmatpush.msrb.mxu0 %v7235_v4  ;;  %7128 = vmatmul.msk.f32.vlgmr.msrb.gmra.mxu3 %vm5452_vm6, %v5396_v5  ;;  %v6018_v29 = vrot.slane %v5395_v14, 4  ;;  %v7224_v26 = vld [vmem:[%s16315_s3 + $0x9f0] sm:$0xff]  ;;  %v7246_v4 = vld [vmem:[%s16315_s3 + $0xaa0] sm:$0xff]  ;;  %v7223_v5 = vld [vmem:[%s16315_s3 + $0x9e8] sm:$0xff] }
 0xc83   : > { %6077 = vmatpush.msra.mxu3 %v7163_v52  ;;  %5944 = vmatmul.f32.vlgmr.msrb.gmra.mxu2 %v5395_v14  ;;  %v7264_v40 = vld [vmem:[%s16315_s3 + $0xb30] sm:$0xff]  ;;  %v7263_v52 = vld [vmem:[%s16315_s3 + $0xb28] sm:$0xff]  ;;  %v7245_v17 = vld [vmem:[%s16315_s3 + $0xa98] sm:$0xff] }
 0xc84   : > { %6252 = vmatpush.msrb.mxu0 %v7234_v36  ;;  %6161 = vmatpush.msra.mxu1 %v7199_v42  ;;  %v7209_v14 = vld [vmem:[%s16315_s3 + $0x980] sm:$0xff]  ;;  %v7282_v33 = vld [vmem:[%s16315_s3 + $0xbb8] sm:$0xff] }
 0xc85   : > { %6078 = vmatpush.msra.mxu3 %v7162_v21  ;;  %6270 = vmatpush.msrb.mxu2 %v7252_v31  ;;  %v7222_v36 = vld [vmem:[%s16315_s3 + $0x9e0] sm:$0xff]  ;;  %v7259_v31 = vld [vmem:[%s16315_s3 + $0xb08] sm:$0xff] }
 0xc86   : > { %6253 = vmatpush.msrb.mxu0 %v7233_v13  ;;  %6162 = vmatpush.msra.mxu1 %v7198_v0  ;;  %v7262_v21 = vld [vmem:[%s16315_s3 + $0xb20] sm:$0xff]  ;;  %v7208_v0 = vld [vmem:[%s16315_s3 + $0x978] sm:$0xff] }
 0xc87   : > { %6079 = vmatpush.msra.mxu3 %v7161_v43  ;;  %6060 = vmatmul.f32.vlgmr.msra.gmra.mxu0 %v6018_v29  ;;  %v7221_v43 = vld [vmem:[%s16315_s3 + $0x9d8] sm:$0xff] }
 0xc88   : > { %6254 = vmatpush.msrb.mxu0 %v7232_v3  ;;  %6163 = vmatpush.msra.mxu1 %v7197_v8  ;;  %v7298_v29 = vld [vmem:[%s16315_s3 + $0xc38] sm:$0xff]  ;;  %v7207_v3 = vld [vmem:[%s16315_s3 + $0x970] sm:$0xff]  ;;  %v7243_v8 = vld [vmem:[%s16315_s3 + $0xa88] sm:$0xff] }
 0xc89   : > { %6177 = vmatpush.msrb.mxu3 %v7219_v49  ;;  %6271 = vmatpush.msrb.mxu2 %v7251_v16  ;;  %v7295_v16 = vld [vmem:[%s16315_s3 + $0xc20] sm:$0xff] }
 0xc8a   : > { %6255 = vmatpush.msrb.mxu0 %v7231_v27  ;;  %7174 = vmatmul.msk.f32.vlgmr.msra.gmra.mxu3 %vm5452_vm6, %v6019_v15  ;;  %v7242_v15 = vld [vmem:[%s16315_s3 + $0xa80] sm:$0xff] }
 0xc8b   : > { %6178 = vmatpush.msrb.mxu3 %v7218_v47  ;;  %6164 = vmatpush.msra.mxu1 %v7196_v50  ;;  %v7297_v47 = vld [vmem:[%s16315_s3 + $0xc30] sm:$0xff] }
 0xc8c   : > { %6256 = vmatpush.msrb.mxu0 %v7230_v55  ;;  %6272 = vmatpush.msrb.mxu2 %v7250_v10  ;;  %v7260_v50 = vld [vmem:[%s16315_s3 + $0xb10] sm:$0xff] }
 0xc8d   : > { %6179 = vmatpush.msrb.mxu3 %v7217_v37  ;;  %6165 = vmatpush.msra.mxu1 %v7195_v2  ;;  %v7281_v55 = vld [vmem:[%s16315_s3 + $0xbb0] sm:$0xff] }
 0xc8e   : > { %6257 = vmatpush.msrb.mxu0 %v7229_v18  ;;  %6273 = vmatpush.msrb.mxu2 %v7249_v41 }
 0xc8f   : > { %6180 = vmatpush.msrb.mxu3 %v7216_v38  ;;  %6166 = vmatpush.msra.mxu1 %v7194_v54  ;;  %v7280_v54 = vld [vmem:[%s16315_s3 + $0xba8] sm:$0xff] }
 0xc90   : > { %6258 = vmatpush.msrb.mxu0 %v7228_v19  ;;  %6274 = vmatpush.msrb.mxu2 %v7248_v51  ;;  %v7241_v19 = vld [vmem:[%s16315_s3 + $0xa78] sm:$0xff]  ;;  %v7293_v51 = vld [vmem:[%s16315_s3 + $0xc10] sm:$0xff] }
 0xc91   : > { %6181 = vmatpush.msrb.mxu3 %v7215_v1  ;;  %6167 = vmatpush.msra.mxu1 %v7193_v58  ;;  %v7258_v1 = vld [vmem:[%s16315_s3 + $0xb00] sm:$0xff] }
 0xc92   : > { %6259 = vmatpush.msrb.mxu0 %v7227_v11  ;;  %6275 = vmatpush.msrb.mxu2 %v7247_v32  ;;  %v7294_v11 = vld [vmem:[%s16315_s3 + $0xc18] sm:$0xff] }
 0xc93   : > { %6182 = vmatpush.msrb.mxu3 %v7214_v46  ;;  %6168 = vmatpush.msra.mxu1 %v7192_v6  ;;  %v7279_v46 = vld [vmem:[%s16315_s3 + $0xba0] sm:$0xff] }
 0xc94   : > { %6260 = vmatpush.msrb.mxu0 %v7226_v48  ;;  %6276 = vmatpush.msrb.mxu2 %v7246_v4  ;;  %v7257_v48 = vld [vmem:[%s16315_s3 + $0xaf8] sm:$0xff]  ;;  %v7276_v4 = vld [vmem:[%s16315_s3 + $0xb88] sm:$0xff] }
 0xc95   : > { %6183 = vmatpush.msrb.mxu3 %v7213_v22  ;;  %6169 = vmatpush.msra.mxu1 %v7191_v7 }
 0xc96   : > { %6261 = vmatpush.msrb.mxu0 %v7225_v12  ;;  %6277 = vmatpush.msrb.mxu2 %v7245_v17  ;;  %v7277_v12 = vld [vmem:[%s16315_s3 + $0xb90] sm:$0xff] }
 0xc97   : > { %6184 = vmatpush.msrb.mxu3 %v7212_v57  ;;  %6293 = vmatpush.msrb.mxu1 %v7265_v62  ;;  %v7256_v57 = vld [vmem:[%s16315_s3 + $0xaf0] sm:$0xff] }
 0xc98   : > { %6262 = vmatpush.msrb.mxu0 %v7224_v26  ;;  %6278 = vmatpush.msrb.mxu2 %v7244_v23  ;;  %v7239_v26 = vld [vmem:[%s16315_s3 + $0xa68] sm:$0xff] }
 0xc99   : > { %6185 = vmatpush.msrb.mxu3 %v7211_v28  ;;  %6294 = vmatpush.msrb.mxu1 %v7264_v40  ;;  %v5183_v42 = vpop.permute.xlu0 %5182  ;;  %v7292_v28 = vld [vmem:[%s16315_s3 + $0xc08] sm:$0xff] }
 0xc9a   : > { %6263 = vmatpush.msrb.mxu0 %v7223_v5  ;;  %v15559_v13 = vmax.f32 %v14830_v44, %v5183_v42  ;;  %v7261_v44 = vld [vmem:[%s16315_s3 + $0xb18] sm:$0xff]  ;;  %6279 = vmatpush.msrb.mxu2 %v7243_v8  ;;  %v7275_v5 = vld [vmem:[%s16315_s3 + $0xb80] sm:$0xff] }
 0xc9b   : > { %6186 = vmatpush.msrb.mxu3 %v7210_v24  ;;  %6295 = vmatpush.msrb.mxu1 %v7263_v52  ;;  %v7254_v24 = vld [vmem:[%s16315_s3 + $0xae0] sm:$0xff]  ;;  %v7327_v8 = vld [vmem:[%s16315_s3 + $0xd18] sm:$0xff] }
 0xc9c   : > { %6264 = vmatpush.msrb.mxu0 %v7222_v36  ;;  %v5281_v49 = vrot.slane %v15559_v13, 1  ;;  %6280 = vmatpush.msrb.mxu2 %v7242_v15  ;;  %v7237_v36 = vld [vmem:[%s16315_s3 + $0xa58] sm:$0xff]  ;;  %v7309_v15 = vld [vmem:[%s16315_s3 + $0xc90] sm:$0xff] }
 0xc9d   : > { %6187 = vmatpush.msrb.mxu3 %v7209_v14  ;;  %6296 = vmatpush.msrb.mxu1 %v7262_v21  ;;  %v7290_v14 = vld [vmem:[%s16315_s3 + $0xbf8] sm:$0xff] }
 0xc9e   : > { %6265 = vmatpush.msrb.mxu0 %v7221_v43  ;;  %v5282_v27 = vsel %vm1499_vm2, %v5275_v60, %v5281_v49  ;;  %v7296_v60 = vld [vmem:[%s16315_s3 + $0xc28] sm:$0xff]  ;;  %6281 = vmatpush.msrb.mxu2 %v7241_v19  ;;  %v7274_v21 = vld [vmem:[%s16315_s3 + $0xb78] sm:$0xff]  ;;  %v7289_v43 = vld [vmem:[%s16315_s3 + $0xbf0] sm:$0xff] }
 0xc9f   : > { %6188 = vmatpush.msrb.mxu3 %v7208_v0  ;;  %6297 = vmatpush.msrb.mxu1 %v7261_v44  ;;  %v15598_v37 = vmax.f32 %v15309_v45, %v5282_v27  ;;  %v7272_v27 = vld [vmem:[%s16315_s3 + $0xb68] sm:$0xff] }
 0xca0   : > { %6380 = vmatpush.msra.mxu0 %v7298_v29  ;;  %v7549_v2 = vpop.permute.xlu2 %7548 }
 0xca1   : > { %6189 = vmatpush.msrb.mxu3 %v7207_v3  ;;  %v5362_v45 = vrot.slane %v15598_v37, 2  ;;  %v7551_v38 = vunpack.i.h.bf16 %v7549_v2  ;;  %v7550_v18 = vunpack.i.l.bf16 %v7549_v2  ;;  %6298 = vmatpush.msrb.mxu1 %v7260_v50  ;;  %v7273_v3 = vld [vmem:[%s16315_s3 + $0xb70] sm:$0xff]  ;;  %v7287_v50 = vld [vmem:[%s16315_s3 + $0xbe0] sm:$0xff]  ;;  %v7286_v2 = vld [vmem:[%s16315_s3 + $0xbd8] sm:$0xff] }
 0xca2   : > { %6381 = vmatpush.msra.mxu0 %v7297_v47 }
 0xca3   : > { %6360 = vmatpush.msra.mxu3 %v7282_v33  ;;  %v5195_v58 = vsel %vm1051_vm4, %v7551_v38, %v5183_v42  ;;  %v5194_v10 = vsel %vm1051_vm4, %v7550_v18, %v7551_v38  ;;  %6299 = vmatpush.msrb.mxu1 %v7259_v31  ;;  %v5363_v6 = vsel %vm3270_vm5, %v5356_v25, %v5362_v45  ;;  %v7278_v25 = vld [vmem:[%s16315_s3 + $0xb98] sm:$0xff]  ;;  %v7308_v38 = vld [vmem:[%s16315_s3 + $0xc88] sm:$0xff] }
 0xca4   : > { %6382 = vmatpush.msra.mxu0 %v7296_v60  ;;  %v15636_v41 = vmax.f32 %v14996_v53, %v5195_v58  ;;  %v15639_v22 = vmax.f32 %v14992_v61, %v5194_v10  ;;  %v15645_v7 = vmax.f32 %v15360_v20, %v5363_v6  ;;  %v7240_v20 = vld [vmem:[%s16315_s3 + $0xa70] sm:$0xff]  ;;  %v7253_v42 = vld [vmem:[%s16315_s3 + $0xad8] sm:$0xff]  ;;  %v7271_v60 = vld [vmem:[%s16315_s3 + $0xb60] sm:$0xff] }
 0xca5   : > { %6361 = vmatpush.msra.mxu3 %v7281_v55  ;;  %6300 = vmatpush.msrb.mxu1 %v7258_v1  ;;  %v7310_v33 = vld [vmem:[%s16315_s3 + $0xc98] sm:$0xff]  ;;  %v7326_v55 = vld [vmem:[%s16315_s3 + $0xd10] sm:$0xff]  ;;  %v7325_v18 = vld [vmem:[%s16315_s3 + $0xd08] sm:$0xff] }
 0xca6   : > { %6383 = vmatpush.msra.mxu0 %v7295_v16  ;;  %v5279_v53 = vrot.slane %v15636_v41, 1  ;;  %v5277_v61 = vrot.slane %v15639_v22, 1  ;;  %7220 = vmatmul.msk.f32.vlgmr.msrb.gmra.mxu3 %vm5452_vm6, %v15645_v7  ;;  %v7270_v16 = vld [vmem:[%s16315_s3 + $0xb58] sm:$0xff]  ;;  %v7285_v1 = vld [vmem:[%s16315_s3 + $0xbd0] sm:$0xff]  ;;  %v6245_v58 = vrot.slane %v15645_v7, 4  ;;  %v7307_v10 = vld [vmem:[%s16315_s3 + $0xc80] sm:$0xff] }
 0xca7   : > { %6362 = vmatpush.msra.mxu3 %v7280_v54  ;;  %6301 = vmatpush.msrb.mxu1 %v7257_v48  ;;  %v7269_v6 = vld [vmem:[%s16315_s3 + $0xb50] sm:$0xff]  ;;  %v7323_v48 = vld [vmem:[%s16315_s3 + $0xcf8] sm:$0xff] }
 0xca8   : > { %6384 = vmatpush.msra.mxu0 %v7294_v11  ;;  %v5280_v62 = vsel %vm1499_vm2, %v5273_v59, %v5279_v53  ;;  %v5278_v32 = vsel %vm1499_vm2, %v5271_v34, %v5277_v61  ;;  %6282 = vmatpush.msrb.mxu2 %v7240_v20  ;;  %v7255_v34 = vld [vmem:[%s16315_s3 + $0xae8] sm:$0xff]  ;;  %v15752_v47 = vmax.f32 %v15636_v41, %v5279_v53  ;;  %v7283_v53 = vld [vmem:[%s16315_s3 + $0xbc0] sm:$0xff]  ;;  %v7322_v20 = vld [vmem:[%s16315_s3 + $0xcf0] sm:$0xff] }
 0xca9   : > { %6363 = vmatpush.msra.mxu3 %v7279_v46  ;;  %v15681_v40 = vmax.f32 %v15323_v56, %v5280_v62  ;;  %v15684_v59 = vmax.f32 %v15289_v39, %v5278_v32  ;;  %6302 = vmatpush.msrb.mxu1 %v7256_v57  ;;  %v7291_v56 = vld [vmem:[%s16315_s3 + $0xc00] sm:$0xff]  ;;  %v15775_v31 = vmax.f32 %v15639_v22, %v5277_v61  ;;  %v7284_v41 = vld [vmem:[%s16315_s3 + $0xbc8] sm:$0xff]  ;;  %v7306_v22 = vld [vmem:[%s16315_s3 + $0xc78] sm:$0xff] }
 0xcaa   : > { %6385 = vmatpush.msra.mxu0 %v7293_v51  ;;  %v7238_v39 = vld [vmem:[%s16315_s3 + $0xa60] sm:$0xff]  ;;  %6283 = vmatpush.msrb.mxu2 %v7239_v26  ;;  %v5366_v54 = vrot.slane %v15752_v47, 2  ;;  %v7305_v61 = vld [vmem:[%s16315_s3 + $0xc70] sm:$0xff]  ;;  %v7357_v57 = vld [vmem:[%s16315_s3 + $0xe08] sm:$0xff] }
 0xcab   : > { %6364 = vmatpush.msra.mxu3 %v7278_v25  ;;  %v5358_v52 = vrot.slane %v15684_v59, 2  ;;  %v5360_v17 = vrot.slane %v15681_v40, 2  ;;  %6303 = vmatpush.msrb.mxu1 %v7255_v34  ;;  %v7324_v46 = vld [vmem:[%s16315_s3 + $0xd00] sm:$0xff]  ;;  %v5364_v11 = vrot.slane %v15775_v31, 2  ;;  %v7268_v25 = vld [vmem:[%s16315_s3 + $0xb48] sm:$0xff] }
 0xcac   : > { %6386 = vmatpush.msra.mxu0 %v7292_v28  ;;  %6284 = vmatpush.msrb.mxu2 %v7238_v39  ;;  %v7267_v62 = vld [vmem:[%s16315_s3 + $0xb40] sm:$0xff]  ;;  %v7304_v32 = vld [vmem:[%s16315_s3 + $0xc68] sm:$0xff]  ;;  %v7343_v39 = vld [vmem:[%s16315_s3 + $0xd98] sm:$0xff] }
 0xcad   : > { %6365 = vmatpush.msra.mxu3 %v7277_v12  ;;  %v5359_v23 = vsel %vm3270_vm5, %v5352_v9, %v5358_v52  ;;  %v5361_v0 = vsel %vm3270_vm5, %v5354_v63, %v5360_v17  ;;  %6304 = vmatpush.msrb.mxu1 %v7254_v24  ;;  %v7328_v9 = vld [vmem:[%s16315_s3 + $0xd20] sm:$0xff]  ;;  %v5367_v7 = vsel %vm3270_vm5, %v5360_v17, %v5366_v54  ;;  %v7321_v28 = vld [vmem:[%s16315_s3 + $0xce8] sm:$0xff]  ;;  %v7319_v24 = vld [vmem:[%s16315_s3 + $0xcd8] sm:$0xff] }
 0xcae   : > { %6387 = vmatpush.msra.mxu0 %v7291_v56  ;;  %v5397_v29 = vmax.f32 %v15329_v30, %v5359_v23  ;;  %v5398_v44 = vmax.f32 %v15366_v35, %v5361_v0  ;;  %6285 = vmatpush.msrb.mxu2 %v7237_v36  ;;  %v7311_v63 = vld [vmem:[%s16315_s3 + $0xca0] sm:$0xff]  ;;  %v7288_v30 = vld [vmem:[%s16315_s3 + $0xbe8] sm:$0xff]  ;;  %v15826_v51 = vmax.f32 %v15681_v40, %v5367_v7  ;;  %v7318_v36 = vld [vmem:[%s16315_s3 + $0xcd0] sm:$0xff] }
 0xcaf   : > { %6366 = vmatpush.msra.mxu3 %v7276_v4  ;;  %6305 = vmatpush.msrb.mxu1 %v7253_v42  ;;  %v5365_v12 = vsel %vm3270_vm5, %v5358_v52, %v5364_v11  ;;  %v7344_v40 = vld [vmem:[%s16315_s3 + $0xda0] sm:$0xff]  ;;  %v15861_v4 = vmax.f32 %v15559_v13, %v5281_v49  ;;  %v7355_v13 = vld [vmem:[%s16315_s3 + $0xdf8] sm:$0xff]  ;;  %v7354_v52 = vld [vmem:[%s16315_s3 + $0xdf0] sm:$0xff] }
 0xcb0   : > { %6388 = vmatpush.msra.mxu0 %v7290_v14  ;;  %6150 = vmatmul.f32.vlgmr.msra.gmra.mxu2 %v5397_v29  ;;  %v6243_v35 = vrot.slane %v5397_v29, 4  ;;  %v6244_v19 = vrot.slane %v5398_v44, 4  ;;  %v15850_v26 = vmax.f32 %v15684_v59, %v5365_v12  ;;  %v7356_v34 = vld [vmem:[%s16315_s3 + $0xe00] sm:$0xff]  ;;  %v7302_v49 = vld [vmem:[%s16315_s3 + $0xc58] sm:$0xff]  ;;  %v7301_v14 = vld [vmem:[%s16315_s3 + $0xc50] sm:$0xff] }
 0xcb1   : > { %6367 = vmatpush.msra.mxu3 %v7275_v5  ;;  %6170 = vmatmul.f32.vlgmr.msra.gmra.mxu1 %v5398_v44  ;;  %v7303_v59 = vld [vmem:[%s16315_s3 + $0xc60] sm:$0xff]  ;;  %v7342_v5 = vld [vmem:[%s16315_s3 + $0xd90] sm:$0xff]  ;;  %v5368_v17 = vrot.slane %v15861_v4, 2  ;;  %v7341_v42 = vld [vmem:[%s16315_s3 + $0xd88] sm:$0xff] }
 0xcb2   : > { %6389 = vmatpush.msra.mxu0 %v7289_v43  ;;  %6476 = vmatpush.msra.mxu2 %v7328_v9  ;;  %v7320_v56 = vld [vmem:[%s16315_s3 + $0xce0] sm:$0xff]  ;;  %v7300_v23 = vld [vmem:[%s16315_s3 + $0xc48] sm:$0xff]  ;;  %v7388_v7 = vld [vmem:[%s16315_s3 + $0xef8] sm:$0xff] }
 0xcb3   : > { %6368 = vmatpush.msra.mxu3 %v7274_v21  ;;  %6403 = vmatpush.msra.mxu1 %v7311_v63  ;;  %v7353_v21 = vld [vmem:[%s16315_s3 + $0xde8] sm:$0xff]  ;;  %v7340_v43 = vld [vmem:[%s16315_s3 + $0xd80] sm:$0xff]  ;;  %v5369_v44 = vsel %vm3270_vm5, %v5362_v45, %v5368_v17  ;;  %v7351_v45 = vld [vmem:[%s16315_s3 + $0xdd8] sm:$0xff] }
 0xcb4   : > { %6390 = vmatpush.msra.mxu0 %v7288_v30  ;;  %6477 = vmatpush.msra.mxu2 %v7327_v8  ;;  %v7317_v0 = vld [vmem:[%s16315_s3 + $0xcc8] sm:$0xff]  ;;  %v7352_v29 = vld [vmem:[%s16315_s3 + $0xde0] sm:$0xff]  ;;  %v7315_v30 = vld [vmem:[%s16315_s3 + $0xcb8] sm:$0xff] }
 0xcb5   : > { %6369 = vmatpush.msra.mxu3 %v7273_v3  ;;  %6266 = vmatmul.f32.vlgmr.msrb.gmra.mxu0 %v6243_v35  ;;  %v7299_v9 = vld [vmem:[%s16315_s3 + $0xc40] sm:$0xff]  ;;  %v7339_v3 = vld [vmem:[%s16315_s3 + $0xd78] sm:$0xff]  ;;  %v5402_v35 = vmax.f32 %v15598_v37, %v5369_v44  ;;  %v7374_v8 = vld [vmem:[%s16315_s3 + $0xe88] sm:$0xff] }
 0xcb6   : > { %6404 = vmatpush.msra.mxu1 %v7310_v33  ;;  %6391 = vmatpush.msra.mxu0 %v7287_v50  ;;  %v7316_v63 = vld [vmem:[%s16315_s3 + $0xcc0] sm:$0xff]  ;;  %v7338_v33 = vld [vmem:[%s16315_s3 + $0xd70] sm:$0xff] }
 0xcb7   : > { %6370 = vmatpush.msra.mxu3 %v7272_v27  ;;  %6478 = vmatpush.msra.mxu2 %v7326_v55  ;;  %v7350_v27 = vld [vmem:[%s16315_s3 + $0xdd0] sm:$0xff]  ;;  %v7373_v50 = vld [vmem:[%s16315_s3 + $0xe80] sm:$0xff]  ;;  %v7349_v55 = vld [vmem:[%s16315_s3 + $0xdc8] sm:$0xff] }
 0xcb8   : > { %6405 = vmatpush.msra.mxu1 %v7309_v15  ;;  %6392 = vmatpush.msra.mxu0 %v7286_v2  ;;  %v7314_v37 = vld [vmem:[%s16315_s3 + $0xcb0] sm:$0xff]  ;;  %v7337_v15 = vld [vmem:[%s16315_s3 + $0xd68] sm:$0xff]  ;;  %v7372_v2 = vld [vmem:[%s16315_s3 + $0xe78] sm:$0xff] }
 0xcb9   : > { %6371 = vmatpush.msra.mxu3 %v7271_v60  ;;  %6479 = vmatpush.msra.mxu2 %v7325_v18  ;;  %v7313_v60 = vld [vmem:[%s16315_s3 + $0xca8] sm:$0xff]  ;;  %v7348_v18 = vld [vmem:[%s16315_s3 + $0xdc0] sm:$0xff]  ;;  %v7420_v12 = vld [vmem:[%s16315_s3 + $0xff0] sm:$0xff] }
 0xcba   : > { %6406 = vmatpush.msra.mxu1 %v7308_v38  ;;  %6393 = vmatpush.msra.mxu0 %v7285_v1  ;;  %v7336_v38 = vld [vmem:[%s16315_s3 + $0xd60] sm:$0xff]  ;;  %v7371_v1 = vld [vmem:[%s16315_s3 + $0xe70] sm:$0xff] }
 0xcbb   : > { %6372 = vmatpush.msra.mxu3 %v7270_v16  ;;  %6286 = vmatmul.f32.vlgmr.msrb.gmra.mxu2 %v6244_v19  ;;  %v6469_v16 = vrot.slane %v15850_v26, 4  ;;  %v7390_v19 = vld [vmem:[%s16315_s3 + $0xf08] sm:$0xff]  ;;  %v7381_v44 = vld [vmem:[%s16315_s3 + $0xec0] sm:$0xff] }
 0xcbc   : > { %7266 = vmatmul.msk.f32.vlgmr.msrb.gmra.mxu1 %vm5452_vm6, %v6245_v58  ;;  %6480 = vmatpush.msra.mxu2 %v7324_v46  ;;  %v7335_v58 = vld [vmem:[%s16315_s3 + $0xd58] sm:$0xff]  ;;  %v7370_v46 = vld [vmem:[%s16315_s3 + $0xe68] sm:$0xff] }
 0xcbd   : > { %6407 = vmatpush.msra.mxu1 %v7307_v10  ;;  %6373 = vmatpush.msra.mxu3 %v7269_v6  ;;  %v7347_v10 = vld [vmem:[%s16315_s3 + $0xdb8] sm:$0xff]  ;;  %v7389_v6 = vld [vmem:[%s16315_s3 + $0xf00] sm:$0xff] }
 0xcbe   : > { %6394 = vmatpush.msra.mxu0 %v7284_v41  ;;  %6481 = vmatpush.msra.mxu2 %v7323_v48  ;;  %v7334_v41 = vld [vmem:[%s16315_s3 + $0xd50] sm:$0xff]  ;;  %v7369_v48 = vld [vmem:[%s16315_s3 + $0xe60] sm:$0xff] }
 0xcbf   : > { %6408 = vmatpush.msra.mxu1 %v7306_v22  ;;  %6374 = vmatpush.msra.mxu3 %v7268_v25  ;;  %v7346_v22 = vld [vmem:[%s16315_s3 + $0xdb0] sm:$0xff]  ;;  %v7333_v25 = vld [vmem:[%s16315_s3 + $0xd48] sm:$0xff] }
 0xcc0   : > { %6395 = vmatpush.msra.mxu0 %v7283_v53  ;;  %6482 = vmatpush.msra.mxu2 %v7322_v20  ;;  %v7345_v53 = vld [vmem:[%s16315_s3 + $0xda8] sm:$0xff]  ;;  %v6471_v20 = vrot.slane %v5402_v35, 4 }
 0xcc1   : > { %6396 = vmatmul.f32.vlgmr.msra.gmra.mxu0 %v15826_v51  ;;  %6409 = vmatpush.msra.mxu1 %v7305_v61  ;;  %v7368_v61 = vld [vmem:[%s16315_s3 + $0xe58] sm:$0xff] }
 0xcc2   : > { %6519 = vmatpush.msrb.mxu0 %v7357_v57  ;;  %6375 = vmatpush.msra.mxu3 %v7267_v62  ;;  %v7387_v57 = vld [vmem:[%s16315_s3 + $0xef0] sm:$0xff]  ;;  %v7332_v62 = vld [vmem:[%s16315_s3 + $0xd40] sm:$0xff] }
 0xcc3   : > { %6410 = vmatpush.msra.mxu1 %v7304_v32  ;;  %6376 = vmatmul.f32.vlgmr.msra.gmra.mxu3 %v15850_v26  ;;  %v7367_v32 = vld [vmem:[%s16315_s3 + $0xe50] sm:$0xff]  ;;  %v7419_v26 = vld [vmem:[%s16315_s3 + $0xfe8] sm:$0xff] }
 0xcc4   : > { %6483 = vmatpush.msra.mxu2 %v7321_v28  ;;  %6496 = vmatpush.msrb.mxu3 %v7344_v40  ;;  %v7386_v28 = vld [vmem:[%s16315_s3 + $0xee8] sm:$0xff]  ;;  %v7331_v40 = vld [vmem:[%s16315_s3 + $0xd38] sm:$0xff] }
 0xcc5   : > { %6520 = vmatpush.msrb.mxu0 %v7356_v34  ;;  %6411 = vmatpush.msra.mxu1 %v7303_v59  ;;  %v7366_v34 = vld [vmem:[%s16315_s3 + $0xe48] sm:$0xff]  ;;  %v7385_v59 = vld [vmem:[%s16315_s3 + $0xee0] sm:$0xff] }
 0xcc6   : > { %6484 = vmatpush.msra.mxu2 %v7320_v56  ;;  %6497 = vmatpush.msrb.mxu3 %v7343_v39  ;;  %v7418_v56 = vld [vmem:[%s16315_s3 + $0xfe0] sm:$0xff]  ;;  %v7330_v39 = vld [vmem:[%s16315_s3 + $0xd30] sm:$0xff] }
 0xcc7   : > { %6521 = vmatpush.msrb.mxu0 %v7355_v13  ;;  %6412 = vmatpush.msra.mxu1 %v7302_v49  ;;  %v7365_v13 = vld [vmem:[%s16315_s3 + $0xe40] sm:$0xff]  ;;  %v7384_v49 = vld [vmem:[%s16315_s3 + $0xed8] sm:$0xff] }
 0xcc8   : > { %6485 = vmatpush.msra.mxu2 %v7319_v24  ;;  %6498 = vmatpush.msrb.mxu3 %v7342_v5  ;;  %v7417_v24 = vld [vmem:[%s16315_s3 + $0xfd8] sm:$0xff]  ;;  %v7329_v5 = vld [vmem:[%s16315_s3 + $0xd28] sm:$0xff] }
 0xcc9   : > { %6522 = vmatpush.msrb.mxu0 %v7354_v52  ;;  %6413 = vmatpush.msra.mxu1 %v7301_v14  ;;  %v7364_v52 = vld [vmem:[%s16315_s3 + $0xe38] sm:$0xff]  ;;  %v7383_v14 = vld [vmem:[%s16315_s3 + $0xed0] sm:$0xff] }
 0xcca   : > { %6486 = vmatpush.msra.mxu2 %v7318_v36  ;;  %6499 = vmatpush.msrb.mxu3 %v7341_v42  ;;  %v6470_v36 = vrot.slane %v15826_v51, 4  ;;  %v7403_v42 = vld [vmem:[%s16315_s3 + $0xf70] sm:$0xff]  ;;  %v7402_v51 = vld [vmem:[%s16315_s3 + $0xf68] sm:$0xff] }
 0xccb   : > { %6523 = vmatpush.msrb.mxu0 %v7353_v21  ;;  %6414 = vmatpush.msra.mxu1 %v7300_v23  ;;  %v7416_v21 = vld [vmem:[%s16315_s3 + $0xfd0] sm:$0xff] }
 0xccc   : > { %6487 = vmatpush.msra.mxu2 %v7317_v0  ;;  %6500 = vmatpush.msrb.mxu3 %v7340_v43  ;;  %v7363_v23 = vld [vmem:[%s16315_s3 + $0xe30] sm:$0xff]  ;;  %v7382_v0 = vld [vmem:[%s16315_s3 + $0xec8] sm:$0xff] }
 0xccd   : > { %6524 = vmatpush.msrb.mxu0 %v7352_v29  ;;  %6415 = vmatpush.msra.mxu1 %v7299_v9  ;;  %v7415_v43 = vld [vmem:[%s16315_s3 + $0xfc8] sm:$0xff]  ;;  %v7401_v9 = vld [vmem:[%s16315_s3 + $0xf60] sm:$0xff] }
 0xcce   : > { %6488 = vmatpush.msra.mxu2 %v7316_v63  ;;  %6501 = vmatpush.msrb.mxu3 %v7339_v3  ;;  %v7362_v29 = vld [vmem:[%s16315_s3 + $0xe28] sm:$0xff]  ;;  %v7414_v63 = vld [vmem:[%s16315_s3 + $0xfc0] sm:$0xff] }
 0xccf   : > { %6525 = vmatpush.msrb.mxu0 %v7351_v45  ;;  %7312 = vmatmul.msk.f32.vlgmr.msra.gmra.mxu1 %vm5452_vm6, %v5402_v35  ;;  %v7361_v3 = vld [vmem:[%s16315_s3 + $0xe20] sm:$0xff]  ;;  %v7380_v45 = vld [vmem:[%s16315_s3 + $0xeb8] sm:$0xff] }
 0xcd0   : > { %6489 = vmatpush.msra.mxu2 %v7315_v30  ;;  %6586 = vmatpush.msrb.mxu1 %v7374_v8  ;;  %v7400_v30 = vld [vmem:[%s16315_s3 + $0xf58] sm:$0xff] }
 0xcd1   : > { %6502 = vmatpush.msrb.mxu3 %v7338_v33  ;;  %6526 = vmatpush.msrb.mxu0 %v7350_v27  ;;  %v7413_v35 = vld [vmem:[%s16315_s3 + $0xfb8] sm:$0xff]  ;;  %v7379_v33 = vld [vmem:[%s16315_s3 + $0xeb0] sm:$0xff] }
 0xcd2   : > { %6490 = vmatpush.msra.mxu2 %v7314_v37  ;;  %6587 = vmatpush.msrb.mxu1 %v7373_v50  ;;  %v7360_v8 = vld [vmem:[%s16315_s3 + $0xe18] sm:$0xff]  ;;  %v7399_v27 = vld [vmem:[%s16315_s3 + $0xf50] sm:$0xff] }
 0xcd3   : > { %6503 = vmatpush.msrb.mxu3 %v7337_v15  ;;  %6527 = vmatpush.msrb.mxu0 %v7349_v55  ;;  %v7412_v37 = vld [vmem:[%s16315_s3 + $0xfb0] sm:$0xff]  ;;  %v7378_v15 = vld [vmem:[%s16315_s3 + $0xea8] sm:$0xff] }
 0xcd4   : > { %6491 = vmatpush.msra.mxu2 %v7313_v60  ;;  %6588 = vmatpush.msrb.mxu1 %v7372_v2  ;;  %v7359_v50 = vld [vmem:[%s16315_s3 + $0xe10] sm:$0xff]  ;;  %v7398_v55 = vld [vmem:[%s16315_s3 + $0xf48] sm:$0xff]  ;;  %v7377_v2 = vld [vmem:[%s16315_s3 + $0xea0] sm:$0xff] }
 0xcd5   : > { %6504 = vmatpush.msrb.mxu3 %v7336_v38  ;;  %6528 = vmatpush.msrb.mxu0 %v7348_v18  ;;  %v7411_v60 = vld [vmem:[%s16315_s3 + $0xfa8] sm:$0xff]  ;;  %v5403_v38 = vmax.f32 %v15775_v31, %v5364_v11  ;;  %v7436_v18 = vld [vmem:[%s16315_s3 + $0x1070] sm:$0xff]  ;;  %v7396_v11 = vld [vmem:[%s16315_s3 + $0xf38] sm:$0xff] }
 0xcd6   : > { %6492 = vmatmul.f32.vlgmr.msra.gmra.mxu2 %v6469_v16  ;;  %6589 = vmatpush.msrb.mxu1 %v7371_v1  ;;  %v7397_v16 = vld [vmem:[%s16315_s3 + $0xf40] sm:$0xff]  ;;  %v7435_v31 = vld [vmem:[%s16315_s3 + $0x1068] sm:$0xff] }
 0xcd7   : > { %6606 = vmatpush.msrb.mxu2 %v7390_v19  ;;  %6505 = vmatpush.msrb.mxu3 %v7335_v58  ;;  %v7410_v1 = vld [vmem:[%s16315_s3 + $0xfa0] sm:$0xff]  ;;  %v7376_v19 = vld [vmem:[%s16315_s3 + $0xe98] sm:$0xff] }
 0xcd8   : > { %6529 = vmatpush.msrb.mxu0 %v7347_v10  ;;  %6590 = vmatpush.msrb.mxu1 %v7370_v46  ;;  %v7409_v58 = vld [vmem:[%s16315_s3 + $0xf98] sm:$0xff]  ;;  %v7375_v10 = vld [vmem:[%s16315_s3 + $0xe90] sm:$0xff]  ;;  %v7434_v46 = vld [vmem:[%s16315_s3 + $0x1060] sm:$0xff] }
 0xcd9   : > { %6607 = vmatpush.msrb.mxu2 %v7389_v6  ;;  %6506 = vmatpush.msrb.mxu3 %v7334_v41  ;;  %v7395_v6 = vld [vmem:[%s16315_s3 + $0xf30] sm:$0xff] }
 0xcda   : > { %6530 = vmatpush.msrb.mxu0 %v7346_v22  ;;  %6591 = vmatpush.msrb.mxu1 %v7369_v48  ;;  %v7408_v41 = vld [vmem:[%s16315_s3 + $0xf90] sm:$0xff]  ;;  %v16169_v22 = vmax.f32 %v15752_v47, %v5366_v54  ;;  %v7433_v48 = vld [vmem:[%s16315_s3 + $0x1058] sm:$0xff] }
 0xcdb   : > { %6608 = vmatpush.msrb.mxu2 %v7388_v7  ;;  %6507 = vmatpush.msrb.mxu3 %v7333_v25  ;;  %v7449_v7 = vld [vmem:[%s16315_s3 + $0x10d8] sm:$0xff]  ;;  %v7394_v25 = vld [vmem:[%s16315_s3 + $0xf28] sm:$0xff]  ;;  %v7432_v47 = vld [vmem:[%s16315_s3 + $0x1050] sm:$0xff] }
 0xcdc   : > { %6531 = vmatpush.msrb.mxu0 %v7345_v53  ;;  %6592 = vmatpush.msrb.mxu1 %v7368_v61  ;;  %v7407_v53 = vld [vmem:[%s16315_s3 + $0xf88] sm:$0xff]  ;;  %v7448_v54 = vld [vmem:[%s16315_s3 + $0x10d0] sm:$0xff]  ;;  %v7393_v61 = vld [vmem:[%s16315_s3 + $0xf20] sm:$0xff] }
 0xcdd   : > { %7358 = vmatmul.msk.f32.vlgmr.msrb.gmra.mxu0 %vm5452_vm6, %v6471_v20  ;;  %6609 = vmatpush.msrb.mxu2 %v7387_v57  ;;  %v7406_v20 = vld [vmem:[%s16315_s3 + $0xf80] sm:$0xff]  ;;  %v7431_v57 = vld [vmem:[%s16315_s3 + $0x1048] sm:$0xff] }
 0xcde   : > { %6702 = vmatpush.msra.mxu0 %v7420_v12  ;;  %6508 = vmatpush.msrb.mxu3 %v7332_v62  ;;  %v7447_v12 = vld [vmem:[%s16315_s3 + $0x10c8] sm:$0xff]  ;;  %v7392_v62 = vld [vmem:[%s16315_s3 + $0xf18] sm:$0xff] }
 0xcdf   : > { %6593 = vmatpush.msrb.mxu1 %v7367_v32  ;;  %6610 = vmatpush.msrb.mxu2 %v7386_v28  ;;  %v7405_v32 = vld [vmem:[%s16315_s3 + $0xf78] sm:$0xff]  ;;  %v7430_v28 = vld [vmem:[%s16315_s3 + $0x1040] sm:$0xff] }
 0xce0   : > { %6703 = vmatpush.msra.mxu0 %v7419_v26  ;;  %6509 = vmatpush.msrb.mxu3 %v7331_v40  ;;  %v6695_v26 = vrot.slane %v5403_v38, 4  ;;  %v7446_v40 = vld [vmem:[%s16315_s3 + $0x10c0] sm:$0xff] }
 0xce1   : > { %6594 = vmatpush.msrb.mxu1 %v7366_v34  ;;  %6611 = vmatpush.msrb.mxu2 %v7385_v59  ;;  %v7391_v34 = vld [vmem:[%s16315_s3 + $0xf10] sm:$0xff]  ;;  %v7429_v59 = vld [vmem:[%s16315_s3 + $0x1038] sm:$0xff] }
 0xce2   : > { %6704 = vmatpush.msra.mxu0 %v7418_v56  ;;  %6510 = vmatpush.msrb.mxu3 %v7330_v39  ;;  %v5405_v56 = vmax.f32 %v15861_v4, %v5368_v17  ;;  %v7445_v39 = vld [vmem:[%s16315_s3 + $0x10b8] sm:$0xff]  ;;  %v7427_v4 = vld [vmem:[%s16315_s3 + $0x1028] sm:$0xff] }
 0xce3   : > { %6595 = vmatpush.msrb.mxu1 %v7365_v13  ;;  %6612 = vmatpush.msrb.mxu2 %v7384_v49  ;;  %v7428_v13 = vld [vmem:[%s16315_s3 + $0x1030] sm:$0xff]  ;;  %v7443_v17 = vld [vmem:[%s16315_s3 + $0x10a8] sm:$0xff] }
 0xce4   : > { %6705 = vmatpush.msra.mxu0 %v7417_v24  ;;  %6511 = vmatpush.msrb.mxu3 %v7329_v5  ;;  %v7444_v49 = vld [vmem:[%s16315_s3 + $0x10b0] sm:$0xff]  ;;  %v7426_v24 = vld [vmem:[%s16315_s3 + $0x1020] sm:$0xff] }
 0xce5   : > { %6596 = vmatpush.msrb.mxu1 %v7364_v52  ;;  %6512 = vmatmul.f32.vlgmr.msrb.gmra.mxu3 %v6470_v36  ;;  %v7442_v5 = vld [vmem:[%s16315_s3 + $0x10a0] sm:$0xff]  ;;  %v7425_v52 = vld [vmem:[%s16315_s3 + $0x1018] sm:$0xff]  ;;  %v7424_v36 = vld [vmem:[%s16315_s3 + $0x1010] sm:$0xff] }
 0xce6   : > { %6613 = vmatpush.msrb.mxu2 %v7383_v14  ;;  %6629 = vmatpush.msra.mxu3 %v7403_v42  ;;  %v7441_v14 = vld [vmem:[%s16315_s3 + $0x1098] sm:$0xff]  ;;  %v7440_v42 = vld [vmem:[%s16315_s3 + $0x1090] sm:$0xff] }
 0xce7   : > { %6706 = vmatpush.msra.mxu0 %v7416_v21  ;;  %6597 = vmatpush.msrb.mxu1 %v7363_v23  ;;  %v7423_v21 = vld [vmem:[%s16315_s3 + $0x1008] sm:$0xff] }
 0xce8   : > { %6614 = vmatpush.msrb.mxu2 %v7382_v0  ;;  %6630 = vmatpush.msra.mxu3 %v7402_v51  ;;  %v7439_v23 = vld [vmem:[%s16315_s3 + $0x1088] sm:$0xff]  ;;  %v7422_v0 = vld [vmem:[%s16315_s3 + $0x1000] sm:$0xff] }
 0xce9   : > { %6707 = vmatpush.msra.mxu0 %v7415_v43  ;;  %6598 = vmatpush.msrb.mxu1 %v7362_v29  ;;  %v7438_v51 = vld [vmem:[%s16315_s3 + $0x1080] sm:$0xff]  ;;  %v7421_v43 = vld [vmem:[%s16315_s3 + $0xff8] sm:$0xff] }
 0xcea   : > { %6615 = vmatpush.msrb.mxu2 %v7381_v44  ;;  %6631 = vmatpush.msra.mxu3 %v7401_v9  ;;  %v7437_v29 = vld [vmem:[%s16315_s3 + $0x1078] sm:$0xff]  ;;  %v6696_v44 = vrot.slane %v16169_v22, 4  ;;  %v6697_v9 = vrot.slane %v5405_v56, 4 }
 0xceb   : > { %6708 = vmatpush.msra.mxu0 %v7414_v63  ;;  %6599 = vmatpush.msrb.mxu1 %v7361_v3  ;;  %v5589_v63 = vpop.f32.mrf.mxu3  ;;  %v5493_v3 = vpop.f32.mrf.mxu1 }
 0xcec   : > { %6616 = vmatpush.msrb.mxu2 %v7380_v45  ;;  %6632 = vmatpush.msra.mxu3 %v7400_v30  ;;  %v5473_v45 = vpop.f32.mrf.mxu0  ;;  %v5513_v30 = vpop.f32.mrf.mxu2 }
 0xced   : > { %6709 = vmatpush.msra.mxu0 %v7413_v35  ;;  %6600 = vmatpush.msrb.mxu1 %v7360_v8 }
 0xcee   : > { %6617 = vmatpush.msrb.mxu2 %v7379_v33  ;;  %6633 = vmatpush.msra.mxu3 %v7399_v27 }
 0xcef   : > { %6710 = vmatpush.msra.mxu0 %v7412_v37  ;;  %6601 = vmatpush.msrb.mxu1 %v7359_v50 }
 0xcf0   : > { %6618 = vmatpush.msrb.mxu2 %v7378_v15  ;;  %6634 = vmatpush.msra.mxu3 %v7398_v55 }
 0xcf1   : > { %6711 = vmatpush.msra.mxu0 %v7411_v60  ;;  %6602 = vmatmul.f32.vlgmr.msrb.gmra.mxu1 %v5403_v38 }
 0xcf2   : > { %6619 = vmatpush.msrb.mxu2 %v7377_v2  ;;  %6722 = vmatpush.msra.mxu1 %v7436_v18 }
 0xcf3   : > { %6635 = vmatpush.msra.mxu3 %v7397_v16  ;;  %6712 = vmatpush.msra.mxu0 %v7410_v1  ;;  %v5719_v35 = vpop.f32.mrf.mxu3  ;;  %v5699_v8 = vpop.f32.mrf.mxu1 }
 0xcf4   : > { %6620 = vmatpush.msrb.mxu2 %v7376_v19  ;;  %6723 = vmatpush.msra.mxu1 %v7435_v31  ;;  %v5629_v33 = vpop.f32.mrf.mxu0  ;;  %v5609_v27 = vpop.f32.mrf.mxu2 }
 0xcf5   : > { %6636 = vmatpush.msra.mxu3 %v7396_v11  ;;  %6713 = vmatpush.msra.mxu0 %v7409_v58 }
 0xcf6   : > { %6621 = vmatpush.msrb.mxu2 %v7375_v10  ;;  %6724 = vmatpush.msra.mxu1 %v7434_v46  ;;  %v5494_v10 = vadd.f32 %v5493_v3, %v5473_v45 }
 0xcf7   : > { %6637 = vmatpush.msra.mxu3 %v7395_v6  ;;  %6714 = vmatpush.msra.mxu0 %v7408_v41  ;;  %v5610_v6 = vadd.f32 %v5609_v27, %v5589_v63 }
 0xcf8   : > { %6622 = vmatmul.f32.vlgmr.msrb.gmra.mxu2 %v16169_v22  ;;  %6725 = vmatpush.msra.mxu1 %v7433_v48  ;;  %v5514_v22 = vadd.f32 %v5513_v30, %v5494_v10  ;;  %v5720_v48 = vadd.f32 %v5719_v35, %v5699_v8 }
 0xcf9   : > { %6745 = vmatpush.msra.mxu2 %v7449_v7  ;;  %6638 = vmatpush.msra.mxu3 %v7394_v25  ;;  %v5406_v7 = vld [vmem:[%s16316_s4] sm:$0x1] }
 0xcfa   : > { %6715 = vmatpush.msra.mxu0 %v7407_v53  ;;  %6726 = vmatpush.msra.mxu1 %v7432_v47  ;;  %v5630_v53 = vadd.f32 %v5629_v33, %v5610_v6 }
 0xcfb   : > { %6746 = vmatpush.msra.mxu2 %v7448_v54  ;;  %6639 = vmatpush.msra.mxu3 %v7393_v61  ;;  %v5855_v37 = vpop.f32.mrf.mxu3  ;;  %v5835_v50 = vpop.f32.mrf.mxu1  ;;  %v5516_v54 = vadd.f32 %v5514_v22, %v5406_v7 }
 0xcfc   : > { %6716 = vmatpush.msra.mxu0 %v7406_v20  ;;  %6727 = vmatpush.msra.mxu1 %v7431_v57  ;;  %v5739_v15 = vpop.f32.mrf.mxu0  ;;  %v5815_v55 = vpop.f32.mrf.mxu2 }
 0xcfd   : > { %6747 = vmatpush.msra.mxu2 %v7447_v12  ;;  %6640 = vmatpush.msra.mxu3 %v7392_v62  ;;  %v5740_v61 = vadd.f32 %v5739_v15, %v5720_v48  ;;  %v5836_v20 = vadd.f32 %v5835_v50, %v5815_v55  ;;  %v5632_v62 = vadd.f32 %v5630_v53, %v5516_v54 }
 0xcfe   : > { %6717 = vmatpush.msra.mxu0 %v7405_v32  ;;  %6728 = vmatpush.msra.mxu1 %v7430_v28 }
 0xcff   : > { %6718 = vmatmul.f32.vlgmr.msra.gmra.mxu0 %v6695_v26  ;;  %6748 = vmatpush.msra.mxu2 %v7446_v40  ;;  %v5856_v32 = vadd.f32 %v5855_v37, %v5836_v20  ;;  %v5742_v26 = vadd.f32 %v5740_v61, %v5632_v62 }
 0xd00   : > { %6641 = vmatpush.msra.mxu3 %v7391_v34  ;;  %6729 = vmatpush.msra.mxu1 %v7429_v59 }
 0xd01   : > { %7404 = vmatmul.msk.f32.vlgmr.msra.gmra.mxu3 %vm5452_vm6, %v5405_v56  ;;  %6749 = vmatpush.msra.mxu2 %v7445_v39  ;;  %v5858_v39 = vadd.f32 %v5856_v32, %v5742_v26 }
 0xd02   : > { %6730 = vmatpush.msra.mxu1 %v7428_v13 }
 0xd03   : > { %6750 = vmatpush.msra.mxu2 %v7444_v49  ;;  %v6041_v2 = vpop.f32.mrf.mxu1 }
 0xd04   : > { %6731 = vmatpush.msra.mxu1 %v7427_v4  ;;  %v5925_v38 = vpop.f32.mrf.mxu0 }
 0xd05   : > { %6751 = vmatpush.msra.mxu2 %v7443_v17  ;;  %v5965_v60 = vpop.f32.mrf.mxu3 }
 0xd06   : > { %6732 = vmatpush.msra.mxu1 %v7426_v24  ;;  %v5945_v18 = vpop.f32.mrf.mxu2 }
 0xd07   : > { %6752 = vmatpush.msra.mxu2 %v7442_v5  ;;  %v5946_v57 = vadd.f32 %v5945_v18, %v5925_v38 }
 0xd08   : > { %6733 = vmatpush.msra.mxu1 %v7425_v52 }
 0xd09   : > { %6753 = vmatpush.msra.mxu2 %v7441_v14  ;;  %v5966_v34 = vadd.f32 %v5965_v60, %v5946_v57 }
 0xd0a   : > { %6734 = vmatpush.msra.mxu1 %v7424_v36 }
 0xd0b   : > { %6754 = vmatpush.msra.mxu2 %v7440_v42  ;;  %v5968_v17 = vadd.f32 %v5966_v34, %v5858_v39 }
 0xd0c   : > { %6735 = vmatpush.msra.mxu1 %v7423_v21  ;;  %v6061_v19 = vpop.f32.mrf.mxu0 }
 0xd0d   : > { %6755 = vmatpush.msra.mxu2 %v7439_v23  ;;  %v6081_v16 = vpop.f32.mrf.mxu3  ;;  %v6062_v40 = vadd.f32 %v6061_v19, %v6041_v2 }
 0xd0e   : > { %6736 = vmatpush.msra.mxu1 %v7422_v0 }
 0xd0f   : > { %6756 = vmatpush.msra.mxu2 %v7438_v51  ;;  %v6082_v13 = vadd.f32 %v6081_v16, %v6062_v40 }
 0xd10   : > { %6737 = vmatpush.msra.mxu1 %v7421_v43 }
 0xd11   : > { %6757 = vmatpush.msra.mxu2 %v7437_v29  ;;  %6738 = vmatmul.f32.vlgmr.msra.gmra.mxu1 %v6696_v44  ;;  %v6084_v52 = vadd.f32 %v6082_v13, %v5968_v17 }
 0xd12   : > { %7450 = vmatmul.msk.f32.vlgmr.msra.gmra.mxu2 %vm5452_vm6, %v6697_v9 }
 0xd29   : > { %v6191_v11 = vpop.f32.mrf.mxu3 }
 0xd2e   : > { %v6171_v1 = vpop.f32.mrf.mxu1 }
 0xd32   : > { %v6267_v46 = vpop.f32.mrf.mxu0 }
 0xd33   : > { %v6151_v31 = vpop.f32.mrf.mxu2 }
 0xd34   : > { %v6172_v59 = vadd.f32 %v6171_v1, %v6151_v31 }
 0xd36   : > { %v6192_v24 = vadd.f32 %v6191_v11, %v6172_v59 }
 0xd38   : > { %v6194_v23 = vadd.f32 %v6192_v24, %v6084_v52 }
 0xd39   : > { %v6307_v58 = vpop.f32.mrf.mxu1 }
 0xd3e   : > { %v6287_v41 = vpop.f32.mrf.mxu2  ;;  %v6397_v12 = vpop.f32.mrf.mxu0 }
 0xd3f   : > { %v6288_v49 = vadd.f32 %v6287_v41, %v6267_v46 }
 0xd41   : > { %v6308_v14 = vadd.f32 %v6307_v58, %v6288_v49 }
 0xd43   : > { %v6310_v43 = vadd.f32 %v6308_v14, %v6194_v23 }
 0xd46   : > { %v6377_v25 = vpop.f32.mrf.mxu3 }
 0xd47   : > { %v6398_v36 = vadd.f32 %v6397_v12, %v6377_v25 }
 0xd4c   : > { %v6417_v47 = vpop.f32.mrf.mxu1 }
 0xd4d   : > { %v6418_v0 = vadd.f32 %v6417_v47, %v6398_v36 }
 0xd4f   : > { %v6420_v63 = vadd.f32 %v6418_v0, %v6310_v43 }
 0xd59   : > { %v6493_v28 = vpop.f32.mrf.mxu2 }
 0xd5a   : > { %v6533_v5 = vpop.f32.mrf.mxu0 }
 0xd68   : > { %v6513_v56 = vpop.f32.mrf.mxu3 }
 0xd69   : > { %v6514_v42 = vadd.f32 %v6513_v56, %v6493_v28 }
 0xd6b   : > { %v6534_v29 = vadd.f32 %v6533_v5, %v6514_v42 }
 0xd6d   : > { %v6536_v30 = vadd.f32 %v6534_v29, %v6420_v63 }
 0xd6e   : > { %v6603_v4 = vpop.f32.mrf.mxu1 }
 0xd7b   : > { %v6623_v21 = vpop.f32.mrf.mxu2 }
 0xd7c   : > { %v6624_v44 = vadd.f32 %v6623_v21, %v6603_v4  ;;  %v6719_v45 = vpop.f32.mrf.mxu0 }
 0xd84   : > { %v6643_v51 = vpop.f32.mrf.mxu3 }
 0xd85   : > { %v6644_v3 = vadd.f32 %v6643_v51, %v6624_v44 }
 0xd87   : > { %v6646_v33 = vadd.f32 %v6644_v3, %v6536_v30 }
 0xd8e   : > { %v6739_v9 = vpop.f32.mrf.mxu1 }
 0xd8f   : > { %v6740_v35 = vadd.f32 %v6739_v9, %v6719_v45 }
 0xd95   : > { %v6759_v8 = vpop.f32.mrf.mxu2 }
 0xd96   : > { %v6760_v27 = vadd.f32 %v6759_v8, %v6740_v35 }
 0xd98   : > { %v6762_v37 = vadd.f32 %v6760_v27, %v6646_v33 }
 0xd9a   : > { %6764 = vst.msk [vmem:[%s216_s25] sm:$0x1] %vm6763_vm7, %v6762_v37 }
 0xd9b   : > { %7810 = shalt.err (!%p7807_p3)
}
 0xd9c   : > { %7454 = dma.vmem_to_hbm [thread:$0]  (%p7919_p5), %s6777_s6, 16, %s6779_s7, %s6766_s15  }
 0xd9d PF: > { %p7460_p4 = scmp.ge.s32.totalorder %s7845_s21, 2  ;;  %s6790_s11 = sand.u32 1, %s7833_s18  }
 0xd9e   : > { %s6791_s12 = scalar_lea.sflag [#allocation3], %s6790_s11 }
 0xd9f   : > { %p7457_p7 = pnand %p7460_p4, %p7923_p6 }
 0xda1   : > { %p7458_p8 = pneg %p7457_p7 }
 0xda3   : > { %7828 = dma.done.wait (%p7458_p8), %s6791_s12, 16  }
 0xda4   : > { %7830 = vsyncadd (%p7458_p8), %s6791_s12, 4294967280  ;;  %p15_p9 = scmp.ge.s32.totalorder %s7906_s24, 4   ;;  %s18066_s18 = smov %s7837_s19 }
 0xda5   : > { %s18067_s19 = smov %s7841_s20  ;;  %s18068_s20 = smov %s7917_s27 }
 0xda6   : > { %s18069_s21 = smov %s7906_s24  ;;  %17 = sbr.rel (!%p15_p9) target bundleno = 3 (0x3), region = 114 }
 0xdab   :  { %6796 = vsyncpa [#allocation3], 1 }
 0xdac   :  { %6798 = vsyncpa [#allocation3 + $0x1], 1 }

</bundles_post_ra>
